<compile_context>
chip_gen: v7x
topology: tpu7x:2x2x1
jax: 0.10.0
libtpu: 0.0.40
codegen_flags: <defaults>
</compile_context>

<pallas_src>
import functools

import jax
import jax.numpy as jnp
from jax.experimental import pallas as pl
from jax.experimental.pallas import tpu as pltpu

LEAKY_SLOPE = 0.01  # PyTorch nn.LeakyReLU default negative_slope


def _round_up(n, m):
    return ((n + m - 1) // m) * m


# ----------------------------------------------------------------------------
# Pallas kernel: fused (A @ B) + bias + activation
# ----------------------------------------------------------------------------
def _matmul_bias_act_kernel(a_ref, b_ref, bias_ref, o_ref, *, act):
    acc = jnp.dot(a_ref[...], b_ref[...], preferred_element_type=jnp.float32)
    acc = acc + bias_ref[...]
    if act == "leaky":
        acc = jnp.maximum(acc, LEAKY_SLOPE * acc)
    elif act == "sigmoid":
        acc = 1.0 / (1.0 + jnp.exp(-acc))  # exact: preserves the [0, 1] range
    o_ref[...] = acc.astype(o_ref.dtype)


def matmul_bias_act(a, b, bias, act="none", out_dtype=jnp.bfloat16, tm=512):
    """activation(a @ b + bias). a: (M, K), b: (K, N), bias: (N,) -> (M, N)."""
    M, K = a.shape
    K2, N = b.shape
    assert K == K2, (K, K2)

    a = a.astype(jnp.bfloat16)
    b = b.astype(jnp.bfloat16)
    bias = bias.astype(jnp.float32).reshape(1, N)

    # Only M gets padded (to a multiple of the row tile); K and N use
    # full-extent blocks so no padded copies / write amplification.
    tm_eff = min(tm, _round_up(M, 8))
    Mp = _round_up(M, tm_eff)
    if Mp != M:
        a = jnp.pad(a, ((0, Mp - M), (0, 0)))

    kernel = functools.partial(_matmul_bias_act_kernel, act=act)
    out = pl.pallas_call(
        kernel,
        out_shape=jax.ShapeDtypeStruct((Mp, N), out_dtype),
        grid_spec=pltpu.PrefetchScalarGridSpec(
            num_scalar_prefetch=0,
            grid=(Mp // tm_eff,),
            in_specs=[
                pl.BlockSpec((tm_eff, K), lambda i: (i, 0)),  # A row tile
                pl.BlockSpec((K, N), lambda i: (0, 0)),       # full weight, resident
                pl.BlockSpec((1, N), lambda i: (0, 0)),       # bias row
            ],
            out_specs=pl.BlockSpec((tm_eff, N), lambda i: (i, 0)),
        ),
        compiler_params=pltpu.CompilerParams(
            dimension_semantics=("parallel",),
            vmem_limit_bytes=32 * 1024 * 1024,
        ),
    )(a, b, bias)
    return out[:M] if Mp != M else out


# ----------------------------------------------------------------------------
# Plain-JAX glue (NHWC layout); all matmuls go through the Pallas kernel
# ----------------------------------------------------------------------------
def im2col_nhwc(x, kh, kw, stride, pad):
    """x: (N, H, W, C) -> ((N*Ho*Wo), kh*kw*C); K index = (i*kw + j)*C + c."""
    if pad:
        x = jnp.pad(x, ((0, 0), (pad, pad), (pad, pad), (0, 0)))
    n, h, w, c = x.shape
    ho = (h - kh) // stride + 1
    wo = (w - kw) // stride + 1
    cols = []
    for i in range(kh):
        for j in range(kw):
            cols.append(x[:, i:i + stride * ho:stride, j:j + stride * wo:stride, :])
    cols = jnp.concatenate(cols, axis=-1)               # (N, Ho, Wo, kh*kw*C)
    return cols.reshape(n * ho * wo, kh * kw * c), ho, wo


def conv2d_nhwc(x, w, b, stride, pad, act, out_dtype=jnp.bfloat16):
    """x: (N, H, W, Cin); w: (Cout, Cin, kh, kw) [PyTorch Conv2d layout]; b: (Cout,)."""
    out_ch, in_ch, kh, kw = w.shape
    cols, ho, wo = im2col_nhwc(x, kh, kw, stride, pad)
    # Reorder weight so its K index (i*kw + j)*Cin + c matches the im2col.
    wm = w.transpose(2, 3, 1, 0).reshape(kh * kw * in_ch, out_ch)
    y = matmul_bias_act(cols, wm, b, act, out_dtype)
    return y.reshape(x.shape[0], ho, wo, out_ch)        # stays NHWC


def conv_transpose_1x1_dense(z, w, b, act, out_dtype=jnp.bfloat16):
    """ConvTranspose2d(latent, Cout, kernel=K, stride=1) on a 1x1 input == one GEMM.

    z: (N, latent); w: (latent, Cout, K, K) [PyTorch layout]. Returns (N, K, K, Cout).
    """
    latent, cout, kh, kw = w.shape
    wm = w.transpose(0, 2, 3, 1).reshape(latent, kh * kw * cout)
    y = matmul_bias_act(z, wm, jnp.tile(b, kh * kw), act, out_dtype)
    return y.reshape(z.shape[0], kh, kw, cout)


def conv_transpose2d_s2k4p1_nhwc(x, w, b, act, out_dtype=jnp.bfloat16):
    """ConvTranspose2d(kernel=4, stride=2, padding=1) via sub-pixel decomposition.

    x: (N, H, W, Cin); w: (Cin, Cout, 4, 4) [PyTorch ConvTranspose2d layout].
    Output phase (ry, rx) at position (m, q) is a stride-1 2x2 conv over the
    1-padded input with sub-kernel taps w[:, :, 3-ry-2a, 3-rx-2b], window at
    (m+ry, q+rx).  One dense GEMM computes all 4 phases; outputs interleave.
    Returns (N, 2H, 2W, Cout).
    """
    n, hh, ww, cin = x.shape
    cin_w, cout, kh, kw = w.shape
    assert (kh, kw) == (4, 4) and cin_w == cin

    ap = jnp.pad(x, ((0, 0), (1, 1), (1, 1), (0, 0)))   # (N, H+2, W+2, Cin)
    cols = []
    for a in range(2):
        for bb in range(2):
            cols.append(ap[:, a:a + hh + 1, bb:bb + ww + 1, :])
    cols = jnp.concatenate(cols, axis=-1)               # (N, H+1, W+1, 4*Cin)
    cols = cols.reshape(n * (hh + 1) * (ww + 1), 4 * cin)

    # Weight matrix: rows ordered (a, b, cin), columns ordered (ry, rx, cout).
    blocks = []
    for a in range(2):
        for bb in range(2):
            row = []
            for ry in range(2):
                for rx in range(2):
                    row.append(w[:, :, 3 - ry - 2 * a, 3 - rx - 2 * bb])  # (Cin, Cout)
            blocks.append(jnp.concatenate(row, axis=1))                   # (Cin, 4*Cout)
    wm = jnp.concatenate(blocks, axis=0)                                  # (4*Cin, 4*Cout)

    y = matmul_bias_act(cols, wm, jnp.tile(b, 4), act, out_dtype)
    y = y.reshape(n, hh + 1, ww + 1, 2, 2, cout)        # [n, p, q, ry, rx, oc]

    p00 = y[:, 0:hh,     0:ww,     0, 0, :]
    p01 = y[:, 0:hh,     1:ww + 1, 0, 1, :]
    p10 = y[:, 1:hh + 1, 0:ww,     1, 0, :]
    p11 = y[:, 1:hh + 1, 1:ww + 1, 1, 1, :]
    out = jnp.stack([p00, p01, p10, p11], axis=-2)      # (N, H, W, 4, Cout)
    out = out.reshape(n, hh, ww, 2, 2, cout)
    out = out.transpose(0, 1, 3, 2, 4, 5).reshape(n, 2 * hh, 2 * ww, cout)
    return out


# ----------------------------------------------------------------------------
# appearance_autoencoder forward (PyTorch semantics; NCHW in / NCHW out)
# ----------------------------------------------------------------------------
def appearance_autoencoder_forward(x, p):
    h = jnp.transpose(x, (0, 2, 3, 1)).astype(jnp.bfloat16)       # NHWC once
    # encoder: 4x (Conv2d k3 s2 p1 + LeakyReLU): 128 -> 8 spatial, 3 -> 128 ch
    h = conv2d_nhwc(h, p["enc_w1"], p["enc_b1"], 2, 1, "leaky")
    h = conv2d_nhwc(h, p["enc_w2"], p["enc_b2"], 2, 1, "leaky")
    h = conv2d_nhwc(h, p["enc_w3"], p["enc_b3"], 2, 1, "leaky")
    h = conv2d_nhwc(h, p["enc_w4"], p["enc_b4"], 2, 1, "leaky")   # (N, 8, 8, 128)
    n = h.shape[0]
    latent = p["fc_w"].shape[0]
    # fc1: PyTorch flattens NCHW as (c, ky, kx); permute the weight columns
    # (cheap, weight-side) instead of transposing the activation.
    wf = p["fc_w"].reshape(latent, 128, 8, 8).transpose(0, 2, 3, 1)
    wf = wf.reshape(latent, 128 * 8 * 8)
    z = matmul_bias_act(h.reshape(n, 128 * 8 * 8), wf.T, p["fc_b"], "leaky")
    # decoder
    d = conv_transpose_1x1_dense(z, p["dec_w1"], p["dec_b1"], "leaky")         # (N, 8, 8, 128)
    d = conv_transpose2d_s2k4p1_nhwc(d, p["dec_w2"], p["dec_b2"], "leaky")     # (N, 16, 16, 64)
    d = conv_transpose2d_s2k4p1_nhwc(d, p["dec_w3"], p["dec_b3"], "leaky")     # (N, 32, 32, 32)
    d = conv_transpose2d_s2k4p1_nhwc(d, p["dec_w4"], p["dec_b4"], "leaky")     # (N, 64, 64, 16)
    d = conv_transpose2d_s2k4p1_nhwc(d, p["dec_w5"], p["dec_b5"], "sigmoid",
                                     out_dtype=jnp.float32)                    # (N, 128, 128, 3)
    return jnp.transpose(d, (0, 3, 1, 2))                                      # back to NCHW


def init_params(key, latent_dim):
    shapes = {
        "enc_w1": (16, 3, 3, 3),   "enc_b1": (16,),
        "enc_w2": (32, 16, 3, 3),  "enc_b2": (32,),
        "enc_w3": (64, 32, 3, 3),  "enc_b3": (64,),
        "enc_w4": (128, 64, 3, 3), "enc_b4": (128,),
        "fc_w": (latent_dim, 128 * 8 * 8), "fc_b": (latent_dim,),
        "dec_w1": (latent_dim, 128, 8, 8), "dec_b1": (128,),
        "dec_w2": (128, 64, 4, 4), "dec_b2": (64,),
        "dec_w3": (64, 32, 4, 4),  "dec_b3": (32,),
        "dec_w4": (32, 16, 4, 4),  "dec_b4": (16,),
        "dec_w5": (16, 3, 4, 4),   "dec_b5": (3,),
    }
    params = {}
    keys = jax.random.split(key, len(shapes))
    for k, (name, shp) in zip(keys, sorted(shapes.items())):
        params[name] = 0.05 * jax.random.normal(k, shp, dtype=jnp.float32)
    return params


if __name__ == "__main__":
    latent_dim = 32
    key = jax.random.PRNGKey(0)
    k_params, k_x = jax.random.split(key)

    params = init_params(k_params, latent_dim)
    # fc1 hard-codes 128*8*8 input features -> encoder input spatial must be 128x128.
    x = jax.random.uniform(k_x, (2, 3, 128, 128), dtype=jnp.float32)

    fwd = jax.jit(appearance_autoencoder_forward)
    x_recon = fwd(x, params)
    jax.block_until_ready(x_recon)

    assert x_recon.shape == (2, 3, 128, 128), x_recon.shape
    assert x_recon.dtype == jnp.float32
    assert bool(jnp.all(jnp.isfinite(x_recon)))
    assert bool(jnp.all((x_recon >= 0.0) & (x_recon <= 1.0)))  # sigmoid output range
    print("KERNEL_OK")
</pallas_src>

<mosaic_0001>
module attributes {stable_mosaic.version = 11 : i64} {
  func.func @_matmul_bias_act_kernel(%arg0: i32, %arg1: memref<512x27xbf16, #tpu.memory_space<vmem>>, %arg2: memref<27x16xbf16, #tpu.memory_space<vmem>>, %arg3: memref<1x16xf32, #tpu.memory_space<vmem>>, %arg4: memref<512x16xbf16, #tpu.memory_space<vmem>>) attributes {dimension_semantics = [#tpu.dimension_semantics<parallel>], iteration_bounds = array<i64: 16>, scalar_prefetch = 0 : i64, scratch_operands = 0 : i64, tpu.core_type = #tpu.core_type<tc>, window_params = [{transform_indices = @transform_0, window_bounds = array<i64: 512, 27>}, {pipeline_mode = #tpu.pipeline_mode<synchronous>, transform_indices = @transform_1, window_bounds = array<i64: 27, 16>}, {pipeline_mode = #tpu.pipeline_mode<synchronous>, transform_indices = @transform_2, window_bounds = array<i64: 1, 16>}, {transform_indices = @transform_3, window_bounds = array<i64: 512, 16>}]} {
    %c0 = arith.constant 0 : index
    %c0_0 = arith.constant 0 : index
    %0 = vector.load %arg1[%c0, %c0_0] : memref<512x27xbf16, #tpu.memory_space<vmem>>, vector<512x27xbf16>
    %c0_1 = arith.constant 0 : index
    %c0_2 = arith.constant 0 : index
    %1 = vector.load %arg2[%c0_1, %c0_2] : memref<27x16xbf16, #tpu.memory_space<vmem>>, vector<27x16xbf16>
    %cst = arith.constant dense<0.000000e+00> : vector<512x16xf32>
    %2 = tpu.matmul %0, %1, %cst {dimension_numbers = #tpu.dot_dimension_numbers<[1], [0], [0], [1], [0, 0, 1, 1], [], []>} : vector<512x27xbf16>, vector<27x16xbf16>, vector<512x16xf32> -> vector<512x16xf32>
    %c0_3 = arith.constant 0 : index
    %c0_4 = arith.constant 0 : index
    %3 = vector.load %arg3[%c0_3, %c0_4] : memref<1x16xf32, #tpu.memory_space<vmem>>, vector<1x16xf32>
    %4 = vector.broadcast %3 : vector<1x16xf32> to vector<512x16xf32>
    %5 = arith.addf %2, %4 : vector<512x16xf32>
    %cst_5 = arith.constant 0.00999999977 : f32
    %6 = vector.broadcast %cst_5 : f32 to vector<512x16xf32>
    %7 = arith.mulf %6, %5 : vector<512x16xf32>
    %8 = arith.maximumf %5, %7 : vector<512x16xf32>
    %9 = arith.truncf %8 : vector<512x16xf32> to vector<512x16xbf16>
    %c0_6 = arith.constant 0 : index
    %c0_7 = arith.constant 0 : index
    %10 = vector.load %arg4[%c0_6, %c0_7] : memref<512x16xbf16, #tpu.memory_space<vmem>>, vector<512x16xbf16>
    tpu.vector_store %arg4[%c0_6, %c0_7], %9 {strides = array<i32>} : memref<512x16xbf16, #tpu.memory_space<vmem>>, vector<512x16xbf16>,
    return
  }
  func.func @transform_0(%arg0: i32) -> (i32, i32) {
    %c0_i32 = arith.constant 0 : i32
    %c0_i32_0 = arith.constant 0 : i32
    return %arg0, %c0_i32 : i32, i32
  }
  func.func @transform_1(%arg0: i32) -> (i32, i32) {
    %c0_i32 = arith.constant 0 : i32
    %c0_i32_0 = arith.constant 0 : i32
    %c0_i32_1 = arith.constant 0 : i32
    return %c0_i32, %c0_i32_0 : i32, i32
  }
  func.func @transform_2(%arg0: i32) -> (i32, i32) {
    %c0_i32 = arith.constant 0 : i32
    %c0_i32_0 = arith.constant 0 : i32
    %c0_i32_1 = arith.constant 0 : i32
    return %c0_i32, %c0_i32_0 : i32, i32
  }
  func.func @transform_3(%arg0: i32) -> (i32, i32) {
    %c0_i32 = arith.constant 0 : i32
    %c0_i32_0 = arith.constant 0 : i32
    return %arg0, %c0_i32 : i32, i32
  }
}

module attributes {stable_mosaic.version = 11 : i64} {
  func.func @_matmul_bias_act_kernel(%arg0: i32, %arg1: memref<512x144xbf16, #tpu.memory_space<vmem>>, %arg2: memref<144x32xbf16, #tpu.memory_space<vmem>>, %arg3: memref<1x32xf32, #tpu.memory_space<vmem>>, %arg4: memref<512x32xbf16, #tpu.memory_space<vmem>>) attributes {dimension_semantics = [#tpu.dimension_semantics<parallel>], iteration_bounds = array<i64: 4>, scalar_prefetch = 0 : i64, scratch_operands = 0 : i64, tpu.core_type = #tpu.core_type<tc>, window_params = [{transform_indices = @transform_0, window_bounds = array<i64: 512, 144>}, {pipeline_mode = #tpu.pipeline_mode<synchronous>, transform_indices = @transform_1, window_bounds = array<i64: 144, 32>}, {pipeline_mode = #tpu.pipeline_mode<synchronous>, transform_indices = @transform_2, window_bounds = array<i64: 1, 32>}, {transform_indices = @transform_3, window_bounds = array<i64: 512, 32>}]} {
    %c0 = arith.constant 0 : index
    %c0_0 = arith.constant 0 : index
    %0 = vector.load %arg1[%c0, %c0_0] : memref<512x144xbf16, #tpu.memory_space<vmem>>, vector<512x144xbf16>
    %c0_1 = arith.constant 0 : index
    %c0_2 = arith.constant 0 : index
    %1 = vector.load %arg2[%c0_1, %c0_2] : memref<144x32xbf16, #tpu.memory_space<vmem>>, vector<144x32xbf16>
    %cst = arith.constant dense<0.000000e+00> : vector<512x32xf32>
    %2 = tpu.matmul %0, %1, %cst {dimension_numbers = #tpu.dot_dimension_numbers<[1], [0], [0], [1], [0, 0, 1, 1], [], []>} : vector<512x144xbf16>, vector<144x32xbf16>, vector<512x32xf32> -> vector<512x32xf32>
    %c0_3 = arith.constant 0 : index
    %c0_4 = arith.constant 0 : index
    %3 = vector.load %arg3[%c0_3, %c0_4] : memref<1x32xf32, #tpu.memory_space<vmem>>, vector<1x32xf32>
    %4 = vector.broadcast %3 : vector<1x32xf32> to vector<512x32xf32>
    %5 = arith.addf %2, %4 : vector<512x32xf32>
    %cst_5 = arith.constant 0.00999999977 : f32
    %6 = vector.broadcast %cst_5 : f32 to vector<512x32xf32>
    %7 = arith.mulf %6, %5 : vector<512x32xf32>
    %8 = arith.maximumf %5, %7 : vector<512x32xf32>
    %9 = arith.truncf %8 : vector<512x32xf32> to vector<512x32xbf16>
    %c0_6 = arith.constant 0 : index
    %c0_7 = arith.constant 0 : index
    %10 = vector.load %arg4[%c0_6, %c0_7] : memref<512x32xbf16, #tpu.memory_space<vmem>>, vector<512x32xbf16>
    tpu.vector_store %arg4[%c0_6, %c0_7], %9 {strides = array<i32>} : memref<512x32xbf16, #tpu.memory_space<vmem>>, vector<512x32xbf16>,
    return
  }
  func.func @transform_0(%arg0: i32) -> (i32, i32) {
    %c0_i32 = arith.constant 0 : i32
    %c0_i32_0 = arith.constant 0 : i32
    return %arg0, %c0_i32 : i32, i32
  }
  func.func @transform_1(%arg0: i32) -> (i32, i32) {
    %c0_i32 = arith.constant 0 : i32
    %c0_i32_0 = arith.constant 0 : i32
    %c0_i32_1 = arith.constant 0 : i32
    return %c0_i32, %c0_i32_0 : i32, i32
  }
  func.func @transform_2(%arg0: i32) -> (i32, i32) {
    %c0_i32 = arith.constant 0 : i32
    %c0_i32_0 = arith.constant 0 : i32
    %c0_i32_1 = arith.constant 0 : i32
    return %c0_i32, %c0_i32_0 : i32, i32
  }
  func.func @transform_3(%arg0: i32) -> (i32, i32) {
    %c0_i32 = arith.constant 0 : i32
    %c0_i32_0 = arith.constant 0 : i32
    return %arg0, %c0_i32 : i32, i32
  }
}

module attributes {stable_mosaic.version = 11 : i64} {
  func.func @_matmul_bias_act_kernel(%arg0: i32, %arg1: memref<512x288xbf16, #tpu.memory_space<vmem>>, %arg2: memref<288x64xbf16, #tpu.memory_space<vmem>>, %arg3: memref<1x64xf32, #tpu.memory_space<vmem>>, %arg4: memref<512x64xbf16, #tpu.memory_space<vmem>>) attributes {dimension_semantics = [#tpu.dimension_semantics<parallel>], iteration_bounds = array<i64: 1>, scalar_prefetch = 0 : i64, scratch_operands = 0 : i64, tpu.core_type = #tpu.core_type<tc>, window_params = [{transform_indices = @transform_0, window_bounds = array<i64: 512, 288>}, {pipeline_mode = #tpu.pipeline_mode<synchronous>, transform_indices = @transform_1, window_bounds = array<i64: 288, 64>}, {pipeline_mode = #tpu.pipeline_mode<synchronous>, transform_indices = @transform_2, window_bounds = array<i64: 1, 64>}, {transform_indices = @transform_3, window_bounds = array<i64: 512, 64>}]} {
    %c0 = arith.constant 0 : index
    %c0_0 = arith.constant 0 : index
    %0 = vector.load %arg1[%c0, %c0_0] : memref<512x288xbf16, #tpu.memory_space<vmem>>, vector<512x288xbf16>
    %c0_1 = arith.constant 0 : index
    %c0_2 = arith.constant 0 : index
    %1 = vector.load %arg2[%c0_1, %c0_2] : memref<288x64xbf16, #tpu.memory_space<vmem>>, vector<288x64xbf16>
    %cst = arith.constant dense<0.000000e+00> : vector<512x64xf32>
    %2 = tpu.matmul %0, %1, %cst {dimension_numbers = #tpu.dot_dimension_numbers<[1], [0], [0], [1], [0, 0, 1, 1], [], []>} : vector<512x288xbf16>, vector<288x64xbf16>, vector<512x64xf32> -> vector<512x64xf32>
    %c0_3 = arith.constant 0 : index
    %c0_4 = arith.constant 0 : index
    %3 = vector.load %arg3[%c0_3, %c0_4] : memref<1x64xf32, #tpu.memory_space<vmem>>, vector<1x64xf32>
    %4 = vector.broadcast %3 : vector<1x64xf32> to vector<512x64xf32>
    %5 = arith.addf %2, %4 : vector<512x64xf32>
    %cst_5 = arith.constant 0.00999999977 : f32
    %6 = vector.broadcast %cst_5 : f32 to vector<512x64xf32>
    %7 = arith.mulf %6, %5 : vector<512x64xf32>
    %8 = arith.maximumf %5, %7 : vector<512x64xf32>
    %9 = arith.truncf %8 : vector<512x64xf32> to vector<512x64xbf16>
    %c0_6 = arith.constant 0 : index
    %c0_7 = arith.constant 0 : index
    %10 = vector.load %arg4[%c0_6, %c0_7] : memref<512x64xbf16, #tpu.memory_space<vmem>>, vector<512x64xbf16>
    tpu.vector_store %arg4[%c0_6, %c0_7], %9 {strides = array<i32>} : memref<512x64xbf16, #tpu.memory_space<vmem>>, vector<512x64xbf16>,
    return
  }
  func.func @transform_0(%arg0: i32) -> (i32, i32) {
    %c0_i32 = arith.constant 0 : i32
    %c0_i32_0 = arith.constant 0 : i32
    return %arg0, %c0_i32 : i32, i32
  }
  func.func @transform_1(%arg0: i32) -> (i32, i32) {
    %c0_i32 = arith.constant 0 : i32
    %c0_i32_0 = arith.constant 0 : i32
    %c0_i32_1 = arith.constant 0 : i32
    return %c0_i32, %c0_i32_0 : i32, i32
  }
  func.func @transform_2(%arg0: i32) -> (i32, i32) {
    %c0_i32 = arith.constant 0 : i32
    %c0_i32_0 = arith.constant 0 : i32
    %c0_i32_1 = arith.constant 0 : i32
    return %c0_i32, %c0_i32_0 : i32, i32
  }
  func.func @transform_3(%arg0: i32) -> (i32, i32) {
    %c0_i32 = arith.constant 0 : i32
    %c0_i32_0 = arith.constant 0 : i32
    return %arg0, %c0_i32 : i32, i32
  }
}

module attributes {stable_mosaic.version = 11 : i64} {
  func.func @_matmul_bias_act_kernel(%arg0: i32, %arg1: memref<128x576xbf16, #tpu.memory_space<vmem>>, %arg2: memref<576x128xbf16, #tpu.memory_space<vmem>>, %arg3: memref<1x128xf32, #tpu.memory_space<vmem>>, %arg4: memref<128x128xbf16, #tpu.memory_space<vmem>>) attributes {dimension_semantics = [#tpu.dimension_semantics<parallel>], iteration_bounds = array<i64: 1>, scalar_prefetch = 0 : i64, scratch_operands = 0 : i64, tpu.core_type = #tpu.core_type<tc>, window_params = [{transform_indices = @transform_0, window_bounds = array<i64: 128, 576>}, {pipeline_mode = #tpu.pipeline_mode<synchronous>, transform_indices = @transform_1, window_bounds = array<i64: 576, 128>}, {pipeline_mode = #tpu.pipeline_mode<synchronous>, transform_indices = @transform_2, window_bounds = array<i64: 1, 128>}, {transform_indices = @transform_3, window_bounds = array<i64: 128, 128>}]} {
    %c0 = arith.constant 0 : index
    %c0_0 = arith.constant 0 : index
    %0 = vector.load %arg1[%c0, %c0_0] : memref<128x576xbf16, #tpu.memory_space<vmem>>, vector<128x576xbf16>
    %c0_1 = arith.constant 0 : index
    %c0_2 = arith.constant 0 : index
    %1 = vector.load %arg2[%c0_1, %c0_2] : memref<576x128xbf16, #tpu.memory_space<vmem>>, vector<576x128xbf16>
    %cst = arith.constant dense<0.000000e+00> : vector<128x128xf32>
    %2 = tpu.matmul %0, %1, %cst {dimension_numbers = #tpu.dot_dimension_numbers<[1], [0], [0], [1], [0, 0, 1, 1], [], []>} : vector<128x576xbf16>, vector<576x128xbf16>, vector<128x128xf32> -> vector<128x128xf32>
    %c0_3 = arith.constant 0 : index
    %c0_4 = arith.constant 0 : index
    %3 = vector.load %arg3[%c0_3, %c0_4] : memref<1x128xf32, #tpu.memory_space<vmem>>, vector<1x128xf32>
    %4 = vector.broadcast %3 : vector<1x128xf32> to vector<128x128xf32>
    %5 = arith.addf %2, %4 : vector<128x128xf32>
    %cst_5 = arith.constant 0.00999999977 : f32
    %6 = vector.broadcast %cst_5 : f32 to vector<128x128xf32>
    %7 = arith.mulf %6, %5 : vector<128x128xf32>
    %8 = arith.maximumf %5, %7 : vector<128x128xf32>
    %9 = arith.truncf %8 : vector<128x128xf32> to vector<128x128xbf16>
    %c0_6 = arith.constant 0 : index
    %c0_7 = arith.constant 0 : index
    %10 = vector.load %arg4[%c0_6, %c0_7] : memref<128x128xbf16, #tpu.memory_space<vmem>>, vector<128x128xbf16>
    tpu.vector_store %arg4[%c0_6, %c0_7], %9 {strides = array<i32>} : memref<128x128xbf16, #tpu.memory_space<vmem>>, vector<128x128xbf16>,
    return
  }
  func.func @transform_0(%arg0: i32) -> (i32, i32) {
    %c0_i32 = arith.constant 0 : i32
    %c0_i32_0 = arith.constant 0 : i32
    return %arg0, %c0_i32 : i32, i32
  }
  func.func @transform_1(%arg0: i32) -> (i32, i32) {
    %c0_i32 = arith.constant 0 : i32
    %c0_i32_0 = arith.constant 0 : i32
    %c0_i32_1 = arith.constant 0 : i32
    return %c0_i32, %c0_i32_0 : i32, i32
  }
  func.func @transform_2(%arg0: i32) -> (i32, i32) {
    %c0_i32 = arith.constant 0 : i32
    %c0_i32_0 = arith.constant 0 : i32
    %c0_i32_1 = arith.constant 0 : i32
    return %c0_i32, %c0_i32_0 : i32, i32
  }
  func.func @transform_3(%arg0: i32) -> (i32, i32) {
    %c0_i32 = arith.constant 0 : i32
    %c0_i32_0 = arith.constant 0 : i32
    return %arg0, %c0_i32 : i32, i32
  }
}

module attributes {stable_mosaic.version = 11 : i64} {
  func.func @_matmul_bias_act_kernel(%arg0: i32, %arg1: memref<8x8192xbf16, #tpu.memory_space<vmem>>, %arg2: memref<8192x32xbf16, #tpu.memory_space<vmem>>, %arg3: memref<1x32xf32, #tpu.memory_space<vmem>>, %arg4: memref<8x32xbf16, #tpu.memory_space<vmem>>) attributes {dimension_semantics = [#tpu.dimension_semantics<parallel>], iteration_bounds = array<i64: 1>, scalar_prefetch = 0 : i64, scratch_operands = 0 : i64, tpu.core_type = #tpu.core_type<tc>, window_params = [{transform_indices = @transform_0, window_bounds = array<i64: 8, 8192>}, {pipeline_mode = #tpu.pipeline_mode<synchronous>, transform_indices = @transform_1, window_bounds = array<i64: 8192, 32>}, {pipeline_mode = #tpu.pipeline_mode<synchronous>, transform_indices = @transform_2, window_bounds = array<i64: 1, 32>}, {transform_indices = @transform_3, window_bounds = array<i64: 8, 32>}]} {
    %c0 = arith.constant 0 : index
    %c0_0 = arith.constant 0 : index
    %0 = vector.load %arg1[%c0, %c0_0] : memref<8x8192xbf16, #tpu.memory_space<vmem>>, vector<8x8192xbf16>
    %c0_1 = arith.constant 0 : index
    %c0_2 = arith.constant 0 : index
    %1 = vector.load %arg2[%c0_1, %c0_2] : memref<8192x32xbf16, #tpu.memory_space<vmem>>, vector<8192x32xbf16>
    %cst = arith.constant dense<0.000000e+00> : vector<8x32xf32>
    %2 = tpu.matmul %0, %1, %cst {dimension_numbers = #tpu.dot_dimension_numbers<[1], [0], [0], [1], [0, 0, 1, 1], [], []>} : vector<8x8192xbf16>, vector<8192x32xbf16>, vector<8x32xf32> -> vector<8x32xf32>
    %c0_3 = arith.constant 0 : index
    %c0_4 = arith.constant 0 : index
    %3 = vector.load %arg3[%c0_3, %c0_4] : memref<1x32xf32, #tpu.memory_space<vmem>>, vector<1x32xf32>
    %4 = vector.broadcast %3 : vector<1x32xf32> to vector<8x32xf32>
    %5 = arith.addf %2, %4 : vector<8x32xf32>
    %cst_5 = arith.constant 0.00999999977 : f32
    %6 = vector.broadcast %cst_5 : f32 to vector<8x32xf32>
    %7 = arith.mulf %6, %5 : vector<8x32xf32>
    %8 = arith.maximumf %5, %7 : vector<8x32xf32>
    %9 = arith.truncf %8 : vector<8x32xf32> to vector<8x32xbf16>
    %c0_6 = arith.constant 0 : index
    %c0_7 = arith.constant 0 : index
    %10 = vector.load %arg4[%c0_6, %c0_7] : memref<8x32xbf16, #tpu.memory_space<vmem>>, vector<8x32xbf16>
    tpu.vector_store %arg4[%c0_6, %c0_7], %9 {strides = array<i32>} : memref<8x32xbf16, #tpu.memory_space<vmem>>, vector<8x32xbf16>,
    return
  }
  func.func @transform_0(%arg0: i32) -> (i32, i32) {
    %c0_i32 = arith.constant 0 : i32
    %c0_i32_0 = arith.constant 0 : i32
    return %arg0, %c0_i32 : i32, i32
  }
  func.func @transform_1(%arg0: i32) -> (i32, i32) {
    %c0_i32 = arith.constant 0 : i32
    %c0_i32_0 = arith.constant 0 : i32
    %c0_i32_1 = arith.constant 0 : i32
    return %c0_i32, %c0_i32_0 : i32, i32
  }
  func.func @transform_2(%arg0: i32) -> (i32, i32) {
    %c0_i32 = arith.constant 0 : i32
    %c0_i32_0 = arith.constant 0 : i32
    %c0_i32_1 = arith.constant 0 : i32
    return %c0_i32, %c0_i32_0 : i32, i32
  }
  func.func @transform_3(%arg0: i32) -> (i32, i32) {
    %c0_i32 = arith.constant 0 : i32
    %c0_i32_0 = arith.constant 0 : i32
    return %arg0, %c0_i32 : i32, i32
  }
}

module attributes {stable_mosaic.version = 11 : i64} {
  func.func @_matmul_bias_act_kernel(%arg0: i32, %arg1: memref<8x32xbf16, #tpu.memory_space<vmem>>, %arg2: memref<32x8192xbf16, #tpu.memory_space<vmem>>, %arg3: memref<1x8192xf32, #tpu.memory_space<vmem>>, %arg4: memref<8x8192xbf16, #tpu.memory_space<vmem>>) attributes {dimension_semantics = [#tpu.dimension_semantics<parallel>], iteration_bounds = array<i64: 1>, scalar_prefetch = 0 : i64, scratch_operands = 0 : i64, tpu.core_type = #tpu.core_type<tc>, window_params = [{transform_indices = @transform_0, window_bounds = array<i64: 8, 32>}, {pipeline_mode = #tpu.pipeline_mode<synchronous>, transform_indices = @transform_1, window_bounds = array<i64: 32, 8192>}, {pipeline_mode = #tpu.pipeline_mode<synchronous>, transform_indices = @transform_2, window_bounds = array<i64: 1, 8192>}, {transform_indices = @transform_3, window_bounds = array<i64: 8, 8192>}]} {
    %c0 = arith.constant 0 : index
    %c0_0 = arith.constant 0 : index
    %0 = vector.load %arg1[%c0, %c0_0] : memref<8x32xbf16, #tpu.memory_space<vmem>>, vector<8x32xbf16>
    %c0_1 = arith.constant 0 : index
    %c0_2 = arith.constant 0 : index
    %1 = vector.load %arg2[%c0_1, %c0_2] : memref<32x8192xbf16, #tpu.memory_space<vmem>>, vector<32x8192xbf16>
    %cst = arith.constant dense<0.000000e+00> : vector<8x8192xf32>
    %2 = tpu.matmul %0, %1, %cst {dimension_numbers = #tpu.dot_dimension_numbers<[1], [0], [0], [1], [0, 0, 1, 1], [], []>} : vector<8x32xbf16>, vector<32x8192xbf16>, vector<8x8192xf32> -> vector<8x8192xf32>
    %c0_3 = arith.constant 0 : index
    %c0_4 = arith.constant 0 : index
    %3 = vector.load %arg3[%c0_3, %c0_4] : memref<1x8192xf32, #tpu.memory_space<vmem>>, vector<1x8192xf32>
    %4 = vector.broadcast %3 : vector<1x8192xf32> to vector<8x8192xf32>
    %5 = arith.addf %2, %4 : vector<8x8192xf32>
    %cst_5 = arith.constant 0.00999999977 : f32
    %6 = vector.broadcast %cst_5 : f32 to vector<8x8192xf32>
    %7 = arith.mulf %6, %5 : vector<8x8192xf32>
    %8 = arith.maximumf %5, %7 : vector<8x8192xf32>
    %9 = arith.truncf %8 : vector<8x8192xf32> to vector<8x8192xbf16>
    %c0_6 = arith.constant 0 : index
    %c0_7 = arith.constant 0 : index
    %10 = vector.load %arg4[%c0_6, %c0_7] : memref<8x8192xbf16, #tpu.memory_space<vmem>>, vector<8x8192xbf16>
    tpu.vector_store %arg4[%c0_6, %c0_7], %9 {strides = array<i32>} : memref<8x8192xbf16, #tpu.memory_space<vmem>>, vector<8x8192xbf16>,
    return
  }
  func.func @transform_0(%arg0: i32) -> (i32, i32) {
    %c0_i32 = arith.constant 0 : i32
    %c0_i32_0 = arith.constant 0 : i32
    return %arg0, %c0_i32 : i32, i32
  }
  func.func @transform_1(%arg0: i32) -> (i32, i32) {
    %c0_i32 = arith.constant 0 : i32
    %c0_i32_0 = arith.constant 0 : i32
    %c0_i32_1 = arith.constant 0 : i32
    return %c0_i32, %c0_i32_0 : i32, i32
  }
  func.func @transform_2(%arg0: i32) -> (i32, i32) {
    %c0_i32 = arith.constant 0 : i32
    %c0_i32_0 = arith.constant 0 : i32
    %c0_i32_1 = arith.constant 0 : i32
    return %c0_i32, %c0_i32_0 : i32, i32
  }
  func.func @transform_3(%arg0: i32) -> (i32, i32) {
    %c0_i32 = arith.constant 0 : i32
    %c0_i32_0 = arith.constant 0 : i32
    return %arg0, %c0_i32 : i32, i32
  }
}

module attributes {stable_mosaic.version = 11 : i64} {
  func.func @_matmul_bias_act_kernel(%arg0: i32, %arg1: memref<168x512xbf16, #tpu.memory_space<vmem>>, %arg2: memref<512x256xbf16, #tpu.memory_space<vmem>>, %arg3: memref<1x256xf32, #tpu.memory_space<vmem>>, %arg4: memref<168x256xbf16, #tpu.memory_space<vmem>>) attributes {dimension_semantics = [#tpu.dimension_semantics<parallel>], iteration_bounds = array<i64: 1>, scalar_prefetch = 0 : i64, scratch_operands = 0 : i64, tpu.core_type = #tpu.core_type<tc>, window_params = [{transform_indices = @transform_0, window_bounds = array<i64: 168, 512>}, {pipeline_mode = #tpu.pipeline_mode<synchronous>, transform_indices = @transform_1, window_bounds = array<i64: 512, 256>}, {pipeline_mode = #tpu.pipeline_mode<synchronous>, transform_indices = @transform_2, window_bounds = array<i64: 1, 256>}, {transform_indices = @transform_3, window_bounds = array<i64: 168, 256>}]} {
    %c0 = arith.constant 0 : index
    %c0_0 = arith.constant 0 : index
    %0 = vector.load %arg1[%c0, %c0_0] : memref<168x512xbf16, #tpu.memory_space<vmem>>, vector<168x512xbf16>
    %c0_1 = arith.constant 0 : index
    %c0_2 = arith.constant 0 : index
    %1 = vector.load %arg2[%c0_1, %c0_2] : memref<512x256xbf16, #tpu.memory_space<vmem>>, vector<512x256xbf16>
    %cst = arith.constant dense<0.000000e+00> : vector<168x256xf32>
    %2 = tpu.matmul %0, %1, %cst {dimension_numbers = #tpu.dot_dimension_numbers<[1], [0], [0], [1], [0, 0, 1, 1], [], []>} : vector<168x512xbf16>, vector<512x256xbf16>, vector<168x256xf32> -> vector<168x256xf32>
    %c0_3 = arith.constant 0 : index
    %c0_4 = arith.constant 0 : index
    %3 = vector.load %arg3[%c0_3, %c0_4] : memref<1x256xf32, #tpu.memory_space<vmem>>, vector<1x256xf32>
    %4 = vector.broadcast %3 : vector<1x256xf32> to vector<168x256xf32>
    %5 = arith.addf %2, %4 : vector<168x256xf32>
    %cst_5 = arith.constant 0.00999999977 : f32
    %6 = vector.broadcast %cst_5 : f32 to vector<168x256xf32>
    %7 = arith.mulf %6, %5 : vector<168x256xf32>
    %8 = arith.maximumf %5, %7 : vector<168x256xf32>
    %9 = arith.truncf %8 : vector<168x256xf32> to vector<168x256xbf16>
    %c0_6 = arith.constant 0 : index
    %c0_7 = arith.constant 0 : index
    %10 = vector.load %arg4[%c0_6, %c0_7] : memref<168x256xbf16, #tpu.memory_space<vmem>>, vector<168x256xbf16>
    tpu.vector_store %arg4[%c0_6, %c0_7], %9 {strides = array<i32>} : memref<168x256xbf16, #tpu.memory_space<vmem>>, vector<168x256xbf16>,
    return
  }
  func.func @transform_0(%arg0: i32) -> (i32, i32) {
    %c0_i32 = arith.constant 0 : i32
    %c0_i32_0 = arith.constant 0 : i32
    return %arg0, %c0_i32 : i32, i32
  }
  func.func @transform_1(%arg0: i32) -> (i32, i32) {
    %c0_i32 = arith.constant 0 : i32
    %c0_i32_0 = arith.constant 0 : i32
    %c0_i32_1 = arith.constant 0 : i32
    return %c0_i32, %c0_i32_0 : i32, i32
  }
  func.func @transform_2(%arg0: i32) -> (i32, i32) {
    %c0_i32 = arith.constant 0 : i32
    %c0_i32_0 = arith.constant 0 : i32
    %c0_i32_1 = arith.constant 0 : i32
    return %c0_i32, %c0_i32_0 : i32, i32
  }
  func.func @transform_3(%arg0: i32) -> (i32, i32) {
    %c0_i32 = arith.constant 0 : i32
    %c0_i32_0 = arith.constant 0 : i32
    return %arg0, %c0_i32 : i32, i32
  }
}

module attributes {stable_mosaic.version = 11 : i64} {
  func.func @_matmul_bias_act_kernel(%arg0: i32, %arg1: memref<512x256xbf16, #tpu.memory_space<vmem>>, %arg2: memref<256x128xbf16, #tpu.memory_space<vmem>>, %arg3: memref<1x128xf32, #tpu.memory_space<vmem>>, %arg4: memref<512x128xbf16, #tpu.memory_space<vmem>>) attributes {dimension_semantics = [#tpu.dimension_semantics<parallel>], iteration_bounds = array<i64: 2>, scalar_prefetch = 0 : i64, scratch_operands = 0 : i64, tpu.core_type = #tpu.core_type<tc>, window_params = [{transform_indices = @transform_0, window_bounds = array<i64: 512, 256>}, {pipeline_mode = #tpu.pipeline_mode<synchronous>, transform_indices = @transform_1, window_bounds = array<i64: 256, 128>}, {pipeline_mode = #tpu.pipeline_mode<synchronous>, transform_indices = @transform_2, window_bounds = array<i64: 1, 128>}, {transform_indices = @transform_3, window_bounds = array<i64: 512, 128>}]} {
    %c0 = arith.constant 0 : index
    %c0_0 = arith.constant 0 : index
    %0 = vector.load %arg1[%c0, %c0_0] : memref<512x256xbf16, #tpu.memory_space<vmem>>, vector<512x256xbf16>
    %c0_1 = arith.constant 0 : index
    %c0_2 = arith.constant 0 : index
    %1 = vector.load %arg2[%c0_1, %c0_2] : memref<256x128xbf16, #tpu.memory_space<vmem>>, vector<256x128xbf16>
    %cst = arith.constant dense<0.000000e+00> : vector<512x128xf32>
    %2 = tpu.matmul %0, %1, %cst {dimension_numbers = #tpu.dot_dimension_numbers<[1], [0], [0], [1], [0, 0, 1, 1], [], []>} : vector<512x256xbf16>, vector<256x128xbf16>, vector<512x128xf32> -> vector<512x128xf32>
    %c0_3 = arith.constant 0 : index
    %c0_4 = arith.constant 0 : index
    %3 = vector.load %arg3[%c0_3, %c0_4] : memref<1x128xf32, #tpu.memory_space<vmem>>, vector<1x128xf32>
    %4 = vector.broadcast %3 : vector<1x128xf32> to vector<512x128xf32>
    %5 = arith.addf %2, %4 : vector<512x128xf32>
    %cst_5 = arith.constant 0.00999999977 : f32
    %6 = vector.broadcast %cst_5 : f32 to vector<512x128xf32>
    %7 = arith.mulf %6, %5 : vector<512x128xf32>
    %8 = arith.maximumf %5, %7 : vector<512x128xf32>
    %9 = arith.truncf %8 : vector<512x128xf32> to vector<512x128xbf16>
    %c0_6 = arith.constant 0 : index
    %c0_7 = arith.constant 0 : index
    %10 = vector.load %arg4[%c0_6, %c0_7] : memref<512x128xbf16, #tpu.memory_space<vmem>>, vector<512x128xbf16>
    tpu.vector_store %arg4[%c0_6, %c0_7], %9 {strides = array<i32>} : memref<512x128xbf16, #tpu.memory_space<vmem>>, vector<512x128xbf16>,
    return
  }
  func.func @transform_0(%arg0: i32) -> (i32, i32) {
    %c0_i32 = arith.constant 0 : i32
    %c0_i32_0 = arith.constant 0 : i32
    return %arg0, %c0_i32 : i32, i32
  }
  func.func @transform_1(%arg0: i32) -> (i32, i32) {
    %c0_i32 = arith.constant 0 : i32
    %c0_i32_0 = arith.constant 0 : i32
    %c0_i32_1 = arith.constant 0 : i32
    return %c0_i32, %c0_i32_0 : i32, i32
  }
  func.func @transform_2(%arg0: i32) -> (i32, i32) {
    %c0_i32 = arith.constant 0 : i32
    %c0_i32_0 = arith.constant 0 : i32
    %c0_i32_1 = arith.constant 0 : i32
    return %c0_i32, %c0_i32_0 : i32, i32
  }
  func.func @transform_3(%arg0: i32) -> (i32, i32) {
    %c0_i32 = arith.constant 0 : i32
    %c0_i32_0 = arith.constant 0 : i32
    return %arg0, %c0_i32 : i32, i32
  }
}

module attributes {stable_mosaic.version = 11 : i64} {
  func.func @_matmul_bias_act_kernel(%arg0: i32, %arg1: memref<512x128xbf16, #tpu.memory_space<vmem>>, %arg2: memref<128x64xbf16, #tpu.memory_space<vmem>>, %arg3: memref<1x64xf32, #tpu.memory_space<vmem>>, %arg4: memref<512x64xbf16, #tpu.memory_space<vmem>>) attributes {dimension_semantics = [#tpu.dimension_semantics<parallel>], iteration_bounds = array<i64: 5>, scalar_prefetch = 0 : i64, scratch_operands = 0 : i64, tpu.core_type = #tpu.core_type<tc>, window_params = [{transform_indices = @transform_0, window_bounds = array<i64: 512, 128>}, {pipeline_mode = #tpu.pipeline_mode<synchronous>, transform_indices = @transform_1, window_bounds = array<i64: 128, 64>}, {pipeline_mode = #tpu.pipeline_mode<synchronous>, transform_indices = @transform_2, window_bounds = array<i64: 1, 64>}, {transform_indices = @transform_3, window_bounds = array<i64: 512, 64>}]} {
    %c0 = arith.constant 0 : index
    %c0_0 = arith.constant 0 : index
    %0 = vector.load %arg1[%c0, %c0_0] : memref<512x128xbf16, #tpu.memory_space<vmem>>, vector<512x128xbf16>
    %c0_1 = arith.constant 0 : index
    %c0_2 = arith.constant 0 : index
    %1 = vector.load %arg2[%c0_1, %c0_2] : memref<128x64xbf16, #tpu.memory_space<vmem>>, vector<128x64xbf16>
    %cst = arith.constant dense<0.000000e+00> : vector<512x64xf32>
    %2 = tpu.matmul %0, %1, %cst {dimension_numbers = #tpu.dot_dimension_numbers<[1], [0], [0], [1], [0, 0, 1, 1], [], []>} : vector<512x128xbf16>, vector<128x64xbf16>, vector<512x64xf32> -> vector<512x64xf32>
    %c0_3 = arith.constant 0 : index
    %c0_4 = arith.constant 0 : index
    %3 = vector.load %arg3[%c0_3, %c0_4] : memref<1x64xf32, #tpu.memory_space<vmem>>, vector<1x64xf32>
    %4 = vector.broadcast %3 : vector<1x64xf32> to vector<512x64xf32>
    %5 = arith.addf %2, %4 : vector<512x64xf32>
    %cst_5 = arith.constant 0.00999999977 : f32
    %6 = vector.broadcast %cst_5 : f32 to vector<512x64xf32>
    %7 = arith.mulf %6, %5 : vector<512x64xf32>
    %8 = arith.maximumf %5, %7 : vector<512x64xf32>
    %9 = arith.truncf %8 : vector<512x64xf32> to vector<512x64xbf16>
    %c0_6 = arith.constant 0 : index
    %c0_7 = arith.constant 0 : index
    %10 = vector.load %arg4[%c0_6, %c0_7] : memref<512x64xbf16, #tpu.memory_space<vmem>>, vector<512x64xbf16>
    tpu.vector_store %arg4[%c0_6, %c0_7], %9 {strides = array<i32>} : memref<512x64xbf16, #tpu.memory_space<vmem>>, vector<512x64xbf16>,
    return
  }
  func.func @transform_0(%arg0: i32) -> (i32, i32) {
    %c0_i32 = arith.constant 0 : i32
    %c0_i32_0 = arith.constant 0 : i32
    return %arg0, %c0_i32 : i32, i32
  }
  func.func @transform_1(%arg0: i32) -> (i32, i32) {
    %c0_i32 = arith.constant 0 : i32
    %c0_i32_0 = arith.constant 0 : i32
    %c0_i32_1 = arith.constant 0 : i32
    return %c0_i32, %c0_i32_0 : i32, i32
  }
  func.func @transform_2(%arg0: i32) -> (i32, i32) {
    %c0_i32 = arith.constant 0 : i32
    %c0_i32_0 = arith.constant 0 : i32
    %c0_i32_1 = arith.constant 0 : i32
    return %c0_i32, %c0_i32_0 : i32, i32
  }
  func.func @transform_3(%arg0: i32) -> (i32, i32) {
    %c0_i32 = arith.constant 0 : i32
    %c0_i32_0 = arith.constant 0 : i32
    return %arg0, %c0_i32 : i32, i32
  }
}

module attributes {stable_mosaic.version = 11 : i64} {
  func.func @_matmul_bias_act_kernel(%arg0: i32, %arg1: memref<512x64xbf16, #tpu.memory_space<vmem>>, %arg2: memref<64x12xbf16, #tpu.memory_space<vmem>>, %arg3: memref<1x12xf32, #tpu.memory_space<vmem>>, %arg4: memref<512x12xf32, #tpu.memory_space<vmem>>) attributes {dimension_semantics = [#tpu.dimension_semantics<parallel>], iteration_bounds = array<i64: 17>, scalar_prefetch = 0 : i64, scratch_operands = 0 : i64, tpu.core_type = #tpu.core_type<tc>, window_params = [{transform_indices = @transform_0, window_bounds = array<i64: 512, 64>}, {pipeline_mode = #tpu.pipeline_mode<synchronous>, transform_indices = @transform_1, window_bounds = array<i64: 64, 12>}, {pipeline_mode = #tpu.pipeline_mode<synchronous>, transform_indices = @transform_2, window_bounds = array<i64: 1, 12>}, {transform_indices = @transform_3, window_bounds = array<i64: 512, 12>}]} {
    %c0 = arith.constant 0 : index
    %c0_0 = arith.constant 0 : index
    %0 = vector.load %arg1[%c0, %c0_0] : memref<512x64xbf16, #tpu.memory_space<vmem>>, vector<512x64xbf16>
    %c0_1 = arith.constant 0 : index
    %c0_2 = arith.constant 0 : index
    %1 = vector.load %arg2[%c0_1, %c0_2] : memref<64x12xbf16, #tpu.memory_space<vmem>>, vector<64x12xbf16>
    %cst = arith.constant dense<0.000000e+00> : vector<512x12xf32>
    %2 = tpu.matmul %0, %1, %cst {dimension_numbers = #tpu.dot_dimension_numbers<[1], [0], [0], [1], [0, 0, 1, 1], [], []>} : vector<512x64xbf16>, vector<64x12xbf16>, vector<512x12xf32> -> vector<512x12xf32>
    %c0_3 = arith.constant 0 : index
    %c0_4 = arith.constant 0 : index
    %3 = vector.load %arg3[%c0_3, %c0_4] : memref<1x12xf32, #tpu.memory_space<vmem>>, vector<1x12xf32>
    %4 = vector.broadcast %3 : vector<1x12xf32> to vector<512x12xf32>
    %5 = arith.addf %2, %4 : vector<512x12xf32>
    %cst_5 = arith.constant 0.000000e+00 : f32
    %6 = vector.broadcast %cst_5 : f32 to vector<512x12xf32>
    %7 = arith.subf %6, %5 : vector<512x12xf32>
    %8 = math.exp %7 : vector<512x12xf32>
    %cst_6 = arith.constant 1.000000e+00 : f32
    %9 = vector.broadcast %cst_6 : f32 to vector<512x12xf32>
    %10 = arith.addf %9, %8 : vector<512x12xf32>
    %cst_7 = arith.constant 1.000000e+00 : f32
    %11 = vector.broadcast %cst_7 : f32 to vector<512x12xf32>
    %12 = arith.divf %11, %10 : vector<512x12xf32>
    %c0_8 = arith.constant 0 : index
    %c0_9 = arith.constant 0 : index
    %13 = vector.load %arg4[%c0_8, %c0_9] : memref<512x12xf32, #tpu.memory_space<vmem>>, vector<512x12xf32>
    tpu.vector_store %arg4[%c0_8, %c0_9], %12 {strides = array<i32>} : memref<512x12xf32, #tpu.memory_space<vmem>>, vector<512x12xf32>,
    return
  }
  func.func @transform_0(%arg0: i32) -> (i32, i32) {
    %c0_i32 = arith.constant 0 : i32
    %c0_i32_0 = arith.constant 0 : i32
    return %arg0, %c0_i32 : i32, i32
  }
  func.func @transform_1(%arg0: i32) -> (i32, i32) {
    %c0_i32 = arith.constant 0 : i32
    %c0_i32_0 = arith.constant 0 : i32
    %c0_i32_1 = arith.constant 0 : i32
    return %c0_i32, %c0_i32_0 : i32, i32
  }
  func.func @transform_2(%arg0: i32) -> (i32, i32) {
    %c0_i32 = arith.constant 0 : i32
    %c0_i32_0 = arith.constant 0 : i32
    %c0_i32_1 = arith.constant 0 : i32
    return %c0_i32, %c0_i32_0 : i32, i32
  }
  func.func @transform_3(%arg0: i32) -> (i32, i32) {
    %c0_i32 = arith.constant 0 : i32
    %c0_i32_0 = arith.constant 0 : i32
    return %arg0, %c0_i32 : i32, i32
  }
}

</mosaic_0001>

<bundles_post_ra>
// kernel: tile.39
= control target key start
LH: loop header
LB: loop body
LE: loop exit
PB: predicated region body
PF: predicated region fallthrough
CT: control target
= control target key end

     0   :  { %vm7_vm0 = vcmask 261120   ;;  %s37_s8 = smov 32   ;;  %s38_s9 = smov 64   ;;  %vm13_vm1 = vcmask 1048320   ;;  %vm19_vm2 = vcmask 785920   ;;  %vm25_vm3 = vcmask 523520   ;;  %s55_s0 = inlined_call_operand.vmem [shape: f32[4,32], index: 0, kind: input, shape index: {}]   ;;  %s56_s1 = inlined_call_operand.vmem [shape: f32[1,128], index: 1, kind: output, shape index: {}]  }
   0x1   :  { %v4_v0 = vld [vmem:[%s55_s0] sm:$0xf]  ;;  %s36_s0 = smov 96  }
   0x2   :  { %5 = vst [vmem:[#allocation1] sm:$0xf] %v4_v0 }
   0x9   :  { %v10_v1 = vld [vmem:[#allocation1 + $0x3] sm:$0x1]   ;;  %v22_v2 = vld [vmem:[#allocation1 + $0x1] sm:$0x1]   ;;  %v6_v3 = vld [vmem:[#allocation1] sm:$0x1]  }
   0xa   :  { %11 = vrot.lane.b32.xlu0 %v10_v1, %s36_s0  ;;  %23 = vrot.lane.b32.xlu1 %v22_v2, %s37_s8  ;;  %v16_v4 = vld [vmem:[#allocation1 + $0x2] sm:$0x1]   ;;  %8 = vst.msk [vmem:[#allocation0] sm:$0x1] %vm7_vm0, %v6_v3  }
   0xe   :  { %17 = vrot.lane.b32.xlu0 %v16_v4, %s38_s9 }
  0x7c   :  { %v12_v5 = vpop.permute.xlu0 %11   ;;  %v24_v6 = vpop.permute.xlu1 %23  }
  0x7d   :  { %14 = vst.msk [vmem:[#allocation0] sm:$0x1] %vm13_vm1, %v12_v5  }
  0x80   :  { %v18_v7 = vpop.permute.xlu0 %17  }
  0x81   :  { %20 = vst.msk [vmem:[#allocation0] sm:$0x1] %vm19_vm2, %v18_v7  }
  0x82   :  { %26 = vst.msk [vmem:[#allocation0] sm:$0x1] %vm25_vm3, %v24_v6  }
  0x89   :  { %v30_v8 = vld [vmem:[#allocation0] sm:$0x1] }
  0x8a   :  { %32 = vst [vmem:[%s56_s1] sm:$0x1] %v30_v8 }

// kernel: tile.34
= control target key start
LH: loop header
LB: loop body
LE: loop exit
PB: predicated region body
PF: predicated region fallthrough
CT: control target
= control target key end

     0   :  { %s6_s8 = smov 3  ;;  %vm8_vm0 = vcmask 523264   ;;  %s30_s9 = smov 64   ;;  %vm15_vm1 = vcmask 1048064   ;;  %s50_s0 = inlined_call_operand.vmem [shape: f32[4,64], index: 0, kind: input, shape index: {}]   ;;  %s51_s1 = inlined_call_operand.vmem [shape: f32[1,256], index: 1, kind: output, shape index: {}]  }
   0x1   :  { %v4_v0 = vld [vmem:[%s50_s0] sm:$0xf]  ;;  %s11_s0 = smov 3 }
   0x2   :  { %5 = vst [vmem:[#allocation1] sm:$0xf] %v4_v0 }
   0x9   :  { %v12_v1 = vld [vmem:[#allocation1 + $0x1] ss:$2 sm:%s11_s0]   ;;  %v7_v2 = vld [vmem:[#allocation1] ss:$2 sm:%s6_s8]  }
   0xa   :  { %13 = vrot.lane.b32.xlu0 %v12_v1, %s30_s9  ;;  %9 = vst.msk [vmem:[#allocation0] ss:$8 sm:$0x3] %vm8_vm0, %v7_v2  }
  0x7c   :  { %v14_v3 = vpop.permute.xlu0 %13  }
  0x7d   :  { %16 = vst.msk [vmem:[#allocation0] ss:$8 sm:$0x3] %vm15_vm1, %v14_v3  }
  0x84   :  { %v20_v4 = vld [vmem:[#allocation0] sm:$0x1]  ;;  %v24_v5 = vld [vmem:[#allocation0 + $0x8] sm:$0x1] }
  0x85   :  { %22 = vst [vmem:[%s51_s1] sm:$0x1] %v20_v4  ;;  %28 = vst [vmem:[%s51_s1 + $0x1] sm:$0x1] %v24_v5 }

// kernel: tile.38
= control target key start
LH: loop header
LB: loop body
LE: loop exit
PB: predicated region body
PF: predicated region fallthrough
CT: control target
= control target key end

     0   :  { %2 = vsyncpa [#allocation1], 0  ;;  %s44_s6 = smov [#allocation0]   ;;  %s70_s0 = inlined_call_operand.hbm [shape: f32[32], index: 0, kind: input, shape index: {}]   ;;  %s71_s1 = inlined_call_operand.vmem [shape: f32[4,32], index: 1, kind: output, shape index: {}]  }
   0x1   :  { %s9_s7 = sshll.u32 %s44_s6, 4  ;;  %s20_s10 = scalar_lea.hbm %s70_s0, 16  ;;  %s10_s7 = int_to_ptr.vmem [resolvable:$true] %s9_s7 }
   0x2   :  { %p21_p0 = scmp.ne.s32.totalorder %s70_s0, %s20_s10  ;;  %p24_p1 = scmp.lt.u32.totalorder %s20_s10, %s70_s0 }
   0x4   :  { %p26_p2 = pnand %p24_p1, %p21_p0 }
   0x6   :  { %29 = shalt.err (!%p26_p2)
}
   0x7   :  { %s30_s15 = scalar_lea.vmem %s10_s7, 16  ;;  %s34_s16 = scalar_lea.vmem %s10_s7, 32 }
   0x8   :  { %p31_p3 = scmp.ne.s32.totalorder %s10_s7, %s30_s15  ;;  %p35_p4 = scmp.lt.s32.totalorder %s10_s7, %s10_s7 }
   0x9   :  { %p36_p5 = scmp.lt.s32.totalorder %s34_s16, %s30_s15 }
   0xb   :  { %p37_p6 = por %p36_p5, %p35_p4 }
   0xd   :  { %p38_p7 = pnand %p37_p6, %p31_p3 }
   0xf   :  { %41 = shalt.err (!%p38_p7)
}
  0x10   :  { %12 = dma.hbm_to_vmem [thread:$0]  %s70_s0, 16, %s10_s7, [#allocation1]  }
  0x11   :  { %42 = dma.done.wait [#allocation1], 16  }
  0x12   :  { %43 = vsyncadd [#allocation1], 4294967280  ;;  %v16_v0 = vld [vmem:[#allocation0] ss:$0 sm:$0xff] }
  0x13   :  { %17 = vst [vmem:[%s71_s1] sm:$0xf] %v16_v0 }
  0x14   :  { %18 = vsyncpa [#allocation1], 1 }

// kernel: tile.33
= control target key start
LH: loop header
LB: loop body
LE: loop exit
PB: predicated region body
PF: predicated region fallthrough
CT: control target
= control target key end

     0   :  { %2 = vsyncpa [#allocation1], 0  ;;  %s44_s6 = smov [#allocation0]   ;;  %s70_s0 = inlined_call_operand.hbm [shape: f32[64], index: 0, kind: input, shape index: {}]   ;;  %s71_s1 = inlined_call_operand.vmem [shape: f32[4,64], index: 1, kind: output, shape index: {}]  }
   0x1   :  { %s9_s7 = sshll.u32 %s44_s6, 4  ;;  %s20_s10 = scalar_lea.hbm %s70_s0, 16  ;;  %s10_s7 = int_to_ptr.vmem [resolvable:$true] %s9_s7 }
   0x2   :  { %p21_p0 = scmp.ne.s32.totalorder %s70_s0, %s20_s10  ;;  %p24_p1 = scmp.lt.u32.totalorder %s20_s10, %s70_s0 }
   0x4   :  { %p26_p2 = pnand %p24_p1, %p21_p0 }
   0x6   :  { %29 = shalt.err (!%p26_p2)
}
   0x7   :  { %s30_s15 = scalar_lea.vmem %s10_s7, 16  ;;  %s34_s16 = scalar_lea.vmem %s10_s7, 32 }
   0x8   :  { %p31_p3 = scmp.ne.s32.totalorder %s10_s7, %s30_s15  ;;  %p35_p4 = scmp.lt.s32.totalorder %s10_s7, %s10_s7 }
   0x9   :  { %p36_p5 = scmp.lt.s32.totalorder %s34_s16, %s30_s15 }
   0xb   :  { %p37_p6 = por %p36_p5, %p35_p4 }
   0xd   :  { %p38_p7 = pnand %p37_p6, %p31_p3 }
   0xf   :  { %41 = shalt.err (!%p38_p7)
}
  0x10   :  { %12 = dma.hbm_to_vmem [thread:$0]  %s70_s0, 16, %s10_s7, [#allocation1]  }
  0x11   :  { %42 = dma.done.wait [#allocation1], 16  }
  0x12   :  { %43 = vsyncadd [#allocation1], 4294967280  ;;  %v16_v0 = vld [vmem:[#allocation0] ss:$0 sm:$0xff] }
  0x13   :  { %17 = vst [vmem:[%s71_s1] sm:$0xf] %v16_v0 }
  0x14   :  { %18 = vsyncpa [#allocation1], 1 }

// kernel: tile.43
= control target key start
LH: loop header
LB: loop body
LE: loop exit
PB: predicated region body
PF: predicated region fallthrough
CT: control target
= control target key end

     0   :  { %2 = vsyncpa [#allocation1], 0  ;;  %s44_s6 = smov [#allocation0]   ;;  %s70_s0 = inlined_call_operand.hbm [shape: f32[16], index: 0, kind: input, shape index: {}]   ;;  %s71_s1 = inlined_call_operand.vmem [shape: f32[4,16], index: 1, kind: output, shape index: {}]  }
   0x1   :  { %s9_s7 = sshll.u32 %s44_s6, 4  ;;  %s20_s10 = scalar_lea.hbm %s70_s0, 16  ;;  %s10_s7 = int_to_ptr.vmem [resolvable:$true] %s9_s7 }
   0x2   :  { %p21_p0 = scmp.ne.s32.totalorder %s70_s0, %s20_s10  ;;  %p24_p1 = scmp.lt.u32.totalorder %s20_s10, %s70_s0 }
   0x4   :  { %p26_p2 = pnand %p24_p1, %p21_p0 }
   0x6   :  { %29 = shalt.err (!%p26_p2)
}
   0x7   :  { %s30_s15 = scalar_lea.vmem %s10_s7, 16  ;;  %s34_s16 = scalar_lea.vmem %s10_s7, 32 }
   0x8   :  { %p31_p3 = scmp.ne.s32.totalorder %s10_s7, %s30_s15  ;;  %p35_p4 = scmp.lt.s32.totalorder %s10_s7, %s10_s7 }
   0x9   :  { %p36_p5 = scmp.lt.s32.totalorder %s34_s16, %s30_s15 }
   0xb   :  { %p37_p6 = por %p36_p5, %p35_p4 }
   0xd   :  { %p38_p7 = pnand %p37_p6, %p31_p3 }
   0xf   :  { %41 = shalt.err (!%p38_p7)
}
  0x10   :  { %12 = dma.hbm_to_vmem [thread:$0]  %s70_s0, 16, %s10_s7, [#allocation1]  }
  0x11   :  { %42 = dma.done.wait [#allocation1], 16  }
  0x12   :  { %43 = vsyncadd [#allocation1], 4294967280  ;;  %v16_v0 = vld [vmem:[#allocation0] ss:$0 sm:$0xff] }
  0x13   :  { %17 = vst [vmem:[%s71_s1] sm:$0xf] %v16_v0 }
  0x14   :  { %18 = vsyncpa [#allocation1], 1 }

// kernel: tile.44
= control target key start
LH: loop header
LB: loop body
LE: loop exit
PB: predicated region body
PF: predicated region fallthrough
CT: control target
= control target key end

     0   :  { %vm7_vm0 = vcmask 130048   ;;  %s37_s8 = smov 16   ;;  %s38_s9 = smov 32   ;;  %vm13_vm1 = vcmask 523648   ;;  %vm19_vm2 = vcmask 392448   ;;  %vm25_vm3 = vcmask 261248   ;;  %s55_s0 = inlined_call_operand.vmem [shape: f32[4,16], index: 0, kind: input, shape index: {}]   ;;  %s56_s1 = inlined_call_operand.vmem [shape: f32[1,64], index: 1, kind: output, shape index: {}]  }
   0x1   :  { %v4_v0 = vld [vmem:[%s55_s0] sm:$0xf]  ;;  %s36_s0 = smov 48  }
   0x2   :  { %5 = vst [vmem:[#allocation1] sm:$0xf] %v4_v0 }
   0x9   :  { %v10_v1 = vld [vmem:[#allocation1 + $0x3] sm:$0x1]   ;;  %v22_v2 = vld [vmem:[#allocation1 + $0x1] sm:$0x1]   ;;  %v6_v3 = vld [vmem:[#allocation1] sm:$0x1]  }
   0xa   :  { %11 = vrot.lane.b32.xlu0 %v10_v1, %s36_s0  ;;  %23 = vrot.lane.b32.xlu1 %v22_v2, %s37_s8  ;;  %v16_v4 = vld [vmem:[#allocation1 + $0x2] sm:$0x1]   ;;  %8 = vst.msk [vmem:[#allocation0] sm:$0x1] %vm7_vm0, %v6_v3  }
   0xe   :  { %17 = vrot.lane.b32.xlu0 %v16_v4, %s38_s9 }
  0x7c   :  { %v12_v5 = vpop.permute.xlu0 %11   ;;  %v24_v6 = vpop.permute.xlu1 %23  }
  0x7d   :  { %14 = vst.msk [vmem:[#allocation0] sm:$0x1] %vm13_vm1, %v12_v5  }
  0x80   :  { %v18_v7 = vpop.permute.xlu0 %17  }
  0x81   :  { %20 = vst.msk [vmem:[#allocation0] sm:$0x1] %vm19_vm2, %v18_v7  }
  0x82   :  { %26 = vst.msk [vmem:[#allocation0] sm:$0x1] %vm25_vm3, %v24_v6  }
  0x89   :  { %v30_v8 = vld [vmem:[#allocation0] sm:$0x1] }
  0x8a   :  { %32 = vst [vmem:[%s56_s1] sm:$0x1] %v30_v8 }

// kernel: tile.48
= control target key start
LH: loop header
LB: loop body
LE: loop exit
PB: predicated region body
PF: predicated region fallthrough
CT: control target
= control target key end

     0   :  { %2 = vsyncpa [#allocation1], 0  ;;  %s44_s6 = smov [#allocation0]   ;;  %s70_s0 = inlined_call_operand.hbm [shape: f32[3], index: 0, kind: input, shape index: {}]   ;;  %s71_s1 = inlined_call_operand.vmem [shape: f32[4,3], index: 1, kind: output, shape index: {}]  }
   0x1   :  { %s9_s7 = sshll.u32 %s44_s6, 4  ;;  %s20_s10 = scalar_lea.hbm %s70_s0, 16  ;;  %s10_s7 = int_to_ptr.vmem [resolvable:$true] %s9_s7 }
   0x2   :  { %p21_p0 = scmp.ne.s32.totalorder %s70_s0, %s20_s10  ;;  %p24_p1 = scmp.lt.u32.totalorder %s20_s10, %s70_s0 }
   0x4   :  { %p26_p2 = pnand %p24_p1, %p21_p0 }
   0x6   :  { %29 = shalt.err (!%p26_p2)
}
   0x7   :  { %s30_s15 = scalar_lea.vmem %s10_s7, 16  ;;  %s34_s16 = scalar_lea.vmem %s10_s7, 32 }
   0x8   :  { %p31_p3 = scmp.ne.s32.totalorder %s10_s7, %s30_s15  ;;  %p35_p4 = scmp.lt.s32.totalorder %s10_s7, %s10_s7 }
   0x9   :  { %p36_p5 = scmp.lt.s32.totalorder %s34_s16, %s30_s15 }
   0xb   :  { %p37_p6 = por %p36_p5, %p35_p4 }
   0xd   :  { %p38_p7 = pnand %p37_p6, %p31_p3 }
   0xf   :  { %41 = shalt.err (!%p38_p7)
}
  0x10   :  { %12 = dma.hbm_to_vmem [thread:$0]  %s70_s0, 16, %s10_s7, [#allocation1]  }
  0x11   :  { %42 = dma.done.wait [#allocation1], 16  }
  0x12   :  { %43 = vsyncadd [#allocation1], 4294967280  ;;  %v16_v0 = vld [vmem:[#allocation0] ss:$0 sm:$0xff] }
  0x13   :  { %17 = vst [vmem:[%s71_s1] sm:$0xf] %v16_v0 }
  0x14   :  { %18 = vsyncpa [#allocation1], 1 }

// kernel: tile.49
= control target key start
LH: loop header
LB: loop body
LE: loop exit
PB: predicated region body
PF: predicated region fallthrough
CT: control target
= control target key end

     0   :  { %vm7_vm0 = vcmask 23552   ;;  %s37_s8 = smov 3   ;;  %s38_s9 = smov 6   ;;  %vm13_vm1 = vcmask 97352   ;;  %vm19_vm2 = vcmask 72752   ;;  %vm25_vm3 = vcmask 48152   ;;  %s55_s0 = inlined_call_operand.vmem [shape: f32[4,3], index: 0, kind: input, shape index: {}]   ;;  %s56_s1 = inlined_call_operand.vmem [shape: f32[1,12], index: 1, kind: output, shape index: {}]  }
   0x1   :  { %v4_v0 = vld [vmem:[%s55_s0] sm:$0xf]  ;;  %s36_s0 = smov 9  }
   0x2   :  { %5 = vst [vmem:[#allocation1] sm:$0xf] %v4_v0 }
   0x9   :  { %v10_v1 = vld [vmem:[#allocation1 + $0x3] sm:$0x1]   ;;  %v22_v2 = vld [vmem:[#allocation1 + $0x1] sm:$0x1]   ;;  %v6_v3 = vld [vmem:[#allocation1] sm:$0x1]  }
   0xa   :  { %11 = vrot.lane.b32.xlu0 %v10_v1, %s36_s0  ;;  %23 = vrot.lane.b32.xlu1 %v22_v2, %s37_s8  ;;  %v16_v4 = vld [vmem:[#allocation1 + $0x2] sm:$0x1]   ;;  %8 = vst.msk [vmem:[#allocation0] sm:$0x1] %vm7_vm0, %v6_v3  }
   0xe   :  { %17 = vrot.lane.b32.xlu0 %v16_v4, %s38_s9 }
  0x7c   :  { %v12_v5 = vpop.permute.xlu0 %11   ;;  %v24_v6 = vpop.permute.xlu1 %23  }
  0x7d   :  { %14 = vst.msk [vmem:[#allocation0] sm:$0x1] %vm13_vm1, %v12_v5  }
  0x80   :  { %v18_v7 = vpop.permute.xlu0 %17  }
  0x81   :  { %20 = vst.msk [vmem:[#allocation0] sm:$0x1] %vm19_vm2, %v18_v7  }
  0x82   :  { %26 = vst.msk [vmem:[#allocation0] sm:$0x1] %vm25_vm3, %v24_v6  }
  0x89   :  { %v30_v8 = vld [vmem:[#allocation0] sm:$0x1] }
  0x8a   :  { %32 = vst [vmem:[%s56_s1] sm:$0x1] %v30_v8 }

// kernel: tile.28
= control target key start
LH: loop header
LB: loop body
LE: loop exit
PB: predicated region body
PF: predicated region fallthrough
CT: control target
= control target key end

     0   :  { %2 = vsyncpa [#allocation1], 0  ;;  %s65_s6 = smov [#allocation0]   ;;  %s112_s0 = inlined_call_operand.hbm [shape: f32[128], index: 0, kind: input, shape index: {}]   ;;  %s113_s1 = inlined_call_operand.vmem [shape: f32[64,128], index: 1, kind: output, shape index: {}]  }
   0x1   :  { %s9_s7 = sshll.u32 %s65_s6, 4  ;;  %s41_s10 = scalar_lea.hbm %s112_s0, 16  ;;  %s10_s7 = int_to_ptr.vmem [resolvable:$true] %s9_s7 }
   0x2   :  { %p42_p0 = scmp.ne.s32.totalorder %s112_s0, %s41_s10  ;;  %p45_p1 = scmp.lt.u32.totalorder %s41_s10, %s112_s0 }
   0x4   :  { %p47_p2 = pnand %p45_p1, %p42_p0 }
   0x6   :  { %50 = shalt.err (!%p47_p2)
}
   0x7   :  { %s51_s15 = scalar_lea.vmem %s10_s7, 16  ;;  %s55_s16 = scalar_lea.vmem %s10_s7, 32 }
   0x8   :  { %p52_p3 = scmp.ne.s32.totalorder %s10_s7, %s51_s15  ;;  %p56_p4 = scmp.lt.s32.totalorder %s10_s7, %s10_s7 }
   0x9   :  { %p57_p5 = scmp.lt.s32.totalorder %s55_s16, %s51_s15 }
   0xb   :  { %p58_p6 = por %p57_p5, %p56_p4 }
   0xd   :  { %p59_p7 = pnand %p58_p6, %p52_p3 }
   0xf   :  { %62 = shalt.err (!%p59_p7)
}
  0x10   :  { %12 = dma.hbm_to_vmem [thread:$0]  %s112_s0, 16, %s10_s7, [#allocation1]  }
  0x11   :  { %63 = dma.done.wait [#allocation1], 16  }
  0x12   :  { %64 = vsyncadd [#allocation1], 4294967280  ;;  %v16_v0 = vld [vmem:[#allocation0] ss:$0 sm:$0xff] }
  0x13   :  { %17 = vst [vmem:[%s113_s1] sm:$0xff] %v16_v0  ;;  %33 = vst [vmem:[%s113_s1 + $0x8] sm:$0xff] %v16_v0 }
  0x14   :  { %34 = vst [vmem:[%s113_s1 + $0x10] sm:$0xff] %v16_v0  ;;  %35 = vst [vmem:[%s113_s1 + $0x18] sm:$0xff] %v16_v0 }
  0x15   :  { %36 = vst [vmem:[%s113_s1 + $0x20] sm:$0xff] %v16_v0  ;;  %37 = vst [vmem:[%s113_s1 + $0x28] sm:$0xff] %v16_v0 }
  0x16   :  { %38 = vst [vmem:[%s113_s1 + $0x30] sm:$0xff] %v16_v0  ;;  %39 = vst [vmem:[%s113_s1 + $0x38] sm:$0xff] %v16_v0 }
  0x17   :  { %32 = vsyncpa [#allocation1], 1 }

// kernel: appearance_autoencoder_forward.10
= control target key start
LH: loop header
LB: loop body
LE: loop exit
PB: predicated region body
PF: predicated region fallthrough
CT: control target
= control target key end

     0   :  { %s1703_s12 = smov 0   ;;  %s1998_s0 = inlined_call_operand.vmem [shape: bf16[8192,27], index: 0, kind: input, shape index: {}]   ;;  %s1999_s1 = inlined_call_operand.vmem [shape: bf16[27,16], index: 1, kind: input, shape index: {}]   ;;  %s2000_s2 = inlined_call_operand.vmem [shape: f32[1,16], index: 2, kind: input, shape index: {}]   ;;  %s2001_s3 = inlined_call_operand.vmem [shape: bf16[8192,16], index: 3, kind: output, shape index: {}]  }
   0x1 LB: > { %s1319_s13 = sadd.s32 4294967295, %s1680_s12   ;;  %p1323_p0 = scmp.ge.s32.totalorder %s1680_s12, 1  ;;  %s1680_s12 = sphi %s1703_s12, %s13_s12  }
   0x2   : > { %p138_p1 = scmp.lt.s32.totalorder %s1680_s12, 17 }
   0x4   : > { %p139_p2 = pnand %p1323_p0, %p138_p1 }
   0x5   : > { %v1640_v0 = vld [vmem:[%s1999_s1] sm:$0xff] (!%p139_p2)   ;;  %vm518_vm0 = vcmask (!%p139_p2), 1044480   ;;  %v1641_v1 = vld [vmem:[%s1999_s1 + $0x8] sm:$0x3f] (!%p139_p2)   ;;  %vm519_vm1 = vcmask (!%p139_p2), 1045504   ;;  %s1324_s18 = sshll.u32 (!%p139_p2), %s1319_s13, 6 }
   0x6   : > { %142 = sbr.rel (%p139_p2) target bundleno = 301 (0x12d), region = 32  ;;  %1559 = vmatprep.subr.bf16.mxu0 (!%p139_p2), %v1640_v0  ;;  %1627 = vmatprep.subr.bf16.mxu1 (!%p139_p2), %v1640_v0  ;;  %v1682_v2 = vmov (!%p139_p2), 65535   ;;  %p163_p3 = scmp.lt.s32.totalorder (!%p139_p2), %s1324_s18, 1023  ;;  %vm421_vm2 = vcmask (!%p139_p2), 220160   ;;  %v1794_v38 = vld [vmem:[%s2000_s2] ss:$0 sm:$0xff] (!%p139_p2) }
   0x7   : > { %1560 = vmatpush3.bf16.msra.mxu0 (!%p139_p2), %v1640_v0  ;;  %1629 = vmatpush3.bf16.msra.mxu1 (!%p139_p2), %v1640_v0  ;;  %v520_v3 = vsel (!%p139_p2), %vm518_vm0, 4294967295, %v1682_v2  ;;  %vm1198_vm3 = vcmask (!%p139_p2), 125952  }
   0x8   : > { %v521_v4 = vsel (!%p139_p2), %vm519_vm1, %v520_v3, 0 }
   0x9   : > { %v523_v5 = vand.u32 (!%p139_p2), %v1641_v1, %v521_v4 }
   0xb   : > { %1561 = vmatprep.subr.bf16.mxu0 (!%p139_p2), %v523_v5  ;;  %1628 = vmatprep.subr.bf16.mxu1 (!%p139_p2), %v523_v5 }
   0xc   : > { %1562 = vmatpush3.bf16.msra.mxu0 (!%p139_p2), %v523_v5  ;;  %1630 = vmatpush3.bf16.msra.mxu1 (!%p139_p2), %v523_v5 }
   0xd   : > { %s2003_s18 = smov (!%p163_p3, %s1324_s18), 1023 }
   0xe   : > { %s1325_s19 = sshll.u32 %s2003_s18, 2 }
   0xf   : > { %s1725_s22 = scalar_lea.vmem %s1998_s0, %s1325_s19  ;;  %s1809_s27 = scalar_lea.vmem %s2001_s3, %s1325_s19 }
  0x10   : > { %v1642_v6 = vld [vmem:[%s1725_s22] sm:$0xff]   ;;  %v1644_v8 = vld [vmem:[%s1725_s22 + $0x8] sm:$0xff]   ;;  %v1646_v10 = vld [vmem:[%s1725_s22 + $0x10] sm:$0xff]  }
  0x11   : > { %v1643_v7 = vld [vmem:[%s1725_s22 + $0x80] sm:$0xff]   ;;  %1563 = vmatprep.mubr.msk.bf16.mxu0 %vm421_vm2, %v1642_v6  ;;  %v1645_v9 = vld [vmem:[%s1725_s22 + $0x88] sm:$0xff]   ;;  %v1647_v11 = vld [vmem:[%s1725_s22 + $0x90] sm:$0xff]  }
  0x12   : > { %1595 = vmatprep.mubr.msk.bf16.mxu1 %vm421_vm2, %v1643_v7  ;;  %1564 = vmatmul.mubr.msk.bf16.vlgmr.msra.gmra.mrb[0].mxu0 %vm421_vm2, %v1644_v8  ;;  %v1648_v12 = vld [vmem:[%s1725_s22 + $0x18] sm:$0xff]   ;;  %v1650_v14 = vld [vmem:[%s1725_s22 + $0x20] sm:$0xff]   ;;  %v1652_v16 = vld [vmem:[%s1725_s22 + $0x28] sm:$0xff]  }
  0x13   : > { %1596 = vmatmul.mubr.msk.bf16.vlgmr.msra.gmra.mrb[0].mxu1 %vm421_vm2, %v1645_v9  ;;  %1567 = vmatprep.mubr.msk.bf16.mxu0 %vm421_vm2, %v1646_v10  ;;  %v1649_v13 = vld [vmem:[%s1725_s22 + $0x98] sm:$0xff]   ;;  %v1651_v15 = vld [vmem:[%s1725_s22 + $0xa0] sm:$0xff]   ;;  %v1653_v17 = vld [vmem:[%s1725_s22 + $0xa8] sm:$0xff]  }
  0x14   : > { %1599 = vmatprep.mubr.msk.bf16.mxu1 %vm421_vm2, %v1647_v11  ;;  %v1654_v18 = vld [vmem:[%s1725_s22 + $0x30] sm:$0xff]   ;;  %v1656_v20 = vld [vmem:[%s1725_s22 + $0x38] sm:$0xff]   ;;  %v1658_v22 = vld [vmem:[%s1725_s22 + $0x40] sm:$0xff]  }
  0x15   : > { %v1655_v19 = vld [vmem:[%s1725_s22 + $0xb0] sm:$0xff]   ;;  %v1657_v21 = vld [vmem:[%s1725_s22 + $0xb8] sm:$0xff]   ;;  %v1659_v23 = vld [vmem:[%s1725_s22 + $0xc0] sm:$0xff]  }
  0x16   : > { %v1660_v24 = vld [vmem:[%s1725_s22 + $0x48] sm:$0xff]   ;;  %v1662_v26 = vld [vmem:[%s1725_s22 + $0x50] sm:$0xff]   ;;  %v1664_v28 = vld [vmem:[%s1725_s22 + $0x58] sm:$0xff]  }
  0x17   : > { %v1661_v25 = vld [vmem:[%s1725_s22 + $0xc8] sm:$0xff]   ;;  %v1663_v27 = vld [vmem:[%s1725_s22 + $0xd0] sm:$0xff]   ;;  %v1665_v29 = vld [vmem:[%s1725_s22 + $0xd8] sm:$0xff]  }
  0x18   : > { %v1666_v30 = vld [vmem:[%s1725_s22 + $0x60] sm:$0xff]   ;;  %v1668_v32 = vld [vmem:[%s1725_s22 + $0x68] sm:$0xff]   ;;  %v1670_v34 = vld [vmem:[%s1725_s22 + $0x70] sm:$0xff]  }
  0x19   : > { %v1667_v31 = vld [vmem:[%s1725_s22 + $0xe0] sm:$0xff]   ;;  %v1669_v33 = vld [vmem:[%s1725_s22 + $0xe8] sm:$0xff]   ;;  %v1671_v35 = vld [vmem:[%s1725_s22 + $0xf0] sm:$0xff]  }
  0x1a   : > { %1568 = vmatmul.mubr.msk.bf16.gmra.mrb[4].mxu0 %vm421_vm2, %v1648_v12  ;;  %v1672_v36 = vld [vmem:[%s1725_s22 + $0x78] sm:$0xff]  }
  0x1b   : > { %1600 = vmatmul.mubr.msk.bf16.gmra.mrb[4].mxu1 %vm421_vm2, %v1649_v13  ;;  %1571 = vmatprep.mubr.msk.bf16.mxu0 %vm421_vm2, %v1650_v14  ;;  %v1673_v37 = vld [vmem:[%s1725_s22 + $0xf8] sm:$0xff]  }
  0x1c   : > { %1603 = vmatprep.mubr.msk.bf16.mxu1 %vm421_vm2, %v1651_v15 }
  0x22   : > { %1572 = vmatmul.mubr.msk.bf16.gmra.mrb[8].mxu0 %vm421_vm2, %v1652_v16 }
  0x23   : > { %1604 = vmatmul.mubr.msk.bf16.gmra.mrb[8].mxu1 %vm421_vm2, %v1653_v17  ;;  %1575 = vmatprep.mubr.msk.bf16.mxu0 %vm421_vm2, %v1654_v18 }
  0x24   : > { %1607 = vmatprep.mubr.msk.bf16.mxu1 %vm421_vm2, %v1655_v19 }
  0x2a   : > { %1576 = vmatmul.mubr.msk.bf16.gmra.mrb[12].mxu0 %vm421_vm2, %v1656_v20 }
  0x2b   : > { %1608 = vmatmul.mubr.msk.bf16.gmra.mrb[12].mxu1 %vm421_vm2, %v1657_v21  ;;  %1579 = vmatprep.mubr.msk.bf16.mxu0 %vm421_vm2, %v1658_v22 }
  0x2c   : > { %1611 = vmatprep.mubr.msk.bf16.mxu1 %vm421_vm2, %v1659_v23 }
  0x32   : > { %1580 = vmatmul.mubr.msk.bf16.gmra.mrb[16].mxu0 %vm421_vm2, %v1660_v24 }
  0x33   : > { %1612 = vmatmul.mubr.msk.bf16.gmra.mrb[16].mxu1 %vm421_vm2, %v1661_v25  ;;  %1583 = vmatprep.mubr.msk.bf16.mxu0 %vm421_vm2, %v1662_v26 }
  0x34   : > { %1615 = vmatprep.mubr.msk.bf16.mxu1 %vm421_vm2, %v1663_v27 }
  0x3a   : > { %1584 = vmatmul.mubr.msk.bf16.gmra.mrb[20].mxu0 %vm421_vm2, %v1664_v28 }
  0x3b   : > { %1616 = vmatmul.mubr.msk.bf16.gmra.mrb[20].mxu1 %vm421_vm2, %v1665_v29  ;;  %1587 = vmatprep.mubr.msk.bf16.mxu0 %vm421_vm2, %v1666_v30 }
  0x3c   : > { %1619 = vmatprep.mubr.msk.bf16.mxu1 %vm421_vm2, %v1667_v31 }
  0x42   : > { %1588 = vmatmul.mubr.msk.bf16.gmra.mrb[24].mxu0 %vm421_vm2, %v1668_v32 }
  0x43   : > { %1620 = vmatmul.mubr.msk.bf16.gmra.mrb[24].mxu1 %vm421_vm2, %v1669_v33  ;;  %1591 = vmatprep.mubr.msk.bf16.mxu0 %vm421_vm2, %v1670_v34 }
  0x44   : > { %1623 = vmatprep.mubr.msk.bf16.mxu1 %vm421_vm2, %v1671_v35 }
  0x4a   : > { %1592 = vmatmul.mubr.msk.bf16.gmra.mrb[28].mxu0 %vm421_vm2, %v1672_v36 }
  0x4b   : > { %1624 = vmatmul.mubr.msk.bf16.gmra.mrb[28].mxu1 %vm421_vm2, %v1673_v37 }
  0xe5   : > { %v1565_v39 = vpop.f32.mrb[0].mxu0 }
  0xe6   : > { %v568_v40 = vadd.f32 %v1565_v39, %v1794_v38  ;;  %v1597_v41 = vpop.f32.mrb[0].mxu1  ;;  %v559_v42 = vpop.f32.mrb[1].mxu0 }
  0xe7   : > { %v696_v43 = vadd.f32 %v1597_v41, %v1794_v38  ;;  %v560_v44 = vadd.f32 %v1794_v38, %v559_v42  ;;  %v687_v45 = vpop.f32.mrb[1].mxu1  ;;  %v1566_v46 = vpop.f32.mrb[2].mxu0 }
  0xe8   : > { %v816_v47 = vmul.f32 0.01, %v568_v40  ;;  %v688_v48 = vadd.f32 %v1794_v38, %v687_v45  ;;  %v571_v49 = vadd.f32 %v1566_v46, %v1794_v38  ;;  %v1598_v50 = vpop.f32.mrb[2].mxu1  ;;  %v562_v51 = vpop.f32.mrb[3].mxu0 }
  0xe9   : > { %v848_v52 = vmul.f32 0.01, %v696_v43  ;;  %v814_v53 = vmul.f32 0.01, %v560_v44  ;;  %v699_v54 = vadd.f32 %v1598_v50, %v1794_v38  ;;  %v563_v55 = vadd.f32 %v1794_v38, %v562_v51  ;;  %v690_v56 = vpop.f32.mrb[3].mxu1 }
  0xea   : > { %v880_v57 = vmax.f32 %v568_v40, %v816_v47  ;;  %v846_v58 = vmul.f32 0.01, %v688_v48  ;;  %v817_v59 = vmul.f32 0.01, %v571_v49  ;;  %v691_v60 = vadd.f32 %v1794_v38, %v690_v56 }
  0xeb   : > { %v912_v61 = vmax.f32 %v696_v43, %v848_v52  ;;  %v878_v62 = vmax.f32 %v560_v44, %v814_v53  ;;  %v849_v63 = vmul.f32 0.01, %v699_v54  ;;  %v815_v0 = vmul.f32 0.01, %v563_v55 }
  0xec   : > { %v1463_v1 = vpack.c.bf16 %v880_v57, %v880_v57  ;;  %v910_v2 = vmax.f32 %v688_v48, %v846_v58  ;;  %v881_v3 = vmax.f32 %v571_v49, %v817_v59  ;;  %v847_v4 = vmul.f32 0.01, %v691_v60 }
  0xed   : > { %v1495_v5 = vpack.c.bf16 %v912_v61, %v912_v61  ;;  %v1461_v6 = vpack.c.bf16 %v878_v62, %v878_v62  ;;  %v913_v7 = vmax.f32 %v699_v54, %v849_v63  ;;  %v879_v8 = vmax.f32 %v563_v55, %v815_v0  ;;  %v1569_v9 = vpop.f32.mrb[4].mxu0 }
  0xee   : > { %1201 = vst.msk [vmem:[%s1809_s27 + $0x8] sm:$0xf] %vm1198_vm3, %v1463_v1  ;;  %v1493_v10 = vpack.c.bf16 %v910_v2, %v910_v2  ;;  %v1464_v11 = vpack.c.bf16 %v881_v3, %v881_v3  ;;  %v911_v12 = vmax.f32 %v691_v60, %v847_v4  ;;  %v584_v13 = vadd.f32 %v1569_v9, %v1794_v38  ;;  %v1601_v14 = vpop.f32.mrb[4].mxu1  ;;  %v575_v15 = vpop.f32.mrb[5].mxu0 }
  0xef   : > { %1233 = vst.msk [vmem:[%s1809_s27 + $0x88] sm:$0xf] %vm1198_vm3, %v1495_v5  ;;  %1199 = vst.msk [vmem:[%s1809_s27] sm:$0xf] %vm1198_vm3, %v1461_v6  ;;  %v1496_v16 = vpack.c.bf16 %v913_v7, %v913_v7  ;;  %v1462_v17 = vpack.c.bf16 %v879_v8, %v879_v8  ;;  %v712_v18 = vadd.f32 %v1601_v14, %v1794_v38  ;;  %v703_v20 = vpop.f32.mrb[5].mxu1  ;;  %v1570_v21 = vpop.f32.mrb[6].mxu0 }
  0xf0   : > { %v576_v19 = vadd.f32 %v1794_v38, %v575_v15  ;;  %1231 = vst.msk [vmem:[%s1809_s27 + $0x80] sm:$0xf] %vm1198_vm3, %v1493_v10  ;;  %1202 = vst.msk [vmem:[%s1809_s27 + $0xc] sm:$0xf] %vm1198_vm3, %v1464_v11  ;;  %v1494_v22 = vpack.c.bf16 %v911_v12, %v911_v12  ;;  %v820_v23 = vmul.f32 0.01, %v584_v13  ;;  %v704_v24 = vadd.f32 %v1794_v38, %v703_v20 }
  0xf1   : > { %v587_v25 = vadd.f32 %v1570_v21, %v1794_v38  ;;  %v1602_v26 = vpop.f32.mrb[6].mxu1  ;;  %v578_v27 = vpop.f32.mrb[7].mxu0  ;;  %1234 = vst.msk [vmem:[%s1809_s27 + $0x8c] sm:$0xf] %vm1198_vm3, %v1496_v16  ;;  %1200 = vst.msk [vmem:[%s1809_s27 + $0x4] sm:$0xf] %vm1198_vm3, %v1462_v17 }
  0xf2   : > { %v852_v28 = vmul.f32 0.01, %v712_v18  ;;  %v818_v29 = vmul.f32 0.01, %v576_v19  ;;  %v715_v30 = vadd.f32 %v1602_v26, %v1794_v38  ;;  %v579_v31 = vadd.f32 %v1794_v38, %v578_v27  ;;  %v706_v32 = vpop.f32.mrb[7].mxu1 }
  0xf3   : > { %1232 = vst.msk [vmem:[%s1809_s27 + $0x84] sm:$0xf] %vm1198_vm3, %v1494_v22  ;;  %v884_v33 = vmax.f32 %v584_v13, %v820_v23  ;;  %v850_v34 = vmul.f32 0.01, %v704_v24  ;;  %v821_v35 = vmul.f32 0.01, %v587_v25  ;;  %v707_v36 = vadd.f32 %v1794_v38, %v706_v32 }
  0xf4   : > { %v916_v37 = vmax.f32 %v712_v18, %v852_v28  ;;  %v882_v39 = vmax.f32 %v576_v19, %v818_v29  ;;  %v853_v40 = vmul.f32 0.01, %v715_v30  ;;  %v819_v41 = vmul.f32 0.01, %v579_v31 }
  0xf5   : > { %v1467_v42 = vpack.c.bf16 %v884_v33, %v884_v33  ;;  %v914_v43 = vmax.f32 %v704_v24, %v850_v34  ;;  %v885_v44 = vmax.f32 %v587_v25, %v821_v35  ;;  %v851_v45 = vmul.f32 0.01, %v707_v36  ;;  %v1573_v50 = vpop.f32.mrb[8].mxu0 }
  0xf6   : > { %v1499_v46 = vpack.c.bf16 %v916_v37, %v916_v37  ;;  %v1465_v47 = vpack.c.bf16 %v882_v39, %v882_v39  ;;  %v917_v48 = vmax.f32 %v715_v30, %v853_v40  ;;  %v883_v49 = vmax.f32 %v579_v31, %v819_v41  ;;  %v1605_v55 = vpop.f32.mrb[8].mxu1  ;;  %v591_v56 = vpop.f32.mrb[9].mxu0 }
  0xf7   : > { %1205 = vst.msk [vmem:[%s1809_s27 + $0x18] sm:$0xf] %vm1198_vm3, %v1467_v42  ;;  %v1497_v51 = vpack.c.bf16 %v914_v43, %v914_v43  ;;  %v1468_v52 = vpack.c.bf16 %v885_v44, %v885_v44  ;;  %v915_v53 = vmax.f32 %v707_v36, %v851_v45  ;;  %v600_v54 = vadd.f32 %v1573_v50, %v1794_v38  ;;  %v719_v61 = vpop.f32.mrb[9].mxu1  ;;  %v1574_v62 = vpop.f32.mrb[10].mxu0 }
  0xf8   : > { %1237 = vst.msk [vmem:[%s1809_s27 + $0x98] sm:$0xf] %vm1198_vm3, %v1499_v46  ;;  %1203 = vst.msk [vmem:[%s1809_s27 + $0x10] sm:$0xf] %vm1198_vm3, %v1465_v47  ;;  %v1500_v57 = vpack.c.bf16 %v917_v48, %v917_v48  ;;  %v1466_v58 = vpack.c.bf16 %v883_v49, %v883_v49  ;;  %v728_v59 = vadd.f32 %v1605_v55, %v1794_v38  ;;  %v1606_v3 = vpop.f32.mrb[10].mxu1  ;;  %v594_v4 = vpop.f32.mrb[11].mxu0 }
  0xf9   : > { %v592_v60 = vadd.f32 %v1794_v38, %v591_v56  ;;  %1235 = vst.msk [vmem:[%s1809_s27 + $0x90] sm:$0xf] %vm1198_vm3, %v1497_v51  ;;  %1206 = vst.msk [vmem:[%s1809_s27 + $0x1c] sm:$0xf] %vm1198_vm3, %v1468_v52  ;;  %v1498_v63 = vpack.c.bf16 %v915_v53, %v915_v53  ;;  %v824_v0 = vmul.f32 0.01, %v600_v54  ;;  %v720_v1 = vadd.f32 %v1794_v38, %v719_v61 }
  0xfa   : > { %v603_v2 = vadd.f32 %v1574_v62, %v1794_v38  ;;  %1238 = vst.msk [vmem:[%s1809_s27 + $0x9c] sm:$0xf] %vm1198_vm3, %v1500_v57  ;;  %1204 = vst.msk [vmem:[%s1809_s27 + $0x14] sm:$0xf] %vm1198_vm3, %v1466_v58  ;;  %v856_v5 = vmul.f32 0.01, %v728_v59  ;;  %v731_v7 = vadd.f32 %v1606_v3, %v1794_v38  ;;  %v595_v8 = vadd.f32 %v1794_v38, %v594_v4 }
  0xfb   : > { %v822_v6 = vmul.f32 0.01, %v592_v60  ;;  %v722_v9 = vpop.f32.mrb[11].mxu1  ;;  %1236 = vst.msk [vmem:[%s1809_s27 + $0x94] sm:$0xf] %vm1198_vm3, %v1498_v63  ;;  %v888_v10 = vmax.f32 %v600_v54, %v824_v0 }
  0xfc   : > { %v854_v11 = vmul.f32 0.01, %v720_v1  ;;  %v825_v12 = vmul.f32 0.01, %v603_v2  ;;  %v723_v13 = vadd.f32 %v1794_v38, %v722_v9  ;;  %v920_v14 = vmax.f32 %v728_v59, %v856_v5 }
  0xfd   : > { %v886_v15 = vmax.f32 %v592_v60, %v822_v6  ;;  %v857_v16 = vmul.f32 0.01, %v731_v7  ;;  %v823_v17 = vmul.f32 0.01, %v595_v8  ;;  %v1471_v18 = vpack.c.bf16 %v888_v10, %v888_v10  ;;  %v1577_v26 = vpop.f32.mrb[12].mxu0 }
  0xfe   : > { %v918_v19 = vmax.f32 %v720_v1, %v854_v11  ;;  %v889_v20 = vmax.f32 %v603_v2, %v825_v12  ;;  %v855_v21 = vmul.f32 0.01, %v723_v13  ;;  %v1503_v22 = vpack.c.bf16 %v920_v14, %v920_v14  ;;  %v1609_v31 = vpop.f32.mrb[12].mxu1  ;;  %v607_v32 = vpop.f32.mrb[13].mxu0 }
  0xff   : > { %v1469_v23 = vpack.c.bf16 %v886_v15, %v886_v15  ;;  %v921_v24 = vmax.f32 %v731_v7, %v857_v16  ;;  %v887_v25 = vmax.f32 %v595_v8, %v823_v17  ;;  %1209 = vst.msk [vmem:[%s1809_s27 + $0x28] sm:$0xf] %vm1198_vm3, %v1471_v18  ;;  %v616_v30 = vadd.f32 %v1577_v26, %v1794_v38  ;;  %v735_v37 = vpop.f32.mrb[13].mxu1  ;;  %v1578_v39 = vpop.f32.mrb[14].mxu0 }
 0x100   : > { %v1501_v27 = vpack.c.bf16 %v918_v19, %v918_v19  ;;  %v1472_v28 = vpack.c.bf16 %v889_v20, %v889_v20  ;;  %v919_v29 = vmax.f32 %v723_v13, %v855_v21  ;;  %1241 = vst.msk [vmem:[%s1809_s27 + $0xa8] sm:$0xf] %vm1198_vm3, %v1503_v22  ;;  %v744_v35 = vadd.f32 %v1609_v31, %v1794_v38  ;;  %v1610_v44 = vpop.f32.mrb[14].mxu1  ;;  %v610_v45 = vpop.f32.mrb[15].mxu0 }
 0x101   : > { %1207 = vst.msk [vmem:[%s1809_s27 + $0x20] sm:$0xf] %vm1198_vm3, %v1469_v23  ;;  %v1504_v33 = vpack.c.bf16 %v921_v24, %v921_v24  ;;  %v1470_v34 = vpack.c.bf16 %v887_v25, %v887_v25  ;;  %v608_v36 = vadd.f32 %v1794_v38, %v607_v32  ;;  %v828_v41 = vmul.f32 0.01, %v616_v30  ;;  %v738_v50 = vpop.f32.mrb[15].mxu1 }
 0x102   : > { %1239 = vst.msk [vmem:[%s1809_s27 + $0xa0] sm:$0xf] %vm1198_vm3, %v1501_v27  ;;  %1210 = vst.msk [vmem:[%s1809_s27 + $0x2c] sm:$0xf] %vm1198_vm3, %v1472_v28  ;;  %v1502_v40 = vpack.c.bf16 %v919_v29, %v919_v29  ;;  %v736_v42 = vadd.f32 %v1794_v38, %v735_v37  ;;  %v619_v43 = vadd.f32 %v1578_v39, %v1794_v38  ;;  %v860_v46 = vmul.f32 0.01, %v744_v35 }
 0x103   : > { %1242 = vst.msk [vmem:[%s1809_s27 + $0xac] sm:$0xf] %vm1198_vm3, %v1504_v33  ;;  %1208 = vst.msk [vmem:[%s1809_s27 + $0x24] sm:$0xf] %vm1198_vm3, %v1470_v34  ;;  %v826_v47 = vmul.f32 0.01, %v608_v36  ;;  %v747_v48 = vadd.f32 %v1610_v44, %v1794_v38  ;;  %v611_v49 = vadd.f32 %v1794_v38, %v610_v45  ;;  %v892_v51 = vmax.f32 %v616_v30, %v828_v41 }
 0x104   : > { %1240 = vst.msk [vmem:[%s1809_s27 + $0xa4] sm:$0xf] %vm1198_vm3, %v1502_v40  ;;  %v858_v52 = vmul.f32 0.01, %v736_v42  ;;  %v829_v53 = vmul.f32 0.01, %v619_v43  ;;  %v739_v54 = vadd.f32 %v1794_v38, %v738_v50  ;;  %v924_v55 = vmax.f32 %v744_v35, %v860_v46 }
 0x105   : > { %v890_v56 = vmax.f32 %v608_v36, %v826_v47  ;;  %v861_v57 = vmul.f32 0.01, %v747_v48  ;;  %v827_v58 = vmul.f32 0.01, %v611_v49  ;;  %v1475_v59 = vpack.c.bf16 %v892_v51, %v892_v51  ;;  %v1581_v3 = vpop.f32.mrb[16].mxu0 }
 0x106   : > { %v922_v60 = vmax.f32 %v736_v42, %v858_v52  ;;  %v893_v61 = vmax.f32 %v619_v43, %v829_v53  ;;  %v859_v62 = vmul.f32 0.01, %v739_v54  ;;  %v1507_v63 = vpack.c.bf16 %v924_v55, %v924_v55  ;;  %v1613_v8 = vpop.f32.mrb[16].mxu1  ;;  %v623_v9 = vpop.f32.mrb[17].mxu0 }
 0x107   : > { %v1473_v0 = vpack.c.bf16 %v890_v56, %v890_v56  ;;  %v925_v1 = vmax.f32 %v747_v48, %v861_v57  ;;  %v891_v2 = vmax.f32 %v611_v49, %v827_v58  ;;  %1213 = vst.msk [vmem:[%s1809_s27 + $0x38] sm:$0xf] %vm1198_vm3, %v1475_v59  ;;  %v632_v7 = vadd.f32 %v1581_v3, %v1794_v38  ;;  %v751_v14 = vpop.f32.mrb[17].mxu1  ;;  %v1582_v15 = vpop.f32.mrb[18].mxu0 }
 0x108   : > { %v1505_v4 = vpack.c.bf16 %v922_v60, %v922_v60  ;;  %v1476_v5 = vpack.c.bf16 %v893_v61, %v893_v61  ;;  %v923_v6 = vmax.f32 %v739_v54, %v859_v62  ;;  %1245 = vst.msk [vmem:[%s1809_s27 + $0xb8] sm:$0xf] %vm1198_vm3, %v1507_v63  ;;  %v760_v12 = vadd.f32 %v1613_v8, %v1794_v38  ;;  %v1614_v20 = vpop.f32.mrb[18].mxu1  ;;  %v626_v21 = vpop.f32.mrb[19].mxu0 }
 0x109   : > { %1211 = vst.msk [vmem:[%s1809_s27 + $0x30] sm:$0xf] %vm1198_vm3, %v1473_v0  ;;  %v1508_v10 = vpack.c.bf16 %v925_v1, %v925_v1  ;;  %v1474_v11 = vpack.c.bf16 %v891_v2, %v891_v2  ;;  %v624_v13 = vadd.f32 %v1794_v38, %v623_v9  ;;  %v832_v17 = vmul.f32 0.01, %v632_v7  ;;  %v754_v26 = vpop.f32.mrb[19].mxu1 }
 0x10a   : > { %1243 = vst.msk [vmem:[%s1809_s27 + $0xb0] sm:$0xf] %vm1198_vm3, %v1505_v4  ;;  %1214 = vst.msk [vmem:[%s1809_s27 + $0x3c] sm:$0xf] %vm1198_vm3, %v1476_v5  ;;  %v1506_v16 = vpack.c.bf16 %v923_v6, %v923_v6  ;;  %v752_v18 = vadd.f32 %v1794_v38, %v751_v14  ;;  %v635_v19 = vadd.f32 %v1582_v15, %v1794_v38  ;;  %v864_v22 = vmul.f32 0.01, %v760_v12 }
 0x10b   : > { %1246 = vst.msk [vmem:[%s1809_s27 + $0xbc] sm:$0xf] %vm1198_vm3, %v1508_v10  ;;  %1212 = vst.msk [vmem:[%s1809_s27 + $0x34] sm:$0xf] %vm1198_vm3, %v1474_v11  ;;  %v830_v23 = vmul.f32 0.01, %v624_v13  ;;  %v763_v24 = vadd.f32 %v1614_v20, %v1794_v38  ;;  %v627_v25 = vadd.f32 %v1794_v38, %v626_v21  ;;  %v896_v27 = vmax.f32 %v632_v7, %v832_v17 }
 0x10c   : > { %1244 = vst.msk [vmem:[%s1809_s27 + $0xb4] sm:$0xf] %vm1198_vm3, %v1506_v16  ;;  %v862_v28 = vmul.f32 0.01, %v752_v18  ;;  %v833_v29 = vmul.f32 0.01, %v635_v19  ;;  %v755_v30 = vadd.f32 %v1794_v38, %v754_v26  ;;  %v928_v31 = vmax.f32 %v760_v12, %v864_v22 }
 0x10d   : > { %v894_v32 = vmax.f32 %v624_v13, %v830_v23  ;;  %v865_v33 = vmul.f32 0.01, %v763_v24  ;;  %v831_v34 = vmul.f32 0.01, %v627_v25  ;;  %v1479_v35 = vpack.c.bf16 %v896_v27, %v896_v27  ;;  %v1585_v44 = vpop.f32.mrb[20].mxu0 }
 0x10e   : > { %v926_v36 = vmax.f32 %v752_v18, %v862_v28  ;;  %v897_v37 = vmax.f32 %v635_v19, %v833_v29  ;;  %v863_v39 = vmul.f32 0.01, %v755_v30  ;;  %v1511_v40 = vpack.c.bf16 %v928_v31, %v928_v31  ;;  %v1617_v49 = vpop.f32.mrb[20].mxu1  ;;  %v639_v50 = vpop.f32.mrb[21].mxu0 }
 0x10f   : > { %v1477_v41 = vpack.c.bf16 %v894_v32, %v894_v32  ;;  %v929_v42 = vmax.f32 %v763_v24, %v865_v33  ;;  %v895_v43 = vmax.f32 %v627_v25, %v831_v34  ;;  %1217 = vst.msk [vmem:[%s1809_s27 + $0x48] sm:$0xf] %vm1198_vm3, %v1479_v35  ;;  %v648_v48 = vadd.f32 %v1585_v44, %v1794_v38  ;;  %v767_v55 = vpop.f32.mrb[21].mxu1  ;;  %v1586_v56 = vpop.f32.mrb[22].mxu0 }
 0x110   : > { %v1509_v45 = vpack.c.bf16 %v926_v36, %v926_v36  ;;  %v1480_v46 = vpack.c.bf16 %v897_v37, %v897_v37  ;;  %v927_v47 = vmax.f32 %v755_v30, %v863_v39  ;;  %1249 = vst.msk [vmem:[%s1809_s27 + $0xc8] sm:$0xf] %vm1198_vm3, %v1511_v40  ;;  %v776_v53 = vadd.f32 %v1617_v49, %v1794_v38  ;;  %v1618_v61 = vpop.f32.mrb[22].mxu1  ;;  %v642_v62 = vpop.f32.mrb[23].mxu0 }
 0x111   : > { %1215 = vst.msk [vmem:[%s1809_s27 + $0x40] sm:$0xf] %vm1198_vm3, %v1477_v41  ;;  %v1512_v51 = vpack.c.bf16 %v929_v42, %v929_v42  ;;  %v1478_v52 = vpack.c.bf16 %v895_v43, %v895_v43  ;;  %v640_v54 = vadd.f32 %v1794_v38, %v639_v50  ;;  %v836_v58 = vmul.f32 0.01, %v648_v48  ;;  %v770_v3 = vpop.f32.mrb[23].mxu1 }
 0x112   : > { %1247 = vst.msk [vmem:[%s1809_s27 + $0xc0] sm:$0xf] %vm1198_vm3, %v1509_v45  ;;  %1218 = vst.msk [vmem:[%s1809_s27 + $0x4c] sm:$0xf] %vm1198_vm3, %v1480_v46  ;;  %v1510_v57 = vpack.c.bf16 %v927_v47, %v927_v47  ;;  %v768_v59 = vadd.f32 %v1794_v38, %v767_v55  ;;  %v651_v60 = vadd.f32 %v1586_v56, %v1794_v38  ;;  %v868_v63 = vmul.f32 0.01, %v776_v53 }
 0x113   : > { %1250 = vst.msk [vmem:[%s1809_s27 + $0xcc] sm:$0xf] %vm1198_vm3, %v1512_v51  ;;  %1216 = vst.msk [vmem:[%s1809_s27 + $0x44] sm:$0xf] %vm1198_vm3, %v1478_v52  ;;  %v834_v0 = vmul.f32 0.01, %v640_v54  ;;  %v779_v1 = vadd.f32 %v1618_v61, %v1794_v38  ;;  %v643_v2 = vadd.f32 %v1794_v38, %v642_v62  ;;  %v900_v4 = vmax.f32 %v648_v48, %v836_v58 }
 0x114   : > { %1248 = vst.msk [vmem:[%s1809_s27 + $0xc4] sm:$0xf] %vm1198_vm3, %v1510_v57  ;;  %v866_v5 = vmul.f32 0.01, %v768_v59  ;;  %v837_v6 = vmul.f32 0.01, %v651_v60  ;;  %v771_v7 = vadd.f32 %v1794_v38, %v770_v3  ;;  %v932_v8 = vmax.f32 %v776_v53, %v868_v63 }
 0x115   : > { %v898_v9 = vmax.f32 %v640_v54, %v834_v0  ;;  %v869_v10 = vmul.f32 0.01, %v779_v1  ;;  %v835_v11 = vmul.f32 0.01, %v643_v2  ;;  %v1483_v12 = vpack.c.bf16 %v900_v4, %v900_v4  ;;  %v1589_v20 = vpop.f32.mrb[24].mxu0 }
 0x116   : > { %v930_v13 = vmax.f32 %v768_v59, %v866_v5  ;;  %v901_v14 = vmax.f32 %v651_v60, %v837_v6  ;;  %v867_v15 = vmul.f32 0.01, %v771_v7  ;;  %v1515_v16 = vpack.c.bf16 %v932_v8, %v932_v8  ;;  %v1621_v25 = vpop.f32.mrb[24].mxu1  ;;  %v655_v26 = vpop.f32.mrb[25].mxu0 }
 0x117   : > { %v1481_v17 = vpack.c.bf16 %v898_v9, %v898_v9  ;;  %v933_v18 = vmax.f32 %v779_v1, %v869_v10  ;;  %v899_v19 = vmax.f32 %v643_v2, %v835_v11  ;;  %1221 = vst.msk [vmem:[%s1809_s27 + $0x58] sm:$0xf] %vm1198_vm3, %v1483_v12  ;;  %v664_v24 = vadd.f32 %v1589_v20, %v1794_v38  ;;  %v783_v31 = vpop.f32.mrb[25].mxu1  ;;  %v1590_v32 = vpop.f32.mrb[26].mxu0 }
 0x118   : > { %v1513_v21 = vpack.c.bf16 %v930_v13, %v930_v13  ;;  %v1484_v22 = vpack.c.bf16 %v901_v14, %v901_v14  ;;  %v931_v23 = vmax.f32 %v771_v7, %v867_v15  ;;  %1253 = vst.msk [vmem:[%s1809_s27 + $0xd8] sm:$0xf] %vm1198_vm3, %v1515_v16  ;;  %v792_v29 = vadd.f32 %v1621_v25, %v1794_v38  ;;  %v1622_v37 = vpop.f32.mrb[26].mxu1  ;;  %v658_v39 = vpop.f32.mrb[27].mxu0 }
 0x119   : > { %1219 = vst.msk [vmem:[%s1809_s27 + $0x50] sm:$0xf] %vm1198_vm3, %v1481_v17  ;;  %v1516_v27 = vpack.c.bf16 %v933_v18, %v933_v18  ;;  %v1482_v28 = vpack.c.bf16 %v899_v19, %v899_v19  ;;  %v656_v30 = vadd.f32 %v1794_v38, %v655_v26  ;;  %v840_v34 = vmul.f32 0.01, %v664_v24  ;;  %v786_v44 = vpop.f32.mrb[27].mxu1 }
 0x11a   : > { %1251 = vst.msk [vmem:[%s1809_s27 + $0xd0] sm:$0xf] %vm1198_vm3, %v1513_v21  ;;  %1222 = vst.msk [vmem:[%s1809_s27 + $0x5c] sm:$0xf] %vm1198_vm3, %v1484_v22  ;;  %v1514_v33 = vpack.c.bf16 %v931_v23, %v931_v23  ;;  %v784_v35 = vadd.f32 %v1794_v38, %v783_v31  ;;  %v667_v36 = vadd.f32 %v1590_v32, %v1794_v38  ;;  %v872_v40 = vmul.f32 0.01, %v792_v29 }
 0x11b   : > { %1254 = vst.msk [vmem:[%s1809_s27 + $0xdc] sm:$0xf] %vm1198_vm3, %v1516_v27  ;;  %1220 = vst.msk [vmem:[%s1809_s27 + $0x54] sm:$0xf] %vm1198_vm3, %v1482_v28  ;;  %v838_v41 = vmul.f32 0.01, %v656_v30  ;;  %v795_v42 = vadd.f32 %v1622_v37, %v1794_v38  ;;  %v659_v43 = vadd.f32 %v1794_v38, %v658_v39  ;;  %v904_v45 = vmax.f32 %v664_v24, %v840_v34 }
 0x11c   : > { %1252 = vst.msk [vmem:[%s1809_s27 + $0xd4] sm:$0xf] %vm1198_vm3, %v1514_v33  ;;  %v870_v46 = vmul.f32 0.01, %v784_v35  ;;  %v841_v47 = vmul.f32 0.01, %v667_v36  ;;  %v787_v48 = vadd.f32 %v1794_v38, %v786_v44  ;;  %v936_v49 = vmax.f32 %v792_v29, %v872_v40 }
 0x11d   : > { %v902_v50 = vmax.f32 %v656_v30, %v838_v41  ;;  %v873_v51 = vmul.f32 0.01, %v795_v42  ;;  %v839_v52 = vmul.f32 0.01, %v659_v43  ;;  %v1487_v53 = vpack.c.bf16 %v904_v45, %v904_v45  ;;  %v1593_v61 = vpop.f32.mrb[28].mxu0 }
 0x11e   : > { %v934_v54 = vmax.f32 %v784_v35, %v870_v46  ;;  %v905_v55 = vmax.f32 %v667_v36, %v841_v47  ;;  %v871_v56 = vmul.f32 0.01, %v787_v48  ;;  %v1519_v57 = vpack.c.bf16 %v936_v49, %v936_v49  ;;  %v1625_v2 = vpop.f32.mrb[28].mxu1  ;;  %v671_v3 = vpop.f32.mrb[29].mxu0 }
 0x11f   : > { %v1485_v58 = vpack.c.bf16 %v902_v50, %v902_v50  ;;  %v937_v59 = vmax.f32 %v795_v42, %v873_v51  ;;  %v903_v60 = vmax.f32 %v659_v43, %v839_v52  ;;  %1225 = vst.msk [vmem:[%s1809_s27 + $0x68] sm:$0xf] %vm1198_vm3, %v1487_v53  ;;  %v680_v1 = vadd.f32 %v1593_v61, %v1794_v38  ;;  %v799_v8 = vpop.f32.mrb[29].mxu1  ;;  %v1594_v9 = vpop.f32.mrb[30].mxu0 }
 0x120   : > { %v1517_v62 = vpack.c.bf16 %v934_v54, %v934_v54  ;;  %v1488_v63 = vpack.c.bf16 %v905_v55, %v905_v55  ;;  %v935_v0 = vmax.f32 %v787_v48, %v871_v56  ;;  %1257 = vst.msk [vmem:[%s1809_s27 + $0xe8] sm:$0xf] %vm1198_vm3, %v1519_v57  ;;  %v808_v6 = vadd.f32 %v1625_v2, %v1794_v38  ;;  %v1626_v14 = vpop.f32.mrb[30].mxu1  ;;  %v674_v15 = vpop.f32.mrb[31].mxu0 }
 0x121   : > { %1223 = vst.msk [vmem:[%s1809_s27 + $0x60] sm:$0xf] %vm1198_vm3, %v1485_v58  ;;  %v1520_v4 = vpack.c.bf16 %v937_v59, %v937_v59  ;;  %v1486_v5 = vpack.c.bf16 %v903_v60, %v903_v60  ;;  %v672_v7 = vadd.f32 %v1794_v38, %v671_v3  ;;  %v844_v11 = vmul.f32 0.01, %v680_v1  ;;  %v802_v20 = vpop.f32.mrb[31].mxu1 }
 0x122   : > { %1255 = vst.msk [vmem:[%s1809_s27 + $0xe0] sm:$0xf] %vm1198_vm3, %v1517_v62  ;;  %1226 = vst.msk [vmem:[%s1809_s27 + $0x6c] sm:$0xf] %vm1198_vm3, %v1488_v63  ;;  %v1518_v10 = vpack.c.bf16 %v935_v0, %v935_v0  ;;  %v800_v12 = vadd.f32 %v1794_v38, %v799_v8  ;;  %v683_v13 = vadd.f32 %v1594_v9, %v1794_v38  ;;  %v876_v16 = vmul.f32 0.01, %v808_v6 }
 0x123   : > { %1258 = vst.msk [vmem:[%s1809_s27 + $0xec] sm:$0xf] %vm1198_vm3, %v1520_v4  ;;  %1224 = vst.msk [vmem:[%s1809_s27 + $0x64] sm:$0xf] %vm1198_vm3, %v1486_v5  ;;  %v842_v17 = vmul.f32 0.01, %v672_v7  ;;  %v811_v18 = vadd.f32 %v1626_v14, %v1794_v38  ;;  %v675_v19 = vadd.f32 %v1794_v38, %v674_v15  ;;  %v908_v21 = vmax.f32 %v680_v1, %v844_v11 }
 0x124   : > { %1256 = vst.msk [vmem:[%s1809_s27 + $0xe4] sm:$0xf] %vm1198_vm3, %v1518_v10  ;;  %v874_v22 = vmul.f32 0.01, %v800_v12  ;;  %v845_v23 = vmul.f32 0.01, %v683_v13  ;;  %v803_v24 = vadd.f32 %v1794_v38, %v802_v20  ;;  %v940_v25 = vmax.f32 %v808_v6, %v876_v16 }
 0x125   : > { %v906_v26 = vmax.f32 %v672_v7, %v842_v17  ;;  %v877_v27 = vmul.f32 0.01, %v811_v18  ;;  %v843_v28 = vmul.f32 0.01, %v675_v19  ;;  %v1491_v29 = vpack.c.bf16 %v908_v21, %v908_v21 }
 0x126   : > { %v938_v30 = vmax.f32 %v800_v12, %v874_v22  ;;  %v909_v31 = vmax.f32 %v683_v13, %v845_v23  ;;  %v875_v32 = vmul.f32 0.01, %v803_v24  ;;  %v1523_v33 = vpack.c.bf16 %v940_v25, %v940_v25 }
 0x127   : > { %v1489_v34 = vpack.c.bf16 %v906_v26, %v906_v26  ;;  %v941_v35 = vmax.f32 %v811_v18, %v877_v27  ;;  %v907_v36 = vmax.f32 %v675_v19, %v843_v28  ;;  %1229 = vst.msk [vmem:[%s1809_s27 + $0x78] sm:$0xf] %vm1198_vm3, %v1491_v29 }
 0x128   : > { %v1521_v38 = vpack.c.bf16 %v938_v30, %v938_v30  ;;  %v1492_v37 = vpack.c.bf16 %v909_v31, %v909_v31  ;;  %v939_v39 = vmax.f32 %v803_v24, %v875_v32  ;;  %1261 = vst.msk [vmem:[%s1809_s27 + $0xf8] sm:$0xf] %vm1198_vm3, %v1523_v33 }
 0x129   : > { %1227 = vst.msk [vmem:[%s1809_s27 + $0x70] sm:$0xf] %vm1198_vm3, %v1489_v34  ;;  %v1524_v40 = vpack.c.bf16 %v941_v35, %v941_v35  ;;  %v1490_v41 = vpack.c.bf16 %v907_v36, %v907_v36 }
 0x12a   : > { %1259 = vst.msk [vmem:[%s1809_s27 + $0xf0] sm:$0xf] %vm1198_vm3, %v1521_v38  ;;  %1230 = vst.msk [vmem:[%s1809_s27 + $0x7c] sm:$0xf] %vm1198_vm3, %v1492_v37  ;;  %v1522_v42 = vpack.c.bf16 %v939_v39, %v939_v39 }
 0x12b   : > { %1262 = vst.msk [vmem:[%s1809_s27 + $0xfc] sm:$0xf] %vm1198_vm3, %v1524_v40  ;;  %1228 = vst.msk [vmem:[%s1809_s27 + $0x74] sm:$0xf] %vm1198_vm3, %v1490_v41 }
 0x12c   : > { %1260 = vst.msk [vmem:[%s1809_s27 + $0xf4] sm:$0xf] %vm1198_vm3, %v1522_v42 }
 0x12d PF: > { %s13_s12 = sadd.s32 1, %s1680_s12  }
 0x12e   : > { %p10_p4 = scmp.ge.s32.totalorder %s13_s12, 18  }
 0x130   :  { %12 = sbr.rel (!%p10_p4) target bundleno = 1 (0x1), region = 62 }

// kernel: appearance_autoencoder_forward.11
= control target key start
LH: loop header
LB: loop body
LE: loop exit
PB: predicated region body
PF: predicated region fallthrough
CT: control target
= control target key end

     0   :  { %s1908_s12 = smov 0   ;;  %s2253_s0 = inlined_call_operand.vmem [shape: bf16[2048,144], index: 0, kind: input, shape index: {}]   ;;  %s2254_s1 = inlined_call_operand.vmem [shape: bf16[144,32], index: 1, kind: input, shape index: {}]   ;;  %s2255_s2 = inlined_call_operand.vmem [shape: f32[1,32], index: 2, kind: input, shape index: {}]   ;;  %s2256_s3 = inlined_call_operand.vmem [shape: bf16[2048,32], index: 3, kind: output, shape index: {}]  }
   0x1 LB: > { %s1500_s13 = sadd.s32 4294967295, %s1885_s12   ;;  %p1504_p0 = scmp.ge.s32.totalorder %s1885_s12, 1  ;;  %s1885_s12 = sphi %s1908_s12, %s13_s12  }
   0x2   : > { %p139_p1 = scmp.lt.s32.totalorder %s1885_s12, 5 }
   0x4   : > { %p140_p2 = pnand %p1504_p0, %p139_p1 }
   0x5   : > { %v1774_v0 = vld [vmem:[%s2254_s1] sm:$0xff] (!%p140_p2)   ;;  %v1887_v1 = vmov (!%p140_p2), 0   ;;  %s1505_s16 = sshll.u32 (!%p140_p2), %s1500_s13, 6  ;;  %v1775_v2 = vld [vmem:[%s2254_s1 + $0x8] sm:$0xff] (!%p140_p2)   ;;  %v1776_v3 = vld [vmem:[%s2254_s1 + $0x10] sm:$0xff] (!%p140_p2)   ;;  %vm609_vm0 = vcmask (!%p140_p2), 130048  }
   0x6   : > { %143 = sbr.rel (%p140_p2) target bundleno = 385 (0x181), region = 32  ;;  %706 = vmatprep.subr.bf16.mxu0 (!%p140_p2), %v1887_v1  ;;  %1747 = vmatprep.subr.bf16.mxu1 (!%p140_p2), %v1887_v1  ;;  %p165_p3 = scmp.lt.s32.totalorder (!%p140_p2), %s1505_s16, 255  ;;  %v1777_v4 = vld [vmem:[%s2254_s1 + $0x18] sm:$0xff] (!%p140_p2)   ;;  %v1778_v7 = vld [vmem:[%s2254_s1 + $0x20] sm:$0xff] (!%p140_p2)   ;;  %v1779_v8 = vld [vmem:[%s2254_s1 + $0x28] sm:$0xff] (!%p140_p2)   ;;  %vm1379_vm1 = vcmask (!%p140_p2), 257024  }
   0x7   : > { %707 = vmatpush1.bf16.msra.mxu0 (!%p140_p2), %v1774_v0  ;;  %1756 = vmatpush1.bf16.msra.mxu1 (!%p140_p2), %v1774_v0  ;;  %v1780_v9 = vld [vmem:[%s2254_s1 + $0x30] sm:$0xff] (!%p140_p2)   ;;  %v1781_v10 = vld [vmem:[%s2254_s1 + $0x38] sm:$0xff] (!%p140_p2)   ;;  %v1782_v11 = vld [vmem:[%s2254_s1 + $0x40] sm:$0xff] (!%p140_p2)  }
   0x8   : > { %708 = vmatprep.subr.bf16.mxu0 (!%p140_p2), %v1887_v1  ;;  %1748 = vmatprep.subr.bf16.mxu1 (!%p140_p2), %v1887_v1 }
   0xb   : > { %709 = vmatpush1.bf16.msra.mxu0 (!%p140_p2), %v1775_v2  ;;  %1757 = vmatpush1.bf16.msra.mxu1 (!%p140_p2), %v1775_v2 }
   0xc   : > { %710 = vmatprep.subr.bf16.mxu0 (!%p140_p2), %v1887_v1  ;;  %1749 = vmatprep.subr.bf16.mxu1 (!%p140_p2), %v1887_v1 }
   0xd   : > { %s2258_s16 = smov (!%p165_p3, %s1505_s16), 255 }
   0xe   : > { %s1682_s21 = sshll.u32 %s2258_s16, 3  ;;  %s1509_s13 = sshll.u32 %s2258_s16, 2 }
   0xf   : > { %s1931_s24 = scalar_lea.vmem %s2253_s0, %s1682_s21  ;;  %711 = vmatpush1.bf16.msra.mxu0 %v1776_v3  ;;  %1758 = vmatpush1.bf16.msra.mxu1 %v1776_v3  ;;  %s2060_s17 = scalar_lea.vmem %s2256_s3, %s1509_s13 }
  0x10   : > { %v1785_v5 = vld [vmem:[%s1931_s24 + $0x4] ss:$8 sps:$4 sm:$0xff]   ;;  %712 = vmatprep.subr.bf16.mxu0 %v1887_v1  ;;  %1750 = vmatprep.subr.bf16.mxu1 %v1887_v1  ;;  %v1783_v12 = vld [vmem:[%s1931_s24] ss:$8 sps:$4 sm:$0xff]   ;;  %v1789_v14 = vld [vmem:[%s1931_s24 + $0x14] ss:$8 sps:$4 sm:$0xff]  }
  0x11   : > { %v1788_v6 = vld [vmem:[%s1931_s24 + $0x104] ss:$8 sps:$4 sm:$0xff]   ;;  %1584 = vmatprep.mubr.msk.bf16.mxu0 %vm609_vm0, %v1785_v5  ;;  %v1786_v13 = vld [vmem:[%s1931_s24 + $0x100] ss:$8 sps:$4 sm:$0xff]   ;;  %v1791_v15 = vld [vmem:[%s1931_s24 + $0x114] ss:$8 sps:$4 sm:$0xff]  }
  0x12   : > { %1600 = vmatprep.mubr.msk.bf16.mxu1 %vm609_vm0, %v1788_v6  ;;  %v1793_v16 = vld [vmem:[%s1931_s24 + $0x10] ss:$8 sps:$4 sm:$0xff]   ;;  %v1795_v18 = vld [vmem:[%s1931_s24 + $0x24] ss:$8 sps:$4 sm:$0xff]   ;;  %v1799_v20 = vld [vmem:[%s1931_s24 + $0x20] ss:$8 sps:$4 sm:$0xff]  }
  0x13   : > { %713 = vmatpush1.bf16.msra.mxu0 %v1777_v4  ;;  %1759 = vmatpush1.bf16.msra.mxu1 %v1777_v4  ;;  %v1794_v17 = vld [vmem:[%s1931_s24 + $0x110] ss:$8 sps:$4 sm:$0xff]   ;;  %v1797_v19 = vld [vmem:[%s1931_s24 + $0x124] ss:$8 sps:$4 sm:$0xff]   ;;  %v1800_v21 = vld [vmem:[%s1931_s24 + $0x120] ss:$8 sps:$4 sm:$0xff]  }
  0x14   : > { %714 = vmatprep.subr.bf16.mxu0 %v1887_v1  ;;  %1751 = vmatprep.subr.bf16.mxu1 %v1887_v1  ;;  %v1801_v22 = vld [vmem:[%s1931_s24 + $0x34] ss:$8 sps:$4 sm:$0xff]   ;;  %v1805_v24 = vld [vmem:[%s1931_s24 + $0x30] ss:$8 sps:$4 sm:$0xff]   ;;  %v1807_v26 = vld [vmem:[%s1931_s24 + $0x44] ss:$8 sps:$4 sm:$0xff]  }
  0x15   : > { %v1803_v23 = vld [vmem:[%s1931_s24 + $0x134] ss:$8 sps:$4 sm:$0xff]   ;;  %v1806_v25 = vld [vmem:[%s1931_s24 + $0x130] ss:$8 sps:$4 sm:$0xff]   ;;  %v1809_v27 = vld [vmem:[%s1931_s24 + $0x144] ss:$8 sps:$4 sm:$0xff]  }
  0x16   : > { %v1811_v28 = vld [vmem:[%s1931_s24 + $0x40] ss:$8 sps:$4 sm:$0xff]   ;;  %v1813_v30 = vld [vmem:[%s1931_s24 + $0x54] ss:$8 sps:$4 sm:$0xff]   ;;  %v1817_v32 = vld [vmem:[%s1931_s24 + $0x50] ss:$8 sps:$4 sm:$0xff]  }
  0x17   : > { %715 = vmatpush1.bf16.msra.mxu0 %v1778_v7  ;;  %1760 = vmatpush1.bf16.msra.mxu1 %v1778_v7  ;;  %v1812_v29 = vld [vmem:[%s1931_s24 + $0x140] ss:$8 sps:$4 sm:$0xff]   ;;  %v1815_v31 = vld [vmem:[%s1931_s24 + $0x154] ss:$8 sps:$4 sm:$0xff]   ;;  %v1818_v33 = vld [vmem:[%s1931_s24 + $0x150] ss:$8 sps:$4 sm:$0xff]  }
  0x18   : > { %716 = vmatprep.subr.bf16.mxu0 %v1887_v1  ;;  %1752 = vmatprep.subr.bf16.mxu1 %v1887_v1  ;;  %v1819_v34 = vld [vmem:[%s1931_s24 + $0x64] ss:$8 sps:$4 sm:$0xff]   ;;  %v1823_v36 = vld [vmem:[%s1931_s24 + $0x60] ss:$8 sps:$4 sm:$0xff]   ;;  %v1825_v38 = vld [vmem:[%s1931_s24 + $0x74] ss:$8 sps:$4 sm:$0xff]  }
  0x19   : > { %v1821_v35 = vld [vmem:[%s1931_s24 + $0x164] ss:$8 sps:$4 sm:$0xff]   ;;  %v1824_v37 = vld [vmem:[%s1931_s24 + $0x160] ss:$8 sps:$4 sm:$0xff]   ;;  %v1827_v39 = vld [vmem:[%s1931_s24 + $0x174] ss:$8 sps:$4 sm:$0xff]  }
  0x1a   : > { %v1829_v40 = vld [vmem:[%s1931_s24 + $0x70] ss:$8 sps:$4 sm:$0xff]   ;;  %v1831_v42 = vld [vmem:[%s1931_s24 + $0x84] ss:$8 sps:$4 sm:$0xff]   ;;  %v1835_v44 = vld [vmem:[%s1931_s24 + $0x80] ss:$8 sps:$4 sm:$0xff]  }
  0x1b   : > { %717 = vmatpush1.bf16.msra.mxu0 %v1779_v8  ;;  %1761 = vmatpush1.bf16.msra.mxu1 %v1779_v8  ;;  %v1830_v41 = vld [vmem:[%s1931_s24 + $0x170] ss:$8 sps:$4 sm:$0xff]   ;;  %v1833_v43 = vld [vmem:[%s1931_s24 + $0x184] ss:$8 sps:$4 sm:$0xff]   ;;  %v1836_v45 = vld [vmem:[%s1931_s24 + $0x180] ss:$8 sps:$4 sm:$0xff]  }
  0x1c   : > { %718 = vmatprep.subr.bf16.mxu0 %v1887_v1  ;;  %1753 = vmatprep.subr.bf16.mxu1 %v1887_v1  ;;  %v1837_v46 = vld [vmem:[%s1931_s24 + $0x94] ss:$8 sps:$4 sm:$0xff]   ;;  %v1841_v48 = vld [vmem:[%s1931_s24 + $0x90] ss:$8 sps:$4 sm:$0xff]   ;;  %v1843_v50 = vld [vmem:[%s1931_s24 + $0xa4] ss:$8 sps:$4 sm:$0xff]  }
  0x1d   : > { %v1839_v47 = vld [vmem:[%s1931_s24 + $0x194] ss:$8 sps:$4 sm:$0xff]   ;;  %v1842_v49 = vld [vmem:[%s1931_s24 + $0x190] ss:$8 sps:$4 sm:$0xff]   ;;  %v1845_v51 = vld [vmem:[%s1931_s24 + $0x1a4] ss:$8 sps:$4 sm:$0xff]  }
  0x1e   : > { %v1847_v52 = vld [vmem:[%s1931_s24 + $0xa0] ss:$8 sps:$4 sm:$0xff]   ;;  %v1849_v54 = vld [vmem:[%s1931_s24 + $0xb4] ss:$8 sps:$4 sm:$0xff]   ;;  %v1853_v56 = vld [vmem:[%s1931_s24 + $0xb0] ss:$8 sps:$4 sm:$0xff]  }
  0x1f   : > { %719 = vmatpush1.bf16.msra.mxu0 %v1780_v9  ;;  %1762 = vmatpush1.bf16.msra.mxu1 %v1780_v9  ;;  %v1848_v53 = vld [vmem:[%s1931_s24 + $0x1a0] ss:$8 sps:$4 sm:$0xff]   ;;  %v1851_v55 = vld [vmem:[%s1931_s24 + $0x1b4] ss:$8 sps:$4 sm:$0xff]   ;;  %v1854_v57 = vld [vmem:[%s1931_s24 + $0x1b0] ss:$8 sps:$4 sm:$0xff]  }
  0x20   : > { %720 = vmatprep.subr.bf16.mxu0 %v1887_v1  ;;  %1754 = vmatprep.subr.bf16.mxu1 %v1887_v1  ;;  %v1855_v58 = vld [vmem:[%s1931_s24 + $0xc4] ss:$8 sps:$4 sm:$0xff]   ;;  %v1859_v60 = vld [vmem:[%s1931_s24 + $0xc0] ss:$8 sps:$4 sm:$0xff]   ;;  %v1861_v62 = vld [vmem:[%s1931_s24 + $0xd4] ss:$8 sps:$4 sm:$0xff]  }
  0x21   : > { %v1857_v59 = vld [vmem:[%s1931_s24 + $0x1c4] ss:$8 sps:$4 sm:$0xff]   ;;  %v1860_v61 = vld [vmem:[%s1931_s24 + $0x1c0] ss:$8 sps:$4 sm:$0xff]   ;;  %v1863_v63 = vld [vmem:[%s1931_s24 + $0x1d4] ss:$8 sps:$4 sm:$0xff]  }
  0x22   : > { %v1865_v0 = vld [vmem:[%s1931_s24 + $0xd0] ss:$8 sps:$4 sm:$0xff]   ;;  %v1867_v2 = vld [vmem:[%s1931_s24 + $0xe4] ss:$8 sps:$4 sm:$0xff]   ;;  %v1871_v4 = vld [vmem:[%s1931_s24 + $0xe0] ss:$8 sps:$4 sm:$0xff]  }
  0x23   : > { %721 = vmatpush1.bf16.msra.mxu0 %v1781_v10  ;;  %1763 = vmatpush1.bf16.msra.mxu1 %v1781_v10  ;;  %v1869_v3 = vld [vmem:[%s1931_s24 + $0x1e4] ss:$8 sps:$4 sm:$0xff]   ;;  %v1872_v5 = vld [vmem:[%s1931_s24 + $0x1e0] ss:$8 sps:$4 sm:$0xff]   ;;  %v1873_v6 = vld [vmem:[%s1931_s24 + $0xf4] ss:$8 sps:$4 sm:$0xff]  }
  0x24   : > { %722 = vmatprep.subr.bf16.mxu0 %v1887_v1  ;;  %1755 = vmatprep.subr.bf16.mxu1 %v1887_v1  ;;  %v1866_v1 = vld [vmem:[%s1931_s24 + $0x1d0] ss:$8 sps:$4 sm:$0xff]   ;;  %v1875_v7 = vld [vmem:[%s1931_s24 + $0x1f4] ss:$8 sps:$4 sm:$0xff]   ;;  %v2050_v10 = vld [vmem:[%s2255_s2] ss:$0 sm:$0xff] }
  0x25   : > { %v1877_v8 = vld [vmem:[%s1931_s24 + $0xf0] ss:$8 sps:$4 sm:$0xff]  }
  0x26   : > { %v1878_v9 = vld [vmem:[%s1931_s24 + $0x1f0] ss:$8 sps:$4 sm:$0xff]  }
  0x27   : > { %723 = vmatpush1.bf16.msra.mxu0 %v1782_v11  ;;  %1764 = vmatpush1.bf16.msra.mxu1 %v1782_v11 }
  0x2a   : > { %739 = vmatmul.mubr.bf16.vlgmr.msra.gmra.mrb[0].mxu0 %v1783_v12  ;;  %867 = vmatmul.mubr.bf16.vlgmr.msra.gmra.mrb[0].mxu1 %v1786_v13 }
  0x2b   : > { %1585 = vmatprep.mubr.msk.bf16.mxu0 %vm609_vm0, %v1789_v14  ;;  %1601 = vmatprep.mubr.msk.bf16.mxu1 %vm609_vm0, %v1791_v15 }
  0x32   : > { %747 = vmatmul.mubr.bf16.gmra.mrb[4].mxu0 %v1793_v16  ;;  %875 = vmatmul.mubr.bf16.gmra.mrb[4].mxu1 %v1794_v17 }
  0x33   : > { %1586 = vmatprep.mubr.msk.bf16.mxu0 %vm609_vm0, %v1795_v18  ;;  %1602 = vmatprep.mubr.msk.bf16.mxu1 %vm609_vm0, %v1797_v19 }
  0x3a   : > { %755 = vmatmul.mubr.bf16.gmra.mrb[8].mxu0 %v1799_v20  ;;  %883 = vmatmul.mubr.bf16.gmra.mrb[8].mxu1 %v1800_v21 }
  0x3b   : > { %1587 = vmatprep.mubr.msk.bf16.mxu0 %vm609_vm0, %v1801_v22  ;;  %1603 = vmatprep.mubr.msk.bf16.mxu1 %vm609_vm0, %v1803_v23 }
  0x42   : > { %763 = vmatmul.mubr.bf16.gmra.mrb[12].mxu0 %v1805_v24  ;;  %891 = vmatmul.mubr.bf16.gmra.mrb[12].mxu1 %v1806_v25 }
  0x43   : > { %1588 = vmatprep.mubr.msk.bf16.mxu0 %vm609_vm0, %v1807_v26  ;;  %1604 = vmatprep.mubr.msk.bf16.mxu1 %vm609_vm0, %v1809_v27 }
  0x4a   : > { %771 = vmatmul.mubr.bf16.gmra.mrb[16].mxu0 %v1811_v28  ;;  %899 = vmatmul.mubr.bf16.gmra.mrb[16].mxu1 %v1812_v29 }
  0x4b   : > { %1589 = vmatprep.mubr.msk.bf16.mxu0 %vm609_vm0, %v1813_v30  ;;  %1605 = vmatprep.mubr.msk.bf16.mxu1 %vm609_vm0, %v1815_v31 }
  0x52   : > { %779 = vmatmul.mubr.bf16.gmra.mrb[20].mxu0 %v1817_v32  ;;  %907 = vmatmul.mubr.bf16.gmra.mrb[20].mxu1 %v1818_v33 }
  0x53   : > { %1590 = vmatprep.mubr.msk.bf16.mxu0 %vm609_vm0, %v1819_v34  ;;  %1606 = vmatprep.mubr.msk.bf16.mxu1 %vm609_vm0, %v1821_v35 }
  0x5a   : > { %787 = vmatmul.mubr.bf16.gmra.mrb[24].mxu0 %v1823_v36  ;;  %915 = vmatmul.mubr.bf16.gmra.mrb[24].mxu1 %v1824_v37 }
  0x5b   : > { %1591 = vmatprep.mubr.msk.bf16.mxu0 %vm609_vm0, %v1825_v38  ;;  %1607 = vmatprep.mubr.msk.bf16.mxu1 %vm609_vm0, %v1827_v39 }
  0x62   : > { %795 = vmatmul.mubr.bf16.gmra.mrb[28].mxu0 %v1829_v40  ;;  %923 = vmatmul.mubr.bf16.gmra.mrb[28].mxu1 %v1830_v41 }
  0x63   : > { %1592 = vmatprep.mubr.msk.bf16.mxu0 %vm609_vm0, %v1831_v42  ;;  %1608 = vmatprep.mubr.msk.bf16.mxu1 %vm609_vm0, %v1833_v43 }
  0x6a   : > { %803 = vmatmul.mubr.bf16.gmra.mrb[32].mxu0 %v1835_v44  ;;  %931 = vmatmul.mubr.bf16.gmra.mrb[32].mxu1 %v1836_v45 }
  0x6b   : > { %1593 = vmatprep.mubr.msk.bf16.mxu0 %vm609_vm0, %v1837_v46  ;;  %1609 = vmatprep.mubr.msk.bf16.mxu1 %vm609_vm0, %v1839_v47 }
  0x72   : > { %811 = vmatmul.mubr.bf16.gmra.mrb[36].mxu0 %v1841_v48  ;;  %939 = vmatmul.mubr.bf16.gmra.mrb[36].mxu1 %v1842_v49 }
  0x73   : > { %1594 = vmatprep.mubr.msk.bf16.mxu0 %vm609_vm0, %v1843_v50  ;;  %1610 = vmatprep.mubr.msk.bf16.mxu1 %vm609_vm0, %v1845_v51 }
  0x7a   : > { %819 = vmatmul.mubr.bf16.gmra.mrb[40].mxu0 %v1847_v52  ;;  %947 = vmatmul.mubr.bf16.gmra.mrb[40].mxu1 %v1848_v53 }
  0x7b   : > { %1595 = vmatprep.mubr.msk.bf16.mxu0 %vm609_vm0, %v1849_v54  ;;  %1611 = vmatprep.mubr.msk.bf16.mxu1 %vm609_vm0, %v1851_v55 }
  0x82   : > { %827 = vmatmul.mubr.bf16.gmra.mrb[44].mxu0 %v1853_v56  ;;  %955 = vmatmul.mubr.bf16.gmra.mrb[44].mxu1 %v1854_v57 }
  0x83   : > { %1596 = vmatprep.mubr.msk.bf16.mxu0 %vm609_vm0, %v1855_v58  ;;  %1612 = vmatprep.mubr.msk.bf16.mxu1 %vm609_vm0, %v1857_v59 }
  0x8a   : > { %835 = vmatmul.mubr.bf16.gmra.mrb[48].mxu0 %v1859_v60  ;;  %963 = vmatmul.mubr.bf16.gmra.mrb[48].mxu1 %v1860_v61 }
  0x8b   : > { %1597 = vmatprep.mubr.msk.bf16.mxu0 %vm609_vm0, %v1861_v62  ;;  %1613 = vmatprep.mubr.msk.bf16.mxu1 %vm609_vm0, %v1863_v63 }
  0x92   : > { %843 = vmatmul.mubr.bf16.gmra.mrb[52].mxu0 %v1865_v0  ;;  %971 = vmatmul.mubr.bf16.gmra.mrb[52].mxu1 %v1866_v1 }
  0x93   : > { %1598 = vmatprep.mubr.msk.bf16.mxu0 %vm609_vm0, %v1867_v2  ;;  %1614 = vmatprep.mubr.msk.bf16.mxu1 %vm609_vm0, %v1869_v3 }
  0x9a   : > { %851 = vmatmul.mubr.bf16.gmra.mrb[56].mxu0 %v1871_v4  ;;  %979 = vmatmul.mubr.bf16.gmra.mrb[56].mxu1 %v1872_v5 }
  0x9b   : > { %1599 = vmatprep.mubr.msk.bf16.mxu0 %vm609_vm0, %v1873_v6  ;;  %1615 = vmatprep.mubr.msk.bf16.mxu1 %vm609_vm0, %v1875_v7 }
  0xa2   : > { %859 = vmatmul.mubr.bf16.gmra.mrb[60].mxu0 %v1877_v8  ;;  %987 = vmatmul.mubr.bf16.gmra.mrb[60].mxu1 %v1878_v9 }
  0xfd   : > { %v740_v11 = vpop.f32.mrb[0].mxu0  ;;  %v868_v12 = vpop.f32.mrb[0].mxu1 }
  0xfe   : > { %v741_v13 = vadd.f32 %v2050_v10, %v740_v11  ;;  %v869_v14 = vadd.f32 %v2050_v10, %v868_v12  ;;  %v742_v15 = vpop.f32.mrb[1].mxu0  ;;  %v870_v16 = vpop.f32.mrb[1].mxu1 }
  0xff   : > { %v743_v17 = vpop.f32.mrb[2].mxu0  ;;  %v871_v18 = vpop.f32.mrb[2].mxu1 }
 0x100   : > { %v995_v19 = vmul.f32 0.01, %v741_v13  ;;  %v1027_v20 = vmul.f32 0.01, %v869_v14  ;;  %v744_v21 = vadd.f32 %v2050_v10, %v743_v17  ;;  %v872_v22 = vadd.f32 %v2050_v10, %v871_v18  ;;  %v745_v23 = vpop.f32.mrb[3].mxu0  ;;  %v873_v24 = vpop.f32.mrb[3].mxu1 }
 0x102   : > { %v1059_v25 = vmax.f32 %v741_v13, %v995_v19  ;;  %v1091_v26 = vmax.f32 %v869_v14, %v1027_v20  ;;  %v996_v27 = vmul.f32 0.01, %v744_v21  ;;  %v1028_v28 = vmul.f32 0.01, %v872_v22 }
 0x104   : > { %v1683_v29 = vpack.c.bf16 %v1059_v25, %v1059_v25  ;;  %v1715_v30 = vpack.c.bf16 %v1091_v26, %v1091_v26  ;;  %v1060_v31 = vmax.f32 %v744_v21, %v996_v27  ;;  %v1092_v32 = vmax.f32 %v872_v22, %v1028_v28 }
 0x105   : > { %v748_v33 = vpop.f32.mrb[4].mxu0  ;;  %v876_v34 = vpop.f32.mrb[4].mxu1 }
 0x106   : > { %1380 = vst.msk [vmem:[%s2060_s17] sm:$0xf] %vm1379_vm1, %v1683_v29  ;;  %1412 = vst.msk [vmem:[%s2060_s17 + $0x80] sm:$0xf] %vm1379_vm1, %v1715_v30  ;;  %v1684_v35 = vpack.c.bf16 %v1060_v31, %v1060_v31  ;;  %v1716_v36 = vpack.c.bf16 %v1092_v32, %v1092_v32  ;;  %v749_v37 = vadd.f32 %v2050_v10, %v748_v33  ;;  %v750_v39 = vpop.f32.mrb[5].mxu0  ;;  %v878_v40 = vpop.f32.mrb[5].mxu1 }
 0x107   : > { %v877_v38 = vadd.f32 %v2050_v10, %v876_v34  ;;  %v751_v41 = vpop.f32.mrb[6].mxu0  ;;  %v879_v42 = vpop.f32.mrb[6].mxu1 }
 0x108   : > { %1381 = vst.msk [vmem:[%s2060_s17 + $0x4] sm:$0xf] %vm1379_vm1, %v1684_v35  ;;  %1413 = vst.msk [vmem:[%s2060_s17 + $0x84] sm:$0xf] %vm1379_vm1, %v1716_v36  ;;  %v997_v43 = vmul.f32 0.01, %v749_v37  ;;  %v752_v45 = vadd.f32 %v2050_v10, %v751_v41  ;;  %v880_v46 = vadd.f32 %v2050_v10, %v879_v42 }
 0x109   : > { %v1029_v44 = vmul.f32 0.01, %v877_v38  ;;  %v753_v47 = vpop.f32.mrb[7].mxu0  ;;  %v881_v48 = vpop.f32.mrb[7].mxu1 }
 0x10a   : > { %v1061_v49 = vmax.f32 %v749_v37, %v997_v43  ;;  %v998_v51 = vmul.f32 0.01, %v752_v45  ;;  %v1030_v52 = vmul.f32 0.01, %v880_v46 }
 0x10b   : > { %v1093_v50 = vmax.f32 %v877_v38, %v1029_v44 }
 0x10c   : > { %v1685_v53 = vpack.c.bf16 %v1061_v49, %v1061_v49  ;;  %v1062_v55 = vmax.f32 %v752_v45, %v998_v51  ;;  %v1094_v56 = vmax.f32 %v880_v46, %v1030_v52 }
 0x10d   : > { %v1717_v54 = vpack.c.bf16 %v1093_v50, %v1093_v50  ;;  %v756_v57 = vpop.f32.mrb[8].mxu0  ;;  %v884_v58 = vpop.f32.mrb[8].mxu1 }
 0x10e   : > { %1382 = vst.msk [vmem:[%s2060_s17 + $0x8] sm:$0xf] %vm1379_vm1, %v1685_v53  ;;  %v1686_v59 = vpack.c.bf16 %v1062_v55, %v1062_v55  ;;  %v1718_v60 = vpack.c.bf16 %v1094_v56, %v1094_v56  ;;  %v757_v61 = vadd.f32 %v2050_v10, %v756_v57  ;;  %v885_v62 = vadd.f32 %v2050_v10, %v884_v58  ;;  %v758_v63 = vpop.f32.mrb[9].mxu0  ;;  %v886_v0 = vpop.f32.mrb[9].mxu1 }
 0x10f   : > { %1414 = vst.msk [vmem:[%s2060_s17 + $0x88] sm:$0xf] %vm1379_vm1, %v1717_v54  ;;  %v759_v1 = vpop.f32.mrb[10].mxu0  ;;  %v887_v2 = vpop.f32.mrb[10].mxu1 }
 0x110   : > { %1383 = vst.msk [vmem:[%s2060_s17 + $0xc] sm:$0xf] %vm1379_vm1, %v1686_v59  ;;  %1415 = vst.msk [vmem:[%s2060_s17 + $0x8c] sm:$0xf] %vm1379_vm1, %v1718_v60  ;;  %v999_v3 = vmul.f32 0.01, %v757_v61  ;;  %v760_v5 = vadd.f32 %v2050_v10, %v759_v1  ;;  %v888_v6 = vadd.f32 %v2050_v10, %v887_v2 }
 0x111   : > { %v1031_v4 = vmul.f32 0.01, %v885_v62  ;;  %v761_v7 = vpop.f32.mrb[11].mxu0  ;;  %v889_v8 = vpop.f32.mrb[11].mxu1 }
 0x112   : > { %v1063_v9 = vmax.f32 %v757_v61, %v999_v3  ;;  %v1000_v12 = vmul.f32 0.01, %v760_v5  ;;  %v1032_v13 = vmul.f32 0.01, %v888_v6 }
 0x113   : > { %v1095_v11 = vmax.f32 %v885_v62, %v1031_v4 }
 0x114   : > { %v1687_v14 = vpack.c.bf16 %v1063_v9, %v1063_v9  ;;  %v1064_v16 = vmax.f32 %v760_v5, %v1000_v12  ;;  %v1096_v17 = vmax.f32 %v888_v6, %v1032_v13 }
 0x115   : > { %v1719_v15 = vpack.c.bf16 %v1095_v11, %v1095_v11  ;;  %v764_v18 = vpop.f32.mrb[12].mxu0  ;;  %v892_v19 = vpop.f32.mrb[12].mxu1 }
 0x116   : > { %1384 = vst.msk [vmem:[%s2060_s17 + $0x10] sm:$0xf] %vm1379_vm1, %v1687_v14  ;;  %v1688_v20 = vpack.c.bf16 %v1064_v16, %v1064_v16  ;;  %v1720_v21 = vpack.c.bf16 %v1096_v17, %v1096_v17  ;;  %v765_v22 = vadd.f32 %v2050_v10, %v764_v18  ;;  %v893_v23 = vadd.f32 %v2050_v10, %v892_v19  ;;  %v766_v24 = vpop.f32.mrb[13].mxu0  ;;  %v894_v25 = vpop.f32.mrb[13].mxu1 }
 0x117   : > { %1416 = vst.msk [vmem:[%s2060_s17 + $0x90] sm:$0xf] %vm1379_vm1, %v1719_v15  ;;  %v767_v26 = vpop.f32.mrb[14].mxu0  ;;  %v895_v27 = vpop.f32.mrb[14].mxu1 }
 0x118   : > { %1385 = vst.msk [vmem:[%s2060_s17 + $0x14] sm:$0xf] %vm1379_vm1, %v1688_v20  ;;  %1417 = vst.msk [vmem:[%s2060_s17 + $0x94] sm:$0xf] %vm1379_vm1, %v1720_v21  ;;  %v1001_v28 = vmul.f32 0.01, %v765_v22  ;;  %v768_v30 = vadd.f32 %v2050_v10, %v767_v26  ;;  %v896_v31 = vadd.f32 %v2050_v10, %v895_v27 }
 0x119   : > { %v1033_v29 = vmul.f32 0.01, %v893_v23  ;;  %v769_v32 = vpop.f32.mrb[15].mxu0  ;;  %v897_v33 = vpop.f32.mrb[15].mxu1 }
 0x11a   : > { %v1065_v34 = vmax.f32 %v765_v22, %v1001_v28  ;;  %v1002_v36 = vmul.f32 0.01, %v768_v30  ;;  %v1034_v37 = vmul.f32 0.01, %v896_v31 }
 0x11b   : > { %v1097_v35 = vmax.f32 %v893_v23, %v1033_v29 }
 0x11c   : > { %v1689_v38 = vpack.c.bf16 %v1065_v34, %v1065_v34  ;;  %v1066_v40 = vmax.f32 %v768_v30, %v1002_v36  ;;  %v1098_v41 = vmax.f32 %v896_v31, %v1034_v37 }
 0x11d   : > { %v1721_v39 = vpack.c.bf16 %v1097_v35, %v1097_v35  ;;  %v772_v42 = vpop.f32.mrb[16].mxu0  ;;  %v900_v43 = vpop.f32.mrb[16].mxu1 }
 0x11e   : > { %1386 = vst.msk [vmem:[%s2060_s17 + $0x18] sm:$0xf] %vm1379_vm1, %v1689_v38  ;;  %v1690_v44 = vpack.c.bf16 %v1066_v40, %v1066_v40  ;;  %v1722_v45 = vpack.c.bf16 %v1098_v41, %v1098_v41  ;;  %v773_v46 = vadd.f32 %v2050_v10, %v772_v42  ;;  %v901_v47 = vadd.f32 %v2050_v10, %v900_v43  ;;  %v774_v48 = vpop.f32.mrb[17].mxu0  ;;  %v902_v49 = vpop.f32.mrb[17].mxu1 }
 0x11f   : > { %1418 = vst.msk [vmem:[%s2060_s17 + $0x98] sm:$0xf] %vm1379_vm1, %v1721_v39  ;;  %v775_v50 = vpop.f32.mrb[18].mxu0  ;;  %v903_v51 = vpop.f32.mrb[18].mxu1 }
 0x120   : > { %1387 = vst.msk [vmem:[%s2060_s17 + $0x1c] sm:$0xf] %vm1379_vm1, %v1690_v44  ;;  %1419 = vst.msk [vmem:[%s2060_s17 + $0x9c] sm:$0xf] %vm1379_vm1, %v1722_v45  ;;  %v1003_v52 = vmul.f32 0.01, %v773_v46  ;;  %v776_v54 = vadd.f32 %v2050_v10, %v775_v50  ;;  %v904_v55 = vadd.f32 %v2050_v10, %v903_v51 }
 0x121   : > { %v1035_v53 = vmul.f32 0.01, %v901_v47  ;;  %v777_v56 = vpop.f32.mrb[19].mxu0  ;;  %v905_v57 = vpop.f32.mrb[19].mxu1 }
 0x122   : > { %v1067_v58 = vmax.f32 %v773_v46, %v1003_v52  ;;  %v1004_v60 = vmul.f32 0.01, %v776_v54  ;;  %v1036_v61 = vmul.f32 0.01, %v904_v55 }
 0x123   : > { %v1099_v59 = vmax.f32 %v901_v47, %v1035_v53 }
 0x124   : > { %v1691_v62 = vpack.c.bf16 %v1067_v58, %v1067_v58  ;;  %v1068_v0 = vmax.f32 %v776_v54, %v1004_v60  ;;  %v1100_v1 = vmax.f32 %v904_v55, %v1036_v61 }
 0x125   : > { %v1723_v63 = vpack.c.bf16 %v1099_v59, %v1099_v59  ;;  %v780_v2 = vpop.f32.mrb[20].mxu0  ;;  %v908_v3 = vpop.f32.mrb[20].mxu1 }
 0x126   : > { %1388 = vst.msk [vmem:[%s2060_s17 + $0x20] sm:$0xf] %vm1379_vm1, %v1691_v62  ;;  %v1692_v4 = vpack.c.bf16 %v1068_v0, %v1068_v0  ;;  %v1724_v5 = vpack.c.bf16 %v1100_v1, %v1100_v1  ;;  %v781_v6 = vadd.f32 %v2050_v10, %v780_v2  ;;  %v909_v7 = vadd.f32 %v2050_v10, %v908_v3  ;;  %v782_v8 = vpop.f32.mrb[21].mxu0  ;;  %v910_v9 = vpop.f32.mrb[21].mxu1 }
 0x127   : > { %1420 = vst.msk [vmem:[%s2060_s17 + $0xa0] sm:$0xf] %vm1379_vm1, %v1723_v63  ;;  %v783_v11 = vpop.f32.mrb[22].mxu0  ;;  %v911_v12 = vpop.f32.mrb[22].mxu1 }
 0x128   : > { %1389 = vst.msk [vmem:[%s2060_s17 + $0x24] sm:$0xf] %vm1379_vm1, %v1692_v4  ;;  %1421 = vst.msk [vmem:[%s2060_s17 + $0xa4] sm:$0xf] %vm1379_vm1, %v1724_v5  ;;  %v1005_v13 = vmul.f32 0.01, %v781_v6  ;;  %v784_v15 = vadd.f32 %v2050_v10, %v783_v11  ;;  %v912_v16 = vadd.f32 %v2050_v10, %v911_v12 }
 0x129   : > { %v1037_v14 = vmul.f32 0.01, %v909_v7  ;;  %v785_v17 = vpop.f32.mrb[23].mxu0  ;;  %v913_v18 = vpop.f32.mrb[23].mxu1 }
 0x12a   : > { %v1069_v19 = vmax.f32 %v781_v6, %v1005_v13  ;;  %v1006_v21 = vmul.f32 0.01, %v784_v15  ;;  %v1038_v22 = vmul.f32 0.01, %v912_v16 }
 0x12b   : > { %v1101_v20 = vmax.f32 %v909_v7, %v1037_v14 }
 0x12c   : > { %v1693_v23 = vpack.c.bf16 %v1069_v19, %v1069_v19  ;;  %v1070_v25 = vmax.f32 %v784_v15, %v1006_v21  ;;  %v1102_v26 = vmax.f32 %v912_v16, %v1038_v22 }
 0x12d   : > { %v1725_v24 = vpack.c.bf16 %v1101_v20, %v1101_v20  ;;  %v788_v27 = vpop.f32.mrb[24].mxu0  ;;  %v916_v28 = vpop.f32.mrb[24].mxu1 }
 0x12e   : > { %1390 = vst.msk [vmem:[%s2060_s17 + $0x28] sm:$0xf] %vm1379_vm1, %v1693_v23  ;;  %v1694_v29 = vpack.c.bf16 %v1070_v25, %v1070_v25  ;;  %v1726_v30 = vpack.c.bf16 %v1102_v26, %v1102_v26  ;;  %v789_v31 = vadd.f32 %v2050_v10, %v788_v27  ;;  %v917_v32 = vadd.f32 %v2050_v10, %v916_v28  ;;  %v790_v33 = vpop.f32.mrb[25].mxu0  ;;  %v918_v34 = vpop.f32.mrb[25].mxu1 }
 0x12f   : > { %1422 = vst.msk [vmem:[%s2060_s17 + $0xa8] sm:$0xf] %vm1379_vm1, %v1725_v24  ;;  %v791_v35 = vpop.f32.mrb[26].mxu0  ;;  %v919_v36 = vpop.f32.mrb[26].mxu1 }
 0x130   : > { %1391 = vst.msk [vmem:[%s2060_s17 + $0x2c] sm:$0xf] %vm1379_vm1, %v1694_v29  ;;  %1423 = vst.msk [vmem:[%s2060_s17 + $0xac] sm:$0xf] %vm1379_vm1, %v1726_v30  ;;  %v1007_v37 = vmul.f32 0.01, %v789_v31  ;;  %v792_v39 = vadd.f32 %v2050_v10, %v791_v35  ;;  %v920_v40 = vadd.f32 %v2050_v10, %v919_v36 }
 0x131   : > { %v1039_v38 = vmul.f32 0.01, %v917_v32  ;;  %v793_v41 = vpop.f32.mrb[27].mxu0  ;;  %v921_v42 = vpop.f32.mrb[27].mxu1 }
 0x132   : > { %v1071_v43 = vmax.f32 %v789_v31, %v1007_v37  ;;  %v1008_v45 = vmul.f32 0.01, %v792_v39  ;;  %v1040_v46 = vmul.f32 0.01, %v920_v40 }
 0x133   : > { %v1103_v44 = vmax.f32 %v917_v32, %v1039_v38 }
 0x134   : > { %v1695_v47 = vpack.c.bf16 %v1071_v43, %v1071_v43  ;;  %v1072_v49 = vmax.f32 %v792_v39, %v1008_v45  ;;  %v1104_v50 = vmax.f32 %v920_v40, %v1040_v46 }
 0x135   : > { %v1727_v48 = vpack.c.bf16 %v1103_v44, %v1103_v44  ;;  %v796_v51 = vpop.f32.mrb[28].mxu0  ;;  %v924_v52 = vpop.f32.mrb[28].mxu1 }
 0x136   : > { %1392 = vst.msk [vmem:[%s2060_s17 + $0x30] sm:$0xf] %vm1379_vm1, %v1695_v47  ;;  %v1696_v53 = vpack.c.bf16 %v1072_v49, %v1072_v49  ;;  %v1728_v54 = vpack.c.bf16 %v1104_v50, %v1104_v50  ;;  %v797_v55 = vadd.f32 %v2050_v10, %v796_v51  ;;  %v925_v56 = vadd.f32 %v2050_v10, %v924_v52  ;;  %v798_v57 = vpop.f32.mrb[29].mxu0  ;;  %v926_v58 = vpop.f32.mrb[29].mxu1 }
 0x137   : > { %1424 = vst.msk [vmem:[%s2060_s17 + $0xb0] sm:$0xf] %vm1379_vm1, %v1727_v48  ;;  %v799_v59 = vpop.f32.mrb[30].mxu0  ;;  %v927_v60 = vpop.f32.mrb[30].mxu1 }
 0x138   : > { %1393 = vst.msk [vmem:[%s2060_s17 + $0x34] sm:$0xf] %vm1379_vm1, %v1696_v53  ;;  %1425 = vst.msk [vmem:[%s2060_s17 + $0xb4] sm:$0xf] %vm1379_vm1, %v1728_v54  ;;  %v1009_v61 = vmul.f32 0.01, %v797_v55  ;;  %v800_v63 = vadd.f32 %v2050_v10, %v799_v59  ;;  %v928_v0 = vadd.f32 %v2050_v10, %v927_v60 }
 0x139   : > { %v1041_v62 = vmul.f32 0.01, %v925_v56  ;;  %v801_v1 = vpop.f32.mrb[31].mxu0  ;;  %v929_v2 = vpop.f32.mrb[31].mxu1 }
 0x13a   : > { %v1073_v3 = vmax.f32 %v797_v55, %v1009_v61  ;;  %v1010_v5 = vmul.f32 0.01, %v800_v63  ;;  %v1042_v6 = vmul.f32 0.01, %v928_v0 }
 0x13b   : > { %v1105_v4 = vmax.f32 %v925_v56, %v1041_v62 }
 0x13c   : > { %v1697_v7 = vpack.c.bf16 %v1073_v3, %v1073_v3  ;;  %v1074_v9 = vmax.f32 %v800_v63, %v1010_v5  ;;  %v1106_v11 = vmax.f32 %v928_v0, %v1042_v6 }
 0x13d   : > { %v1729_v8 = vpack.c.bf16 %v1105_v4, %v1105_v4  ;;  %v804_v12 = vpop.f32.mrb[32].mxu0  ;;  %v932_v13 = vpop.f32.mrb[32].mxu1 }
 0x13e   : > { %1394 = vst.msk [vmem:[%s2060_s17 + $0x38] sm:$0xf] %vm1379_vm1, %v1697_v7  ;;  %v1698_v14 = vpack.c.bf16 %v1074_v9, %v1074_v9  ;;  %v1730_v15 = vpack.c.bf16 %v1106_v11, %v1106_v11  ;;  %v805_v16 = vadd.f32 %v2050_v10, %v804_v12  ;;  %v933_v17 = vadd.f32 %v2050_v10, %v932_v13  ;;  %v806_v18 = vpop.f32.mrb[33].mxu0  ;;  %v934_v19 = vpop.f32.mrb[33].mxu1 }
 0x13f   : > { %1426 = vst.msk [vmem:[%s2060_s17 + $0xb8] sm:$0xf] %vm1379_vm1, %v1729_v8  ;;  %v807_v20 = vpop.f32.mrb[34].mxu0  ;;  %v935_v21 = vpop.f32.mrb[34].mxu1 }
 0x140   : > { %1395 = vst.msk [vmem:[%s2060_s17 + $0x3c] sm:$0xf] %vm1379_vm1, %v1698_v14  ;;  %1427 = vst.msk [vmem:[%s2060_s17 + $0xbc] sm:$0xf] %vm1379_vm1, %v1730_v15  ;;  %v1011_v22 = vmul.f32 0.01, %v805_v16  ;;  %v808_v24 = vadd.f32 %v2050_v10, %v807_v20  ;;  %v936_v25 = vadd.f32 %v2050_v10, %v935_v21 }
 0x141   : > { %v1043_v23 = vmul.f32 0.01, %v933_v17  ;;  %v809_v26 = vpop.f32.mrb[35].mxu0  ;;  %v937_v27 = vpop.f32.mrb[35].mxu1 }
 0x142   : > { %v1075_v28 = vmax.f32 %v805_v16, %v1011_v22  ;;  %v1012_v30 = vmul.f32 0.01, %v808_v24  ;;  %v1044_v31 = vmul.f32 0.01, %v936_v25 }
 0x143   : > { %v1107_v29 = vmax.f32 %v933_v17, %v1043_v23 }
 0x144   : > { %v1699_v32 = vpack.c.bf16 %v1075_v28, %v1075_v28  ;;  %v1076_v34 = vmax.f32 %v808_v24, %v1012_v30  ;;  %v1108_v35 = vmax.f32 %v936_v25, %v1044_v31 }
 0x145   : > { %v1731_v33 = vpack.c.bf16 %v1107_v29, %v1107_v29  ;;  %v812_v36 = vpop.f32.mrb[36].mxu0  ;;  %v940_v37 = vpop.f32.mrb[36].mxu1 }
 0x146   : > { %1396 = vst.msk [vmem:[%s2060_s17 + $0x40] sm:$0xf] %vm1379_vm1, %v1699_v32  ;;  %v1700_v38 = vpack.c.bf16 %v1076_v34, %v1076_v34  ;;  %v1732_v39 = vpack.c.bf16 %v1108_v35, %v1108_v35  ;;  %v813_v40 = vadd.f32 %v2050_v10, %v812_v36  ;;  %v941_v41 = vadd.f32 %v2050_v10, %v940_v37  ;;  %v814_v42 = vpop.f32.mrb[37].mxu0  ;;  %v942_v43 = vpop.f32.mrb[37].mxu1 }
 0x147   : > { %1428 = vst.msk [vmem:[%s2060_s17 + $0xc0] sm:$0xf] %vm1379_vm1, %v1731_v33  ;;  %v815_v44 = vpop.f32.mrb[38].mxu0  ;;  %v943_v45 = vpop.f32.mrb[38].mxu1 }
 0x148   : > { %1397 = vst.msk [vmem:[%s2060_s17 + $0x44] sm:$0xf] %vm1379_vm1, %v1700_v38  ;;  %1429 = vst.msk [vmem:[%s2060_s17 + $0xc4] sm:$0xf] %vm1379_vm1, %v1732_v39  ;;  %v1013_v46 = vmul.f32 0.01, %v813_v40  ;;  %v816_v48 = vadd.f32 %v2050_v10, %v815_v44  ;;  %v944_v49 = vadd.f32 %v2050_v10, %v943_v45 }
 0x149   : > { %v1045_v47 = vmul.f32 0.01, %v941_v41  ;;  %v817_v50 = vpop.f32.mrb[39].mxu0  ;;  %v945_v51 = vpop.f32.mrb[39].mxu1 }
 0x14a   : > { %v1077_v52 = vmax.f32 %v813_v40, %v1013_v46  ;;  %v1014_v54 = vmul.f32 0.01, %v816_v48  ;;  %v1046_v55 = vmul.f32 0.01, %v944_v49 }
 0x14b   : > { %v1109_v53 = vmax.f32 %v941_v41, %v1045_v47 }
 0x14c   : > { %v1701_v56 = vpack.c.bf16 %v1077_v52, %v1077_v52  ;;  %v1078_v58 = vmax.f32 %v816_v48, %v1014_v54  ;;  %v1110_v59 = vmax.f32 %v944_v49, %v1046_v55 }
 0x14d   : > { %v1733_v57 = vpack.c.bf16 %v1109_v53, %v1109_v53  ;;  %v820_v60 = vpop.f32.mrb[40].mxu0  ;;  %v948_v61 = vpop.f32.mrb[40].mxu1 }
 0x14e   : > { %1398 = vst.msk [vmem:[%s2060_s17 + $0x48] sm:$0xf] %vm1379_vm1, %v1701_v56  ;;  %v1702_v62 = vpack.c.bf16 %v1078_v58, %v1078_v58  ;;  %v1734_v63 = vpack.c.bf16 %v1110_v59, %v1110_v59  ;;  %v821_v0 = vadd.f32 %v2050_v10, %v820_v60  ;;  %v949_v1 = vadd.f32 %v2050_v10, %v948_v61  ;;  %v822_v2 = vpop.f32.mrb[41].mxu0  ;;  %v950_v3 = vpop.f32.mrb[41].mxu1 }
 0x14f   : > { %1430 = vst.msk [vmem:[%s2060_s17 + $0xc8] sm:$0xf] %vm1379_vm1, %v1733_v57  ;;  %v823_v4 = vpop.f32.mrb[42].mxu0  ;;  %v951_v5 = vpop.f32.mrb[42].mxu1 }
 0x150   : > { %1399 = vst.msk [vmem:[%s2060_s17 + $0x4c] sm:$0xf] %vm1379_vm1, %v1702_v62  ;;  %1431 = vst.msk [vmem:[%s2060_s17 + $0xcc] sm:$0xf] %vm1379_vm1, %v1734_v63  ;;  %v1015_v6 = vmul.f32 0.01, %v821_v0  ;;  %v824_v8 = vadd.f32 %v2050_v10, %v823_v4  ;;  %v952_v9 = vadd.f32 %v2050_v10, %v951_v5 }
 0x151   : > { %v1047_v7 = vmul.f32 0.01, %v949_v1  ;;  %v825_v11 = vpop.f32.mrb[43].mxu0  ;;  %v953_v12 = vpop.f32.mrb[43].mxu1 }
 0x152   : > { %v1079_v13 = vmax.f32 %v821_v0, %v1015_v6  ;;  %v1016_v15 = vmul.f32 0.01, %v824_v8  ;;  %v1048_v16 = vmul.f32 0.01, %v952_v9 }
 0x153   : > { %v1111_v14 = vmax.f32 %v949_v1, %v1047_v7 }
 0x154   : > { %v1703_v17 = vpack.c.bf16 %v1079_v13, %v1079_v13  ;;  %v1080_v19 = vmax.f32 %v824_v8, %v1016_v15  ;;  %v1112_v20 = vmax.f32 %v952_v9, %v1048_v16 }
 0x155   : > { %v1735_v18 = vpack.c.bf16 %v1111_v14, %v1111_v14  ;;  %v828_v21 = vpop.f32.mrb[44].mxu0  ;;  %v956_v22 = vpop.f32.mrb[44].mxu1 }
 0x156   : > { %1400 = vst.msk [vmem:[%s2060_s17 + $0x50] sm:$0xf] %vm1379_vm1, %v1703_v17  ;;  %v1704_v23 = vpack.c.bf16 %v1080_v19, %v1080_v19  ;;  %v1736_v24 = vpack.c.bf16 %v1112_v20, %v1112_v20  ;;  %v829_v25 = vadd.f32 %v2050_v10, %v828_v21  ;;  %v957_v26 = vadd.f32 %v2050_v10, %v956_v22  ;;  %v830_v27 = vpop.f32.mrb[45].mxu0  ;;  %v958_v28 = vpop.f32.mrb[45].mxu1 }
 0x157   : > { %1432 = vst.msk [vmem:[%s2060_s17 + $0xd0] sm:$0xf] %vm1379_vm1, %v1735_v18  ;;  %v831_v29 = vpop.f32.mrb[46].mxu0  ;;  %v959_v30 = vpop.f32.mrb[46].mxu1 }
 0x158   : > { %1401 = vst.msk [vmem:[%s2060_s17 + $0x54] sm:$0xf] %vm1379_vm1, %v1704_v23  ;;  %1433 = vst.msk [vmem:[%s2060_s17 + $0xd4] sm:$0xf] %vm1379_vm1, %v1736_v24  ;;  %v1017_v31 = vmul.f32 0.01, %v829_v25  ;;  %v832_v33 = vadd.f32 %v2050_v10, %v831_v29  ;;  %v960_v34 = vadd.f32 %v2050_v10, %v959_v30 }
 0x159   : > { %v1049_v32 = vmul.f32 0.01, %v957_v26  ;;  %v833_v35 = vpop.f32.mrb[47].mxu0  ;;  %v961_v36 = vpop.f32.mrb[47].mxu1 }
 0x15a   : > { %v1081_v37 = vmax.f32 %v829_v25, %v1017_v31  ;;  %v1018_v39 = vmul.f32 0.01, %v832_v33  ;;  %v1050_v40 = vmul.f32 0.01, %v960_v34 }
 0x15b   : > { %v1113_v38 = vmax.f32 %v957_v26, %v1049_v32 }
 0x15c   : > { %v1705_v41 = vpack.c.bf16 %v1081_v37, %v1081_v37  ;;  %v1082_v43 = vmax.f32 %v832_v33, %v1018_v39  ;;  %v1114_v44 = vmax.f32 %v960_v34, %v1050_v40 }
 0x15d   : > { %v1737_v42 = vpack.c.bf16 %v1113_v38, %v1113_v38  ;;  %v836_v45 = vpop.f32.mrb[48].mxu0  ;;  %v964_v46 = vpop.f32.mrb[48].mxu1 }
 0x15e   : > { %1402 = vst.msk [vmem:[%s2060_s17 + $0x58] sm:$0xf] %vm1379_vm1, %v1705_v41  ;;  %v1706_v47 = vpack.c.bf16 %v1082_v43, %v1082_v43  ;;  %v1738_v48 = vpack.c.bf16 %v1114_v44, %v1114_v44  ;;  %v837_v49 = vadd.f32 %v2050_v10, %v836_v45  ;;  %v965_v50 = vadd.f32 %v2050_v10, %v964_v46  ;;  %v838_v51 = vpop.f32.mrb[49].mxu0  ;;  %v966_v52 = vpop.f32.mrb[49].mxu1 }
 0x15f   : > { %1434 = vst.msk [vmem:[%s2060_s17 + $0xd8] sm:$0xf] %vm1379_vm1, %v1737_v42  ;;  %v839_v53 = vpop.f32.mrb[50].mxu0  ;;  %v967_v54 = vpop.f32.mrb[50].mxu1 }
 0x160   : > { %1403 = vst.msk [vmem:[%s2060_s17 + $0x5c] sm:$0xf] %vm1379_vm1, %v1706_v47  ;;  %1435 = vst.msk [vmem:[%s2060_s17 + $0xdc] sm:$0xf] %vm1379_vm1, %v1738_v48  ;;  %v1019_v55 = vmul.f32 0.01, %v837_v49  ;;  %v840_v57 = vadd.f32 %v2050_v10, %v839_v53  ;;  %v968_v58 = vadd.f32 %v2050_v10, %v967_v54 }
 0x161   : > { %v1051_v56 = vmul.f32 0.01, %v965_v50  ;;  %v841_v59 = vpop.f32.mrb[51].mxu0  ;;  %v969_v60 = vpop.f32.mrb[51].mxu1 }
 0x162   : > { %v1083_v61 = vmax.f32 %v837_v49, %v1019_v55  ;;  %v1020_v63 = vmul.f32 0.01, %v840_v57  ;;  %v1052_v0 = vmul.f32 0.01, %v968_v58 }
 0x163   : > { %v1115_v62 = vmax.f32 %v965_v50, %v1051_v56 }
 0x164   : > { %v1707_v1 = vpack.c.bf16 %v1083_v61, %v1083_v61  ;;  %v1084_v3 = vmax.f32 %v840_v57, %v1020_v63  ;;  %v1116_v4 = vmax.f32 %v968_v58, %v1052_v0 }
 0x165   : > { %v1739_v2 = vpack.c.bf16 %v1115_v62, %v1115_v62  ;;  %v844_v5 = vpop.f32.mrb[52].mxu0  ;;  %v972_v6 = vpop.f32.mrb[52].mxu1 }
 0x166   : > { %1404 = vst.msk [vmem:[%s2060_s17 + $0x60] sm:$0xf] %vm1379_vm1, %v1707_v1  ;;  %v1708_v7 = vpack.c.bf16 %v1084_v3, %v1084_v3  ;;  %v1740_v8 = vpack.c.bf16 %v1116_v4, %v1116_v4  ;;  %v845_v9 = vadd.f32 %v2050_v10, %v844_v5  ;;  %v973_v11 = vadd.f32 %v2050_v10, %v972_v6  ;;  %v846_v12 = vpop.f32.mrb[53].mxu0  ;;  %v974_v13 = vpop.f32.mrb[53].mxu1 }
 0x167   : > { %1436 = vst.msk [vmem:[%s2060_s17 + $0xe0] sm:$0xf] %vm1379_vm1, %v1739_v2  ;;  %v847_v14 = vpop.f32.mrb[54].mxu0  ;;  %v975_v15 = vpop.f32.mrb[54].mxu1 }
 0x168   : > { %1405 = vst.msk [vmem:[%s2060_s17 + $0x64] sm:$0xf] %vm1379_vm1, %v1708_v7  ;;  %1437 = vst.msk [vmem:[%s2060_s17 + $0xe4] sm:$0xf] %vm1379_vm1, %v1740_v8  ;;  %v1021_v16 = vmul.f32 0.01, %v845_v9  ;;  %v848_v18 = vadd.f32 %v2050_v10, %v847_v14  ;;  %v976_v19 = vadd.f32 %v2050_v10, %v975_v15 }
 0x169   : > { %v1053_v17 = vmul.f32 0.01, %v973_v11  ;;  %v849_v20 = vpop.f32.mrb[55].mxu0  ;;  %v977_v21 = vpop.f32.mrb[55].mxu1 }
 0x16a   : > { %v1085_v22 = vmax.f32 %v845_v9, %v1021_v16  ;;  %v1022_v24 = vmul.f32 0.01, %v848_v18  ;;  %v1054_v25 = vmul.f32 0.01, %v976_v19 }
 0x16b   : > { %v1117_v23 = vmax.f32 %v973_v11, %v1053_v17 }
 0x16c   : > { %v1709_v26 = vpack.c.bf16 %v1085_v22, %v1085_v22  ;;  %v1086_v28 = vmax.f32 %v848_v18, %v1022_v24  ;;  %v1118_v29 = vmax.f32 %v976_v19, %v1054_v25 }
 0x16d   : > { %v1741_v27 = vpack.c.bf16 %v1117_v23, %v1117_v23  ;;  %v852_v30 = vpop.f32.mrb[56].mxu0  ;;  %v980_v31 = vpop.f32.mrb[56].mxu1 }
 0x16e   : > { %1406 = vst.msk [vmem:[%s2060_s17 + $0x68] sm:$0xf] %vm1379_vm1, %v1709_v26  ;;  %v1710_v32 = vpack.c.bf16 %v1086_v28, %v1086_v28  ;;  %v1742_v33 = vpack.c.bf16 %v1118_v29, %v1118_v29  ;;  %v853_v34 = vadd.f32 %v2050_v10, %v852_v30  ;;  %v981_v35 = vadd.f32 %v2050_v10, %v980_v31  ;;  %v854_v36 = vpop.f32.mrb[57].mxu0  ;;  %v982_v37 = vpop.f32.mrb[57].mxu1 }
 0x16f   : > { %1438 = vst.msk [vmem:[%s2060_s17 + $0xe8] sm:$0xf] %vm1379_vm1, %v1741_v27  ;;  %v855_v38 = vpop.f32.mrb[58].mxu0  ;;  %v983_v39 = vpop.f32.mrb[58].mxu1 }
 0x170   : > { %1407 = vst.msk [vmem:[%s2060_s17 + $0x6c] sm:$0xf] %vm1379_vm1, %v1710_v32  ;;  %1439 = vst.msk [vmem:[%s2060_s17 + $0xec] sm:$0xf] %vm1379_vm1, %v1742_v33  ;;  %v1023_v40 = vmul.f32 0.01, %v853_v34  ;;  %v856_v42 = vadd.f32 %v2050_v10, %v855_v38  ;;  %v984_v43 = vadd.f32 %v2050_v10, %v983_v39 }
 0x171   : > { %v1055_v41 = vmul.f32 0.01, %v981_v35  ;;  %v857_v44 = vpop.f32.mrb[59].mxu0  ;;  %v985_v45 = vpop.f32.mrb[59].mxu1 }
 0x172   : > { %v1087_v46 = vmax.f32 %v853_v34, %v1023_v40  ;;  %v1024_v48 = vmul.f32 0.01, %v856_v42  ;;  %v1056_v49 = vmul.f32 0.01, %v984_v43 }
 0x173   : > { %v1119_v47 = vmax.f32 %v981_v35, %v1055_v41 }
 0x174   : > { %v1711_v50 = vpack.c.bf16 %v1087_v46, %v1087_v46  ;;  %v1088_v52 = vmax.f32 %v856_v42, %v1024_v48  ;;  %v1120_v53 = vmax.f32 %v984_v43, %v1056_v49 }
 0x175   : > { %v1743_v51 = vpack.c.bf16 %v1119_v47, %v1119_v47  ;;  %v860_v54 = vpop.f32.mrb[60].mxu0  ;;  %v988_v55 = vpop.f32.mrb[60].mxu1 }
 0x176   : > { %1408 = vst.msk [vmem:[%s2060_s17 + $0x70] sm:$0xf] %vm1379_vm1, %v1711_v50  ;;  %v1712_v56 = vpack.c.bf16 %v1088_v52, %v1088_v52  ;;  %v1744_v57 = vpack.c.bf16 %v1120_v53, %v1120_v53  ;;  %v861_v58 = vadd.f32 %v2050_v10, %v860_v54  ;;  %v989_v59 = vadd.f32 %v2050_v10, %v988_v55  ;;  %v862_v60 = vpop.f32.mrb[61].mxu0  ;;  %v990_v61 = vpop.f32.mrb[61].mxu1 }
 0x177   : > { %1440 = vst.msk [vmem:[%s2060_s17 + $0xf0] sm:$0xf] %vm1379_vm1, %v1743_v51  ;;  %v863_v62 = vpop.f32.mrb[62].mxu0  ;;  %v991_v63 = vpop.f32.mrb[62].mxu1 }
 0x178   : > { %1409 = vst.msk [vmem:[%s2060_s17 + $0x74] sm:$0xf] %vm1379_vm1, %v1712_v56  ;;  %1441 = vst.msk [vmem:[%s2060_s17 + $0xf4] sm:$0xf] %vm1379_vm1, %v1744_v57  ;;  %v1025_v0 = vmul.f32 0.01, %v861_v58  ;;  %v864_v2 = vadd.f32 %v2050_v10, %v863_v62  ;;  %v992_v3 = vadd.f32 %v2050_v10, %v991_v63 }
 0x179   : > { %v1057_v1 = vmul.f32 0.01, %v989_v59  ;;  %v865_v4 = vpop.f32.mrb[63].mxu0  ;;  %v993_v5 = vpop.f32.mrb[63].mxu1 }
 0x17a   : > { %v1089_v6 = vmax.f32 %v861_v58, %v1025_v0  ;;  %v1026_v8 = vmul.f32 0.01, %v864_v2  ;;  %v1058_v9 = vmul.f32 0.01, %v992_v3 }
 0x17b   : > { %v1121_v7 = vmax.f32 %v989_v59, %v1057_v1 }
 0x17c   : > { %v1713_v11 = vpack.c.bf16 %v1089_v6, %v1089_v6  ;;  %v1090_v13 = vmax.f32 %v864_v2, %v1026_v8  ;;  %v1122_v14 = vmax.f32 %v992_v3, %v1058_v9 }
 0x17d   : > { %v1745_v12 = vpack.c.bf16 %v1121_v7, %v1121_v7 }
 0x17e   : > { %1410 = vst.msk [vmem:[%s2060_s17 + $0x78] sm:$0xf] %vm1379_vm1, %v1713_v11  ;;  %v1714_v15 = vpack.c.bf16 %v1090_v13, %v1090_v13  ;;  %v1746_v16 = vpack.c.bf16 %v1122_v14, %v1122_v14 }
 0x17f   : > { %1442 = vst.msk [vmem:[%s2060_s17 + $0xf8] sm:$0xf] %vm1379_vm1, %v1745_v12 }
 0x180   : > { %1411 = vst.msk [vmem:[%s2060_s17 + $0x7c] sm:$0xf] %vm1379_vm1, %v1714_v15  ;;  %1443 = vst.msk [vmem:[%s2060_s17 + $0xfc] sm:$0xf] %vm1379_vm1, %v1746_v16 }
 0x181 PF: > { %s13_s12 = sadd.s32 1, %s1885_s12  }
 0x182   : > { %p10_p4 = scmp.ge.s32.totalorder %s13_s12, 6  }
 0x184   :  { %12 = sbr.rel (!%p10_p4) target bundleno = 1 (0x1), region = 62 }

// kernel: appearance_autoencoder_forward.12
= control target key start
LH: loop header
LB: loop body
LE: loop exit
PB: predicated region body
PF: predicated region fallthrough
CT: control target
= control target key end

     0   :  { %v2458_v0 = vmov 0   ;;  %vm774_vm0 = vcmask 261120   ;;  %vm1833_vm1 = vcmask 519168   ;;  %s3336_s1 = inlined_call_operand.vmem [shape: bf16[288,64], index: 1, kind: input, shape index: {}]   ;;  %s3337_s0 = inlined_call_operand.vmem [shape: bf16[512,288], index: 0, kind: input, shape index: {}]   ;;  %s3338_s2 = inlined_call_operand.vmem [shape: f32[1,64], index: 2, kind: input, shape index: {}]   ;;  %s3339_s3 = inlined_call_operand.vmem [shape: bf16[512,64], index: 3, kind: output, shape index: {}]  }
   0x1   :  { %871 = vmatprep.subr.bf16.mxu0 %v2458_v0  ;;  %2279 = vmatprep.subr.bf16.mxu1 %v2458_v0  ;;  %v2312_v1 = vld [vmem:[%s3336_s1] sm:$0xff]   ;;  %v2313_v2 = vld [vmem:[%s3336_s1 + $0x8] sm:$0xff]   ;;  %v2314_v3 = vld [vmem:[%s3336_s1 + $0x10] sm:$0xff]  }
   0x2   :  { %872 = vmatpush1.bf16.msra.mxu0 %v2312_v1  ;;  %2295 = vmatpush1.bf16.msra.mxu1 %v2312_v1  ;;  %v2315_v4 = vld [vmem:[%s3336_s1 + $0x18] sm:$0xff]   ;;  %v2316_v5 = vld [vmem:[%s3336_s1 + $0x20] sm:$0xff]   ;;  %v2317_v7 = vld [vmem:[%s3336_s1 + $0x28] sm:$0xff]  }
   0x3   :  { %873 = vmatprep.subr.bf16.mxu0 %v2458_v0  ;;  %2280 = vmatprep.subr.bf16.mxu1 %v2458_v0  ;;  %v2330_v6 = vld [vmem:[%s3337_s0 + $0x4] ss:$12 sps:$4 sm:$0xff]   ;;  %v2319_v10 = vld [vmem:[%s3336_s1 + $0x38] sm:$0xff]   ;;  %v2321_v12 = vld [vmem:[%s3336_s1 + $0x48] sm:$0xff]  }
   0x4   :  { %v2333_v8 = vld [vmem:[%s3337_s0 + $0x244] ss:$12 sps:$4 sm:$0xff]   ;;  %903 = vmatprep.mubr.bf16.mxu0 %v2330_v6  ;;  %v2323_v14 = vld [vmem:[%s3336_s1 + $0x58] sm:$0xff]   ;;  %v2325_v16 = vld [vmem:[%s3336_s1 + $0x68] sm:$0xff]  }
   0x5   :  { %1095 = vmatprep.mubr.bf16.mxu1 %v2333_v8  ;;  %v2318_v9 = vld [vmem:[%s3336_s1 + $0x30] sm:$0xff]   ;;  %v2320_v11 = vld [vmem:[%s3336_s1 + $0x40] sm:$0xff]   ;;  %v2327_v18 = vld [vmem:[%s3336_s1 + $0x78] sm:$0xff]  }
   0x6   :  { %874 = vmatpush1.bf16.msra.mxu0 %v2313_v2  ;;  %2296 = vmatpush1.bf16.msra.mxu1 %v2313_v2  ;;  %v2322_v13 = vld [vmem:[%s3336_s1 + $0x50] sm:$0xff]   ;;  %v2324_v15 = vld [vmem:[%s3336_s1 + $0x60] sm:$0xff]   ;;  %v2335_v22 = vld [vmem:[%s3337_s0 + $0x1c] ss:$12 sps:$4 sm:$0xff]  }
   0x7   :  { %875 = vmatprep.subr.bf16.mxu0 %v2458_v0  ;;  %2281 = vmatprep.subr.bf16.mxu1 %v2458_v0  ;;  %v2326_v17 = vld [vmem:[%s3336_s1 + $0x70] sm:$0xff]   ;;  %v2334_v19 = vld [vmem:[%s3336_s1 + $0x80] sm:$0xff]   ;;  %v2337_v23 = vld [vmem:[%s3337_s0 + $0x25c] ss:$12 sps:$4 sm:$0xff]  }
   0x8   :  { %v2328_v20 = vld [vmem:[%s3337_s0] ss:$12 sps:$4 sm:$0xff]   ;;  %v2339_v25 = vld [vmem:[%s3337_s0 + $0x18] ss:$12 sps:$4 sm:$0xff]   ;;  %v2345_v29 = vld [vmem:[%s3337_s0 + $0x30] ss:$12 sps:$4 sm:$0xff]  }
   0x9   :  { %v2331_v21 = vld [vmem:[%s3337_s0 + $0x240] ss:$12 sps:$4 sm:$0xff]   ;;  %v2340_v26 = vld [vmem:[%s3337_s0 + $0x258] ss:$12 sps:$4 sm:$0xff]   ;;  %v2346_v30 = vld [vmem:[%s3337_s0 + $0x270] ss:$12 sps:$4 sm:$0xff]  }
   0xa   :  { %876 = vmatpush1.bf16.msra.mxu0 %v2314_v3  ;;  %2297 = vmatpush1.bf16.msra.mxu1 %v2314_v3  ;;  %v2359_v24 = vld [vmem:[%s3336_s1 + $0x88] sm:$0xff]   ;;  %v2341_v27 = vld [vmem:[%s3337_s0 + $0x34] ss:$12 sps:$4 sm:$0xff]   ;;  %v2353_v35 = vld [vmem:[%s3337_s0 + $0x64] ss:$12 sps:$4 sm:$0xff]  }
   0xb   :  { %877 = vmatprep.subr.bf16.mxu0 %v2458_v0  ;;  %2282 = vmatprep.subr.bf16.mxu1 %v2458_v0  ;;  %v2343_v28 = vld [vmem:[%s3337_s0 + $0x274] ss:$12 sps:$4 sm:$0xff]   ;;  %v2347_v31 = vld [vmem:[%s3337_s0 + $0x4c] ss:$12 sps:$4 sm:$0xff]   ;;  %v2355_v36 = vld [vmem:[%s3337_s0 + $0x2a4] ss:$12 sps:$4 sm:$0xff]  }
   0xc   :  { %v2349_v32 = vld [vmem:[%s3337_s0 + $0x28c] ss:$12 sps:$4 sm:$0xff]   ;;  %v2351_v33 = vld [vmem:[%s3337_s0 + $0x48] ss:$12 sps:$4 sm:$0xff]   ;;  %v2370_v45 = vld [vmem:[%s3337_s0 + $0x90] ss:$12 sps:$4 sm:$0xff]  }
   0xd   :  { %v2352_v34 = vld [vmem:[%s3337_s0 + $0x288] ss:$12 sps:$4 sm:$0xff]   ;;  %v2357_v37 = vld [vmem:[%s3337_s0 + $0x60] ss:$12 sps:$4 sm:$0xff]   ;;  %v2364_v41 = vld [vmem:[%s3337_s0 + $0x78] ss:$12 sps:$4 sm:$0xff]  }
   0xe   :  { %878 = vmatpush1.bf16.msra.mxu0 %v2315_v4  ;;  %2298 = vmatpush1.bf16.msra.mxu1 %v2315_v4  ;;  %v2358_v38 = vld [vmem:[%s3337_s0 + $0x2a0] ss:$12 sps:$4 sm:$0xff]   ;;  %v2360_v39 = vld [vmem:[%s3337_s0 + $0x7c] ss:$12 sps:$4 sm:$0xff]   ;;  %v2365_v42 = vld [vmem:[%s3337_s0 + $0x2b8] ss:$12 sps:$4 sm:$0xff]  }
   0xf   :  { %879 = vmatprep.subr.bf16.mxu0 %v2458_v0  ;;  %2283 = vmatprep.subr.bf16.mxu1 %v2458_v0  ;;  %v2362_v40 = vld [vmem:[%s3337_s0 + $0x2bc] ss:$12 sps:$4 sm:$0xff]   ;;  %v2366_v43 = vld [vmem:[%s3337_s0 + $0x94] ss:$12 sps:$4 sm:$0xff]   ;;  %v2372_v47 = vld [vmem:[%s3337_s0 + $0xac] ss:$12 sps:$4 sm:$0xff]  }
  0x10   :  { %v2368_v44 = vld [vmem:[%s3337_s0 + $0x2d4] ss:$12 sps:$4 sm:$0xff]   ;;  %v2371_v46 = vld [vmem:[%s3337_s0 + $0x2d0] ss:$12 sps:$4 sm:$0xff]   ;;  %v2374_v48 = vld [vmem:[%s3337_s0 + $0x2ec] ss:$12 sps:$4 sm:$0xff]  }
  0x11   :  { %v2376_v49 = vld [vmem:[%s3337_s0 + $0xa8] ss:$12 sps:$4 sm:$0xff]   ;;  %v2378_v51 = vld [vmem:[%s3337_s0 + $0xc4] ss:$12 sps:$4 sm:$0xff]   ;;  %v2381_v53 = vld [vmem:[%s3337_s0 + $0xc0] ss:$12 sps:$4 sm:$0xff]  }
  0x12   :  { %880 = vmatpush1.bf16.msra.mxu0 %v2316_v5  ;;  %2299 = vmatpush1.bf16.msra.mxu1 %v2316_v5  ;;  %v2377_v50 = vld [vmem:[%s3337_s0 + $0x2e8] ss:$12 sps:$4 sm:$0xff]   ;;  %v2382_v54 = vld [vmem:[%s3337_s0 + $0x20] ss:$12 sps:$4 sm:$0xff]   ;;  %v2385_v56 = vld [vmem:[%s3337_s0 + $0x38] ss:$12 sps:$4 sm:$0xff]  }
  0x13   :  { %881 = vmatprep.subr.bf16.mxu0 %v2458_v0  ;;  %2284 = vmatprep.subr.bf16.mxu1 %v2458_v0  ;;  %v2380_v52 = vld [vmem:[%s3337_s0 + $0x8] ss:$12 sps:$4 sm:$0xff]   ;;  %v2386_v57 = vld [vmem:[%s3337_s0 + $0xd8] ss:$12 sps:$4 sm:$0xff]   ;;  %v2387_v58 = vld [vmem:[%s3337_s0 + $0x50] ss:$12 sps:$4 sm:$0xff]  }
  0x14   :  { %v2383_v55 = vld [vmem:[%s3337_s0 + $0xdc] ss:$12 sps:$4 sm:$0xff]   ;;  %v2388_v59 = vld [vmem:[%s3337_s0 + $0xf4] ss:$12 sps:$4 sm:$0xff]   ;;  %v2393_v63 = vld [vmem:[%s3337_s0 + $0x10c] ss:$12 sps:$4 sm:$0xff]  }
  0x15   :  { %v2390_v60 = vld [vmem:[%s3337_s0 + $0x68] ss:$12 sps:$4 sm:$0xff]   ;;  %v2391_v61 = vld [vmem:[%s3337_s0 + $0xf0] ss:$12 sps:$4 sm:$0xff]   ;;  %v2392_v62 = vld [vmem:[%s3337_s0 + $0x80] ss:$12 sps:$4 sm:$0xff]  }
  0x16   :  { %882 = vmatpush1.bf16.msra.mxu0 %v2317_v7  ;;  %2300 = vmatpush1.bf16.msra.mxu1 %v2317_v7  ;;  %v2396_v1 = vld [vmem:[%s3337_s0 + $0x108] ss:$12 sps:$4 sm:$0xff]   ;;  %v2397_v2 = vld [vmem:[%s3337_s0 + $0xb0] ss:$12 sps:$4 sm:$0xff]   ;;  %v2401_v5 = vld [vmem:[%s3337_s0 + $0x120] ss:$12 sps:$4 sm:$0xff]  }
  0x17   :  { %883 = vmatprep.subr.bf16.mxu0 %v2458_v0  ;;  %2285 = vmatprep.subr.bf16.mxu1 %v2458_v0  ;;  %v2398_v3 = vld [vmem:[%s3337_s0 + $0x124] ss:$12 sps:$4 sm:$0xff]   ;;  %v2400_v4 = vld [vmem:[%s3337_s0 + $0xc8] ss:$12 sps:$4 sm:$0xff]   ;;  %v2402_v6 = vld [vmem:[%s3337_s0 + $0xe0] ss:$12 sps:$4 sm:$0xff]  }
  0x18   :  { %v2403_v7 = vld [vmem:[%s3337_s0 + $0x13c] ss:$12 sps:$4 sm:$0xff]   ;;  %v2405_v8 = vld [vmem:[%s3337_s0 + $0xf8] ss:$12 sps:$4 sm:$0xff]  }
  0x1a   :  { %884 = vmatpush1.bf16.msra.mxu0 %v2318_v9  ;;  %2301 = vmatpush1.bf16.msra.mxu1 %v2318_v9  ;;  %v2406_v9 = vld [vmem:[%s3337_s0 + $0x138] ss:$12 sps:$4 sm:$0xff]  }
  0x1b   :  { %885 = vmatprep.subr.bf16.mxu0 %v2458_v0  ;;  %2286 = vmatprep.subr.bf16.mxu1 %v2458_v0 }
  0x1e   :  { %886 = vmatpush1.bf16.msra.mxu0 %v2319_v10  ;;  %2302 = vmatpush1.bf16.msra.mxu1 %v2319_v10  ;;  %v2407_v10 = vld [vmem:[%s3337_s0 + $0x110] ss:$12 sps:$4 sm:$0xff]  }
  0x1f   :  { %887 = vmatprep.subr.bf16.mxu0 %v2458_v0  ;;  %2287 = vmatprep.subr.bf16.mxu1 %v2458_v0 }
  0x22   :  { %888 = vmatpush1.bf16.msra.mxu0 %v2320_v11  ;;  %2303 = vmatpush1.bf16.msra.mxu1 %v2320_v11  ;;  %v2408_v11 = vld [vmem:[%s3337_s0 + $0x154] ss:$12 sps:$4 sm:$0xff]  }
  0x23   :  { %889 = vmatprep.subr.bf16.mxu0 %v2458_v0  ;;  %2288 = vmatprep.subr.bf16.mxu1 %v2458_v0 }
  0x26   :  { %890 = vmatpush1.bf16.msra.mxu0 %v2321_v12  ;;  %2304 = vmatpush1.bf16.msra.mxu1 %v2321_v12  ;;  %v2410_v12 = vld [vmem:[%s3337_s0 + $0x128] ss:$12 sps:$4 sm:$0xff]  }
  0x27   :  { %891 = vmatprep.subr.bf16.mxu0 %v2458_v0  ;;  %2289 = vmatprep.subr.bf16.mxu1 %v2458_v0 }
  0x2a   :  { %892 = vmatpush1.bf16.msra.mxu0 %v2322_v13  ;;  %2305 = vmatpush1.bf16.msra.mxu1 %v2322_v13  ;;  %v2411_v13 = vld [vmem:[%s3337_s0 + $0x150] ss:$12 sps:$4 sm:$0xff]  }
  0x2b   :  { %893 = vmatprep.subr.bf16.mxu0 %v2458_v0  ;;  %2290 = vmatprep.subr.bf16.mxu1 %v2458_v0 }
  0x2e   :  { %894 = vmatpush1.bf16.msra.mxu0 %v2323_v14  ;;  %2306 = vmatpush1.bf16.msra.mxu1 %v2323_v14  ;;  %v2412_v14 = vld [vmem:[%s3337_s0 + $0x140] ss:$12 sps:$4 sm:$0xff]  }
  0x2f   :  { %895 = vmatprep.subr.bf16.mxu0 %v2458_v0  ;;  %2291 = vmatprep.subr.bf16.mxu1 %v2458_v0 }
  0x32   :  { %896 = vmatpush1.bf16.msra.mxu0 %v2324_v15  ;;  %2307 = vmatpush1.bf16.msra.mxu1 %v2324_v15  ;;  %v2413_v15 = vld [vmem:[%s3337_s0 + $0x16c] ss:$12 sps:$4 sm:$0xff]  }
  0x33   :  { %897 = vmatprep.subr.bf16.mxu0 %v2458_v0  ;;  %2292 = vmatprep.subr.bf16.mxu1 %v2458_v0 }
  0x36   :  { %898 = vmatpush1.bf16.msra.mxu0 %v2325_v16  ;;  %2308 = vmatpush1.bf16.msra.mxu1 %v2325_v16  ;;  %v2415_v16 = vld [vmem:[%s3337_s0 + $0x158] ss:$12 sps:$4 sm:$0xff]  }
  0x37   :  { %899 = vmatprep.subr.bf16.mxu0 %v2458_v0  ;;  %2293 = vmatprep.subr.bf16.mxu1 %v2458_v0 }
  0x3a   :  { %900 = vmatpush1.bf16.msra.mxu0 %v2326_v17  ;;  %2309 = vmatpush1.bf16.msra.mxu1 %v2326_v17  ;;  %v2416_v17 = vld [vmem:[%s3337_s0 + $0x168] ss:$12 sps:$4 sm:$0xff]  }
  0x3b   :  { %901 = vmatprep.subr.bf16.mxu0 %v2458_v0  ;;  %2294 = vmatprep.subr.bf16.mxu1 %v2458_v0  ;;  %v2395_v0 = vld [vmem:[%s3337_s0 + $0x98] ss:$12 sps:$4 sm:$0xff]  }
  0x3e   :  { %902 = vmatpush1.bf16.msra.mxu0 %v2327_v18  ;;  %2310 = vmatpush1.bf16.msra.mxu1 %v2327_v18  ;;  %v2417_v18 = vld [vmem:[%s3337_s0 + $0x170] ss:$12 sps:$4 sm:$0xff]  }
  0x3f   :  { %2211 = vmatprep.subr.bf16.mxu1 %v2334_v19 }
  0x41   :  { %904 = vmatmul.mubr.bf16.vlgmr.msra.gmra.mrb[0].mxu0 %v2328_v20  ;;  %1096 = vmatmul.mubr.bf16.vlgmr.msra.gmra.mrb[0].mxu1 %v2331_v21  ;;  %v2420_v20 = vld [vmem:[%s3337_s0 + $0x188] ss:$12 sps:$4 sm:$0xff]   ;;  %v2421_v21 = vld [vmem:[%s3337_s0 + $0x180] ss:$12 sps:$4 sm:$0xff]  }
  0x42   :  { %2212 = vmatpush3.bf16.msra.mxu1 %v2334_v19  ;;  %911 = vmatprep.mubr.bf16.mxu0 %v2335_v22  ;;  %v2418_v19 = vld [vmem:[%s3337_s0 + $0x184] ss:$12 sps:$4 sm:$0xff]   ;;  %v2422_v22 = vld [vmem:[%s3337_s0 + $0x1a0] ss:$12 sps:$4 sm:$0xff]  }
  0x43   :  { %1103 = vmatprep.mubr.bf16.mxu1 %v2337_v23  ;;  %2213 = vmatprep.subr.bf16.mxu1 %v2359_v24  ;;  %v2423_v23 = vld [vmem:[%s3337_s0 + $0x19c] ss:$12 sps:$4 sm:$0xff]  }
  0x46   :  { %2214 = vmatpush3.bf16.msra.mxu1 %v2359_v24  ;;  %v2425_v24 = vld [vmem:[%s3337_s0 + $0x1b8] ss:$12 sps:$4 sm:$0xff]  }
  0x49   :  { %912 = vmatmul.mubr.bf16.gmra.mrb[4].mxu0 %v2339_v25  ;;  %1104 = vmatmul.mubr.bf16.gmra.mrb[4].mxu1 %v2340_v26  ;;  %v2426_v25 = vld [vmem:[%s3337_s0 + $0x198] ss:$12 sps:$4 sm:$0xff]   ;;  %v2427_v26 = vld [vmem:[%s3337_s0 + $0x1d0] ss:$12 sps:$4 sm:$0xff]  }
  0x4a   :  { %919 = vmatprep.mubr.bf16.mxu0 %v2341_v27  ;;  %1111 = vmatprep.mubr.bf16.mxu1 %v2343_v28  ;;  %v2428_v27 = vld [vmem:[%s3337_s0 + $0x1b4] ss:$12 sps:$4 sm:$0xff]  }
  0x4b   :  { %v2430_v28 = vld [vmem:[%s3337_s0 + $0x1e8] ss:$12 sps:$4 sm:$0xff]  }
  0x51   :  { %920 = vmatmul.mubr.bf16.gmra.mrb[8].mxu0 %v2345_v29  ;;  %1112 = vmatmul.mubr.bf16.gmra.mrb[8].mxu1 %v2346_v30  ;;  %v2431_v29 = vld [vmem:[%s3337_s0 + $0x1b0] ss:$12 sps:$4 sm:$0xff]   ;;  %v2432_v30 = vld [vmem:[%s3337_s0 + $0x200] ss:$12 sps:$4 sm:$0xff]  }
  0x52   :  { %927 = vmatprep.mubr.bf16.mxu0 %v2347_v31  ;;  %1119 = vmatprep.mubr.bf16.mxu1 %v2349_v32  ;;  %v2433_v31 = vld [vmem:[%s3337_s0 + $0x1cc] ss:$12 sps:$4 sm:$0xff]  }
  0x53   :  { %v2435_v32 = vld [vmem:[%s3337_s0 + $0x218] ss:$12 sps:$4 sm:$0xff]  }
  0x59   :  { %928 = vmatmul.mubr.bf16.gmra.mrb[12].mxu0 %v2351_v33  ;;  %1120 = vmatmul.mubr.bf16.gmra.mrb[12].mxu1 %v2352_v34  ;;  %v2436_v33 = vld [vmem:[%s3337_s0 + $0x1c8] ss:$12 sps:$4 sm:$0xff]   ;;  %v2437_v34 = vld [vmem:[%s3337_s0 + $0x230] ss:$12 sps:$4 sm:$0xff]  }
  0x5a   :  { %935 = vmatprep.mubr.bf16.mxu0 %v2353_v35  ;;  %1127 = vmatprep.mubr.bf16.mxu1 %v2355_v36  ;;  %v2438_v35 = vld [vmem:[%s3337_s0 + $0x1e4] ss:$12 sps:$4 sm:$0xff]   ;;  %v2440_v36 = vld [vmem:[%s3337_s0 + $0x248] ss:$12 sps:$4 sm:$0xff]  }
  0x61   :  { %936 = vmatmul.mubr.bf16.gmra.mrb[16].mxu0 %v2357_v37  ;;  %1128 = vmatmul.mubr.bf16.gmra.mrb[16].mxu1 %v2358_v38  ;;  %v2441_v37 = vld [vmem:[%s3337_s0 + $0x1e0] ss:$12 sps:$4 sm:$0xff]  }
  0x62   :  { %943 = vmatprep.mubr.bf16.mxu0 %v2360_v39  ;;  %1135 = vmatprep.mubr.bf16.mxu1 %v2362_v40  ;;  %v2442_v38 = vld [vmem:[%s3337_s0 + $0x260] ss:$12 sps:$4 sm:$0xff]   ;;  %v2443_v39 = vld [vmem:[%s3337_s0 + $0x1fc] ss:$12 sps:$4 sm:$0xff]   ;;  %v2445_v40 = vld [vmem:[%s3337_s0 + $0x278] ss:$12 sps:$4 sm:$0xff]  }
  0x69   :  { %944 = vmatmul.mubr.bf16.gmra.mrb[20].mxu0 %v2364_v41  ;;  %1136 = vmatmul.mubr.bf16.gmra.mrb[20].mxu1 %v2365_v42  ;;  %v2446_v41 = vld [vmem:[%s3337_s0 + $0x1f8] ss:$12 sps:$4 sm:$0xff]   ;;  %v2447_v42 = vld [vmem:[%s3337_s0 + $0x290] ss:$12 sps:$4 sm:$0xff]  }
  0x6a   :  { %951 = vmatprep.mubr.bf16.mxu0 %v2366_v43  ;;  %1143 = vmatprep.mubr.bf16.mxu1 %v2368_v44  ;;  %v2448_v43 = vld [vmem:[%s3337_s0 + $0x214] ss:$12 sps:$4 sm:$0xff]  }
  0x6b   :  { %v2450_v44 = vld [vmem:[%s3337_s0 + $0x2a8] ss:$12 sps:$4 sm:$0xff]  }
  0x71   :  { %952 = vmatmul.mubr.bf16.gmra.mrb[24].mxu0 %v2370_v45  ;;  %1144 = vmatmul.mubr.bf16.gmra.mrb[24].mxu1 %v2371_v46  ;;  %v2451_v45 = vld [vmem:[%s3337_s0 + $0x210] ss:$12 sps:$4 sm:$0xff]   ;;  %v2452_v46 = vld [vmem:[%s3337_s0 + $0x2c0] ss:$12 sps:$4 sm:$0xff]  }
  0x72   :  { %959 = vmatprep.mubr.bf16.mxu0 %v2372_v47  ;;  %1151 = vmatprep.mubr.bf16.mxu1 %v2374_v48  ;;  %v2453_v47 = vld [vmem:[%s3337_s0 + $0x22c] ss:$12 sps:$4 sm:$0xff]  }
  0x73   :  { %v2455_v48 = vld [vmem:[%s3337_s0 + $0x2d8] ss:$12 sps:$4 sm:$0xff]  }
  0x79   :  { %960 = vmatmul.mubr.bf16.gmra.mrb[28].mxu0 %v2376_v49  ;;  %1152 = vmatmul.mubr.bf16.gmra.mrb[28].mxu1 %v2377_v50  ;;  %v2456_v49 = vld [vmem:[%s3337_s0 + $0x228] ss:$12 sps:$4 sm:$0xff]   ;;  %v2457_v50 = vld [vmem:[%s3337_s0 + $0x2f0] ss:$12 sps:$4 sm:$0xff]  }
  0x7a   :  { %967 = vmatprep.mubr.bf16.mxu0 %v2378_v51  ;;  %2215 = vmatprep.mubr.msk.bf16.mxu1 %vm774_vm0, %v2380_v52 }
  0x81   :  { %968 = vmatmul.mubr.bf16.gmra.mrb[32].mxu0 %v2381_v53  ;;  %2216 = vmatmul.mubr.msk.bf16.vlgmr.msra.gmra.mrb[32].mxu1 %vm774_vm0, %v2382_v54 }
  0x82   :  { %975 = vmatprep.mubr.bf16.mxu0 %v2383_v55  ;;  %2219 = vmatprep.mubr.msk.bf16.mxu1 %vm774_vm0, %v2385_v56 }
  0x89   :  { %976 = vmatmul.mubr.bf16.gmra.mrb[36].mxu0 %v2386_v57  ;;  %2220 = vmatmul.mubr.msk.bf16.gmra.mrb[36].mxu1 %vm774_vm0, %v2387_v58 }
  0x8a   :  { %983 = vmatprep.mubr.bf16.mxu0 %v2388_v59  ;;  %2223 = vmatprep.mubr.msk.bf16.mxu1 %vm774_vm0, %v2390_v60 }
  0x91   :  { %984 = vmatmul.mubr.bf16.gmra.mrb[40].mxu0 %v2391_v61  ;;  %2224 = vmatmul.mubr.msk.bf16.gmra.mrb[40].mxu1 %vm774_vm0, %v2392_v62 }
  0x92   :  { %991 = vmatprep.mubr.bf16.mxu0 %v2393_v63  ;;  %2227 = vmatprep.mubr.msk.bf16.mxu1 %vm774_vm0, %v2395_v0 }
  0x99   :  { %992 = vmatmul.mubr.bf16.gmra.mrb[44].mxu0 %v2396_v1  ;;  %2228 = vmatmul.mubr.msk.bf16.gmra.mrb[44].mxu1 %vm774_vm0, %v2397_v2 }
  0x9a   :  { %999 = vmatprep.mubr.bf16.mxu0 %v2398_v3  ;;  %2231 = vmatprep.mubr.msk.bf16.mxu1 %vm774_vm0, %v2400_v4 }
  0xa1   :  { %1000 = vmatmul.mubr.bf16.gmra.mrb[48].mxu0 %v2401_v5  ;;  %2232 = vmatmul.mubr.msk.bf16.gmra.mrb[48].mxu1 %vm774_vm0, %v2402_v6 }
  0xa2   :  { %1007 = vmatprep.mubr.bf16.mxu0 %v2403_v7  ;;  %2235 = vmatprep.mubr.msk.bf16.mxu1 %vm774_vm0, %v2405_v8 }
  0xa9   :  { %1008 = vmatmul.mubr.bf16.gmra.mrb[52].mxu0 %v2406_v9  ;;  %2236 = vmatmul.mubr.msk.bf16.gmra.mrb[52].mxu1 %vm774_vm0, %v2407_v10 }
  0xaa   :  { %1015 = vmatprep.mubr.bf16.mxu0 %v2408_v11  ;;  %2239 = vmatprep.mubr.msk.bf16.mxu1 %vm774_vm0, %v2410_v12 }
  0xb1   :  { %1016 = vmatmul.mubr.bf16.gmra.mrb[56].mxu0 %v2411_v13  ;;  %2240 = vmatmul.mubr.msk.bf16.gmra.mrb[56].mxu1 %vm774_vm0, %v2412_v14 }
  0xb2   :  { %1023 = vmatprep.mubr.bf16.mxu0 %v2413_v15  ;;  %2243 = vmatprep.mubr.msk.bf16.mxu1 %vm774_vm0, %v2415_v16 }
  0xb9   :  { %1024 = vmatmul.mubr.bf16.gmra.mrb[60].mxu0 %v2416_v17  ;;  %2244 = vmatmul.mubr.msk.bf16.gmra.mrb[60].mxu1 %vm774_vm0, %v2417_v18 }
  0xba   :  { %1031 = vmatprep.mubr.bf16.mxu0 %v2418_v19  ;;  %2247 = vmatprep.mubr.msk.bf16.mxu1 %vm774_vm0, %v2420_v20 }
  0xc1   :  { %1032 = vmatmul.mubr.bf16.gmra.mrb[64].mxu0 %v2421_v21  ;;  %2248 = vmatmul.mubr.msk.bf16.gmra.mrb[64].mxu1 %vm774_vm0, %v2422_v22 }
  0xc2   :  { %1039 = vmatprep.mubr.bf16.mxu0 %v2423_v23  ;;  %2251 = vmatprep.mubr.msk.bf16.mxu1 %vm774_vm0, %v2425_v24 }
  0xc9   :  { %1040 = vmatmul.mubr.bf16.gmra.mrb[68].mxu0 %v2426_v25  ;;  %2252 = vmatmul.mubr.msk.bf16.gmra.mrb[68].mxu1 %vm774_vm0, %v2427_v26 }
  0xca   :  { %1047 = vmatprep.mubr.bf16.mxu0 %v2428_v27  ;;  %2255 = vmatprep.mubr.msk.bf16.mxu1 %vm774_vm0, %v2430_v28 }
  0xd1   :  { %1048 = vmatmul.mubr.bf16.gmra.mrb[72].mxu0 %v2431_v29  ;;  %2256 = vmatmul.mubr.msk.bf16.gmra.mrb[72].mxu1 %vm774_vm0, %v2432_v30 }
  0xd2   :  { %1055 = vmatprep.mubr.bf16.mxu0 %v2433_v31  ;;  %2259 = vmatprep.mubr.msk.bf16.mxu1 %vm774_vm0, %v2435_v32 }
  0xd9   :  { %1056 = vmatmul.mubr.bf16.gmra.mrb[76].mxu0 %v2436_v33  ;;  %2260 = vmatmul.mubr.msk.bf16.gmra.mrb[76].mxu1 %vm774_vm0, %v2437_v34 }
  0xda   :  { %1063 = vmatprep.mubr.bf16.mxu0 %v2438_v35  ;;  %2263 = vmatprep.mubr.msk.bf16.mxu1 %vm774_vm0, %v2440_v36 }
  0xe1   :  { %1064 = vmatmul.mubr.bf16.gmra.mrb[80].mxu0 %v2441_v37  ;;  %2264 = vmatmul.mubr.msk.bf16.gmra.mrb[80].mxu1 %vm774_vm0, %v2442_v38 }
  0xe2   :  { %1071 = vmatprep.mubr.bf16.mxu0 %v2443_v39  ;;  %2267 = vmatprep.mubr.msk.bf16.mxu1 %vm774_vm0, %v2445_v40 }
  0xe9   :  { %1072 = vmatmul.mubr.bf16.gmra.mrb[84].mxu0 %v2446_v41  ;;  %2268 = vmatmul.mubr.msk.bf16.gmra.mrb[84].mxu1 %vm774_vm0, %v2447_v42 }
  0xea   :  { %1079 = vmatprep.mubr.bf16.mxu0 %v2448_v43  ;;  %2271 = vmatprep.mubr.msk.bf16.mxu1 %vm774_vm0, %v2450_v44 }
  0xf1   :  { %1080 = vmatmul.mubr.bf16.gmra.mrb[88].mxu0 %v2451_v45  ;;  %2272 = vmatmul.mubr.msk.bf16.gmra.mrb[88].mxu1 %vm774_vm0, %v2452_v46 }
  0xf2   :  { %1087 = vmatprep.mubr.bf16.mxu0 %v2453_v47  ;;  %2275 = vmatprep.mubr.msk.bf16.mxu1 %vm774_vm0, %v2455_v48 }
  0xf9   :  { %1088 = vmatmul.mubr.bf16.gmra.mrb[92].mxu0 %v2456_v49  ;;  %2276 = vmatmul.mubr.msk.bf16.gmra.mrb[92].mxu1 %vm774_vm0, %v2457_v50 }
 0x114   :  { %v2885_v51 = vpop.f32.mrb[0].mxu0  ;;  %v2887_v52 = vpop.f32.mrb[0].mxu1 }
 0x115   :  { %v907_v53 = vpop.f32.mrb[1].mxu0  ;;  %v1099_v54 = vpop.f32.mrb[1].mxu1 }
 0x116   :  { %v2889_v55 = vpop.f32.mrb[2].mxu0  ;;  %v2891_v56 = vpop.f32.mrb[2].mxu1  ;;  %v2948_v53 = vld [vmem:[%s3338_s2] ss:$0 sm:$0xff] }
 0x117   :  { %v910_v57 = vpop.f32.mrb[3].mxu0  ;;  %v1102_v58 = vpop.f32.mrb[3].mxu1 }
 0x118   :  { %v906_v57 = vadd.f32 %v2948_v53, %v2885_v51 }
 0x11c   :  { %v913_v59 = vpop.f32.mrb[4].mxu0  ;;  %v2893_v60 = vpop.f32.mrb[4].mxu1 }
 0x11d   :  { %v915_v61 = vpop.f32.mrb[5].mxu0  ;;  %v1107_v62 = vpop.f32.mrb[5].mxu1  ;;  %v914_v54 = vadd.f32 %v2948_v53, %v913_v59 }
 0x11e   :  { %v916_v63 = vpop.f32.mrb[6].mxu0  ;;  %v2895_v0 = vpop.f32.mrb[6].mxu1 }
 0x11f   :  { %v918_v1 = vpop.f32.mrb[7].mxu0  ;;  %v1110_v2 = vpop.f32.mrb[7].mxu1  ;;  %v917_v62 = vadd.f32 %v2948_v53, %v916_v63 }
 0x124   :  { %v2897_v3 = vpop.f32.mrb[8].mxu0  ;;  %v2899_v4 = vpop.f32.mrb[8].mxu1 }
 0x125   :  { %v923_v5 = vpop.f32.mrb[9].mxu0  ;;  %v1115_v6 = vpop.f32.mrb[9].mxu1 }
 0x126   :  { %v2901_v7 = vpop.f32.mrb[10].mxu0  ;;  %v2903_v8 = vpop.f32.mrb[10].mxu1  ;;  %v909_v6 = vadd.f32 %v2948_v53, %v2889_v55 }
 0x127   :  { %v926_v9 = vpop.f32.mrb[11].mxu0  ;;  %v1118_v10 = vpop.f32.mrb[11].mxu1 }
 0x12c   :  { %v2905_v11 = vpop.f32.mrb[12].mxu0  ;;  %v2907_v12 = vpop.f32.mrb[12].mxu1 }
 0x12d   :  { %v931_v13 = vpop.f32.mrb[13].mxu0  ;;  %v1123_v14 = vpop.f32.mrb[13].mxu1 }
 0x12e   :  { %v2909_v15 = vpop.f32.mrb[14].mxu0  ;;  %v2911_v16 = vpop.f32.mrb[14].mxu1 }
 0x12f   :  { %v934_v17 = vpop.f32.mrb[15].mxu0  ;;  %v1126_v18 = vpop.f32.mrb[15].mxu1 }
 0x134   :  { %v2913_v19 = vpop.f32.mrb[16].mxu0  ;;  %v2915_v20 = vpop.f32.mrb[16].mxu1 }
 0x135   :  { %v939_v21 = vpop.f32.mrb[17].mxu0  ;;  %v1131_v22 = vpop.f32.mrb[17].mxu1 }
 0x136   :  { %v2917_v23 = vpop.f32.mrb[18].mxu0  ;;  %v2919_v24 = vpop.f32.mrb[18].mxu1 }
 0x137   :  { %v942_v25 = vpop.f32.mrb[19].mxu0  ;;  %v1134_v26 = vpop.f32.mrb[19].mxu1 }
 0x13c   :  { %v2921_v27 = vpop.f32.mrb[20].mxu0  ;;  %v2923_v28 = vpop.f32.mrb[20].mxu1 }
 0x13d   :  { %v947_v29 = vpop.f32.mrb[21].mxu0  ;;  %v1139_v30 = vpop.f32.mrb[21].mxu1 }
 0x13e   :  { %v2925_v31 = vpop.f32.mrb[22].mxu0  ;;  %v2927_v32 = vpop.f32.mrb[22].mxu1  ;;  %v930_v29 = vadd.f32 %v2948_v53, %v2905_v11 }
 0x13f   :  { %v950_v33 = vpop.f32.mrb[23].mxu0  ;;  %v1142_v34 = vpop.f32.mrb[23].mxu1 }
 0x140   :  { %v922_v33 = vadd.f32 %v2948_v53, %v2897_v3  ;;  %v925_v3 = vadd.f32 %v2948_v53, %v2901_v7 }
 0x144   :  { %v2929_v35 = vpop.f32.mrb[24].mxu0  ;;  %v2931_v36 = vpop.f32.mrb[24].mxu1 }
 0x145   :  { %v955_v37 = vpop.f32.mrb[25].mxu0  ;;  %v1147_v38 = vpop.f32.mrb[25].mxu1 }
 0x146   :  { %v2933_v39 = vpop.f32.mrb[26].mxu0  ;;  %v2935_v40 = vpop.f32.mrb[26].mxu1 }
 0x147   :  { %v958_v41 = vpop.f32.mrb[27].mxu0  ;;  %v1150_v42 = vpop.f32.mrb[27].mxu1 }
 0x148   :  { %v933_v42 = vadd.f32 %v2948_v53, %v2909_v15 }
 0x14c   :  { %v2937_v43 = vpop.f32.mrb[28].mxu0  ;;  %v2939_v44 = vpop.f32.mrb[28].mxu1 }
 0x14d   :  { %v963_v45 = vpop.f32.mrb[29].mxu0  ;;  %v1155_v46 = vpop.f32.mrb[29].mxu1 }
 0x14e   :  { %v2941_v47 = vpop.f32.mrb[30].mxu0  ;;  %v2943_v48 = vpop.f32.mrb[30].mxu1 }
 0x14f   :  { %v966_v49 = vpop.f32.mrb[31].mxu0  ;;  %v1158_v50 = vpop.f32.mrb[31].mxu1 }
 0x154   :  { %v2953_v58 = vpop.f32.mrb[32].mxu0  ;;  %v2217_v61 = vpop.f32.mrb[32].mxu1 }
 0x155   :  { %v1203_v1 = vadd.f32 %v2217_v61, %v914_v54  ;;  %v971_v2 = vpop.f32.mrb[33].mxu0  ;;  %v1194_v5 = vpop.f32.mrb[33].mxu1 }
 0x156   :  { %v1195_v9 = vadd.f32 %v1194_v5, %v906_v57  ;;  %v2958_v10 = vpop.f32.mrb[34].mxu0  ;;  %v2218_v13 = vpop.f32.mrb[34].mxu1 }
 0x157   :  { %v1451_v14 = vmul.f32 0.01, %v1203_v1  ;;  %v1206_v59 = vadd.f32 %v2218_v13, %v917_v62  ;;  %v974_v17 = vpop.f32.mrb[35].mxu0  ;;  %v1197_v18 = vpop.f32.mrb[35].mxu1 }
 0x158   :  { %v1449_v51 = vmul.f32 0.01, %v1195_v9  ;;  %v1198_v21 = vadd.f32 %v1197_v18, %v909_v6 }
 0x159   :  { %v1515_v22 = vmax.f32 %v1203_v1, %v1451_v14  ;;  %v1452_v25 = vmul.f32 0.01, %v1206_v59 }
 0x15a   :  { %v1513_v63 = vmax.f32 %v1195_v9, %v1449_v51  ;;  %v1450_v26 = vmul.f32 0.01, %v1198_v21  ;;  %v938_v51 = vadd.f32 %v2948_v53, %v2913_v19  ;;  %v941_v19 = vadd.f32 %v2948_v53, %v2917_v23 }
 0x15b   :  { %v2115_v30 = vpack.c.bf16 %v1515_v22, %v1515_v22  ;;  %v1516_v55 = vmax.f32 %v1206_v59, %v1452_v25  ;;  %v946_v59 = vadd.f32 %v2948_v53, %v2921_v27 }
 0x15c   :  { %v2113_v34 = vpack.c.bf16 %v1513_v63, %v1513_v63  ;;  %v1514_v37 = vmax.f32 %v1198_v21, %v1450_v26  ;;  %v2964_v38 = vpop.f32.mrb[36].mxu0  ;;  %v2221_v41 = vpop.f32.mrb[36].mxu1  ;;  %v949_v26 = vadd.f32 %v2948_v53, %v2925_v31 }
 0x15d   :  { %1836 = vst.msk [vmem:[%s3339_s3 + $0x8] sm:$0xf] %vm1833_vm1, %v2115_v30  ;;  %v2116_v45 = vpack.c.bf16 %v1516_v55, %v1516_v55  ;;  %v1219_v11 = vadd.f32 %v2221_v41, %v930_v29  ;;  %v979_v46 = vpop.f32.mrb[37].mxu0  ;;  %v1210_v49 = vpop.f32.mrb[37].mxu1 }
 0x15e   :  { %1834 = vst.msk [vmem:[%s3339_s3] sm:$0xf] %vm1833_vm1, %v2113_v34  ;;  %v2114_v50 = vpack.c.bf16 %v1514_v37, %v1514_v37  ;;  %v1211_v54 = vadd.f32 %v1210_v49, %v922_v33  ;;  %v2978_v15 = vpop.f32.mrb[38].mxu0  ;;  %v2222_v57 = vpop.f32.mrb[38].mxu1 }
 0x15f   :  { %1837 = vst.msk [vmem:[%s3339_s3 + $0xc] sm:$0xf] %vm1833_vm1, %v2116_v45  ;;  %v1455_v61 = vmul.f32 0.01, %v1219_v11  ;;  %v1222_v62 = vadd.f32 %v2222_v57, %v933_v42  ;;  %v982_v1 = vpop.f32.mrb[39].mxu0  ;;  %v1213_v2 = vpop.f32.mrb[39].mxu1  ;;  %v962_v57 = vadd.f32 %v2948_v53, %v2937_v43 }
 0x160   :  { %1835 = vst.msk [vmem:[%s3339_s3 + $0x4] sm:$0xf] %vm1833_vm1, %v2114_v50  ;;  %v1453_v7 = vmul.f32 0.01, %v1211_v54  ;;  %v1214_v5 = vadd.f32 %v1213_v2, %v925_v3  ;;  %v954_v1 = vadd.f32 %v2948_v53, %v2929_v35 }
 0x161   :  { %v1519_v6 = vmax.f32 %v1219_v11, %v1455_v61  ;;  %v1456_v9 = vmul.f32 0.01, %v1222_v62 }
 0x162   :  { %v1517_v13 = vmax.f32 %v1211_v54, %v1453_v7  ;;  %v1454_v14 = vmul.f32 0.01, %v1214_v5 }
 0x163   :  { %v2119_v17 = vpack.c.bf16 %v1519_v6, %v1519_v6  ;;  %v1520_v18 = vmax.f32 %v1222_v62, %v1456_v9  ;;  %v965_v9 = vadd.f32 %v2948_v53, %v2941_v47 }
 0x164   :  { %v2117_v21 = vpack.c.bf16 %v1517_v13, %v1517_v13  ;;  %v1518_v22 = vmax.f32 %v1214_v5, %v1454_v14  ;;  %v2992_v25 = vpop.f32.mrb[40].mxu0  ;;  %v2225_v63 = vpop.f32.mrb[40].mxu1 }
 0x165   :  { %1840 = vst.msk [vmem:[%s3339_s3 + $0x18] sm:$0xf] %vm1833_vm1, %v2119_v17  ;;  %v2120_v29 = vpack.c.bf16 %v1520_v18, %v1520_v18  ;;  %v1235_v27 = vadd.f32 %v2225_v63, %v946_v59  ;;  %v987_v30 = vpop.f32.mrb[41].mxu0  ;;  %v1226_v55 = vpop.f32.mrb[41].mxu1  ;;  %v957_v17 = vadd.f32 %v2948_v53, %v2933_v39 }
 0x166   :  { %1838 = vst.msk [vmem:[%s3339_s3 + $0x10] sm:$0xf] %vm1833_vm1, %v2117_v21  ;;  %v2118_v33 = vpack.c.bf16 %v1518_v22, %v1518_v22  ;;  %v1227_v34 = vadd.f32 %v1226_v55, %v938_v51  ;;  %v3006_v31 = vpop.f32.mrb[42].mxu0  ;;  %v2226_v37 = vpop.f32.mrb[42].mxu1 }
 0x167   :  { %1841 = vst.msk [vmem:[%s3339_s3 + $0x1c] sm:$0xf] %vm1833_vm1, %v2120_v29  ;;  %v1459_v41 = vmul.f32 0.01, %v1235_v27  ;;  %v1238_v42 = vadd.f32 %v2226_v37, %v949_v26  ;;  %v990_v45 = vpop.f32.mrb[43].mxu0  ;;  %v1229_v11 = vpop.f32.mrb[43].mxu1 }
 0x168   :  { %1839 = vst.msk [vmem:[%s3339_s3 + $0x14] sm:$0xf] %vm1833_vm1, %v2118_v33  ;;  %v1457_v23 = vmul.f32 0.01, %v1227_v34  ;;  %v1230_v46 = vadd.f32 %v1229_v11, %v941_v19  ;;  %v978_v33 = vadd.f32 %v2948_v53, %v2964_v38 }
 0x169   :  { %v1523_v49 = vmax.f32 %v1235_v27, %v1459_v41  ;;  %v1460_v3 = vmul.f32 0.01, %v1238_v42  ;;  %v970_v41 = vadd.f32 %v2948_v53, %v2953_v58 }
 0x16a   :  { %v1521_v50 = vmax.f32 %v1227_v34, %v1457_v23  ;;  %v1458_v54 = vmul.f32 0.01, %v1230_v46 }
 0x16b   :  { %v2123_v61 = vpack.c.bf16 %v1523_v49, %v1523_v49  ;;  %v1524_v62 = vmax.f32 %v1238_v42, %v1460_v3 }
 0x16c   :  { %v2121_v2 = vpack.c.bf16 %v1521_v50, %v1521_v50  ;;  %v1522_v7 = vmax.f32 %v1230_v46, %v1458_v54  ;;  %v993_v5 = vpop.f32.mrb[44].mxu0  ;;  %v2229_v6 = vpop.f32.mrb[44].mxu1  ;;  %v981_v46 = vadd.f32 %v2948_v53, %v2978_v15  ;;  %v973_v54 = vadd.f32 %v2948_v53, %v2958_v10 }
 0x16d   :  { %1844 = vst.msk [vmem:[%s3339_s3 + $0x28] sm:$0xf] %vm1833_vm1, %v2123_v61  ;;  %v2124_v13 = vpack.c.bf16 %v1524_v62, %v1524_v62  ;;  %v1251_v14 = vadd.f32 %v2229_v6, %v962_v57  ;;  %v995_v43 = vpop.f32.mrb[45].mxu0  ;;  %v1242_v59 = vpop.f32.mrb[45].mxu1 }
 0x16e   :  { %1842 = vst.msk [vmem:[%s3339_s3 + $0x20] sm:$0xf] %vm1833_vm1, %v2121_v2  ;;  %v2122_v35 = vpack.c.bf16 %v1522_v7, %v1522_v7  ;;  %v1243_v18 = vadd.f32 %v1242_v59, %v954_v1  ;;  %v996_v47 = vpop.f32.mrb[46].mxu0  ;;  %v2230_v51 = vpop.f32.mrb[46].mxu1  ;;  %v994_v59 = vadd.f32 %v2948_v53, %v993_v5 }
 0x16f   :  { %1845 = vst.msk [vmem:[%s3339_s3 + $0x2c] sm:$0xf] %vm1833_vm1, %v2124_v13  ;;  %v1463_v21 = vmul.f32 0.01, %v1251_v14  ;;  %v1254_v22 = vadd.f32 %v2230_v51, %v965_v9  ;;  %v998_v63 = vpop.f32.mrb[47].mxu0  ;;  %v1245_v26 = vpop.f32.mrb[47].mxu1 }
 0x170   :  { %1843 = vst.msk [vmem:[%s3339_s3 + $0x24] sm:$0xf] %vm1833_vm1, %v2122_v35  ;;  %v1461_v39 = vmul.f32 0.01, %v1243_v18  ;;  %v1246_v29 = vadd.f32 %v1245_v26, %v957_v17  ;;  %v997_v26 = vadd.f32 %v2948_v53, %v996_v47 }
 0x171   :  { %v1527_v27 = vmax.f32 %v1251_v14, %v1463_v21  ;;  %v1464_v30 = vmul.f32 0.01, %v1254_v22 }
 0x172   :  { %v1525_v55 = vmax.f32 %v1243_v18, %v1461_v39  ;;  %v1462_v19 = vmul.f32 0.01, %v1246_v29  ;;  %v986_v18 = vadd.f32 %v2948_v53, %v2992_v25 }
 0x173   :  { %v2127_v34 = vpack.c.bf16 %v1527_v27, %v1527_v27  ;;  %v1528_v37 = vmax.f32 %v1254_v22, %v1464_v30  ;;  %v989_v30 = vadd.f32 %v2948_v53, %v3006_v31 }
 0x174   :  { %v2125_v42 = vpack.c.bf16 %v1525_v55, %v1525_v55  ;;  %v1526_v45 = vmax.f32 %v1246_v29, %v1462_v19  ;;  %v1001_v11 = vpop.f32.mrb[48].mxu0  ;;  %v2233_v23 = vpop.f32.mrb[48].mxu1 }
 0x175   :  { %1848 = vst.msk [vmem:[%s3339_s3 + $0x38] sm:$0xf] %vm1833_vm1, %v2127_v34  ;;  %v2128_v49 = vpack.c.bf16 %v1528_v37, %v1528_v37  ;;  %v1267_v3 = vadd.f32 %v2233_v23, %v978_v33  ;;  %v1003_v38 = vpop.f32.mrb[49].mxu0  ;;  %v1258_v50 = vpop.f32.mrb[49].mxu1 }
 0x176   :  { %1846 = vst.msk [vmem:[%s3339_s3 + $0x30] sm:$0xf] %vm1833_vm1, %v2125_v42  ;;  %v2126_v58 = vpack.c.bf16 %v1526_v45, %v1526_v45  ;;  %v1259_v57 = vadd.f32 %v1258_v50, %v970_v41  ;;  %v1004_v15 = vpop.f32.mrb[50].mxu0  ;;  %v2234_v61 = vpop.f32.mrb[50].mxu1 }
 0x177   :  { %1849 = vst.msk [vmem:[%s3339_s3 + $0x3c] sm:$0xf] %vm1833_vm1, %v2128_v49  ;;  %v1467_v62 = vmul.f32 0.01, %v1267_v3  ;;  %v1270_v1 = vadd.f32 %v2234_v61, %v981_v46  ;;  %v1006_v2 = vpop.f32.mrb[51].mxu0  ;;  %v1261_v7 = vpop.f32.mrb[51].mxu1 }
 0x178   :  { %1847 = vst.msk [vmem:[%s3339_s3 + $0x34] sm:$0xf] %vm1833_vm1, %v2126_v58  ;;  %v1465_v10 = vmul.f32 0.01, %v1259_v57  ;;  %v1262_v6 = vadd.f32 %v1261_v7, %v973_v54  ;;  %v1002_v54 = vadd.f32 %v2948_v53, %v1001_v11 }
 0x179   :  { %v1531_v9 = vmax.f32 %v1267_v3, %v1467_v62  ;;  %v1468_v13 = vmul.f32 0.01, %v1270_v1 }
 0x17a   :  { %v1529_v14 = vmax.f32 %v1259_v57, %v1465_v10  ;;  %v1466_v43 = vmul.f32 0.01, %v1262_v6 }
 0x17b   :  { %v2131_v17 = vpack.c.bf16 %v1531_v9, %v1531_v9  ;;  %v1532_v35 = vmax.f32 %v1270_v1, %v1468_v13  ;;  %v1005_v9 = vadd.f32 %v2948_v53, %v1004_v15 }
 0x17c   :  { %v2129_v51 = vpack.c.bf16 %v1529_v14, %v1529_v14  ;;  %v1530_v21 = vmax.f32 %v1262_v6, %v1466_v43  ;;  %v1009_v22 = vpop.f32.mrb[52].mxu0  ;;  %v2237_v63 = vpop.f32.mrb[52].mxu1 }
 0x17d   :  { %1852 = vst.msk [vmem:[%s3339_s3 + $0x48] sm:$0xf] %vm1833_vm1, %v2131_v17  ;;  %v2132_v39 = vpack.c.bf16 %v1532_v35, %v1532_v35  ;;  %v1283_v29 = vadd.f32 %v2237_v63, %v994_v59  ;;  %v1011_v27 = vpop.f32.mrb[53].mxu0  ;;  %v1274_v5 = vpop.f32.mrb[53].mxu1  ;;  %v1010_v3 = vadd.f32 %v2948_v53, %v1009_v22 }
 0x17e   :  { %1850 = vst.msk [vmem:[%s3339_s3 + $0x40] sm:$0xf] %vm1833_vm1, %v2129_v51  ;;  %v2130_v25 = vpack.c.bf16 %v1530_v21, %v1530_v21  ;;  %v1275_v55 = vadd.f32 %v1274_v5, %v986_v18  ;;  %v1012_v47 = vpop.f32.mrb[54].mxu0  ;;  %v2238_v19 = vpop.f32.mrb[54].mxu1 }
 0x17f   :  { %1853 = vst.msk [vmem:[%s3339_s3 + $0x4c] sm:$0xf] %vm1833_vm1, %v2132_v39  ;;  %v1471_v33 = vmul.f32 0.01, %v1283_v29  ;;  %v1286_v34 = vadd.f32 %v2238_v19, %v997_v26  ;;  %v1014_v37 = vpop.f32.mrb[55].mxu0  ;;  %v1277_v41 = vpop.f32.mrb[55].mxu1  ;;  %v1013_v1 = vadd.f32 %v2948_v53, %v1012_v47 }
 0x180   :  { %1851 = vst.msk [vmem:[%s3339_s3 + $0x44] sm:$0xf] %vm1833_vm1, %v2130_v25  ;;  %v1469_v31 = vmul.f32 0.01, %v1275_v55  ;;  %v1278_v42 = vadd.f32 %v1277_v41, %v989_v30 }
 0x181   :  { %v1535_v45 = vmax.f32 %v1283_v29, %v1471_v33  ;;  %v1472_v23 = vmul.f32 0.01, %v1286_v34 }
 0x182   :  { %v1533_v46 = vmax.f32 %v1275_v55, %v1469_v31  ;;  %v1470_v49 = vmul.f32 0.01, %v1278_v42 }
 0x183   :  { %v2135_v38 = vpack.c.bf16 %v1535_v45, %v1535_v45  ;;  %v1536_v50 = vmax.f32 %v1286_v34, %v1472_v23 }
 0x184   :  { %v2133_v58 = vpack.c.bf16 %v1533_v46, %v1533_v46  ;;  %v1534_v57 = vmax.f32 %v1278_v42, %v1470_v49  ;;  %v1017_v61 = vpop.f32.mrb[56].mxu0  ;;  %v2241_v62 = vpop.f32.mrb[56].mxu1 }
 0x185   :  { %1856 = vst.msk [vmem:[%s3339_s3 + $0x58] sm:$0xf] %vm1833_vm1, %v2135_v38  ;;  %v2136_v2 = vpack.c.bf16 %v1536_v50, %v1536_v50  ;;  %v1299_v7 = vadd.f32 %v2241_v62, %v1010_v3  ;;  %v1019_v10 = vpop.f32.mrb[57].mxu0  ;;  %v1290_v6 = vpop.f32.mrb[57].mxu1  ;;  %v1018_v27 = vadd.f32 %v2948_v53, %v1017_v61 }
 0x186   :  { %1854 = vst.msk [vmem:[%s3339_s3 + $0x50] sm:$0xf] %vm1833_vm1, %v2133_v58  ;;  %v2134_v11 = vpack.c.bf16 %v1534_v57, %v1534_v57  ;;  %v1291_v13 = vadd.f32 %v1290_v6, %v1002_v54  ;;  %v1020_v14 = vpop.f32.mrb[58].mxu0  ;;  %v2242_v43 = vpop.f32.mrb[58].mxu1 }
 0x187   :  { %1857 = vst.msk [vmem:[%s3339_s3 + $0x5c] sm:$0xf] %vm1833_vm1, %v2136_v2  ;;  %v1475_v59 = vmul.f32 0.01, %v1299_v7  ;;  %v1302_v17 = vadd.f32 %v2242_v43, %v1013_v1  ;;  %v1022_v35 = vpop.f32.mrb[59].mxu0  ;;  %v1293_v18 = vpop.f32.mrb[59].mxu1  ;;  %v1021_v37 = vadd.f32 %v2948_v53, %v1020_v14 }
 0x188   :  { %1855 = vst.msk [vmem:[%s3339_s3 + $0x54] sm:$0xf] %vm1833_vm1, %v2134_v11  ;;  %v1473_v15 = vmul.f32 0.01, %v1291_v13  ;;  %v1294_v51 = vadd.f32 %v1293_v18, %v1005_v9 }
 0x189   :  { %v1539_v21 = vmax.f32 %v1299_v7, %v1475_v59  ;;  %v1476_v22 = vmul.f32 0.01, %v1302_v17 }
 0x18a   :  { %v1537_v63 = vmax.f32 %v1291_v13, %v1473_v15  ;;  %v1474_v26 = vmul.f32 0.01, %v1294_v51 }
 0x18b   :  { %v2139_v39 = vpack.c.bf16 %v1539_v21, %v1539_v21  ;;  %v1540_v29 = vmax.f32 %v1302_v17, %v1476_v22 }
 0x18c   :  { %v2137_v5 = vpack.c.bf16 %v1537_v63, %v1537_v63  ;;  %v1538_v30 = vmax.f32 %v1294_v51, %v1474_v26  ;;  %v1025_v25 = vpop.f32.mrb[60].mxu0  ;;  %v2245_v55 = vpop.f32.mrb[60].mxu1 }
 0x18d   :  { %1860 = vst.msk [vmem:[%s3339_s3 + $0x68] sm:$0xf] %vm1833_vm1, %v2139_v39  ;;  %v2140_v47 = vpack.c.bf16 %v1540_v29, %v1540_v29  ;;  %v1026_v19 = vadd.f32 %v2948_v53, %v1025_v25  ;;  %v1027_v33 = vpop.f32.mrb[61].mxu0  ;;  %v1306_v34 = vpop.f32.mrb[61].mxu1 }
 0x18e   :  { %1858 = vst.msk [vmem:[%s3339_s3 + $0x60] sm:$0xf] %vm1833_vm1, %v2137_v5  ;;  %v2138_v41 = vpack.c.bf16 %v1538_v30, %v1538_v30  ;;  %v1307_v31 = vadd.f32 %v1306_v34, %v1018_v27  ;;  %v1028_v42 = vpop.f32.mrb[62].mxu0  ;;  %v2246_v45 = vpop.f32.mrb[62].mxu1 }
 0x18f   :  { %1861 = vst.msk [vmem:[%s3339_s3 + $0x6c] sm:$0xf] %vm1833_vm1, %v2140_v47  ;;  %v1315_v23 = vadd.f32 %v2245_v55, %v1026_v19  ;;  %v1029_v46 = vadd.f32 %v2948_v53, %v1028_v42  ;;  %v1030_v49 = vpop.f32.mrb[63].mxu0  ;;  %v1309_v3 = vpop.f32.mrb[63].mxu1 }
 0x190   :  { %1859 = vst.msk [vmem:[%s3339_s3 + $0x64] sm:$0xf] %vm1833_vm1, %v2138_v41  ;;  %v1477_v38 = vmul.f32 0.01, %v1307_v31  ;;  %v1310_v50 = vadd.f32 %v1309_v3, %v1021_v37 }
 0x191   :  { %v1479_v54 = vmul.f32 0.01, %v1315_v23  ;;  %v1318_v58 = vadd.f32 %v2246_v45, %v1029_v46 }
 0x192   :  { %v1541_v57 = vmax.f32 %v1307_v31, %v1477_v38  ;;  %v1478_v61 = vmul.f32 0.01, %v1310_v50 }
 0x193   :  { %v1543_v62 = vmax.f32 %v1315_v23, %v1479_v54  ;;  %v1480_v1 = vmul.f32 0.01, %v1318_v58 }
 0x194   :  { %v2141_v2 = vpack.c.bf16 %v1541_v57, %v1541_v57  ;;  %v1542_v7 = vmax.f32 %v1310_v50, %v1478_v61  ;;  %v1033_v10 = vpop.f32.mrb[64].mxu0  ;;  %v2249_v6 = vpop.f32.mrb[64].mxu1 }
 0x195   :  { %v2143_v9 = vpack.c.bf16 %v1543_v62, %v1543_v62  ;;  %v1544_v11 = vmax.f32 %v1318_v58, %v1480_v1  ;;  %v1034_v13 = vadd.f32 %v2948_v53, %v1033_v10  ;;  %v1035_v14 = vpop.f32.mrb[65].mxu0  ;;  %v1322_v43 = vpop.f32.mrb[65].mxu1 }
 0x196   :  { %1862 = vst.msk [vmem:[%s3339_s3 + $0x70] sm:$0xf] %vm1833_vm1, %v2141_v2  ;;  %v2142_v59 = vpack.c.bf16 %v1542_v7, %v1542_v7  ;;  %v1036_v17 = vpop.f32.mrb[66].mxu0  ;;  %v2250_v35 = vpop.f32.mrb[66].mxu1 }
 0x197   :  { %1864 = vst.msk [vmem:[%s3339_s3 + $0x78] sm:$0xf] %vm1833_vm1, %v2143_v9  ;;  %v2144_v18 = vpack.c.bf16 %v1544_v11, %v1544_v11  ;;  %v1323_v15 = vadd.f32 %v1322_v43, %v1034_v13  ;;  %v1037_v51 = vadd.f32 %v2948_v53, %v1036_v17  ;;  %v1038_v21 = vpop.f32.mrb[67].mxu0  ;;  %v1325_v22 = vpop.f32.mrb[67].mxu1 }
 0x198   :  { %1863 = vst.msk [vmem:[%s3339_s3 + $0x74] sm:$0xf] %vm1833_vm1, %v2142_v59 }
 0x199   :  { %1865 = vst.msk [vmem:[%s3339_s3 + $0x7c] sm:$0xf] %vm1833_vm1, %v2144_v18  ;;  %v1481_v63 = vmul.f32 0.01, %v1323_v15  ;;  %v1326_v26 = vadd.f32 %v1325_v22, %v1037_v51 }
 0x19b   :  { %v1545_v39 = vmax.f32 %v1323_v15, %v1481_v63  ;;  %v1482_v29 = vmul.f32 0.01, %v1326_v26 }
 0x19c   :  { %v1041_v27 = vpop.f32.mrb[68].mxu0  ;;  %v2253_v5 = vpop.f32.mrb[68].mxu1 }
 0x19d   :  { %v2145_v30 = vpack.c.bf16 %v1545_v39, %v1545_v39  ;;  %v1546_v25 = vmax.f32 %v1326_v26, %v1482_v29  ;;  %v1042_v55 = vadd.f32 %v2948_v53, %v1041_v27  ;;  %v1043_v47 = vpop.f32.mrb[69].mxu0  ;;  %v1338_v19 = vpop.f32.mrb[69].mxu1 }
 0x19e   :  { %v1044_v33 = vpop.f32.mrb[70].mxu0  ;;  %v2254_v34 = vpop.f32.mrb[70].mxu1 }
 0x19f   :  { %1866 = vst.msk [vmem:[%s3339_s3 + $0x80] sm:$0xf] %vm1833_vm1, %v2145_v30  ;;  %v2146_v37 = vpack.c.bf16 %v1546_v25, %v1546_v25  ;;  %v1331_v41 = vadd.f32 %v2249_v6, %v1042_v55  ;;  %v1045_v31 = vadd.f32 %v2948_v53, %v1044_v33  ;;  %v1046_v42 = vpop.f32.mrb[71].mxu0  ;;  %v1341_v45 = vpop.f32.mrb[71].mxu1 }
 0x1a1   :  { %1867 = vst.msk [vmem:[%s3339_s3 + $0x84] sm:$0xf] %vm1833_vm1, %v2146_v37  ;;  %v1483_v23 = vmul.f32 0.01, %v1331_v41  ;;  %v1334_v46 = vadd.f32 %v2250_v35, %v1045_v31 }
 0x1a3   :  { %v1547_v49 = vmax.f32 %v1331_v41, %v1483_v23  ;;  %v1484_v3 = vmul.f32 0.01, %v1334_v46 }
 0x1a4   :  { %v1049_v38 = vpop.f32.mrb[72].mxu0  ;;  %v3154_v50 = vpop.f32.mrb[72].mxu1 }
 0x1a5   :  { %v2147_v54 = vpack.c.bf16 %v1547_v49, %v1547_v49  ;;  %v1548_v58 = vmax.f32 %v1334_v46, %v1484_v3  ;;  %v1050_v57 = vadd.f32 %v2948_v53, %v1049_v38  ;;  %v1051_v61 = vpop.f32.mrb[73].mxu0  ;;  %v1354_v62 = vpop.f32.mrb[73].mxu1 }
 0x1a6   :  { %v1052_v1 = vpop.f32.mrb[74].mxu0  ;;  %v3157_v2 = vpop.f32.mrb[74].mxu1 }
 0x1a7   :  { %1868 = vst.msk [vmem:[%s3339_s3 + $0x88] sm:$0xf] %vm1833_vm1, %v2147_v54  ;;  %v2148_v7 = vpack.c.bf16 %v1548_v58, %v1548_v58  ;;  %v1339_v10 = vadd.f32 %v1338_v19, %v1050_v57  ;;  %v1053_v6 = vadd.f32 %v2948_v53, %v1052_v1  ;;  %v1054_v9 = vpop.f32.mrb[75].mxu0  ;;  %v1357_v11 = vpop.f32.mrb[75].mxu1  ;;  %v1106_v19 = vadd.f32 %v2948_v53, %v2893_v60 }
 0x1a8   :  { %v1109_v60 = vadd.f32 %v2948_v53, %v2895_v0 }
 0x1a9   :  { %1869 = vst.msk [vmem:[%s3339_s3 + $0x8c] sm:$0xf] %vm1833_vm1, %v2148_v7  ;;  %v1485_v13 = vmul.f32 0.01, %v1339_v10  ;;  %v1342_v14 = vadd.f32 %v1341_v45, %v1053_v6 }
 0x1ab   :  { %v1549_v43 = vmax.f32 %v1339_v10, %v1485_v13  ;;  %v1486_v59 = vmul.f32 0.01, %v1342_v14 }
 0x1ac   :  { %v1057_v17 = vpop.f32.mrb[76].mxu0  ;;  %v3168_v35 = vpop.f32.mrb[76].mxu1 }
 0x1ad   :  { %v2149_v18 = vpack.c.bf16 %v1549_v43, %v1549_v43  ;;  %v1550_v15 = vmax.f32 %v1342_v14, %v1486_v59  ;;  %v1058_v51 = vadd.f32 %v2948_v53, %v1057_v17  ;;  %v1059_v21 = vpop.f32.mrb[77].mxu0  ;;  %v3171_v22 = vpop.f32.mrb[77].mxu1  ;;  %v1114_v43 = vadd.f32 %v2948_v53, %v2899_v4 }
 0x1ae   :  { %v1060_v63 = vpop.f32.mrb[78].mxu0  ;;  %v3173_v26 = vpop.f32.mrb[78].mxu1 }
 0x1af   :  { %1870 = vst.msk [vmem:[%s3339_s3 + $0x90] sm:$0xf] %vm1833_vm1, %v2149_v18  ;;  %v2150_v39 = vpack.c.bf16 %v1550_v15, %v1550_v15  ;;  %v1347_v29 = vadd.f32 %v2253_v5, %v1058_v51  ;;  %v1061_v27 = vadd.f32 %v2948_v53, %v1060_v63  ;;  %v1062_v30 = vpop.f32.mrb[79].mxu0  ;;  %v3180_v25 = vpop.f32.mrb[79].mxu1  ;;  %v1098_v5 = vadd.f32 %v2948_v53, %v2887_v52 }
 0x1b0   :  { %v1122_v18 = vadd.f32 %v2948_v53, %v2907_v12  ;;  %v1117_v63 = vadd.f32 %v2948_v53, %v2903_v8  ;;  %v1125_v8 = vadd.f32 %v2948_v53, %v2911_v16 }
 0x1b1   :  { %1871 = vst.msk [vmem:[%s3339_s3 + $0x94] sm:$0xf] %vm1833_vm1, %v2150_v39  ;;  %v1487_v55 = vmul.f32 0.01, %v1347_v29  ;;  %v1350_v47 = vadd.f32 %v2254_v34, %v1061_v27  ;;  %v1101_v34 = vadd.f32 %v2948_v53, %v2891_v56 }
 0x1b3   :  { %v1551_v33 = vmax.f32 %v1347_v29, %v1487_v55  ;;  %v1488_v37 = vmul.f32 0.01, %v1350_v47 }
 0x1b4   :  { %v1065_v41 = vpop.f32.mrb[80].mxu0  ;;  %v2265_v31 = vpop.f32.mrb[80].mxu1 }
 0x1b5   :  { %v2151_v42 = vpack.c.bf16 %v1551_v33, %v1551_v33  ;;  %v1552_v45 = vmax.f32 %v1350_v47, %v1488_v37  ;;  %v1066_v23 = vadd.f32 %v2948_v53, %v1065_v41  ;;  %v1395_v46 = vadd.f32 %v2265_v31, %v1106_v19  ;;  %v1067_v49 = vpop.f32.mrb[81].mxu0  ;;  %v1386_v3 = vpop.f32.mrb[81].mxu1 }
 0x1b6   :  { %v1387_v38 = vadd.f32 %v1386_v3, %v1098_v5  ;;  %v1068_v54 = vpop.f32.mrb[82].mxu0  ;;  %v2266_v58 = vpop.f32.mrb[82].mxu1 }
 0x1b7   :  { %1872 = vst.msk [vmem:[%s3339_s3 + $0x98] sm:$0xf] %vm1833_vm1, %v2151_v42  ;;  %v2152_v52 = vpack.c.bf16 %v1552_v45, %v1552_v45  ;;  %v1355_v57 = vadd.f32 %v1354_v62, %v1066_v23  ;;  %v1499_v61 = vmul.f32 0.01, %v1395_v46  ;;  %v1069_v1 = vadd.f32 %v2948_v53, %v1068_v54  ;;  %v1070_v7 = vpop.f32.mrb[83].mxu0  ;;  %v1389_v10 = vpop.f32.mrb[83].mxu1 }
 0x1b8   :  { %v1497_v6 = vmul.f32 0.01, %v1387_v38  ;;  %v1398_v56 = vadd.f32 %v2266_v58, %v1109_v60  ;;  %v1390_v9 = vadd.f32 %v1389_v10, %v1101_v34  ;;  %v1138_v7 = vadd.f32 %v2948_v53, %v2923_v28 }
 0x1b9   :  { %1873 = vst.msk [vmem:[%s3339_s3 + $0x9c] sm:$0xf] %vm1833_vm1, %v2152_v52  ;;  %v1489_v0 = vmul.f32 0.01, %v1355_v57  ;;  %v1563_v13 = vmax.f32 %v1395_v46, %v1499_v61  ;;  %v1358_v14 = vadd.f32 %v1357_v11, %v1069_v1  ;;  %v1130_v52 = vadd.f32 %v2948_v53, %v2915_v20 }
 0x1ba   :  { %v1561_v62 = vmax.f32 %v1387_v38, %v1497_v6  ;;  %v1500_v59 = vmul.f32 0.01, %v1398_v56  ;;  %v1498_v17 = vmul.f32 0.01, %v1390_v9 }
 0x1bb   :  { %v1553_v15 = vmax.f32 %v1355_v57, %v1489_v0  ;;  %v2163_v51 = vpack.c.bf16 %v1563_v13, %v1563_v13  ;;  %v1490_v21 = vmul.f32 0.01, %v1358_v14 }
 0x1bc   :  { %v2161_v39 = vpack.c.bf16 %v1561_v62, %v1561_v62  ;;  %v1564_v29 = vmax.f32 %v1398_v56, %v1500_v59  ;;  %v1562_v27 = vmax.f32 %v1390_v9, %v1498_v17  ;;  %v1073_v30 = vpop.f32.mrb[84].mxu0  ;;  %v2269_v11 = vpop.f32.mrb[84].mxu1  ;;  %v1133_v9 = vadd.f32 %v2948_v53, %v2919_v24 }
 0x1bd   :  { %v2153_v55 = vpack.c.bf16 %v1553_v15, %v1553_v15  ;;  %1884 = vst.msk [vmem:[%s3339_s3 + $0xc8] sm:$0xf] %vm1833_vm1, %v2163_v51  ;;  %v1554_v4 = vmax.f32 %v1358_v14, %v1490_v21  ;;  %v1074_v12 = vadd.f32 %v2948_v53, %v1073_v30  ;;  %v1411_v47 = vadd.f32 %v2269_v11, %v1122_v18  ;;  %v1075_v19 = vpop.f32.mrb[85].mxu0  ;;  %v1402_v33 = vpop.f32.mrb[85].mxu1 }
 0x1be   :  { %1882 = vst.msk [vmem:[%s3339_s3 + $0xc0] sm:$0xf] %vm1833_vm1, %v2161_v39  ;;  %v2164_v37 = vpack.c.bf16 %v1564_v29, %v1564_v29  ;;  %v2162_v5 = vpack.c.bf16 %v1562_v27, %v1562_v27  ;;  %v1403_v41 = vadd.f32 %v1402_v33, %v1114_v43  ;;  %v1076_v31 = vpop.f32.mrb[86].mxu0  ;;  %v2270_v42 = vpop.f32.mrb[86].mxu1  ;;  %v1141_v24 = vadd.f32 %v2948_v53, %v2927_v32 }
 0x1bf   :  { %1874 = vst.msk [vmem:[%s3339_s3 + $0xa0] sm:$0xf] %vm1833_vm1, %v2153_v55  ;;  %v2154_v45 = vpack.c.bf16 %v1554_v4, %v1554_v4  ;;  %v1363_v23 = vadd.f32 %v3154_v50, %v1074_v12  ;;  %v1503_v46 = vmul.f32 0.01, %v1411_v47  ;;  %v1077_v16 = vadd.f32 %v2948_v53, %v1076_v31  ;;  %v1078_v49 = vpop.f32.mrb[87].mxu0  ;;  %v1405_v3 = vpop.f32.mrb[87].mxu1 }
 0x1c0   :  { %1885 = vst.msk [vmem:[%s3339_s3 + $0xcc] sm:$0xf] %vm1833_vm1, %v2164_v37  ;;  %1883 = vst.msk [vmem:[%s3339_s3 + $0xc4] sm:$0xf] %vm1833_vm1, %v2162_v5  ;;  %v1501_v34 = vmul.f32 0.01, %v1403_v41  ;;  %v1414_v60 = vadd.f32 %v2270_v42, %v1125_v8  ;;  %v1406_v38 = vadd.f32 %v1405_v3, %v1117_v63  ;;  %v1146_v8 = vadd.f32 %v2948_v53, %v2931_v36 }
 0x1c1   :  { %1875 = vst.msk [vmem:[%s3339_s3 + $0xa4] sm:$0xf] %vm1833_vm1, %v2154_v45  ;;  %v1491_v50 = vmul.f32 0.01, %v1363_v23  ;;  %v1567_v54 = vmax.f32 %v1411_v47, %v1503_v46  ;;  %v1366_v58 = vadd.f32 %v3157_v2, %v1077_v16  ;;  %v1154_v31 = vadd.f32 %v2948_v53, %v2939_v44 }
 0x1c2   :  { %v1565_v57 = vmax.f32 %v1403_v41, %v1501_v34  ;;  %v1504_v61 = vmul.f32 0.01, %v1414_v60  ;;  %v1502_v1 = vmul.f32 0.01, %v1406_v38  ;;  %v1149_v46 = vadd.f32 %v2948_v53, %v2935_v40 }
 0x1c3   :  { %v1555_v10 = vmax.f32 %v1363_v23, %v1491_v50  ;;  %v2167_v6 = vpack.c.bf16 %v1567_v54, %v1567_v54  ;;  %v1492_v56 = vmul.f32 0.01, %v1366_v58  ;;  %v1157_v40 = vadd.f32 %v2948_v53, %v2943_v48 }
 0x1c4   :  { %v2165_v0 = vpack.c.bf16 %v1565_v57, %v1565_v57  ;;  %v1568_v13 = vmax.f32 %v1414_v60, %v1504_v61  ;;  %v1566_v14 = vmax.f32 %v1406_v38, %v1502_v1  ;;  %v1081_v43 = vpop.f32.mrb[88].mxu0  ;;  %v2273_v2 = vpop.f32.mrb[88].mxu1 }
 0x1c5   :  { %v2155_v62 = vpack.c.bf16 %v1555_v10, %v1555_v10  ;;  %1888 = vst.msk [vmem:[%s3339_s3 + $0xd8] sm:$0xf] %vm1833_vm1, %v2167_v6  ;;  %v1556_v20 = vmax.f32 %v1366_v58, %v1492_v56  ;;  %v1082_v28 = vadd.f32 %v2948_v53, %v1081_v43  ;;  %v1427_v59 = vadd.f32 %v2273_v2, %v1138_v7  ;;  %v1083_v17 = vpop.f32.mrb[89].mxu0  ;;  %v1418_v18 = vpop.f32.mrb[89].mxu1 }
 0x1c6   :  { %1886 = vst.msk [vmem:[%s3339_s3 + $0xd0] sm:$0xf] %vm1833_vm1, %v2165_v0  ;;  %v2168_v15 = vpack.c.bf16 %v1568_v13, %v1568_v13  ;;  %v2166_v51 = vpack.c.bf16 %v1566_v14, %v1566_v14  ;;  %v1419_v21 = vadd.f32 %v1418_v18, %v1130_v52  ;;  %v1084_v63 = vpop.f32.mrb[90].mxu0  ;;  %v2274_v39 = vpop.f32.mrb[90].mxu1 }
 0x1c7   :  { %1876 = vst.msk [vmem:[%s3339_s3 + $0xa8] sm:$0xf] %vm1833_vm1, %v2155_v62  ;;  %v2156_v29 = vpack.c.bf16 %v1556_v20, %v1556_v20  ;;  %v1371_v27 = vadd.f32 %v3171_v22, %v1082_v28  ;;  %v1507_v30 = vmul.f32 0.01, %v1427_v59  ;;  %v1085_v32 = vadd.f32 %v2948_v53, %v1084_v63  ;;  %v1086_v11 = vpop.f32.mrb[91].mxu0  ;;  %v1421_v55 = vpop.f32.mrb[91].mxu1 }
 0x1c8   :  { %1889 = vst.msk [vmem:[%s3339_s3 + $0xdc] sm:$0xf] %vm1833_vm1, %v2168_v15  ;;  %1887 = vst.msk [vmem:[%s3339_s3 + $0xd4] sm:$0xf] %vm1833_vm1, %v2166_v51  ;;  %v1505_v4 = vmul.f32 0.01, %v1419_v21  ;;  %v1430_v12 = vadd.f32 %v2274_v39, %v1141_v24  ;;  %v1422_v47 = vadd.f32 %v1421_v55, %v1133_v9 }
 0x1c9   :  { %1877 = vst.msk [vmem:[%s3339_s3 + $0xac] sm:$0xf] %vm1833_vm1, %v2156_v29  ;;  %v1493_v22 = vmul.f32 0.01, %v1371_v27  ;;  %v1571_v19 = vmax.f32 %v1427_v59, %v1507_v30  ;;  %v1374_v33 = vadd.f32 %v3180_v25, %v1085_v32 }
 0x1ca   :  { %v1569_v37 = vmax.f32 %v1419_v21, %v1505_v4  ;;  %v1508_v5 = vmul.f32 0.01, %v1430_v12  ;;  %v1506_v41 = vmul.f32 0.01, %v1422_v47 }
 0x1cb   :  { %v1557_v42 = vmax.f32 %v1371_v27, %v1493_v22  ;;  %v2171_v45 = vpack.c.bf16 %v1571_v19, %v1571_v19  ;;  %v1494_v23 = vmul.f32 0.01, %v1374_v33 }
 0x1cc   :  { %v2169_v16 = vpack.c.bf16 %v1569_v37, %v1569_v37  ;;  %v1572_v49 = vmax.f32 %v1430_v12, %v1508_v5  ;;  %v1570_v3 = vmax.f32 %v1422_v47, %v1506_v41  ;;  %v1089_v34 = vpop.f32.mrb[92].mxu0  ;;  %v2277_v25 = vpop.f32.mrb[92].mxu1 }
 0x1cd   :  { %v2157_v60 = vpack.c.bf16 %v1557_v42, %v1557_v42  ;;  %1892 = vst.msk [vmem:[%s3339_s3 + $0xe8] sm:$0xf] %vm1833_vm1, %v2171_v45  ;;  %v1558_v36 = vmax.f32 %v1374_v33, %v1494_v23  ;;  %v1090_v44 = vadd.f32 %v2948_v53, %v1089_v34  ;;  %v1443_v38 = vadd.f32 %v2277_v25, %v1154_v31  ;;  %v1091_v50 = vpop.f32.mrb[93].mxu0  ;;  %v1434_v54 = vpop.f32.mrb[93].mxu1 }
 0x1ce   :  { %1890 = vst.msk [vmem:[%s3339_s3 + $0xe0] sm:$0xf] %vm1833_vm1, %v2169_v16  ;;  %v2172_v58 = vpack.c.bf16 %v1572_v49, %v1572_v49  ;;  %v2170_v52 = vpack.c.bf16 %v1570_v3, %v1570_v3  ;;  %v1435_v57 = vadd.f32 %v1434_v54, %v1146_v8  ;;  %v1092_v61 = vpop.f32.mrb[94].mxu0  ;;  %v2278_v1 = vpop.f32.mrb[94].mxu1 }
 0x1cf   :  { %1878 = vst.msk [vmem:[%s3339_s3 + $0xb0] sm:$0xf] %vm1833_vm1, %v2157_v60  ;;  %v2158_v7 = vpack.c.bf16 %v1558_v36, %v1558_v36  ;;  %v1379_v10 = vadd.f32 %v3168_v35, %v1090_v44  ;;  %v1511_v6 = vmul.f32 0.01, %v1443_v38  ;;  %v1093_v48 = vadd.f32 %v2948_v53, %v1092_v61  ;;  %v1094_v56 = vpop.f32.mrb[95].mxu0  ;;  %v1437_v9 = vpop.f32.mrb[95].mxu1 }
 0x1d0   :  { %1893 = vst.msk [vmem:[%s3339_s3 + $0xec] sm:$0xf] %vm1833_vm1, %v2172_v58  ;;  %1891 = vst.msk [vmem:[%s3339_s3 + $0xe4] sm:$0xf] %vm1833_vm1, %v2170_v52  ;;  %v1509_v0 = vmul.f32 0.01, %v1435_v57  ;;  %v1446_v13 = vadd.f32 %v2278_v1, %v1157_v40  ;;  %v1438_v14 = vadd.f32 %v1437_v9, %v1149_v46 }
 0x1d1   :  { %1879 = vst.msk [vmem:[%s3339_s3 + $0xb4] sm:$0xf] %vm1833_vm1, %v2158_v7  ;;  %v1495_v53 = vmul.f32 0.01, %v1379_v10  ;;  %v1575_v35 = vmax.f32 %v1443_v38, %v1511_v6  ;;  %v1382_v43 = vadd.f32 %v3173_v26, %v1093_v48 }
 0x1d2   :  { %v1573_v2 = vmax.f32 %v1435_v57, %v1509_v0  ;;  %v1512_v62 = vmul.f32 0.01, %v1446_v13  ;;  %v1510_v20 = vmul.f32 0.01, %v1438_v14 }
 0x1d3   :  { %v1559_v28 = vmax.f32 %v1379_v10, %v1495_v53  ;;  %v2175_v59 = vpack.c.bf16 %v1575_v35, %v1575_v35  ;;  %v1496_v17 = vmul.f32 0.01, %v1382_v43 }
 0x1d4   :  { %v2173_v18 = vpack.c.bf16 %v1573_v2, %v1573_v2  ;;  %v1576_v24 = vmax.f32 %v1446_v13, %v1512_v62  ;;  %v1574_v15 = vmax.f32 %v1438_v14, %v1510_v20 }
 0x1d5   :  { %v2159_v51 = vpack.c.bf16 %v1559_v28, %v1559_v28  ;;  %1896 = vst.msk [vmem:[%s3339_s3 + $0xf8] sm:$0xf] %vm1833_vm1, %v2175_v59  ;;  %v1560_v21 = vmax.f32 %v1382_v43, %v1496_v17 }
 0x1d6   :  { %1894 = vst.msk [vmem:[%s3339_s3 + $0xf0] sm:$0xf] %vm1833_vm1, %v2173_v18  ;;  %v2176_v26 = vpack.c.bf16 %v1576_v24, %v1576_v24  ;;  %v2174_v63 = vpack.c.bf16 %v1574_v15, %v1574_v15 }
 0x1d7   :  { %1880 = vst.msk [vmem:[%s3339_s3 + $0xb8] sm:$0xf] %vm1833_vm1, %v2159_v51  ;;  %v2160_v39 = vpack.c.bf16 %v1560_v21, %v1560_v21 }
 0x1d8   :  { %1897 = vst.msk [vmem:[%s3339_s3 + $0xfc] sm:$0xf] %vm1833_vm1, %v2176_v26  ;;  %1895 = vst.msk [vmem:[%s3339_s3 + $0xf4] sm:$0xf] %vm1833_vm1, %v2174_v63 }
 0x1d9   :  { %1881 = vst.msk [vmem:[%s3339_s3 + $0xbc] sm:$0xf] %vm1833_vm1, %v2160_v39 }

// kernel: appearance_autoencoder_forward.13
= control target key start
LH: loop header
LB: loop body
LE: loop exit
PB: predicated region body
PF: predicated region fallthrough
CT: control target
= control target key end

     0   :  { %vm558_vm0 = vcmask 523264   ;;  %s1752_s1 = inlined_call_operand.vmem [shape: bf16[576,128], index: 1, kind: input, shape index: {}]   ;;  %s1753_s0 = inlined_call_operand.vmem [shape: bf16[128,576], index: 0, kind: input, shape index: {}]   ;;  %s1754_s2 = inlined_call_operand.vmem [shape: f32[1,128], index: 2, kind: input, shape index: {}]   ;;  %s1755_s3 = inlined_call_operand.vmem [shape: bf16[128,128], index: 3, kind: output, shape index: {}]  }
   0x1   :  { %v1326_v0 = vld [vmem:[%s1752_s1 + $0x40] sm:$0xff]   ;;  %v1330_v4 = vld [vmem:[%s1752_s1 + $0x48] sm:$0xff]   ;;  %v1334_v8 = vld [vmem:[%s1752_s1 + $0x50] sm:$0xff]  }
   0x2   :  { %v1327_v1 = vld [vmem:[%s1752_s1 + $0xc0] sm:$0xff]   ;;  %1154 = vmatprep.subr.bf16.mxu0 %v1326_v0  ;;  %v1331_v5 = vld [vmem:[%s1752_s1 + $0xc8] sm:$0xff]   ;;  %v1335_v9 = vld [vmem:[%s1752_s1 + $0xd0] sm:$0xff]  }
   0x3   :  { %v1328_v2 = vld [vmem:[%s1752_s1] sm:$0xff]   ;;  %1218 = vmatprep.subr.bf16.mxu1 %v1327_v1  ;;  %v1332_v6 = vld [vmem:[%s1752_s1 + $0x8] sm:$0xff]   ;;  %v1336_v10 = vld [vmem:[%s1752_s1 + $0x10] sm:$0xff]  }
   0x4   :  { %v1329_v3 = vld [vmem:[%s1752_s1 + $0x80] sm:$0xff]   ;;  %1155 = vmatpush3.bf16.msra.mxu0 %v1328_v2  ;;  %v1333_v7 = vld [vmem:[%s1752_s1 + $0x88] sm:$0xff]   ;;  %v1337_v11 = vld [vmem:[%s1752_s1 + $0x90] sm:$0xff]  }
   0x5   :  { %1219 = vmatpush3.bf16.msra.mxu1 %v1329_v3  ;;  %1156 = vmatprep.subr.bf16.mxu0 %v1330_v4  ;;  %v1338_v12 = vld [vmem:[%s1752_s1 + $0x58] sm:$0xff]   ;;  %v1342_v16 = vld [vmem:[%s1752_s1 + $0x60] sm:$0xff]   ;;  %v1346_v20 = vld [vmem:[%s1752_s1 + $0x68] sm:$0xff]  }
   0x6   :  { %1220 = vmatprep.subr.bf16.mxu1 %v1331_v5  ;;  %v1339_v13 = vld [vmem:[%s1752_s1 + $0xd8] sm:$0xff]   ;;  %v1343_v17 = vld [vmem:[%s1752_s1 + $0xe0] sm:$0xff]   ;;  %v1347_v21 = vld [vmem:[%s1752_s1 + $0xe8] sm:$0xff]  }
   0x7   :  { %v1340_v14 = vld [vmem:[%s1752_s1 + $0x18] sm:$0xff]   ;;  %v1344_v18 = vld [vmem:[%s1752_s1 + $0x20] sm:$0xff]   ;;  %v1348_v22 = vld [vmem:[%s1752_s1 + $0x28] sm:$0xff]  }
   0x8   :  { %1157 = vmatpush3.bf16.msra.mxu0 %v1332_v6  ;;  %v1341_v15 = vld [vmem:[%s1752_s1 + $0x98] sm:$0xff]   ;;  %v1345_v19 = vld [vmem:[%s1752_s1 + $0xa0] sm:$0xff]   ;;  %v1349_v23 = vld [vmem:[%s1752_s1 + $0xa8] sm:$0xff]  }
   0x9   :  { %1221 = vmatpush3.bf16.msra.mxu1 %v1333_v7  ;;  %1158 = vmatprep.subr.bf16.mxu0 %v1334_v8  ;;  %v1350_v24 = vld [vmem:[%s1752_s1 + $0x70] sm:$0xff]   ;;  %v1354_v28 = vld [vmem:[%s1752_s1 + $0x78] sm:$0xff]   ;;  %v1363_v35 = vld [vmem:[%s1753_s0 + $0xc] ss:$20 sps:$4 sm:$0xff]  }
   0xa   :  { %1222 = vmatprep.subr.bf16.mxu1 %v1335_v9  ;;  %v1351_v25 = vld [vmem:[%s1752_s1 + $0xf0] sm:$0xff]   ;;  %v1355_v29 = vld [vmem:[%s1752_s1 + $0xf8] sm:$0xff]   ;;  %v1364_v36 = vld [vmem:[%s1752_s1 + $0x100] sm:$0xff]   ;;  %712 = vmatprep.mubr.bf16.mxu1 %v1363_v35 }
   0xb   :  { %v1352_v26 = vld [vmem:[%s1752_s1 + $0x30] sm:$0xff]   ;;  %v1356_v30 = vld [vmem:[%s1752_s1 + $0x38] sm:$0xff]   ;;  %v1365_v37 = vld [vmem:[%s1753_s0 + $0x2c] ss:$20 sps:$4 sm:$0xff]  }
   0xc   :  { %1159 = vmatpush3.bf16.msra.mxu0 %v1336_v10  ;;  %v1353_v27 = vld [vmem:[%s1752_s1 + $0xb0] sm:$0xff]   ;;  %v1357_v31 = vld [vmem:[%s1752_s1 + $0xb8] sm:$0xff]   ;;  %v1377_v42 = vld [vmem:[%s1752_s1 + $0x108] sm:$0xff]  }
   0xd   :  { %1223 = vmatpush3.bf16.msra.mxu1 %v1337_v11  ;;  %1160 = vmatprep.subr.bf16.mxu0 %v1338_v12  ;;  %v1358_v32 = vld [vmem:[%s1753_s0] ss:$20 sps:$4 sm:$0xff]   ;;  %v1360_v33 = vld [vmem:[%s1753_s0 + $0x4] ss:$20 sps:$4 sm:$0xff]   ;;  %v1361_v34 = vld [vmem:[%s1753_s0 + $0x8] ss:$20 sps:$4 sm:$0xff]  }
   0xe   :  { %1224 = vmatprep.subr.bf16.mxu1 %v1339_v13  ;;  %615 = vmatprep.mubr.bf16.mxu0 %v1360_v33  ;;  %v1367_v38 = vld [vmem:[%s1753_s0 + $0x34] ss:$20 sps:$4 sm:$0xff]   ;;  %v1370_v40 = vld [vmem:[%s1753_s0 + $0x30] ss:$20 sps:$4 sm:$0xff]   ;;  %v1376_v45 = vld [vmem:[%s1753_s0 + $0x58] ss:$20 sps:$4 sm:$0xff]  }
   0xf   :  { %v1369_v39 = vld [vmem:[%s1753_s0 + $0x28] ss:$20 sps:$4 sm:$0xff]   ;;  %v1375_v44 = vld [vmem:[%s1753_s0 + $0x50] ss:$20 sps:$4 sm:$0xff]   ;;  %v1382_v50 = vld [vmem:[%s1753_s0 + $0x78] ss:$20 sps:$4 sm:$0xff]  }
  0x10   :  { %1161 = vmatpush3.bf16.msra.mxu0 %v1340_v14  ;;  %v1371_v41 = vld [vmem:[%s1753_s0 + $0x54] ss:$20 sps:$4 sm:$0xff]   ;;  %v1373_v43 = vld [vmem:[%s1753_s0 + $0x5c] ss:$20 sps:$4 sm:$0xff]   ;;  %v1380_v48 = vld [vmem:[%s1753_s0 + $0x84] ss:$20 sps:$4 sm:$0xff]  }
  0x11   :  { %1225 = vmatpush3.bf16.msra.mxu1 %v1341_v15  ;;  %1162 = vmatprep.subr.bf16.mxu0 %v1342_v16  ;;  %v1390_v46 = vld [vmem:[%s1752_s1 + $0x110] sm:$0xff]   ;;  %v1403_v49 = vld [vmem:[%s1752_s1 + $0x118] sm:$0xff]   ;;  %v1386_v53 = vld [vmem:[%s1753_s0 + $0xac] ss:$20 sps:$4 sm:$0xff]  }
  0x12   :  { %1226 = vmatprep.subr.bf16.mxu1 %v1343_v17  ;;  %v1378_v47 = vld [vmem:[%s1753_s0 + $0x7c] ss:$20 sps:$4 sm:$0xff]   ;;  %v1383_v51 = vld [vmem:[%s1753_s0 + $0x80] ss:$20 sps:$4 sm:$0xff]   ;;  %v1384_v52 = vld [vmem:[%s1753_s0 + $0xa4] ss:$20 sps:$4 sm:$0xff]  }
  0x13   :  { %v1388_v54 = vld [vmem:[%s1753_s0 + $0xa0] ss:$20 sps:$4 sm:$0xff]   ;;  %v1389_v55 = vld [vmem:[%s1753_s0 + $0xa8] ss:$20 sps:$4 sm:$0xff]   ;;  %v1396_v59 = vld [vmem:[%s1753_s0 + $0xd0] ss:$20 sps:$4 sm:$0xff]  }
  0x14   :  { %1163 = vmatpush3.bf16.msra.mxu0 %v1344_v18  ;;  %v1391_v56 = vld [vmem:[%s1753_s0 + $0xcc] ss:$20 sps:$4 sm:$0xff]   ;;  %v1393_v57 = vld [vmem:[%s1753_s0 + $0xd4] ss:$20 sps:$4 sm:$0xff]   ;;  %v1399_v61 = vld [vmem:[%s1753_s0 + $0xfc] ss:$20 sps:$4 sm:$0xff]  }
  0x15   :  { %1227 = vmatpush3.bf16.msra.mxu1 %v1345_v19  ;;  %1164 = vmatprep.subr.bf16.mxu0 %v1346_v20  ;;  %v1395_v58 = vld [vmem:[%s1753_s0 + $0xc8] ss:$20 sps:$4 sm:$0xff]   ;;  %v1401_v62 = vld [vmem:[%s1753_s0 + $0xf0] ss:$20 sps:$4 sm:$0xff]   ;;  %v1402_v63 = vld [vmem:[%s1753_s0 + $0xf8] ss:$20 sps:$4 sm:$0xff]  }
  0x16   :  { %1228 = vmatprep.subr.bf16.mxu1 %v1347_v21  ;;  %v1397_v60 = vld [vmem:[%s1753_s0 + $0xf4] ss:$20 sps:$4 sm:$0xff]   ;;  %v1404_v0 = vld [vmem:[%s1753_s0 + $0x11c] ss:$20 sps:$4 sm:$0xff]   ;;  %v1406_v1 = vld [vmem:[%s1753_s0 + $0x124] ss:$20 sps:$4 sm:$0xff]  }
  0x17   :  { %v1408_v2 = vld [vmem:[%s1753_s0 + $0x118] ss:$20 sps:$4 sm:$0xff]   ;;  %v1409_v3 = vld [vmem:[%s1753_s0 + $0x120] ss:$20 sps:$4 sm:$0xff]   ;;  %v1410_v4 = vld [vmem:[%s1753_s0 + $0x10] ss:$20 sps:$4 sm:$0xff]  }
  0x18   :  { %1165 = vmatpush3.bf16.msra.mxu0 %v1348_v22  ;;  %v1411_v5 = vld [vmem:[%s1753_s0 + $0xb0] ss:$20 sps:$4 sm:$0xff]   ;;  %v1412_v6 = vld [vmem:[%s1753_s0 + $0x38] ss:$20 sps:$4 sm:$0xff]   ;;  %v1414_v8 = vld [vmem:[%s1753_s0 + $0x60] ss:$20 sps:$4 sm:$0xff]  }
  0x19   :  { %1229 = vmatpush3.bf16.msra.mxu1 %v1349_v23  ;;  %1166 = vmatprep.subr.bf16.mxu0 %v1350_v24  ;;  %v1413_v7 = vld [vmem:[%s1753_s0 + $0xd8] ss:$20 sps:$4 sm:$0xff]   ;;  %v1415_v9 = vld [vmem:[%s1753_s0 + $0x100] ss:$20 sps:$4 sm:$0xff]   ;;  %v1416_v10 = vld [vmem:[%s1753_s0 + $0x88] ss:$20 sps:$4 sm:$0xff]  }
  0x1a   :  { %1230 = vmatprep.subr.bf16.mxu1 %v1351_v25  ;;  %v1417_v11 = vld [vmem:[%s1753_s0 + $0x128] ss:$20 sps:$4 sm:$0xff]   ;;  %v1677_v14 = vld [vmem:[%s1754_s2] ss:$0 sm:$0xff] }
  0x1c   :  { %1167 = vmatpush3.bf16.msra.mxu0 %v1352_v26 }
  0x1d   :  { %1231 = vmatpush3.bf16.msra.mxu1 %v1353_v27  ;;  %1168 = vmatprep.subr.bf16.mxu0 %v1354_v28 }
  0x1e   :  { %1232 = vmatprep.subr.bf16.mxu1 %v1355_v29 }
  0x20   :  { %1169 = vmatpush3.bf16.msra.mxu0 %v1356_v30 }
  0x21   :  { %1233 = vmatpush3.bf16.msra.mxu1 %v1357_v31  ;;  %1294 = vmatprep.subr.bf16.mxu0 %v1364_v36 }
  0x22   :  { %1318 = vmatprep.subr.bf16.mxu1 %v1364_v36 }
  0x23   :  { %616 = vmatmul.mubr.bf16.vlgmr.msra.gmra.mrb[0].mxu0 %v1358_v32 }
  0x24   :  { %713 = vmatmul.mubr.bf16.vlgmr.msra.gmra.mrb[0].mxu1 %v1361_v34  ;;  %1295 = vmatpush3.bf16.msra.mxu0 %v1364_v36 }
  0x25   :  { %1322 = vmatpush3.bf16.msra.mxu1 %v1364_v36  ;;  %623 = vmatprep.mubr.bf16.mxu0 %v1365_v37 }
  0x26   :  { %720 = vmatprep.mubr.bf16.mxu1 %v1367_v38  ;;  %1296 = vmatprep.subr.bf16.mxu0 %v1377_v42 }
  0x27   :  { %1319 = vmatprep.subr.bf16.mxu1 %v1377_v42 }
  0x28   :  { %1297 = vmatpush3.bf16.msra.mxu0 %v1377_v42 }
  0x29   :  { %1323 = vmatpush3.bf16.msra.mxu1 %v1377_v42  ;;  %1298 = vmatprep.subr.bf16.mxu0 %v1390_v46 }
  0x2a   :  { %1320 = vmatprep.subr.bf16.mxu1 %v1390_v46 }
  0x2b   :  { %624 = vmatmul.mubr.bf16.gmra.mrb[4].mxu0 %v1369_v39 }
  0x2c   :  { %721 = vmatmul.mubr.bf16.gmra.mrb[4].mxu1 %v1370_v40  ;;  %631 = vmatprep.mubr.bf16.mxu0 %v1371_v41 }
  0x2d   :  { %728 = vmatprep.mubr.bf16.mxu1 %v1373_v43  ;;  %1299 = vmatpush3.bf16.msra.mxu0 %v1390_v46 }
  0x2e   :  { %1324 = vmatpush3.bf16.msra.mxu1 %v1390_v46  ;;  %1300 = vmatprep.subr.bf16.mxu0 %v1403_v49 }
  0x2f   :  { %1321 = vmatprep.subr.bf16.mxu1 %v1403_v49 }
  0x31   :  { %1301 = vmatpush3.bf16.msra.mxu0 %v1403_v49 }
  0x32   :  { %1325 = vmatpush3.bf16.msra.mxu1 %v1403_v49 }
  0x33   :  { %632 = vmatmul.mubr.bf16.gmra.mrb[8].mxu0 %v1375_v44 }
  0x34   :  { %729 = vmatmul.mubr.bf16.gmra.mrb[8].mxu1 %v1376_v45  ;;  %639 = vmatprep.mubr.bf16.mxu0 %v1378_v47 }
  0x35   :  { %736 = vmatprep.mubr.bf16.mxu1 %v1380_v48 }
  0x3b   :  { %640 = vmatmul.mubr.bf16.gmra.mrb[12].mxu0 %v1382_v50 }
  0x3c   :  { %737 = vmatmul.mubr.bf16.gmra.mrb[12].mxu1 %v1383_v51  ;;  %647 = vmatprep.mubr.bf16.mxu0 %v1384_v52 }
  0x3d   :  { %744 = vmatprep.mubr.bf16.mxu1 %v1386_v53 }
  0x43   :  { %648 = vmatmul.mubr.bf16.gmra.mrb[16].mxu0 %v1388_v54 }
  0x44   :  { %745 = vmatmul.mubr.bf16.gmra.mrb[16].mxu1 %v1389_v55  ;;  %655 = vmatprep.mubr.bf16.mxu0 %v1391_v56 }
  0x45   :  { %752 = vmatprep.mubr.bf16.mxu1 %v1393_v57 }
  0x4b   :  { %656 = vmatmul.mubr.bf16.gmra.mrb[20].mxu0 %v1395_v58 }
  0x4c   :  { %753 = vmatmul.mubr.bf16.gmra.mrb[20].mxu1 %v1396_v59  ;;  %663 = vmatprep.mubr.bf16.mxu0 %v1397_v60 }
  0x4d   :  { %760 = vmatprep.mubr.bf16.mxu1 %v1399_v61 }
  0x53   :  { %664 = vmatmul.mubr.bf16.gmra.mrb[24].mxu0 %v1401_v62 }
  0x54   :  { %761 = vmatmul.mubr.bf16.gmra.mrb[24].mxu1 %v1402_v63  ;;  %671 = vmatprep.mubr.bf16.mxu0 %v1404_v0 }
  0x55   :  { %768 = vmatprep.mubr.bf16.mxu1 %v1406_v1 }
  0x5b   :  { %672 = vmatmul.mubr.bf16.gmra.mrb[28].mxu0 %v1408_v2 }
  0x5c   :  { %769 = vmatmul.mubr.bf16.gmra.mrb[28].mxu1 %v1409_v3  ;;  %1302 = vmatprep.mubr.msk.bf16.mxu0 %vm558_vm0, %v1410_v4 }
  0x5d   :  { %1310 = vmatprep.mubr.msk.bf16.mxu1 %vm558_vm0, %v1411_v5 }
  0x63   :  { %1303 = vmatmul.mubr.msk.bf16.vlgmr.msra.gmra.mrb[32].mxu0 %vm558_vm0, %v1412_v6 }
  0x64   :  { %1311 = vmatmul.mubr.msk.bf16.vlgmr.msra.gmra.mrb[32].mxu1 %vm558_vm0, %v1413_v7  ;;  %1306 = vmatprep.mubr.msk.bf16.mxu0 %vm558_vm0, %v1414_v8 }
  0x65   :  { %1314 = vmatprep.mubr.msk.bf16.mxu1 %vm558_vm0, %v1415_v9 }
  0x6b   :  { %1307 = vmatmul.mubr.msk.bf16.gmra.mrb[36].mxu0 %vm558_vm0, %v1416_v10 }
  0x6c   :  { %1315 = vmatmul.mubr.msk.bf16.gmra.mrb[36].mxu1 %vm558_vm0, %v1417_v11 }
  0xf6   :  { %v1170_v12 = vpop.f32.mrb[0].mxu0 }
  0xf7   :  { %v1234_v13 = vpop.f32.mrb[0].mxu1  ;;  %v1171_v15 = vpop.f32.mrb[1].mxu0 }
  0xf8   :  { %v1172_v16 = vadd.f32 %v1171_v15, %v1170_v12  ;;  %v1235_v17 = vpop.f32.mrb[1].mxu1  ;;  %v1173_v18 = vpop.f32.mrb[2].mxu0 }
  0xf9   :  { %v1236_v19 = vadd.f32 %v1235_v17, %v1234_v13  ;;  %v1237_v20 = vpop.f32.mrb[2].mxu1  ;;  %v1174_v21 = vpop.f32.mrb[3].mxu0 }
  0xfa   :  { %v618_v22 = vadd.f32 %v1172_v16, %v1677_v14  ;;  %v1175_v23 = vadd.f32 %v1174_v21, %v1173_v18  ;;  %v1238_v24 = vpop.f32.mrb[3].mxu1 }
  0xfb   :  { %v1239_v25 = vadd.f32 %v1238_v24, %v1237_v20 }
  0xfc   :  { %v621_v26 = vadd.f32 %v1175_v23, %v1677_v14  ;;  %v1681_v27 = vadd.f32 %v1236_v19, %v618_v22 }
  0xfe   :  { %v1176_v28 = vpop.f32.mrb[4].mxu0  ;;  %v1683_v29 = vadd.f32 %v1239_v25, %v621_v26 }
  0xff   :  { %v1240_v30 = vpop.f32.mrb[4].mxu1  ;;  %v1177_v31 = vpop.f32.mrb[5].mxu0 }
 0x100   :  { %v1178_v32 = vadd.f32 %v1177_v31, %v1176_v28  ;;  %v1241_v33 = vpop.f32.mrb[5].mxu1  ;;  %v1179_v34 = vpop.f32.mrb[6].mxu0 }
 0x101   :  { %v1242_v35 = vadd.f32 %v1241_v33, %v1240_v30  ;;  %v1243_v36 = vpop.f32.mrb[6].mxu1  ;;  %v1180_v37 = vpop.f32.mrb[7].mxu0 }
 0x102   :  { %v626_v38 = vadd.f32 %v1178_v32, %v1677_v14  ;;  %v1181_v39 = vadd.f32 %v1180_v37, %v1179_v34  ;;  %v1244_v40 = vpop.f32.mrb[7].mxu1 }
 0x103   :  { %v1245_v41 = vadd.f32 %v1244_v40, %v1243_v36 }
 0x104   :  { %v629_v42 = vadd.f32 %v1181_v39, %v1677_v14  ;;  %v1687_v43 = vadd.f32 %v1242_v35, %v626_v38 }
 0x106   :  { %v1182_v44 = vpop.f32.mrb[8].mxu0  ;;  %v1689_v45 = vadd.f32 %v1245_v41, %v629_v42 }
 0x107   :  { %v1246_v46 = vpop.f32.mrb[8].mxu1  ;;  %v1183_v47 = vpop.f32.mrb[9].mxu0 }
 0x108   :  { %v1184_v48 = vadd.f32 %v1183_v47, %v1182_v44  ;;  %v1247_v49 = vpop.f32.mrb[9].mxu1  ;;  %v1185_v50 = vpop.f32.mrb[10].mxu0 }
 0x109   :  { %v1248_v51 = vadd.f32 %v1247_v49, %v1246_v46  ;;  %v1249_v52 = vpop.f32.mrb[10].mxu1  ;;  %v1186_v53 = vpop.f32.mrb[11].mxu0 }
 0x10a   :  { %v634_v54 = vadd.f32 %v1184_v48, %v1677_v14  ;;  %v1187_v55 = vadd.f32 %v1186_v53, %v1185_v50  ;;  %v1250_v56 = vpop.f32.mrb[11].mxu1 }
 0x10b   :  { %v1251_v57 = vadd.f32 %v1250_v56, %v1249_v52 }
 0x10c   :  { %v637_v58 = vadd.f32 %v1187_v55, %v1677_v14  ;;  %v1693_v59 = vadd.f32 %v1248_v51, %v634_v54 }
 0x10e   :  { %v1188_v60 = vpop.f32.mrb[12].mxu0  ;;  %v1695_v61 = vadd.f32 %v1251_v57, %v637_v58 }
 0x10f   :  { %v1252_v62 = vpop.f32.mrb[12].mxu1  ;;  %v1189_v63 = vpop.f32.mrb[13].mxu0 }
 0x110   :  { %v1190_v0 = vadd.f32 %v1189_v63, %v1188_v60  ;;  %v1253_v1 = vpop.f32.mrb[13].mxu1  ;;  %v1191_v2 = vpop.f32.mrb[14].mxu0 }
 0x111   :  { %v1254_v3 = vadd.f32 %v1253_v1, %v1252_v62  ;;  %v1255_v4 = vpop.f32.mrb[14].mxu1  ;;  %v1192_v5 = vpop.f32.mrb[15].mxu0 }
 0x112   :  { %v642_v6 = vadd.f32 %v1190_v0, %v1677_v14  ;;  %v1193_v7 = vadd.f32 %v1192_v5, %v1191_v2  ;;  %v1256_v8 = vpop.f32.mrb[15].mxu1 }
 0x113   :  { %v1257_v9 = vadd.f32 %v1256_v8, %v1255_v4 }
 0x114   :  { %v645_v10 = vadd.f32 %v1193_v7, %v1677_v14  ;;  %v1699_v11 = vadd.f32 %v1254_v3, %v642_v6 }
 0x116   :  { %v1194_v12 = vpop.f32.mrb[16].mxu0  ;;  %v1701_v13 = vadd.f32 %v1257_v9, %v645_v10 }
 0x117   :  { %v1258_v15 = vpop.f32.mrb[16].mxu1  ;;  %v1195_v16 = vpop.f32.mrb[17].mxu0 }
 0x118   :  { %v1196_v17 = vadd.f32 %v1195_v16, %v1194_v12  ;;  %v1259_v18 = vpop.f32.mrb[17].mxu1  ;;  %v1197_v19 = vpop.f32.mrb[18].mxu0 }
 0x119   :  { %v1260_v20 = vadd.f32 %v1259_v18, %v1258_v15  ;;  %v1261_v21 = vpop.f32.mrb[18].mxu1  ;;  %v1198_v22 = vpop.f32.mrb[19].mxu0 }
 0x11a   :  { %v650_v23 = vadd.f32 %v1196_v17, %v1677_v14  ;;  %v1199_v24 = vadd.f32 %v1198_v22, %v1197_v19  ;;  %v1262_v25 = vpop.f32.mrb[19].mxu1 }
 0x11b   :  { %v1263_v26 = vadd.f32 %v1262_v25, %v1261_v21 }
 0x11c   :  { %v653_v28 = vadd.f32 %v1199_v24, %v1677_v14  ;;  %v747_v30 = vadd.f32 %v1260_v20, %v650_v23 }
 0x11e   :  { %v1200_v31 = vpop.f32.mrb[20].mxu0  ;;  %v1705_v32 = vadd.f32 %v1263_v26, %v653_v28 }
 0x11f   :  { %v1264_v33 = vpop.f32.mrb[20].mxu1  ;;  %v1201_v34 = vpop.f32.mrb[21].mxu0 }
 0x120   :  { %v1202_v35 = vadd.f32 %v1201_v34, %v1200_v31  ;;  %v1265_v36 = vpop.f32.mrb[21].mxu1  ;;  %v1203_v37 = vpop.f32.mrb[22].mxu0 }
 0x121   :  { %v1266_v38 = vadd.f32 %v1265_v36, %v1264_v33  ;;  %v1267_v39 = vpop.f32.mrb[22].mxu1  ;;  %v1204_v40 = vpop.f32.mrb[23].mxu0 }
 0x122   :  { %v658_v41 = vadd.f32 %v1202_v35, %v1677_v14  ;;  %v1205_v42 = vadd.f32 %v1204_v40, %v1203_v37  ;;  %v1268_v44 = vpop.f32.mrb[23].mxu1 }
 0x123   :  { %v1269_v46 = vadd.f32 %v1268_v44, %v1267_v39 }
 0x124   :  { %v661_v47 = vadd.f32 %v1205_v42, %v1677_v14  ;;  %v755_v48 = vadd.f32 %v1266_v38, %v658_v41 }
 0x126   :  { %v1206_v49 = vpop.f32.mrb[24].mxu0  ;;  %v758_v50 = vadd.f32 %v1269_v46, %v661_v47 }
 0x127   :  { %v1270_v51 = vpop.f32.mrb[24].mxu1  ;;  %v1207_v52 = vpop.f32.mrb[25].mxu0 }
 0x128   :  { %v1208_v53 = vadd.f32 %v1207_v52, %v1206_v49  ;;  %v1271_v54 = vpop.f32.mrb[25].mxu1  ;;  %v1209_v55 = vpop.f32.mrb[26].mxu0 }
 0x129   :  { %v1272_v56 = vadd.f32 %v1271_v54, %v1270_v51  ;;  %v1273_v57 = vpop.f32.mrb[26].mxu1  ;;  %v1210_v58 = vpop.f32.mrb[27].mxu0 }
 0x12a   :  { %v666_v60 = vadd.f32 %v1208_v53, %v1677_v14  ;;  %v1211_v62 = vadd.f32 %v1210_v58, %v1209_v55  ;;  %v1274_v63 = vpop.f32.mrb[27].mxu1 }
 0x12b   :  { %v1275_v0 = vadd.f32 %v1274_v63, %v1273_v57 }
 0x12c   :  { %v669_v1 = vadd.f32 %v1211_v62, %v1677_v14  ;;  %v1711_v2 = vadd.f32 %v1272_v56, %v666_v60 }
 0x12e   :  { %v1212_v3 = vpop.f32.mrb[28].mxu0  ;;  %v1713_v4 = vadd.f32 %v1275_v0, %v669_v1 }
 0x12f   :  { %v1276_v5 = vpop.f32.mrb[28].mxu1  ;;  %v1213_v6 = vpop.f32.mrb[29].mxu0 }
 0x130   :  { %v1214_v7 = vadd.f32 %v1213_v6, %v1212_v3  ;;  %v1277_v8 = vpop.f32.mrb[29].mxu1  ;;  %v1215_v9 = vpop.f32.mrb[30].mxu0 }
 0x131   :  { %v1278_v10 = vadd.f32 %v1277_v8, %v1276_v5  ;;  %v1279_v12 = vpop.f32.mrb[30].mxu1  ;;  %v1216_v15 = vpop.f32.mrb[31].mxu0 }
 0x132   :  { %v674_v16 = vadd.f32 %v1214_v7, %v1677_v14  ;;  %v1217_v17 = vadd.f32 %v1216_v15, %v1215_v9  ;;  %v1280_v18 = vpop.f32.mrb[31].mxu1 }
 0x133   :  { %v1281_v19 = vadd.f32 %v1280_v18, %v1279_v12 }
 0x134   :  { %v677_v20 = vadd.f32 %v1217_v17, %v1677_v14  ;;  %v771_v21 = vadd.f32 %v1278_v10, %v674_v16 }
 0x136   :  { %v1304_v22 = vpop.f32.mrb[32].mxu0  ;;  %v774_v23 = vadd.f32 %v1281_v19, %v677_v20 }
 0x137   :  { %v820_v24 = vadd.f32 %v1304_v22, %v1687_v43  ;;  %v1312_v25 = vpop.f32.mrb[32].mxu1  ;;  %v811_v26 = vpop.f32.mrb[33].mxu0 }
 0x138   :  { %v852_v28 = vadd.f32 %v1312_v25, %v755_v48  ;;  %v812_v31 = vadd.f32 %v811_v26, %v1681_v27  ;;  %v843_v33 = vpop.f32.mrb[33].mxu1  ;;  %v1305_v34 = vpop.f32.mrb[34].mxu0 }
 0x139   :  { %v876_v35 = vmul.f32 0.01, %v820_v24  ;;  %v844_v36 = vadd.f32 %v843_v33, %v747_v30  ;;  %v823_v37 = vadd.f32 %v1305_v34, %v1689_v45  ;;  %v1313_v38 = vpop.f32.mrb[34].mxu1  ;;  %v814_v39 = vpop.f32.mrb[35].mxu0 }
 0x13a   :  { %v884_v40 = vmul.f32 0.01, %v852_v28  ;;  %v874_v14 = vmul.f32 0.01, %v812_v31  ;;  %v855_v41 = vadd.f32 %v1313_v38, %v758_v50  ;;  %v815_v42 = vadd.f32 %v814_v39, %v1683_v29  ;;  %v846_v44 = vpop.f32.mrb[35].mxu1 }
 0x13b   :  { %v882_v43 = vmul.f32 0.01, %v844_v36  ;;  %v877_v46 = vmul.f32 0.01, %v823_v37  ;;  %v847_v47 = vadd.f32 %v846_v44, %v1705_v32  ;;  %v892_v49 = vmax.f32 %v820_v24, %v876_v35 }
 0x13c   :  { %v885_v48 = vmul.f32 0.01, %v855_v41  ;;  %v875_v27 = vmul.f32 0.01, %v815_v42  ;;  %v900_v30 = vmax.f32 %v852_v28, %v884_v40  ;;  %v890_v53 = vmax.f32 %v812_v31, %v874_v14 }
 0x13d   :  { %v893_v51 = vmax.f32 %v823_v37, %v877_v46  ;;  %v883_v52 = vmul.f32 0.01, %v847_v47  ;;  %v898_v56 = vmax.f32 %v844_v36, %v882_v43 }
 0x13e   :  { %v901_v45 = vmax.f32 %v855_v41, %v885_v48  ;;  %v891_v54 = vmax.f32 %v815_v42, %v875_v27  ;;  %v1308_v55 = vpop.f32.mrb[36].mxu0 }
 0x13f   :  { %v1115_v57 = vpack.c.bf16 %v893_v51, %v892_v49  ;;  %v899_v50 = vmax.f32 %v847_v47, %v883_v52  ;;  %v836_v29 = vadd.f32 %v1308_v55, %v1699_v11  ;;  %v1316_v58 = vpop.f32.mrb[36].mxu1  ;;  %v827_v60 = vpop.f32.mrb[37].mxu0 }
 0x140   :  { %v1135_v62 = vpack.c.bf16 %v901_v45, %v900_v30  ;;  %v1110_v63 = vpack.c.bf16 %v891_v54, %v890_v53  ;;  %v868_v32 = vadd.f32 %v1316_v58, %v771_v21  ;;  %v828_v0 = vadd.f32 %v827_v60, %v1693_v59  ;;  %v859_v1 = vpop.f32.mrb[37].mxu1  ;;  %v1309_v3 = vpop.f32.mrb[38].mxu0 }
 0x141   :  { %1147 = vst [vmem:[%s1755_s3 + $0x8] sm:$0xff] %v1115_v57   ;;  %v1130_v5 = vpack.c.bf16 %v899_v50, %v898_v56  ;;  %v880_v6 = vmul.f32 0.01, %v836_v29  ;;  %v860_v7 = vadd.f32 %v859_v1, %v1711_v2  ;;  %v839_v8 = vadd.f32 %v1309_v3, %v1701_v13  ;;  %v1317_v11 = vpop.f32.mrb[38].mxu1  ;;  %v830_v9 = vpop.f32.mrb[39].mxu0 }
 0x142   :  { %1151 = vst [vmem:[%s1755_s3 + $0x28] sm:$0xff] %v1135_v62   ;;  %1111 = vst [vmem:[%s1755_s3] sm:$0xff] %v1110_v63   ;;  %v888_v59 = vmul.f32 0.01, %v868_v32  ;;  %v878_v10 = vmul.f32 0.01, %v828_v0  ;;  %v871_v12 = vadd.f32 %v1317_v11, %v774_v23  ;;  %v831_v15 = vadd.f32 %v830_v9, %v1695_v61  ;;  %v862_v16 = vpop.f32.mrb[39].mxu1 }
 0x143   :  { %1150 = vst [vmem:[%s1755_s3 + $0x20] sm:$0xff] %v1130_v5   ;;  %v886_v13 = vmul.f32 0.01, %v860_v7  ;;  %v881_v2 = vmul.f32 0.01, %v839_v8  ;;  %v863_v17 = vadd.f32 %v862_v16, %v1713_v4  ;;  %v896_v20 = vmax.f32 %v836_v29, %v880_v6 }
 0x144   :  { %v889_v18 = vmul.f32 0.01, %v871_v12  ;;  %v879_v19 = vmul.f32 0.01, %v831_v15  ;;  %v904_v24 = vmax.f32 %v868_v32, %v888_v59  ;;  %v894_v25 = vmax.f32 %v828_v0, %v878_v10 }
 0x145   :  { %v897_v21 = vmax.f32 %v839_v8, %v881_v2  ;;  %v887_v22 = vmul.f32 0.01, %v863_v17  ;;  %v902_v28 = vmax.f32 %v860_v7, %v886_v13 }
 0x146   :  { %v905_v26 = vmax.f32 %v871_v12, %v889_v18  ;;  %v895_v23 = vmax.f32 %v831_v15, %v879_v19 }
 0x147   :  { %v1125_v61 = vpack.c.bf16 %v897_v21, %v896_v20  ;;  %v903_v31 = vmax.f32 %v863_v17, %v887_v22 }
 0x148   :  { %v1145_v33 = vpack.c.bf16 %v905_v26, %v904_v24  ;;  %v1120_v34 = vpack.c.bf16 %v895_v23, %v894_v25 }
 0x149   :  { %1149 = vst [vmem:[%s1755_s3 + $0x18] sm:$0xff] %v1125_v61   ;;  %v1140_v35 = vpack.c.bf16 %v903_v31, %v902_v28 }
 0x14a   :  { %1153 = vst [vmem:[%s1755_s3 + $0x38] sm:$0xff] %v1145_v33   ;;  %1148 = vst [vmem:[%s1755_s3 + $0x10] sm:$0xff] %v1120_v34  }
 0x14b   :  { %1152 = vst [vmem:[%s1755_s3 + $0x30] sm:$0xff] %v1140_v35  }

// kernel: appearance_autoencoder_forward.14
= control target key start
LH: loop header
LB: loop body
LE: loop exit
PB: predicated region body
PF: predicated region fallthrough
CT: control target
= control target key end

     0   :  { %vm5657_vm0 = vcmask 257024   ;;  %s9202_s1 = inlined_call_operand.vmem [shape: bf16[8192,32], index: 1, kind: input, shape index: {}]   ;;  %s9203_s0 = inlined_call_operand.vmem [shape: bf16[8,8192], index: 0, kind: input, shape index: {}]   ;;  %s9204_s2 = inlined_call_operand.vmem [shape: f32[1,32], index: 2, kind: input, shape index: {}]   ;;  %s9205_s3 = inlined_call_operand.vmem [shape: bf16[8,32], index: 3, kind: output, shape index: {}]  }
   0x1   :  { %v6944_v0 = vld [vmem:[%s9202_s1 + $0x40] sm:$0xff]   ;;  %v6948_v4 = vld [vmem:[%s9202_s1 + $0x48] sm:$0xff]   ;;  %v6952_v8 = vld [vmem:[%s9202_s1 + $0x50] sm:$0xff]  }
   0x2   :  { %v6945_v1 = vld [vmem:[%s9202_s1 + $0xc0] sm:$0xff]   ;;  %6240 = vmatprep.subr.bf16.mxu0 %v6944_v0  ;;  %v6949_v5 = vld [vmem:[%s9202_s1 + $0xc8] sm:$0xff]   ;;  %v6953_v9 = vld [vmem:[%s9202_s1 + $0xd0] sm:$0xff]  }
   0x3   :  { %v6946_v2 = vld [vmem:[%s9202_s1] sm:$0xff]   ;;  %6262 = vmatprep.subr.bf16.mxu1 %v6945_v1  ;;  %v6950_v6 = vld [vmem:[%s9202_s1 + $0x8] sm:$0xff]   ;;  %v6954_v10 = vld [vmem:[%s9202_s1 + $0x10] sm:$0xff]  }
   0x4   :  { %v6947_v3 = vld [vmem:[%s9202_s1 + $0x80] sm:$0xff]   ;;  %6241 = vmatpush3.bf16.msra.mxu0 %v6946_v2  ;;  %v6951_v7 = vld [vmem:[%s9202_s1 + $0x88] sm:$0xff]   ;;  %v6955_v11 = vld [vmem:[%s9202_s1 + $0x90] sm:$0xff]  }
   0x5   :  { %6263 = vmatpush3.bf16.msra.mxu1 %v6947_v3  ;;  %6242 = vmatprep.subr.bf16.mxu0 %v6948_v4  ;;  %v6956_v12 = vld [vmem:[%s9202_s1 + $0x58] sm:$0xff]   ;;  %v6960_v16 = vld [vmem:[%s9202_s1 + $0x60] sm:$0xff]   ;;  %v6964_v20 = vld [vmem:[%s9202_s1 + $0x68] sm:$0xff]  }
   0x6   :  { %6264 = vmatprep.subr.bf16.mxu1 %v6949_v5  ;;  %v6957_v13 = vld [vmem:[%s9202_s1 + $0xd8] sm:$0xff]   ;;  %v6961_v17 = vld [vmem:[%s9202_s1 + $0xe0] sm:$0xff]   ;;  %v6965_v21 = vld [vmem:[%s9202_s1 + $0xe8] sm:$0xff]  }
   0x7   :  { %v6958_v14 = vld [vmem:[%s9202_s1 + $0x18] sm:$0xff]   ;;  %v6962_v18 = vld [vmem:[%s9202_s1 + $0x20] sm:$0xff]   ;;  %v6966_v22 = vld [vmem:[%s9202_s1 + $0x28] sm:$0xff]  }
   0x8   :  { %6243 = vmatpush3.bf16.msra.mxu0 %v6950_v6  ;;  %v6959_v15 = vld [vmem:[%s9202_s1 + $0x98] sm:$0xff]   ;;  %v6963_v19 = vld [vmem:[%s9202_s1 + $0xa0] sm:$0xff]   ;;  %v6967_v23 = vld [vmem:[%s9202_s1 + $0xa8] sm:$0xff]  }
   0x9   :  { %6265 = vmatpush3.bf16.msra.mxu1 %v6951_v7  ;;  %6244 = vmatprep.subr.bf16.mxu0 %v6952_v8  ;;  %v6968_v24 = vld [vmem:[%s9202_s1 + $0x70] sm:$0xff]   ;;  %v6972_v28 = vld [vmem:[%s9202_s1 + $0x78] sm:$0xff]   ;;  %v15_v32 = vld [vmem:[%s9203_s0] sm:$0xff] }
   0xa   :  { %6266 = vmatprep.subr.bf16.mxu1 %v6953_v9  ;;  %v6969_v25 = vld [vmem:[%s9202_s1 + $0xf0] sm:$0xff]   ;;  %v6973_v29 = vld [vmem:[%s9202_s1 + $0xf8] sm:$0xff]   ;;  %v16_v33 = vld [vmem:[%s9203_s0 + $0x8] sm:$0xff]  ;;  %v5664_v34 = vcombine.low %v15_v32, %v15_v32  ;;  %v5665_v35 = vcombine.high %v15_v32, %v15_v32 }
   0xb   :  { %v6970_v26 = vld [vmem:[%s9202_s1 + $0x30] sm:$0xff]   ;;  %v6974_v30 = vld [vmem:[%s9202_s1 + $0x38] sm:$0xff]   ;;  %v5666_v36 = vcombine.low %v16_v33, %v16_v33  ;;  %v5667_v37 = vcombine.high %v16_v33, %v16_v33  ;;  %v6980_v38 = vld [vmem:[%s9202_s1 + $0x140] sm:$0xff]  }
   0xc   :  { %6245 = vmatpush3.bf16.msra.mxu0 %v6954_v10  ;;  %v6971_v27 = vld [vmem:[%s9202_s1 + $0xb0] sm:$0xff]   ;;  %v6975_v31 = vld [vmem:[%s9202_s1 + $0xb8] sm:$0xff]   ;;  %v6981_v39 = vld [vmem:[%s9202_s1 + $0x1c0] sm:$0xff]   ;;  %4406 = vmatprep.mubr.bf16.mxu0 %v5665_v35 }
   0xd   :  { %6267 = vmatpush3.bf16.msra.mxu1 %v6955_v11  ;;  %6246 = vmatprep.subr.bf16.mxu0 %v6956_v12  ;;  %v6982_v40 = vld [vmem:[%s9202_s1 + $0x100] sm:$0xff]   ;;  %v6984_v42 = vld [vmem:[%s9202_s1 + $0x148] sm:$0xff]   ;;  %v6988_v46 = vld [vmem:[%s9202_s1 + $0x150] sm:$0xff]  }
   0xe   :  { %6268 = vmatprep.subr.bf16.mxu1 %v6957_v13  ;;  %4446 = vmatprep.mubr.bf16.mxu1 %v5667_v37  ;;  %v6983_v41 = vld [vmem:[%s9202_s1 + $0x180] sm:$0xff]   ;;  %v6985_v43 = vld [vmem:[%s9202_s1 + $0x1c8] sm:$0xff]   ;;  %v6989_v47 = vld [vmem:[%s9202_s1 + $0x1d0] sm:$0xff]  }
   0xf   :  { %v6986_v44 = vld [vmem:[%s9202_s1 + $0x108] sm:$0xff]   ;;  %v6990_v48 = vld [vmem:[%s9202_s1 + $0x110] sm:$0xff]   ;;  %v6992_v50 = vld [vmem:[%s9202_s1 + $0x158] sm:$0xff]  }
  0x10   :  { %6247 = vmatpush3.bf16.msra.mxu0 %v6958_v14  ;;  %v6987_v45 = vld [vmem:[%s9202_s1 + $0x188] sm:$0xff]   ;;  %v6991_v49 = vld [vmem:[%s9202_s1 + $0x190] sm:$0xff]   ;;  %v6993_v51 = vld [vmem:[%s9202_s1 + $0x1d8] sm:$0xff]  }
  0x11   :  { %6269 = vmatpush3.bf16.msra.mxu1 %v6959_v15  ;;  %6248 = vmatprep.subr.bf16.mxu0 %v6960_v16  ;;  %v6994_v52 = vld [vmem:[%s9202_s1 + $0x118] sm:$0xff]   ;;  %v6996_v54 = vld [vmem:[%s9202_s1 + $0x160] sm:$0xff]   ;;  %v7000_v58 = vld [vmem:[%s9202_s1 + $0x168] sm:$0xff]  }
  0x12   :  { %6270 = vmatprep.subr.bf16.mxu1 %v6961_v17  ;;  %v6995_v53 = vld [vmem:[%s9202_s1 + $0x198] sm:$0xff]   ;;  %v6997_v55 = vld [vmem:[%s9202_s1 + $0x1e0] sm:$0xff]   ;;  %v7001_v59 = vld [vmem:[%s9202_s1 + $0x1e8] sm:$0xff]  }
  0x13   :  { %v6998_v56 = vld [vmem:[%s9202_s1 + $0x120] sm:$0xff]   ;;  %v7002_v60 = vld [vmem:[%s9202_s1 + $0x128] sm:$0xff]   ;;  %v7004_v62 = vld [vmem:[%s9202_s1 + $0x170] sm:$0xff]  }
  0x14   :  { %6249 = vmatpush3.bf16.msra.mxu0 %v6962_v18  ;;  %v6999_v57 = vld [vmem:[%s9202_s1 + $0x1a0] sm:$0xff]   ;;  %v7003_v61 = vld [vmem:[%s9202_s1 + $0x1a8] sm:$0xff]   ;;  %v7005_v63 = vld [vmem:[%s9202_s1 + $0x1f0] sm:$0xff]  }
  0x15   :  { %6271 = vmatpush3.bf16.msra.mxu1 %v6963_v19  ;;  %6250 = vmatprep.subr.bf16.mxu0 %v6964_v20  ;;  %v7006_v0 = vld [vmem:[%s9202_s1 + $0x130] sm:$0xff]   ;;  %v7008_v2 = vld [vmem:[%s9202_s1 + $0x178] sm:$0xff]   ;;  %v7016_v12 = vld [vmem:[%s9202_s1 + $0x240] sm:$0xff]  }
  0x16   :  { %6272 = vmatprep.subr.bf16.mxu1 %v6965_v21  ;;  %v7007_v1 = vld [vmem:[%s9202_s1 + $0x1b0] sm:$0xff]   ;;  %v7009_v3 = vld [vmem:[%s9202_s1 + $0x1f8] sm:$0xff]   ;;  %v7017_v13 = vld [vmem:[%s9202_s1 + $0x2c0] sm:$0xff]  }
  0x17   :  { %v7010_v4 = vld [vmem:[%s9202_s1 + $0x138] sm:$0xff]   ;;  %v17_v6 = vld [vmem:[%s9203_s0 + $0x10] sm:$0xff]  ;;  %v7018_v14 = vld [vmem:[%s9202_s1 + $0x200] sm:$0xff]  }
  0x18   :  { %6251 = vmatpush3.bf16.msra.mxu0 %v6966_v22  ;;  %v7011_v5 = vld [vmem:[%s9202_s1 + $0x1b8] sm:$0xff]   ;;  %v5668_v7 = vcombine.low %v17_v6, %v17_v6  ;;  %v5669_v8 = vcombine.high %v17_v6, %v17_v6  ;;  %v7019_v15 = vld [vmem:[%s9202_s1 + $0x280] sm:$0xff]   ;;  %v7020_v16 = vld [vmem:[%s9202_s1 + $0x248] sm:$0xff]  }
  0x19   :  { %6273 = vmatpush3.bf16.msra.mxu1 %v6967_v23  ;;  %6252 = vmatprep.subr.bf16.mxu0 %v6968_v24  ;;  %v18_v9 = vld [vmem:[%s9203_s0 + $0x18] sm:$0xff]  ;;  %v7021_v17 = vld [vmem:[%s9202_s1 + $0x2c8] sm:$0xff]   ;;  %v7024_v20 = vld [vmem:[%s9202_s1 + $0x250] sm:$0xff]  }
  0x1a   :  { %6274 = vmatprep.subr.bf16.mxu1 %v6969_v25  ;;  %v5670_v10 = vcombine.low %v18_v9, %v18_v9  ;;  %v5671_v11 = vcombine.high %v18_v9, %v18_v9  ;;  %v7022_v18 = vld [vmem:[%s9202_s1 + $0x208] sm:$0xff]   ;;  %v7025_v21 = vld [vmem:[%s9202_s1 + $0x2d0] sm:$0xff]   ;;  %v7028_v24 = vld [vmem:[%s9202_s1 + $0x258] sm:$0xff]  }
  0x1b   :  { %v7023_v19 = vld [vmem:[%s9202_s1 + $0x288] sm:$0xff]   ;;  %v7026_v22 = vld [vmem:[%s9202_s1 + $0x210] sm:$0xff]   ;;  %v7029_v25 = vld [vmem:[%s9202_s1 + $0x2d8] sm:$0xff]  }
  0x1c   :  { %6253 = vmatpush3.bf16.msra.mxu0 %v6970_v26  ;;  %v7027_v23 = vld [vmem:[%s9202_s1 + $0x290] sm:$0xff]   ;;  %v7030_v26 = vld [vmem:[%s9202_s1 + $0x218] sm:$0xff]   ;;  %v7036_v32 = vld [vmem:[%s9202_s1 + $0x268] sm:$0xff]  }
  0x1d   :  { %6275 = vmatpush3.bf16.msra.mxu1 %v6971_v27  ;;  %6254 = vmatprep.subr.bf16.mxu0 %v6972_v28  ;;  %v7031_v27 = vld [vmem:[%s9202_s1 + $0x298] sm:$0xff]   ;;  %v7032_v28 = vld [vmem:[%s9202_s1 + $0x260] sm:$0xff]   ;;  %v7037_v33 = vld [vmem:[%s9202_s1 + $0x2e8] sm:$0xff]  }
  0x1e   :  { %6276 = vmatprep.subr.bf16.mxu1 %v6973_v29  ;;  %v7033_v29 = vld [vmem:[%s9202_s1 + $0x2e0] sm:$0xff]   ;;  %v7039_v35 = vld [vmem:[%s9202_s1 + $0x2a8] sm:$0xff]   ;;  %v7041_v37 = vld [vmem:[%s9202_s1 + $0x2f0] sm:$0xff]  }
  0x1f   :  { %v7072_v6 = vld [vmem:[%s9202_s1 + $0x368] sm:$0xff]  }
  0x20   :  { %6255 = vmatpush3.bf16.msra.mxu0 %v6974_v30  ;;  %v7034_v30 = vld [vmem:[%s9202_s1 + $0x220] sm:$0xff]   ;;  %v7075_v9 = vld [vmem:[%s9202_s1 + $0x3a8] sm:$0xff]  }
  0x21   :  { %6277 = vmatpush3.bf16.msra.mxu1 %v6975_v31  ;;  %6284 = vmatprep.subr.bf16.mxu0 %v6980_v38  ;;  %v7035_v31 = vld [vmem:[%s9202_s1 + $0x2a0] sm:$0xff]   ;;  %v7042_v38 = vld [vmem:[%s9202_s1 + $0x230] sm:$0xff]  }
  0x22   :  { %6306 = vmatprep.subr.bf16.mxu1 %v6981_v39  ;;  %v7043_v39 = vld [vmem:[%s9202_s1 + $0x2b0] sm:$0xff]  }
  0x23   :  { %4407 = vmatmul.mubr.bf16.vlgmr.msra.gmra.mrb[0].mxu0 %v5664_v34  ;;  %v7038_v34 = vld [vmem:[%s9202_s1 + $0x228] sm:$0xff]  }
  0x24   :  { %4447 = vmatmul.mubr.bf16.vlgmr.msra.gmra.mrb[0].mxu1 %v5666_v36  ;;  %6285 = vmatpush3.bf16.msra.mxu0 %v6982_v40  ;;  %v7040_v36 = vld [vmem:[%s9202_s1 + $0x270] sm:$0xff]   ;;  %v7044_v40 = vld [vmem:[%s9202_s1 + $0x278] sm:$0xff]  }
  0x25   :  { %6307 = vmatpush3.bf16.msra.mxu1 %v6983_v41  ;;  %6286 = vmatprep.subr.bf16.mxu0 %v6984_v42  ;;  %v7045_v41 = vld [vmem:[%s9202_s1 + $0x2f8] sm:$0xff]  }
  0x26   :  { %6308 = vmatprep.subr.bf16.mxu1 %v6985_v43  ;;  %4486 = vmatprep.mubr.bf16.mxu0 %v5669_v8  ;;  %v7046_v42 = vld [vmem:[%s9202_s1 + $0x238] sm:$0xff]   ;;  %v7074_v8 = vld [vmem:[%s9202_s1 + $0x328] sm:$0xff]  }
  0x27   :  { %4526 = vmatprep.mubr.bf16.mxu1 %v5671_v11  ;;  %v7047_v43 = vld [vmem:[%s9202_s1 + $0x2b8] sm:$0xff]   ;;  %v7077_v11 = vld [vmem:[%s9202_s1 + $0x3f0] sm:$0xff]  }
  0x28   :  { %6287 = vmatpush3.bf16.msra.mxu0 %v6986_v44  ;;  %v19_v44 = vld [vmem:[%s9203_s0 + $0x20] sm:$0xff] }
  0x29   :  { %6309 = vmatpush3.bf16.msra.mxu1 %v6987_v45  ;;  %6288 = vmatprep.subr.bf16.mxu0 %v6988_v46  ;;  %v20_v45 = vld [vmem:[%s9203_s0 + $0x28] sm:$0xff]  ;;  %v5672_v46 = vcombine.low %v19_v44, %v19_v44 }
  0x2a   :  { %6310 = vmatprep.subr.bf16.mxu1 %v6989_v47  ;;  %v5673_v47 = vcombine.high %v19_v44, %v19_v44  ;;  %v7108_v44 = vld [vmem:[%s9202_s1 + $0x468] sm:$0xff]  }
  0x2c   :  { %6289 = vmatpush3.bf16.msra.mxu0 %v6990_v48  ;;  %v5674_v48 = vcombine.low %v20_v45, %v20_v45 }
  0x2d   :  { %6311 = vmatpush3.bf16.msra.mxu1 %v6991_v49  ;;  %6290 = vmatprep.subr.bf16.mxu0 %v6992_v50  ;;  %v5675_v49 = vcombine.high %v20_v45, %v20_v45  ;;  %v7052_v50 = vld [vmem:[%s9202_s1 + $0x340] sm:$0xff]   ;;  %v7109_v45 = vld [vmem:[%s9202_s1 + $0x4e8] sm:$0xff]  }
  0x2e   :  { %6312 = vmatprep.subr.bf16.mxu1 %v6993_v51  ;;  %v7053_v51 = vld [vmem:[%s9202_s1 + $0x3c0] sm:$0xff]  }
  0x30   :  { %6291 = vmatpush3.bf16.msra.mxu0 %v6994_v52  ;;  %v7054_v52 = vld [vmem:[%s9202_s1 + $0x300] sm:$0xff]  }
  0x31   :  { %6313 = vmatpush3.bf16.msra.mxu1 %v6995_v53  ;;  %6292 = vmatprep.subr.bf16.mxu0 %v6996_v54  ;;  %v7055_v53 = vld [vmem:[%s9202_s1 + $0x380] sm:$0xff]   ;;  %v7056_v54 = vld [vmem:[%s9202_s1 + $0x348] sm:$0xff]  }
  0x32   :  { %6314 = vmatprep.subr.bf16.mxu1 %v6997_v55  ;;  %v7057_v55 = vld [vmem:[%s9202_s1 + $0x3c8] sm:$0xff]  }
  0x34   :  { %6293 = vmatpush3.bf16.msra.mxu0 %v6998_v56  ;;  %v7058_v56 = vld [vmem:[%s9202_s1 + $0x308] sm:$0xff]  }
  0x35   :  { %6315 = vmatpush3.bf16.msra.mxu1 %v6999_v57  ;;  %6294 = vmatprep.subr.bf16.mxu0 %v7000_v58  ;;  %v7059_v57 = vld [vmem:[%s9202_s1 + $0x388] sm:$0xff]   ;;  %v7060_v58 = vld [vmem:[%s9202_s1 + $0x350] sm:$0xff]  }
  0x36   :  { %6316 = vmatprep.subr.bf16.mxu1 %v7001_v59  ;;  %v7061_v59 = vld [vmem:[%s9202_s1 + $0x3d0] sm:$0xff]  }
  0x38   :  { %6295 = vmatpush3.bf16.msra.mxu0 %v7002_v60  ;;  %v7062_v60 = vld [vmem:[%s9202_s1 + $0x310] sm:$0xff]  }
  0x39   :  { %6317 = vmatpush3.bf16.msra.mxu1 %v7003_v61  ;;  %6296 = vmatprep.subr.bf16.mxu0 %v7004_v62  ;;  %v7063_v61 = vld [vmem:[%s9202_s1 + $0x390] sm:$0xff]   ;;  %v7064_v62 = vld [vmem:[%s9202_s1 + $0x358] sm:$0xff]  }
  0x3a   :  { %6318 = vmatprep.subr.bf16.mxu1 %v7005_v63  ;;  %v7065_v63 = vld [vmem:[%s9202_s1 + $0x3d8] sm:$0xff]  }
  0x3c   :  { %6297 = vmatpush3.bf16.msra.mxu0 %v7006_v0  ;;  %v7066_v0 = vld [vmem:[%s9202_s1 + $0x318] sm:$0xff]  }
  0x3d   :  { %6319 = vmatpush3.bf16.msra.mxu1 %v7007_v1  ;;  %6298 = vmatprep.subr.bf16.mxu0 %v7008_v2  ;;  %v7067_v1 = vld [vmem:[%s9202_s1 + $0x398] sm:$0xff]   ;;  %v7068_v2 = vld [vmem:[%s9202_s1 + $0x360] sm:$0xff]  }
  0x3e   :  { %6320 = vmatprep.subr.bf16.mxu1 %v7009_v3  ;;  %v7069_v3 = vld [vmem:[%s9202_s1 + $0x3e0] sm:$0xff]  }
  0x40   :  { %6299 = vmatpush3.bf16.msra.mxu0 %v7010_v4  ;;  %v7070_v4 = vld [vmem:[%s9202_s1 + $0x320] sm:$0xff]  }
  0x41   :  { %6321 = vmatpush3.bf16.msra.mxu1 %v7011_v5  ;;  %6328 = vmatprep.subr.bf16.mxu0 %v7016_v12  ;;  %v7071_v5 = vld [vmem:[%s9202_s1 + $0x3a0] sm:$0xff]   ;;  %v7078_v12 = vld [vmem:[%s9202_s1 + $0x330] sm:$0xff]  }
  0x42   :  { %6350 = vmatprep.subr.bf16.mxu1 %v7017_v13  ;;  %v7079_v13 = vld [vmem:[%s9202_s1 + $0x3b0] sm:$0xff]  }
  0x43   :  { %4487 = vmatmul.mubr.bf16.vlgmr.msra.gmra.mrb[4].mxu0 %v5668_v7  ;;  %v7073_v7 = vld [vmem:[%s9202_s1 + $0x3e8] sm:$0xff]  }
  0x44   :  { %4527 = vmatmul.mubr.bf16.vlgmr.msra.gmra.mrb[4].mxu1 %v5670_v10  ;;  %6329 = vmatpush3.bf16.msra.mxu0 %v7018_v14  ;;  %v7076_v10 = vld [vmem:[%s9202_s1 + $0x370] sm:$0xff]   ;;  %v7080_v14 = vld [vmem:[%s9202_s1 + $0x378] sm:$0xff]  }
  0x45   :  { %6351 = vmatpush3.bf16.msra.mxu1 %v7019_v15  ;;  %6330 = vmatprep.subr.bf16.mxu0 %v7020_v16  ;;  %v7081_v15 = vld [vmem:[%s9202_s1 + $0x3f8] sm:$0xff]  }
  0x46   :  { %6352 = vmatprep.subr.bf16.mxu1 %v7021_v17  ;;  %4566 = vmatprep.mubr.bf16.mxu0 %v5673_v47  ;;  %v7082_v16 = vld [vmem:[%s9202_s1 + $0x338] sm:$0xff]   ;;  %v7111_v47 = vld [vmem:[%s9202_s1 + $0x4a8] sm:$0xff]  }
  0x47   :  { %4606 = vmatprep.mubr.bf16.mxu1 %v5675_v49  ;;  %v7083_v17 = vld [vmem:[%s9202_s1 + $0x3b8] sm:$0xff]   ;;  %v7113_v49 = vld [vmem:[%s9202_s1 + $0x4f0] sm:$0xff]  }
  0x48   :  { %6331 = vmatpush3.bf16.msra.mxu0 %v7022_v18  ;;  %v21_v18 = vld [vmem:[%s9203_s0 + $0x30] sm:$0xff] }
  0x49   :  { %6353 = vmatpush3.bf16.msra.mxu1 %v7023_v19  ;;  %6332 = vmatprep.subr.bf16.mxu0 %v7024_v20  ;;  %v22_v19 = vld [vmem:[%s9203_s0 + $0x38] sm:$0xff]  ;;  %v5676_v20 = vcombine.low %v21_v18, %v21_v18 }
  0x4a   :  { %6354 = vmatprep.subr.bf16.mxu1 %v7025_v21  ;;  %v5677_v21 = vcombine.high %v21_v18, %v21_v18  ;;  %v7144_v18 = vld [vmem:[%s9202_s1 + $0x568] sm:$0xff]  }
  0x4c   :  { %6333 = vmatpush3.bf16.msra.mxu0 %v7026_v22  ;;  %v5678_v22 = vcombine.low %v22_v19, %v22_v19 }
  0x4d   :  { %6355 = vmatpush3.bf16.msra.mxu1 %v7027_v23  ;;  %6334 = vmatprep.subr.bf16.mxu0 %v7028_v24  ;;  %v7088_v23 = vld [vmem:[%s9202_s1 + $0x440] sm:$0xff]   ;;  %v5679_v24 = vcombine.high %v22_v19, %v22_v19  ;;  %v7145_v19 = vld [vmem:[%s9202_s1 + $0x5e8] sm:$0xff]  }
  0x4e   :  { %6356 = vmatprep.subr.bf16.mxu1 %v7029_v25  ;;  %v7089_v25 = vld [vmem:[%s9202_s1 + $0x4c0] sm:$0xff]  }
  0x50   :  { %6335 = vmatpush3.bf16.msra.mxu0 %v7030_v26  ;;  %v7090_v26 = vld [vmem:[%s9202_s1 + $0x400] sm:$0xff]  }
  0x51   :  { %6357 = vmatpush3.bf16.msra.mxu1 %v7031_v27  ;;  %6336 = vmatprep.subr.bf16.mxu0 %v7032_v28  ;;  %v7091_v27 = vld [vmem:[%s9202_s1 + $0x480] sm:$0xff]   ;;  %v7092_v28 = vld [vmem:[%s9202_s1 + $0x448] sm:$0xff]  }
  0x52   :  { %6358 = vmatprep.subr.bf16.mxu1 %v7033_v29  ;;  %v7093_v29 = vld [vmem:[%s9202_s1 + $0x4c8] sm:$0xff]  }
  0x54   :  { %6337 = vmatpush3.bf16.msra.mxu0 %v7034_v30  ;;  %v7094_v30 = vld [vmem:[%s9202_s1 + $0x408] sm:$0xff]  }
  0x55   :  { %6359 = vmatpush3.bf16.msra.mxu1 %v7035_v31  ;;  %6338 = vmatprep.subr.bf16.mxu0 %v7036_v32  ;;  %v7095_v31 = vld [vmem:[%s9202_s1 + $0x488] sm:$0xff]   ;;  %v7096_v32 = vld [vmem:[%s9202_s1 + $0x450] sm:$0xff]  }
  0x56   :  { %6360 = vmatprep.subr.bf16.mxu1 %v7037_v33  ;;  %v7097_v33 = vld [vmem:[%s9202_s1 + $0x4d0] sm:$0xff]  }
  0x58   :  { %6339 = vmatpush3.bf16.msra.mxu0 %v7038_v34  ;;  %v7098_v34 = vld [vmem:[%s9202_s1 + $0x410] sm:$0xff]  }
  0x59   :  { %6361 = vmatpush3.bf16.msra.mxu1 %v7039_v35  ;;  %6340 = vmatprep.subr.bf16.mxu0 %v7040_v36  ;;  %v7099_v35 = vld [vmem:[%s9202_s1 + $0x490] sm:$0xff]   ;;  %v7100_v36 = vld [vmem:[%s9202_s1 + $0x458] sm:$0xff]  }
  0x5a   :  { %6362 = vmatprep.subr.bf16.mxu1 %v7041_v37  ;;  %v7101_v37 = vld [vmem:[%s9202_s1 + $0x4d8] sm:$0xff]  }
  0x5c   :  { %6341 = vmatpush3.bf16.msra.mxu0 %v7042_v38  ;;  %v7102_v38 = vld [vmem:[%s9202_s1 + $0x418] sm:$0xff]  }
  0x5d   :  { %6363 = vmatpush3.bf16.msra.mxu1 %v7043_v39  ;;  %6342 = vmatprep.subr.bf16.mxu0 %v7044_v40  ;;  %v7103_v39 = vld [vmem:[%s9202_s1 + $0x498] sm:$0xff]   ;;  %v7104_v40 = vld [vmem:[%s9202_s1 + $0x460] sm:$0xff]  }
  0x5e   :  { %6364 = vmatprep.subr.bf16.mxu1 %v7045_v41  ;;  %v7105_v41 = vld [vmem:[%s9202_s1 + $0x4e0] sm:$0xff]  }
  0x60   :  { %6343 = vmatpush3.bf16.msra.mxu0 %v7046_v42  ;;  %v7106_v42 = vld [vmem:[%s9202_s1 + $0x420] sm:$0xff]  }
  0x61   :  { %6365 = vmatpush3.bf16.msra.mxu1 %v7047_v43  ;;  %6372 = vmatprep.subr.bf16.mxu0 %v7052_v50  ;;  %v7107_v43 = vld [vmem:[%s9202_s1 + $0x4a0] sm:$0xff]   ;;  %v7114_v50 = vld [vmem:[%s9202_s1 + $0x430] sm:$0xff]  }
  0x62   :  { %6394 = vmatprep.subr.bf16.mxu1 %v7053_v51  ;;  %v7115_v51 = vld [vmem:[%s9202_s1 + $0x4b0] sm:$0xff]  }
  0x63   :  { %4567 = vmatmul.mubr.bf16.vlgmr.msra.gmra.mrb[8].mxu0 %v5672_v46  ;;  %v7110_v46 = vld [vmem:[%s9202_s1 + $0x428] sm:$0xff]  }
  0x64   :  { %4607 = vmatmul.mubr.bf16.vlgmr.msra.gmra.mrb[8].mxu1 %v5674_v48  ;;  %6373 = vmatpush3.bf16.msra.mxu0 %v7054_v52  ;;  %v7112_v48 = vld [vmem:[%s9202_s1 + $0x470] sm:$0xff]   ;;  %v7116_v52 = vld [vmem:[%s9202_s1 + $0x478] sm:$0xff]  }
  0x65   :  { %6395 = vmatpush3.bf16.msra.mxu1 %v7055_v53  ;;  %6374 = vmatprep.subr.bf16.mxu0 %v7056_v54  ;;  %v7117_v53 = vld [vmem:[%s9202_s1 + $0x4f8] sm:$0xff]  }
  0x66   :  { %6396 = vmatprep.subr.bf16.mxu1 %v7057_v55  ;;  %4646 = vmatprep.mubr.bf16.mxu0 %v5677_v21  ;;  %v7118_v54 = vld [vmem:[%s9202_s1 + $0x438] sm:$0xff]   ;;  %v7147_v21 = vld [vmem:[%s9202_s1 + $0x5a8] sm:$0xff]  }
  0x67   :  { %4686 = vmatprep.mubr.bf16.mxu1 %v5679_v24  ;;  %v7119_v55 = vld [vmem:[%s9202_s1 + $0x4b8] sm:$0xff]   ;;  %v7150_v24 = vld [vmem:[%s9202_s1 + $0x530] sm:$0xff]  }
  0x68   :  { %6375 = vmatpush3.bf16.msra.mxu0 %v7058_v56  ;;  %v23_v56 = vld [vmem:[%s9203_s0 + $0x40] sm:$0xff] }
  0x69   :  { %6397 = vmatpush3.bf16.msra.mxu1 %v7059_v57  ;;  %6376 = vmatprep.subr.bf16.mxu0 %v7060_v58  ;;  %v5680_v57 = vcombine.low %v23_v56, %v23_v56  ;;  %v5681_v58 = vcombine.high %v23_v56, %v23_v56  ;;  %v7180_v56 = vld [vmem:[%s9202_s1 + $0x668] sm:$0xff]  }
  0x6a   :  { %6398 = vmatprep.subr.bf16.mxu1 %v7061_v59  ;;  %v24_v59 = vld [vmem:[%s9203_s0 + $0x48] sm:$0xff] }
  0x6c   :  { %6377 = vmatpush3.bf16.msra.mxu0 %v7062_v60  ;;  %v5682_v60 = vcombine.low %v24_v59, %v24_v59 }
  0x6d   :  { %6399 = vmatpush3.bf16.msra.mxu1 %v7063_v61  ;;  %6378 = vmatprep.subr.bf16.mxu0 %v7064_v62  ;;  %v5683_v61 = vcombine.high %v24_v59, %v24_v59  ;;  %v7124_v62 = vld [vmem:[%s9202_s1 + $0x540] sm:$0xff]   ;;  %v7183_v59 = vld [vmem:[%s9202_s1 + $0x6a8] sm:$0xff]  }
  0x6e   :  { %6400 = vmatprep.subr.bf16.mxu1 %v7065_v63  ;;  %v7125_v63 = vld [vmem:[%s9202_s1 + $0x5c0] sm:$0xff]  }
  0x70   :  { %6379 = vmatpush3.bf16.msra.mxu0 %v7066_v0  ;;  %v7126_v0 = vld [vmem:[%s9202_s1 + $0x500] sm:$0xff]  }
  0x71   :  { %6401 = vmatpush3.bf16.msra.mxu1 %v7067_v1  ;;  %6380 = vmatprep.subr.bf16.mxu0 %v7068_v2  ;;  %v7127_v1 = vld [vmem:[%s9202_s1 + $0x580] sm:$0xff]   ;;  %v7128_v2 = vld [vmem:[%s9202_s1 + $0x548] sm:$0xff]  }
  0x72   :  { %6402 = vmatprep.subr.bf16.mxu1 %v7069_v3  ;;  %v7129_v3 = vld [vmem:[%s9202_s1 + $0x5c8] sm:$0xff]  }
  0x74   :  { %6381 = vmatpush3.bf16.msra.mxu0 %v7070_v4  ;;  %v7130_v4 = vld [vmem:[%s9202_s1 + $0x508] sm:$0xff]  }
  0x75   :  { %6403 = vmatpush3.bf16.msra.mxu1 %v7071_v5  ;;  %6382 = vmatprep.subr.bf16.mxu0 %v7072_v6  ;;  %v7131_v5 = vld [vmem:[%s9202_s1 + $0x588] sm:$0xff]   ;;  %v7132_v6 = vld [vmem:[%s9202_s1 + $0x550] sm:$0xff]  }
  0x76   :  { %6404 = vmatprep.subr.bf16.mxu1 %v7073_v7  ;;  %v7133_v7 = vld [vmem:[%s9202_s1 + $0x5d0] sm:$0xff]  }
  0x78   :  { %6383 = vmatpush3.bf16.msra.mxu0 %v7074_v8  ;;  %v7134_v8 = vld [vmem:[%s9202_s1 + $0x510] sm:$0xff]  }
  0x79   :  { %6405 = vmatpush3.bf16.msra.mxu1 %v7075_v9  ;;  %6384 = vmatprep.subr.bf16.mxu0 %v7076_v10  ;;  %v7135_v9 = vld [vmem:[%s9202_s1 + $0x590] sm:$0xff]   ;;  %v7136_v10 = vld [vmem:[%s9202_s1 + $0x558] sm:$0xff]  }
  0x7a   :  { %6406 = vmatprep.subr.bf16.mxu1 %v7077_v11  ;;  %v7137_v11 = vld [vmem:[%s9202_s1 + $0x5d8] sm:$0xff]  }
  0x7c   :  { %6385 = vmatpush3.bf16.msra.mxu0 %v7078_v12  ;;  %v7138_v12 = vld [vmem:[%s9202_s1 + $0x518] sm:$0xff]  }
  0x7d   :  { %6407 = vmatpush3.bf16.msra.mxu1 %v7079_v13  ;;  %6386 = vmatprep.subr.bf16.mxu0 %v7080_v14  ;;  %v7139_v13 = vld [vmem:[%s9202_s1 + $0x598] sm:$0xff]   ;;  %v7140_v14 = vld [vmem:[%s9202_s1 + $0x560] sm:$0xff]  }
  0x7e   :  { %6408 = vmatprep.subr.bf16.mxu1 %v7081_v15  ;;  %v7141_v15 = vld [vmem:[%s9202_s1 + $0x5e0] sm:$0xff]  }
  0x80   :  { %6387 = vmatpush3.bf16.msra.mxu0 %v7082_v16  ;;  %v7142_v16 = vld [vmem:[%s9202_s1 + $0x520] sm:$0xff]  }
  0x81   :  { %6409 = vmatpush3.bf16.msra.mxu1 %v7083_v17  ;;  %6416 = vmatprep.subr.bf16.mxu0 %v7088_v23  ;;  %v7143_v17 = vld [vmem:[%s9202_s1 + $0x5a0] sm:$0xff]   ;;  %v7149_v23 = vld [vmem:[%s9202_s1 + $0x5f0] sm:$0xff]  }
  0x82   :  { %6438 = vmatprep.subr.bf16.mxu1 %v7089_v25  ;;  %v7151_v25 = vld [vmem:[%s9202_s1 + $0x5b0] sm:$0xff]  }
  0x83   :  { %4647 = vmatmul.mubr.bf16.vlgmr.msra.gmra.mrb[12].mxu0 %v5676_v20  ;;  %v7146_v20 = vld [vmem:[%s9202_s1 + $0x528] sm:$0xff]  }
  0x84   :  { %4687 = vmatmul.mubr.bf16.vlgmr.msra.gmra.mrb[12].mxu1 %v5678_v22  ;;  %6417 = vmatpush3.bf16.msra.mxu0 %v7090_v26  ;;  %v7148_v22 = vld [vmem:[%s9202_s1 + $0x570] sm:$0xff]   ;;  %v7152_v26 = vld [vmem:[%s9202_s1 + $0x578] sm:$0xff]  }
  0x85   :  { %6439 = vmatpush3.bf16.msra.mxu1 %v7091_v27  ;;  %6418 = vmatprep.subr.bf16.mxu0 %v7092_v28  ;;  %v7153_v27 = vld [vmem:[%s9202_s1 + $0x5f8] sm:$0xff]  }
  0x86   :  { %6440 = vmatprep.subr.bf16.mxu1 %v7093_v29  ;;  %4726 = vmatprep.mubr.bf16.mxu0 %v5681_v58  ;;  %v7154_v28 = vld [vmem:[%s9202_s1 + $0x538] sm:$0xff]   ;;  %v7182_v58 = vld [vmem:[%s9202_s1 + $0x628] sm:$0xff]  }
  0x87   :  { %4766 = vmatprep.mubr.bf16.mxu1 %v5683_v61  ;;  %v7155_v29 = vld [vmem:[%s9202_s1 + $0x5b8] sm:$0xff]   ;;  %v7185_v61 = vld [vmem:[%s9202_s1 + $0x6f0] sm:$0xff]  }
  0x88   :  { %6419 = vmatpush3.bf16.msra.mxu0 %v7094_v30  ;;  %v25_v30 = vld [vmem:[%s9203_s0 + $0x50] sm:$0xff] }
  0x89   :  { %6441 = vmatpush3.bf16.msra.mxu1 %v7095_v31  ;;  %6420 = vmatprep.subr.bf16.mxu0 %v7096_v32  ;;  %v26_v31 = vld [vmem:[%s9203_s0 + $0x58] sm:$0xff]  ;;  %v5684_v32 = vcombine.low %v25_v30, %v25_v30 }
  0x8a   :  { %6442 = vmatprep.subr.bf16.mxu1 %v7097_v33  ;;  %v5685_v33 = vcombine.high %v25_v30, %v25_v30  ;;  %v7215_v30 = vld [vmem:[%s9202_s1 + $0x7a0] sm:$0xff]  }
  0x8c   :  { %6421 = vmatpush3.bf16.msra.mxu0 %v7098_v34  ;;  %v5686_v34 = vcombine.low %v26_v31, %v26_v31 }
  0x8d   :  { %6443 = vmatpush3.bf16.msra.mxu1 %v7099_v35  ;;  %6422 = vmatprep.subr.bf16.mxu0 %v7100_v36  ;;  %v5687_v35 = vcombine.high %v26_v31, %v26_v31  ;;  %v7160_v36 = vld [vmem:[%s9202_s1 + $0x640] sm:$0xff]  }
  0x8e   :  { %6444 = vmatprep.subr.bf16.mxu1 %v7101_v37  ;;  %v7161_v37 = vld [vmem:[%s9202_s1 + $0x6c0] sm:$0xff]  }
  0x90   :  { %6423 = vmatpush3.bf16.msra.mxu0 %v7102_v38  ;;  %v7162_v38 = vld [vmem:[%s9202_s1 + $0x600] sm:$0xff]  }
  0x91   :  { %6445 = vmatpush3.bf16.msra.mxu1 %v7103_v39  ;;  %6424 = vmatprep.subr.bf16.mxu0 %v7104_v40  ;;  %v7163_v39 = vld [vmem:[%s9202_s1 + $0x680] sm:$0xff]   ;;  %v7164_v40 = vld [vmem:[%s9202_s1 + $0x648] sm:$0xff]  }
  0x92   :  { %6446 = vmatprep.subr.bf16.mxu1 %v7105_v41  ;;  %v7165_v41 = vld [vmem:[%s9202_s1 + $0x6c8] sm:$0xff]  }
  0x94   :  { %6425 = vmatpush3.bf16.msra.mxu0 %v7106_v42  ;;  %v7166_v42 = vld [vmem:[%s9202_s1 + $0x608] sm:$0xff]  }
  0x95   :  { %6447 = vmatpush3.bf16.msra.mxu1 %v7107_v43  ;;  %6426 = vmatprep.subr.bf16.mxu0 %v7108_v44  ;;  %v7167_v43 = vld [vmem:[%s9202_s1 + $0x688] sm:$0xff]   ;;  %v7168_v44 = vld [vmem:[%s9202_s1 + $0x650] sm:$0xff]  }
  0x96   :  { %6448 = vmatprep.subr.bf16.mxu1 %v7109_v45  ;;  %v7169_v45 = vld [vmem:[%s9202_s1 + $0x6d0] sm:$0xff]  }
  0x98   :  { %6427 = vmatpush3.bf16.msra.mxu0 %v7110_v46  ;;  %v7170_v46 = vld [vmem:[%s9202_s1 + $0x610] sm:$0xff]  }
  0x99   :  { %6449 = vmatpush3.bf16.msra.mxu1 %v7111_v47  ;;  %6428 = vmatprep.subr.bf16.mxu0 %v7112_v48  ;;  %v7171_v47 = vld [vmem:[%s9202_s1 + $0x690] sm:$0xff]   ;;  %v7172_v48 = vld [vmem:[%s9202_s1 + $0x658] sm:$0xff]  }
  0x9a   :  { %6450 = vmatprep.subr.bf16.mxu1 %v7113_v49  ;;  %v7173_v49 = vld [vmem:[%s9202_s1 + $0x6d8] sm:$0xff]  }
  0x9c   :  { %6429 = vmatpush3.bf16.msra.mxu0 %v7114_v50  ;;  %v7174_v50 = vld [vmem:[%s9202_s1 + $0x618] sm:$0xff]  }
  0x9d   :  { %6451 = vmatpush3.bf16.msra.mxu1 %v7115_v51  ;;  %6430 = vmatprep.subr.bf16.mxu0 %v7116_v52  ;;  %v7175_v51 = vld [vmem:[%s9202_s1 + $0x698] sm:$0xff]   ;;  %v7176_v52 = vld [vmem:[%s9202_s1 + $0x660] sm:$0xff]  }
  0x9e   :  { %6452 = vmatprep.subr.bf16.mxu1 %v7117_v53  ;;  %v7177_v53 = vld [vmem:[%s9202_s1 + $0x6e0] sm:$0xff]  }
  0xa0   :  { %6431 = vmatpush3.bf16.msra.mxu0 %v7118_v54  ;;  %v7178_v54 = vld [vmem:[%s9202_s1 + $0x620] sm:$0xff]  }
  0xa1   :  { %6453 = vmatpush3.bf16.msra.mxu1 %v7119_v55  ;;  %6460 = vmatprep.subr.bf16.mxu0 %v7124_v62  ;;  %v7179_v55 = vld [vmem:[%s9202_s1 + $0x6a0] sm:$0xff]   ;;  %v7186_v62 = vld [vmem:[%s9202_s1 + $0x630] sm:$0xff]  }
  0xa2   :  { %6482 = vmatprep.subr.bf16.mxu1 %v7125_v63  ;;  %v7187_v63 = vld [vmem:[%s9202_s1 + $0x6b0] sm:$0xff]  }
  0xa3   :  { %4727 = vmatmul.mubr.bf16.vlgmr.msra.gmra.mrb[16].mxu0 %v5680_v57  ;;  %v7181_v57 = vld [vmem:[%s9202_s1 + $0x6e8] sm:$0xff]  }
  0xa4   :  { %4767 = vmatmul.mubr.bf16.vlgmr.msra.gmra.mrb[16].mxu1 %v5682_v60  ;;  %6461 = vmatpush3.bf16.msra.mxu0 %v7126_v0  ;;  %v7184_v60 = vld [vmem:[%s9202_s1 + $0x670] sm:$0xff]   ;;  %v7188_v0 = vld [vmem:[%s9202_s1 + $0x678] sm:$0xff]  }
  0xa5   :  { %6483 = vmatpush3.bf16.msra.mxu1 %v7127_v1  ;;  %6462 = vmatprep.subr.bf16.mxu0 %v7128_v2  ;;  %v7189_v1 = vld [vmem:[%s9202_s1 + $0x6f8] sm:$0xff]  }
  0xa6   :  { %6484 = vmatprep.subr.bf16.mxu1 %v7129_v3  ;;  %4806 = vmatprep.mubr.bf16.mxu0 %v5685_v33  ;;  %v7190_v2 = vld [vmem:[%s9202_s1 + $0x638] sm:$0xff]  }
  0xa7   :  { %4846 = vmatprep.mubr.bf16.mxu1 %v5687_v35  ;;  %v7191_v3 = vld [vmem:[%s9202_s1 + $0x6b8] sm:$0xff]  }
  0xa8   :  { %6463 = vmatpush3.bf16.msra.mxu0 %v7130_v4  ;;  %v27_v4 = vld [vmem:[%s9203_s0 + $0x60] sm:$0xff] }
  0xa9   :  { %6485 = vmatpush3.bf16.msra.mxu1 %v7131_v5  ;;  %6464 = vmatprep.subr.bf16.mxu0 %v7132_v6  ;;  %v28_v5 = vld [vmem:[%s9203_s0 + $0x68] sm:$0xff]  ;;  %v5688_v6 = vcombine.low %v27_v4, %v27_v4 }
  0xaa   :  { %6486 = vmatprep.subr.bf16.mxu1 %v7133_v7  ;;  %v5689_v7 = vcombine.high %v27_v4, %v27_v4  ;;  %v7239_v4 = vld [vmem:[%s9202_s1 + $0x888] sm:$0xff]  }
  0xac   :  { %6465 = vmatpush3.bf16.msra.mxu0 %v7134_v8  ;;  %v5690_v8 = vcombine.low %v28_v5, %v28_v5 }
  0xad   :  { %6487 = vmatpush3.bf16.msra.mxu1 %v7135_v9  ;;  %6466 = vmatprep.subr.bf16.mxu0 %v7136_v10  ;;  %v7196_v9 = vld [vmem:[%s9202_s1 + $0x740] sm:$0xff]   ;;  %v5691_v10 = vcombine.high %v28_v5, %v28_v5  ;;  %v7240_v5 = vld [vmem:[%s9202_s1 + $0x850] sm:$0xff]  }
  0xae   :  { %6488 = vmatprep.subr.bf16.mxu1 %v7137_v11  ;;  %v7197_v11 = vld [vmem:[%s9202_s1 + $0x7c0] sm:$0xff]  }
  0xb0   :  { %6467 = vmatpush3.bf16.msra.mxu0 %v7138_v12  ;;  %v7198_v12 = vld [vmem:[%s9202_s1 + $0x700] sm:$0xff]  }
  0xb1   :  { %6489 = vmatpush3.bf16.msra.mxu1 %v7139_v13  ;;  %6468 = vmatprep.subr.bf16.mxu0 %v7140_v14  ;;  %v7199_v13 = vld [vmem:[%s9202_s1 + $0x780] sm:$0xff]   ;;  %v7200_v14 = vld [vmem:[%s9202_s1 + $0x748] sm:$0xff]  }
  0xb2   :  { %6490 = vmatprep.subr.bf16.mxu1 %v7141_v15  ;;  %v7201_v15 = vld [vmem:[%s9202_s1 + $0x7c8] sm:$0xff]  }
  0xb4   :  { %6469 = vmatpush3.bf16.msra.mxu0 %v7142_v16  ;;  %v7202_v16 = vld [vmem:[%s9202_s1 + $0x708] sm:$0xff]  }
  0xb5   :  { %6491 = vmatpush3.bf16.msra.mxu1 %v7143_v17  ;;  %6470 = vmatprep.subr.bf16.mxu0 %v7144_v18  ;;  %v7203_v17 = vld [vmem:[%s9202_s1 + $0x788] sm:$0xff]   ;;  %v7204_v18 = vld [vmem:[%s9202_s1 + $0x750] sm:$0xff]  }
  0xb6   :  { %6492 = vmatprep.subr.bf16.mxu1 %v7145_v19  ;;  %v7205_v19 = vld [vmem:[%s9202_s1 + $0x7d0] sm:$0xff]  }
  0xb8   :  { %6471 = vmatpush3.bf16.msra.mxu0 %v7146_v20  ;;  %v7206_v20 = vld [vmem:[%s9202_s1 + $0x710] sm:$0xff]  }
  0xb9   :  { %6493 = vmatpush3.bf16.msra.mxu1 %v7147_v21  ;;  %6472 = vmatprep.subr.bf16.mxu0 %v7148_v22  ;;  %v7207_v21 = vld [vmem:[%s9202_s1 + $0x790] sm:$0xff]   ;;  %v7208_v22 = vld [vmem:[%s9202_s1 + $0x758] sm:$0xff]  }
  0xba   :  { %6494 = vmatprep.subr.bf16.mxu1 %v7149_v23  ;;  %v7209_v23 = vld [vmem:[%s9202_s1 + $0x7d8] sm:$0xff]  }
  0xbc   :  { %6473 = vmatpush3.bf16.msra.mxu0 %v7150_v24  ;;  %v7210_v24 = vld [vmem:[%s9202_s1 + $0x718] sm:$0xff]  }
  0xbd   :  { %6495 = vmatpush3.bf16.msra.mxu1 %v7151_v25  ;;  %6474 = vmatprep.subr.bf16.mxu0 %v7152_v26  ;;  %v7211_v25 = vld [vmem:[%s9202_s1 + $0x798] sm:$0xff]   ;;  %v7212_v26 = vld [vmem:[%s9202_s1 + $0x760] sm:$0xff]  }
  0xbe   :  { %6496 = vmatprep.subr.bf16.mxu1 %v7153_v27  ;;  %v7213_v27 = vld [vmem:[%s9202_s1 + $0x7e0] sm:$0xff]  }
  0xc0   :  { %6475 = vmatpush3.bf16.msra.mxu0 %v7154_v28  ;;  %v7214_v28 = vld [vmem:[%s9202_s1 + $0x720] sm:$0xff]  }
  0xc1   :  { %6497 = vmatpush3.bf16.msra.mxu1 %v7155_v29  ;;  %6504 = vmatprep.subr.bf16.mxu0 %v7160_v36 }
  0xc2   :  { %6526 = vmatprep.subr.bf16.mxu1 %v7161_v37  ;;  %v7216_v37 = vld [vmem:[%s9202_s1 + $0x768] sm:$0xff]  }
  0xc3   :  { %4807 = vmatmul.mubr.bf16.vlgmr.msra.gmra.mrb[20].mxu0 %v5684_v32  ;;  %v5663_v32 = vld [vmem:[%s9204_s2] ss:$0 sm:$0xff] }
  0xc4   :  { %4847 = vmatmul.mubr.bf16.vlgmr.msra.gmra.mrb[20].mxu1 %v5686_v34  ;;  %6505 = vmatpush3.bf16.msra.mxu0 %v7162_v38 }
  0xc5   :  { %6527 = vmatpush3.bf16.msra.mxu1 %v7163_v39  ;;  %6506 = vmatprep.subr.bf16.mxu0 %v7164_v40  ;;  %v7217_v39 = vld [vmem:[%s9202_s1 + $0x7e8] sm:$0xff]  }
  0xc6   :  { %6528 = vmatprep.subr.bf16.mxu1 %v7165_v41  ;;  %4886 = vmatprep.mubr.bf16.mxu0 %v5689_v7  ;;  %v7242_v7 = vld [vmem:[%s9202_s1 + $0x810] sm:$0xff]  }
  0xc7   :  { %4926 = vmatprep.mubr.bf16.mxu1 %v5691_v10  ;;  %v7245_v10 = vld [vmem:[%s9202_s1 + $0x8d8] sm:$0xff]  }
  0xc8   :  { %6507 = vmatpush3.bf16.msra.mxu0 %v7166_v42  ;;  %v7218_v42 = vld [vmem:[%s9202_s1 + $0x728] sm:$0xff]  }
  0xc9   :  { %6529 = vmatpush3.bf16.msra.mxu1 %v7167_v43  ;;  %6508 = vmatprep.subr.bf16.mxu0 %v7168_v44  ;;  %v7219_v44 = vld [vmem:[%s9202_s1 + $0x7a8] sm:$0xff]  }
  0xca   :  { %6530 = vmatprep.subr.bf16.mxu1 %v7169_v45 }
  0xcc   :  { %6509 = vmatpush3.bf16.msra.mxu0 %v7170_v46 }
  0xcd   :  { %6531 = vmatpush3.bf16.msra.mxu1 %v7171_v47  ;;  %6510 = vmatprep.subr.bf16.mxu0 %v7172_v48  ;;  %v7220_v47 = vld [vmem:[%s9202_s1 + $0x770] sm:$0xff]  }
  0xce   :  { %6532 = vmatprep.subr.bf16.mxu1 %v7173_v49  ;;  %v7221_v48 = vld [vmem:[%s9202_s1 + $0x7f0] sm:$0xff]  }
  0xcf   :  { %v7222_v49 = vld [vmem:[%s9202_s1 + $0x730] sm:$0xff]  }
  0xd0   :  { %6511 = vmatpush3.bf16.msra.mxu0 %v7174_v50  ;;  %v7223_v50 = vld [vmem:[%s9202_s1 + $0x7b0] sm:$0xff]  }
  0xd1   :  { %6533 = vmatpush3.bf16.msra.mxu1 %v7175_v51  ;;  %6512 = vmatprep.subr.bf16.mxu0 %v7176_v52  ;;  %v7224_v51 = vld [vmem:[%s9202_s1 + $0x778] sm:$0xff]  }
  0xd2   :  { %6534 = vmatprep.subr.bf16.mxu1 %v7177_v53  ;;  %v7225_v52 = vld [vmem:[%s9202_s1 + $0x7f8] sm:$0xff]  }
  0xd3   :  { %v7226_v53 = vld [vmem:[%s9202_s1 + $0x738] sm:$0xff]  }
  0xd4   :  { %6513 = vmatpush3.bf16.msra.mxu0 %v7178_v54  ;;  %v7227_v54 = vld [vmem:[%s9202_s1 + $0x7b8] sm:$0xff]  }
  0xd5   :  { %6535 = vmatpush3.bf16.msra.mxu1 %v7179_v55  ;;  %6514 = vmatprep.subr.bf16.mxu0 %v7180_v56  ;;  %v29_v55 = vld [vmem:[%s9203_s0 + $0x70] sm:$0xff]  ;;  %v30_v56 = vld [vmem:[%s9203_s0 + $0x78] sm:$0xff] }
  0xd6   :  { %6536 = vmatprep.subr.bf16.mxu1 %v7181_v57  ;;  %v5692_v57 = vcombine.low %v29_v55, %v29_v55 }
  0xd8   :  { %6515 = vmatpush3.bf16.msra.mxu0 %v7182_v58  ;;  %v5693_v58 = vcombine.high %v29_v55, %v29_v55  ;;  %v7276_v55 = vld [vmem:[%s9202_s1 + $0x950] sm:$0xff]  }
  0xd9   :  { %6537 = vmatpush3.bf16.msra.mxu1 %v7183_v59  ;;  %6516 = vmatprep.subr.bf16.mxu0 %v7184_v60  ;;  %v5694_v59 = vcombine.low %v30_v56, %v30_v56  ;;  %v5695_v60 = vcombine.high %v30_v56, %v30_v56  ;;  %v7277_v56 = vld [vmem:[%s9202_s1 + $0x9d0] sm:$0xff]  }
  0xda   :  { %6538 = vmatprep.subr.bf16.mxu1 %v7185_v61  ;;  %v7232_v61 = vld [vmem:[%s9202_s1 + $0x840] sm:$0xff]  }
  0xdc   :  { %6517 = vmatpush3.bf16.msra.mxu0 %v7186_v62  ;;  %v7233_v62 = vld [vmem:[%s9202_s1 + $0x8c0] sm:$0xff]  }
  0xdd   :  { %6539 = vmatpush3.bf16.msra.mxu1 %v7187_v63  ;;  %6518 = vmatprep.subr.bf16.mxu0 %v7188_v0  ;;  %v7234_v63 = vld [vmem:[%s9202_s1 + $0x800] sm:$0xff]  }
  0xde   :  { %6540 = vmatprep.subr.bf16.mxu1 %v7189_v1  ;;  %v7235_v0 = vld [vmem:[%s9202_s1 + $0x880] sm:$0xff]   ;;  %v7236_v1 = vld [vmem:[%s9202_s1 + $0x848] sm:$0xff]  }
  0xe0   :  { %6519 = vmatpush3.bf16.msra.mxu0 %v7190_v2  ;;  %v7237_v2 = vld [vmem:[%s9202_s1 + $0x8c8] sm:$0xff]  }
  0xe1   :  { %6541 = vmatpush3.bf16.msra.mxu1 %v7191_v3  ;;  %6548 = vmatprep.subr.bf16.mxu0 %v7196_v9  ;;  %v7238_v3 = vld [vmem:[%s9202_s1 + $0x808] sm:$0xff]   ;;  %v7244_v9 = vld [vmem:[%s9202_s1 + $0x858] sm:$0xff]  }
  0xe2   :  { %6570 = vmatprep.subr.bf16.mxu1 %v7197_v11  ;;  %v7246_v11 = vld [vmem:[%s9202_s1 + $0x818] sm:$0xff]  }
  0xe3   :  { %4887 = vmatmul.mubr.bf16.vlgmr.msra.gmra.mrb[24].mxu0 %v5688_v6  ;;  %v7241_v6 = vld [vmem:[%s9202_s1 + $0x8d0] sm:$0xff]  }
  0xe4   :  { %4927 = vmatmul.mubr.bf16.vlgmr.msra.gmra.mrb[24].mxu1 %v5690_v8  ;;  %6549 = vmatpush3.bf16.msra.mxu0 %v7198_v12  ;;  %v7243_v8 = vld [vmem:[%s9202_s1 + $0x890] sm:$0xff]   ;;  %v7247_v12 = vld [vmem:[%s9202_s1 + $0x898] sm:$0xff]  }
  0xe5   :  { %6571 = vmatpush3.bf16.msra.mxu1 %v7199_v13  ;;  %6550 = vmatprep.subr.bf16.mxu0 %v7200_v14  ;;  %v7248_v13 = vld [vmem:[%s9202_s1 + $0x860] sm:$0xff]  }
  0xe6   :  { %6572 = vmatprep.subr.bf16.mxu1 %v7201_v15  ;;  %4966 = vmatprep.mubr.bf16.mxu0 %v5693_v58  ;;  %v7249_v14 = vld [vmem:[%s9202_s1 + $0x8e0] sm:$0xff]   ;;  %v7279_v58 = vld [vmem:[%s9202_s1 + $0x990] sm:$0xff]  }
  0xe7   :  { %5006 = vmatprep.mubr.bf16.mxu1 %v5695_v60  ;;  %v7250_v15 = vld [vmem:[%s9202_s1 + $0x820] sm:$0xff]   ;;  %v7281_v60 = vld [vmem:[%s9202_s1 + $0x9d8] sm:$0xff]  }
  0xe8   :  { %6551 = vmatpush3.bf16.msra.mxu0 %v7202_v16 }
  0xe9   :  { %6573 = vmatpush3.bf16.msra.mxu1 %v7203_v17  ;;  %6552 = vmatprep.subr.bf16.mxu0 %v7204_v18  ;;  %v7251_v17 = vld [vmem:[%s9202_s1 + $0x8a0] sm:$0xff]  }
  0xea   :  { %6574 = vmatprep.subr.bf16.mxu1 %v7205_v19 }
  0xec   :  { %6553 = vmatpush3.bf16.msra.mxu0 %v7206_v20 }
  0xed   :  { %6575 = vmatpush3.bf16.msra.mxu1 %v7207_v21  ;;  %6554 = vmatprep.subr.bf16.mxu0 %v7208_v22 }
  0xee   :  { %6576 = vmatprep.subr.bf16.mxu1 %v7209_v23  ;;  %v7252_v23 = vld [vmem:[%s9202_s1 + $0x868] sm:$0xff]  }
  0xf0   :  { %6555 = vmatpush3.bf16.msra.mxu0 %v7210_v24 }
  0xf1   :  { %6577 = vmatpush3.bf16.msra.mxu1 %v7211_v25  ;;  %6556 = vmatprep.subr.bf16.mxu0 %v7212_v26  ;;  %v7253_v25 = vld [vmem:[%s9202_s1 + $0x8e8] sm:$0xff]  }
  0xf2   :  { %6578 = vmatprep.subr.bf16.mxu1 %v7213_v27 }
  0xf4   :  { %6557 = vmatpush3.bf16.msra.mxu0 %v7214_v28  ;;  %v7254_v28 = vld [vmem:[%s9202_s1 + $0x828] sm:$0xff]  }
  0xf5   :  { %6579 = vmatpush3.bf16.msra.mxu1 %v7215_v30  ;;  %6558 = vmatprep.subr.bf16.mxu0 %v7216_v37  ;;  %v7255_v30 = vld [vmem:[%s9202_s1 + $0x8a8] sm:$0xff]   ;;  %v7260_v37 = vld [vmem:[%s9202_s1 + $0x878] sm:$0xff]  }
  0xf6   :  { %v6256_v29 = vpop.f32.mrb[0].mxu0  ;;  %6580 = vmatprep.subr.bf16.mxu1 %v7217_v39  ;;  %v7262_v39 = vld [vmem:[%s9202_s1 + $0x838] sm:$0xff]  }
  0xf7   :  { %v6278_v31 = vpop.f32.mrb[0].mxu1  ;;  %v6257_v33 = vpop.f32.mrb[1].mxu0 }
  0xf8   :  { %v6279_v34 = vpop.f32.mrb[1].mxu1  ;;  %v6258_v35 = vadd.f32 %v6257_v33, %v6256_v29  ;;  %v6259_v38 = vpop.f32.mrb[2].mxu0  ;;  %6559 = vmatpush3.bf16.msra.mxu0 %v7218_v42  ;;  %v7256_v33 = vld [vmem:[%s9202_s1 + $0x870] sm:$0xff]   ;;  %v32_v42 = vld [vmem:[%s9203_s0 + $0x88] sm:$0xff] }
  0xf9   :  { %v6280_v36 = vadd.f32 %v6279_v34, %v6278_v31  ;;  %v6281_v40 = vpop.f32.mrb[2].mxu1  ;;  %v6260_v43 = vpop.f32.mrb[3].mxu0  ;;  %6581 = vmatpush3.bf16.msra.mxu1 %v7219_v44  ;;  %6560 = vmatprep.subr.bf16.mxu0 %v7220_v47  ;;  %v7257_v34 = vld [vmem:[%s9202_s1 + $0x8f0] sm:$0xff]   ;;  %v7261_v38 = vld [vmem:[%s9202_s1 + $0x8f8] sm:$0xff]   ;;  %v7268_v47 = vld [vmem:[%s9202_s1 + $0x940] sm:$0xff]  }
  0xfa   :  { %v4409_v41 = vadd.f32 %v6258_v35, %v5663_v32  ;;  %v6282_v45 = vpop.f32.mrb[3].mxu1  ;;  %6582 = vmatprep.subr.bf16.mxu1 %v7221_v48  ;;  %v7258_v35 = vld [vmem:[%s9202_s1 + $0x830] sm:$0xff]   ;;  %v7263_v40 = vld [vmem:[%s9202_s1 + $0x8b8] sm:$0xff]   ;;  %v7269_v48 = vld [vmem:[%s9202_s1 + $0x9c0] sm:$0xff]  }
  0xfb   :  { %v5698_v45 = vcombine.low %v32_v42, %v32_v42 }
  0xfc   :  { %v8329_v46 = vadd.f32 %v6280_v36, %v4409_v41  ;;  %6561 = vmatpush3.bf16.msra.mxu0 %v7222_v49  ;;  %v7259_v36 = vld [vmem:[%s9202_s1 + $0x8b0] sm:$0xff]   ;;  %v31_v41 = vld [vmem:[%s9203_s0 + $0x80] sm:$0xff] }
  0xfd   :  { %6583 = vmatpush3.bf16.msra.mxu1 %v7223_v50  ;;  %6562 = vmatprep.subr.bf16.mxu0 %v7224_v51  ;;  %v5696_v43 = vcombine.low %v31_v41, %v31_v41  ;;  %v5697_v44 = vcombine.high %v31_v41, %v31_v41  ;;  %v7270_v49 = vld [vmem:[%s9202_s1 + $0x900] sm:$0xff]   ;;  %v7272_v51 = vld [vmem:[%s9202_s1 + $0x948] sm:$0xff]   ;;  %v7312_v41 = vld [vmem:[%s9202_s1 + $0xa50] sm:$0xff]  }
  0xfe   :  { %6584 = vmatprep.subr.bf16.mxu1 %v7225_v52  ;;  %v7271_v50 = vld [vmem:[%s9202_s1 + $0x980] sm:$0xff]   ;;  %v7273_v52 = vld [vmem:[%s9202_s1 + $0x9c8] sm:$0xff]  }
 0x100   :  { %6563 = vmatpush3.bf16.msra.mxu0 %v7226_v53  ;;  %v7274_v53 = vld [vmem:[%s9202_s1 + $0x908] sm:$0xff]  }
 0x101   :  { %6585 = vmatpush3.bf16.msra.mxu1 %v7227_v54  ;;  %6592 = vmatprep.subr.bf16.mxu0 %v7232_v61  ;;  %v7275_v54 = vld [vmem:[%s9202_s1 + $0x988] sm:$0xff]   ;;  %v7282_v61 = vld [vmem:[%s9202_s1 + $0x918] sm:$0xff]  }
 0x102   :  { %6614 = vmatprep.subr.bf16.mxu1 %v7233_v62  ;;  %v7283_v62 = vld [vmem:[%s9202_s1 + $0x998] sm:$0xff]  }
 0x103   :  { %4967 = vmatmul.mubr.bf16.vlgmr.msra.gmra.mrb[28].mxu0 %v5692_v57  ;;  %v7278_v57 = vld [vmem:[%s9202_s1 + $0x910] sm:$0xff]  }
 0x104   :  { %5007 = vmatmul.mubr.bf16.vlgmr.msra.gmra.mrb[28].mxu1 %v5694_v59  ;;  %6593 = vmatpush3.bf16.msra.mxu0 %v7234_v63  ;;  %v7280_v59 = vld [vmem:[%s9202_s1 + $0x958] sm:$0xff]   ;;  %v7284_v63 = vld [vmem:[%s9202_s1 + $0x960] sm:$0xff]  }
 0x105   :  { %6615 = vmatpush3.bf16.msra.mxu1 %v7235_v0  ;;  %6594 = vmatprep.subr.bf16.mxu0 %v7236_v1  ;;  %v7285_v0 = vld [vmem:[%s9202_s1 + $0x9e0] sm:$0xff]  }
 0x106   :  { %6616 = vmatprep.subr.bf16.mxu1 %v7237_v2  ;;  %5046 = vmatprep.mubr.bf16.mxu0 %v5697_v44  ;;  %v7286_v2 = vld [vmem:[%s9202_s1 + $0x920] sm:$0xff]   ;;  %v7315_v44 = vld [vmem:[%s9202_s1 + $0xa90] sm:$0xff]  }
 0x108   :  { %6595 = vmatpush3.bf16.msra.mxu0 %v7238_v3 }
 0x109   :  { %6617 = vmatpush3.bf16.msra.mxu1 %v7239_v4  ;;  %6596 = vmatprep.subr.bf16.mxu0 %v7240_v5  ;;  %v7287_v4 = vld [vmem:[%s9202_s1 + $0x9a0] sm:$0xff]  }
 0x10a   :  { %6618 = vmatprep.subr.bf16.mxu1 %v7241_v6 }
 0x10c   :  { %6597 = vmatpush3.bf16.msra.mxu0 %v7242_v7 }
 0x10d   :  { %6619 = vmatpush3.bf16.msra.mxu1 %v7243_v8  ;;  %6598 = vmatprep.subr.bf16.mxu0 %v7244_v9  ;;  %v7288_v8 = vld [vmem:[%s9202_s1 + $0x968] sm:$0xff]  }
 0x10e   :  { %6620 = vmatprep.subr.bf16.mxu1 %v7245_v10  ;;  %v7289_v10 = vld [vmem:[%s9202_s1 + $0x9e8] sm:$0xff]  }
 0x110   :  { %6599 = vmatpush3.bf16.msra.mxu0 %v7246_v11 }
 0x111   :  { %6621 = vmatpush3.bf16.msra.mxu1 %v7247_v12  ;;  %6600 = vmatprep.subr.bf16.mxu0 %v7248_v13 }
 0x112   :  { %6622 = vmatprep.subr.bf16.mxu1 %v7249_v14  ;;  %v7290_v14 = vld [vmem:[%s9202_s1 + $0x928] sm:$0xff]  }
 0x114   :  { %6601 = vmatpush3.bf16.msra.mxu0 %v7250_v15  ;;  %v7291_v15 = vld [vmem:[%s9202_s1 + $0x9a8] sm:$0xff]  }
 0x115   :  { %6623 = vmatpush3.bf16.msra.mxu1 %v7251_v17  ;;  %6602 = vmatprep.subr.bf16.mxu0 %v7252_v23  ;;  %v7296_v23 = vld [vmem:[%s9202_s1 + $0x978] sm:$0xff]  }
 0x116   :  { %v6300_v16 = vpop.f32.mrb[4].mxu0  ;;  %6624 = vmatprep.subr.bf16.mxu1 %v7253_v25  ;;  %v7298_v25 = vld [vmem:[%s9202_s1 + $0x938] sm:$0xff]  }
 0x117   :  { %v6322_v18 = vpop.f32.mrb[4].mxu1  ;;  %v6301_v19 = vpop.f32.mrb[5].mxu0 }
 0x118   :  { %v6323_v20 = vpop.f32.mrb[5].mxu1  ;;  %v6302_v21 = vadd.f32 %v6301_v19, %v6300_v16  ;;  %v6303_v24 = vpop.f32.mrb[6].mxu0  ;;  %6603 = vmatpush3.bf16.msra.mxu0 %v7254_v28  ;;  %v7292_v19 = vld [vmem:[%s9202_s1 + $0x970] sm:$0xff]   ;;  %v34_v28 = vld [vmem:[%s9203_s0 + $0x98] sm:$0xff] }
 0x119   :  { %v6324_v22 = vadd.f32 %v6323_v20, %v6322_v18  ;;  %v6325_v26 = vpop.f32.mrb[6].mxu1  ;;  %v6304_v29 = vpop.f32.mrb[7].mxu0  ;;  %6625 = vmatpush3.bf16.msra.mxu1 %v7255_v30  ;;  %6604 = vmatprep.subr.bf16.mxu0 %v7256_v33  ;;  %v7293_v20 = vld [vmem:[%s9202_s1 + $0x9f0] sm:$0xff]   ;;  %v7297_v24 = vld [vmem:[%s9202_s1 + $0x9f8] sm:$0xff]   ;;  %v5703_v33 = vcombine.high %v34_v28, %v34_v28 }
 0x11a   :  { %v4489_v27 = vadd.f32 %v6302_v21, %v8329_v46  ;;  %v6326_v31 = vpop.f32.mrb[7].mxu1  ;;  %6626 = vmatprep.subr.bf16.mxu1 %v7257_v34  ;;  %v5699_v46 = vcombine.high %v32_v42, %v32_v42  ;;  %v7294_v21 = vld [vmem:[%s9202_s1 + $0x930] sm:$0xff]   ;;  %v7299_v26 = vld [vmem:[%s9202_s1 + $0x9b8] sm:$0xff]   ;;  %v7305_v34 = vld [vmem:[%s9202_s1 + $0xac0] sm:$0xff]  }
 0x11b   :  { %v5702_v31 = vcombine.low %v34_v28, %v34_v28  ;;  %v7313_v42 = vld [vmem:[%s9202_s1 + $0xad0] sm:$0xff]  }
 0x11c   :  { %v8434_v32 = vadd.f32 %v6324_v22, %v4489_v27  ;;  %6605 = vmatpush3.bf16.msra.mxu0 %v7258_v35  ;;  %5086 = vmatprep.mubr.bf16.mxu1 %v5699_v46  ;;  %v7295_v22 = vld [vmem:[%s9202_s1 + $0x9b0] sm:$0xff]   ;;  %v7306_v35 = vld [vmem:[%s9202_s1 + $0xa00] sm:$0xff]   ;;  %v7317_v46 = vld [vmem:[%s9202_s1 + $0xad8] sm:$0xff]  }
 0x11d   :  { %6627 = vmatpush3.bf16.msra.mxu1 %v7259_v36  ;;  %6606 = vmatprep.subr.bf16.mxu0 %v7260_v37  ;;  %v33_v27 = vld [vmem:[%s9203_s0 + $0x90] sm:$0xff]  ;;  %v7307_v36 = vld [vmem:[%s9202_s1 + $0xa80] sm:$0xff]   ;;  %v7308_v37 = vld [vmem:[%s9202_s1 + $0xa48] sm:$0xff]  }
 0x11e   :  { %6628 = vmatprep.subr.bf16.mxu1 %v7261_v38  ;;  %v5700_v29 = vcombine.low %v33_v27, %v33_v27  ;;  %v5701_v30 = vcombine.high %v33_v27, %v33_v27  ;;  %v7309_v38 = vld [vmem:[%s9202_s1 + $0xac8] sm:$0xff]   ;;  %v7348_v27 = vld [vmem:[%s9202_s1 + $0xb50] sm:$0xff]  }
 0x11f   :  { %v7349_v28 = vld [vmem:[%s9202_s1 + $0xbd0] sm:$0xff]  }
 0x120   :  { %6607 = vmatpush3.bf16.msra.mxu0 %v7262_v39  ;;  %v7310_v39 = vld [vmem:[%s9202_s1 + $0xa08] sm:$0xff]  }
 0x121   :  { %6629 = vmatpush3.bf16.msra.mxu1 %v7263_v40  ;;  %6636 = vmatprep.subr.bf16.mxu0 %v7268_v47  ;;  %v7311_v40 = vld [vmem:[%s9202_s1 + $0xa88] sm:$0xff]   ;;  %v7318_v47 = vld [vmem:[%s9202_s1 + $0xa18] sm:$0xff]  }
 0x122   :  { %6658 = vmatprep.subr.bf16.mxu1 %v7269_v48  ;;  %v7319_v48 = vld [vmem:[%s9202_s1 + $0xa98] sm:$0xff]  }
 0x123   :  { %5047 = vmatmul.mubr.bf16.vlgmr.msra.gmra.mrb[32].mxu0 %v5696_v43  ;;  %v7314_v43 = vld [vmem:[%s9202_s1 + $0xa10] sm:$0xff]  }
 0x124   :  { %5087 = vmatmul.mubr.bf16.vlgmr.msra.gmra.mrb[32].mxu1 %v5698_v45  ;;  %6637 = vmatpush3.bf16.msra.mxu0 %v7270_v49  ;;  %v7316_v45 = vld [vmem:[%s9202_s1 + $0xa58] sm:$0xff]   ;;  %v7320_v49 = vld [vmem:[%s9202_s1 + $0xa60] sm:$0xff]  }
 0x125   :  { %6659 = vmatpush3.bf16.msra.mxu1 %v7271_v50  ;;  %6638 = vmatprep.subr.bf16.mxu0 %v7272_v51  ;;  %v7321_v50 = vld [vmem:[%s9202_s1 + $0xae0] sm:$0xff]  }
 0x126   :  { %6660 = vmatprep.subr.bf16.mxu1 %v7273_v52  ;;  %5126 = vmatprep.mubr.bf16.mxu0 %v5701_v30  ;;  %v7322_v52 = vld [vmem:[%s9202_s1 + $0xa20] sm:$0xff]   ;;  %v7351_v30 = vld [vmem:[%s9202_s1 + $0xb90] sm:$0xff]  }
 0x127   :  { %5166 = vmatprep.mubr.bf16.mxu1 %v5703_v33  ;;  %v7354_v33 = vld [vmem:[%s9202_s1 + $0xb18] sm:$0xff]  }
 0x128   :  { %6639 = vmatpush3.bf16.msra.mxu0 %v7274_v53 }
 0x129   :  { %6661 = vmatpush3.bf16.msra.mxu1 %v7275_v54  ;;  %6640 = vmatprep.subr.bf16.mxu0 %v7276_v55  ;;  %v7323_v54 = vld [vmem:[%s9202_s1 + $0xaa0] sm:$0xff]  }
 0x12a   :  { %6662 = vmatprep.subr.bf16.mxu1 %v7277_v56 }
 0x12c   :  { %6641 = vmatpush3.bf16.msra.mxu0 %v7278_v57  ;;  %v7324_v57 = vld [vmem:[%s9202_s1 + $0xa68] sm:$0xff]  }
 0x12d   :  { %6663 = vmatpush3.bf16.msra.mxu1 %v7279_v58  ;;  %6642 = vmatprep.subr.bf16.mxu0 %v7280_v59 }
 0x12e   :  { %6664 = vmatprep.subr.bf16.mxu1 %v7281_v60  ;;  %v7325_v60 = vld [vmem:[%s9202_s1 + $0xae8] sm:$0xff]  }
 0x130   :  { %6643 = vmatpush3.bf16.msra.mxu0 %v7282_v61 }
 0x131   :  { %6665 = vmatpush3.bf16.msra.mxu1 %v7283_v62  ;;  %6644 = vmatprep.subr.bf16.mxu0 %v7284_v63  ;;  %v7326_v63 = vld [vmem:[%s9202_s1 + $0xa28] sm:$0xff]  }
 0x132   :  { %6666 = vmatprep.subr.bf16.mxu1 %v7285_v0 }
 0x134   :  { %6645 = vmatpush3.bf16.msra.mxu0 %v7286_v2 }
 0x135   :  { %6667 = vmatpush3.bf16.msra.mxu1 %v7287_v4  ;;  %6646 = vmatprep.subr.bf16.mxu0 %v7288_v8  ;;  %v7328_v4 = vld [vmem:[%s9202_s1 + $0xa70] sm:$0xff]  }
 0x136   :  { %v6344_v1 = vpop.f32.mrb[8].mxu0  ;;  %6668 = vmatprep.subr.bf16.mxu1 %v7289_v10  ;;  %v7331_v8 = vld [vmem:[%s9202_s1 + $0xab0] sm:$0xff]   ;;  %v7333_v10 = vld [vmem:[%s9202_s1 + $0xaf8] sm:$0xff]  }
 0x137   :  { %v6366_v3 = vpop.f32.mrb[8].mxu1  ;;  %v6345_v5 = vpop.f32.mrb[9].mxu0 }
 0x138   :  { %v6346_v6 = vadd.f32 %v6345_v5, %v6344_v1  ;;  %v6367_v7 = vpop.f32.mrb[9].mxu1  ;;  %v6347_v11 = vpop.f32.mrb[10].mxu0  ;;  %6647 = vmatpush3.bf16.msra.mxu0 %v7290_v14  ;;  %v7327_v1 = vld [vmem:[%s9202_s1 + $0xaa8] sm:$0xff]  }
 0x139   :  { %v6368_v9 = vadd.f32 %v6367_v7, %v6366_v3  ;;  %v6369_v13 = vpop.f32.mrb[10].mxu1  ;;  %v6348_v16 = vpop.f32.mrb[11].mxu0  ;;  %6669 = vmatpush3.bf16.msra.mxu1 %v7291_v15  ;;  %6648 = vmatprep.subr.bf16.mxu0 %v7292_v19  ;;  %v7330_v7 = vld [vmem:[%s9202_s1 + $0xa30] sm:$0xff]   ;;  %v7334_v11 = vld [vmem:[%s9202_s1 + $0xa38] sm:$0xff]   ;;  %v7340_v19 = vld [vmem:[%s9202_s1 + $0xb40] sm:$0xff]  }
 0x13a   :  { %v4569_v12 = vadd.f32 %v6346_v6, %v8434_v32  ;;  %v6370_v18 = vpop.f32.mrb[11].mxu1  ;;  %6670 = vmatprep.subr.bf16.mxu1 %v7293_v20  ;;  %v7304_v32 = vld [vmem:[%s9202_s1 + $0xa40] sm:$0xff]   ;;  %v7329_v6 = vld [vmem:[%s9202_s1 + $0xaf0] sm:$0xff]   ;;  %v36_v16 = vld [vmem:[%s9203_s0 + $0xa8] sm:$0xff] }
 0x13b   :  { %v35_v13 = vld [vmem:[%s9203_s0 + $0xa0] sm:$0xff]  ;;  %v5707_v18 = vcombine.high %v36_v16, %v36_v16 }
 0x13c   :  { %v8539_v17 = vadd.f32 %v6368_v9, %v4569_v12  ;;  %6649 = vmatpush3.bf16.msra.mxu0 %v7294_v21  ;;  %v7332_v9 = vld [vmem:[%s9202_s1 + $0xa78] sm:$0xff]   ;;  %v5704_v14 = vcombine.low %v35_v13, %v35_v13  ;;  %v5705_v15 = vcombine.high %v35_v13, %v35_v13  ;;  %v7341_v20 = vld [vmem:[%s9202_s1 + $0xbc0] sm:$0xff]   ;;  %v7384_v13 = vld [vmem:[%s9202_s1 + $0xc50] sm:$0xff]  }
 0x13d   :  { %6671 = vmatpush3.bf16.msra.mxu1 %v7295_v22  ;;  %6650 = vmatprep.subr.bf16.mxu0 %v7296_v23  ;;  %v7335_v12 = vld [vmem:[%s9202_s1 + $0xab8] sm:$0xff]   ;;  %v7342_v21 = vld [vmem:[%s9202_s1 + $0xb00] sm:$0xff]   ;;  %v7344_v23 = vld [vmem:[%s9202_s1 + $0xb48] sm:$0xff]  }
 0x13e   :  { %6672 = vmatprep.subr.bf16.mxu1 %v7297_v24  ;;  %v7343_v22 = vld [vmem:[%s9202_s1 + $0xb80] sm:$0xff]   ;;  %v7345_v24 = vld [vmem:[%s9202_s1 + $0xbc8] sm:$0xff]  }
 0x140   :  { %6651 = vmatpush3.bf16.msra.mxu0 %v7298_v25  ;;  %v7346_v25 = vld [vmem:[%s9202_s1 + $0xb08] sm:$0xff]  }
 0x141   :  { %6673 = vmatpush3.bf16.msra.mxu1 %v7299_v26  ;;  %6680 = vmatprep.subr.bf16.mxu0 %v7304_v32  ;;  %v7347_v26 = vld [vmem:[%s9202_s1 + $0xb88] sm:$0xff]   ;;  %v7353_v32 = vld [vmem:[%s9202_s1 + $0xbd8] sm:$0xff]  }
 0x142   :  { %6702 = vmatprep.subr.bf16.mxu1 %v7305_v34  ;;  %v7355_v34 = vld [vmem:[%s9202_s1 + $0xb98] sm:$0xff]  }
 0x143   :  { %5127 = vmatmul.mubr.bf16.vlgmr.msra.gmra.mrb[36].mxu0 %v5700_v29  ;;  %v7350_v29 = vld [vmem:[%s9202_s1 + $0xb10] sm:$0xff]  }
 0x144   :  { %5167 = vmatmul.mubr.bf16.vlgmr.msra.gmra.mrb[36].mxu1 %v5702_v31  ;;  %6681 = vmatpush3.bf16.msra.mxu0 %v7306_v35  ;;  %v7352_v31 = vld [vmem:[%s9202_s1 + $0xb58] sm:$0xff]   ;;  %v7356_v35 = vld [vmem:[%s9202_s1 + $0xb60] sm:$0xff]  }
 0x145   :  { %6703 = vmatpush3.bf16.msra.mxu1 %v7307_v36  ;;  %6682 = vmatprep.subr.bf16.mxu0 %v7308_v37  ;;  %v7357_v36 = vld [vmem:[%s9202_s1 + $0xbe0] sm:$0xff]  }
 0x146   :  { %6704 = vmatprep.subr.bf16.mxu1 %v7309_v38  ;;  %5206 = vmatprep.mubr.bf16.mxu0 %v5705_v15  ;;  %v7358_v38 = vld [vmem:[%s9202_s1 + $0xb20] sm:$0xff]   ;;  %v7386_v15 = vld [vmem:[%s9202_s1 + $0xc10] sm:$0xff]  }
 0x147   :  { %5246 = vmatprep.mubr.bf16.mxu1 %v5707_v18  ;;  %v7389_v18 = vld [vmem:[%s9202_s1 + $0xcd8] sm:$0xff]  }
 0x148   :  { %6683 = vmatpush3.bf16.msra.mxu0 %v7310_v39 }
 0x149   :  { %6705 = vmatpush3.bf16.msra.mxu1 %v7311_v40  ;;  %6684 = vmatprep.subr.bf16.mxu0 %v7312_v41  ;;  %v7359_v40 = vld [vmem:[%s9202_s1 + $0xba0] sm:$0xff]  }
 0x14a   :  { %6706 = vmatprep.subr.bf16.mxu1 %v7313_v42 }
 0x14c   :  { %6685 = vmatpush3.bf16.msra.mxu0 %v7314_v43  ;;  %v7360_v43 = vld [vmem:[%s9202_s1 + $0xb68] sm:$0xff]  }
 0x14d   :  { %6707 = vmatpush3.bf16.msra.mxu1 %v7315_v44  ;;  %6686 = vmatprep.subr.bf16.mxu0 %v7316_v45 }
 0x14e   :  { %6708 = vmatprep.subr.bf16.mxu1 %v7317_v46  ;;  %v7361_v46 = vld [vmem:[%s9202_s1 + $0xbe8] sm:$0xff]  }
 0x150   :  { %6687 = vmatpush3.bf16.msra.mxu0 %v7318_v47 }
 0x151   :  { %6709 = vmatpush3.bf16.msra.mxu1 %v7319_v48  ;;  %6688 = vmatprep.subr.bf16.mxu0 %v7320_v49  ;;  %v7362_v49 = vld [vmem:[%s9202_s1 + $0xb28] sm:$0xff]  }
 0x152   :  { %6710 = vmatprep.subr.bf16.mxu1 %v7321_v50 }
 0x154   :  { %6689 = vmatpush3.bf16.msra.mxu0 %v7322_v52 }
 0x155   :  { %6711 = vmatpush3.bf16.msra.mxu1 %v7323_v54  ;;  %6690 = vmatprep.subr.bf16.mxu0 %v7324_v57  ;;  %v7364_v54 = vld [vmem:[%s9202_s1 + $0xb70] sm:$0xff]  }
 0x156   :  { %v6388_v51 = vpop.f32.mrb[12].mxu0  ;;  %6712 = vmatprep.subr.bf16.mxu1 %v7325_v60  ;;  %v7366_v57 = vld [vmem:[%s9202_s1 + $0xb30] sm:$0xff]   ;;  %v7369_v60 = vld [vmem:[%s9202_s1 + $0xbf8] sm:$0xff]  }
 0x157   :  { %v6410_v53 = vpop.f32.mrb[12].mxu1  ;;  %v6389_v55 = vpop.f32.mrb[13].mxu0 }
 0x158   :  { %v6411_v56 = vpop.f32.mrb[13].mxu1  ;;  %v6390_v58 = vadd.f32 %v6389_v55, %v6388_v51  ;;  %v6391_v61 = vpop.f32.mrb[14].mxu0  ;;  %6691 = vmatpush3.bf16.msra.mxu0 %v7326_v63  ;;  %v7363_v51 = vld [vmem:[%s9202_s1 + $0xba8] sm:$0xff]   ;;  %v37_v63 = vld [vmem:[%s9203_s0 + $0xb0] sm:$0xff] }
 0x159   :  { %v6412_v59 = vadd.f32 %v6411_v56, %v6410_v53  ;;  %v6413_v62 = vpop.f32.mrb[14].mxu1  ;;  %v6392_v2 = vpop.f32.mrb[15].mxu0  ;;  %6713 = vmatpush3.bf16.msra.mxu1 %v7327_v1  ;;  %6692 = vmatprep.subr.bf16.mxu0 %v7328_v4  ;;  %v7365_v56 = vld [vmem:[%s9202_s1 + $0xbf0] sm:$0xff]   ;;  %v7370_v61 = vld [vmem:[%s9202_s1 + $0xb38] sm:$0xff]   ;;  %v5708_v1 = vcombine.low %v37_v63, %v37_v63 }
 0x15a   :  { %v4649_v0 = vadd.f32 %v6390_v58, %v8539_v17  ;;  %v6414_v3 = vpop.f32.mrb[15].mxu1  ;;  %6714 = vmatprep.subr.bf16.mxu1 %v7329_v6  ;;  %v5706_v17 = vcombine.low %v36_v16, %v36_v16  ;;  %v7367_v58 = vld [vmem:[%s9202_s1 + $0xbb0] sm:$0xff]   ;;  %v7371_v62 = vld [vmem:[%s9202_s1 + $0xbb8] sm:$0xff]   ;;  %v5709_v2 = vcombine.high %v37_v63, %v37_v63  ;;  %v7377_v6 = vld [vmem:[%s9202_s1 + $0xcc0] sm:$0xff]  }
 0x15b   :  { %v7387_v16 = vld [vmem:[%s9202_s1 + $0xc90] sm:$0xff]  }
 0x15c   :  { %v8647_v5 = vadd.f32 %v6412_v59, %v4649_v0  ;;  %6693 = vmatpush3.bf16.msra.mxu0 %v7330_v7  ;;  %v7368_v59 = vld [vmem:[%s9202_s1 + $0xb78] sm:$0xff]   ;;  %v7378_v7 = vld [vmem:[%s9202_s1 + $0xc00] sm:$0xff]   ;;  %v7420_v63 = vld [vmem:[%s9202_s1 + $0xd50] sm:$0xff]  }
 0x15d   :  { %6715 = vmatpush3.bf16.msra.mxu1 %v7331_v8  ;;  %6694 = vmatprep.subr.bf16.mxu0 %v7332_v9  ;;  %v38_v0 = vld [vmem:[%s9203_s0 + $0xb8] sm:$0xff]  ;;  %v7379_v8 = vld [vmem:[%s9202_s1 + $0xc80] sm:$0xff]   ;;  %v7380_v9 = vld [vmem:[%s9202_s1 + $0xc48] sm:$0xff]  }
 0x15e   :  { %6716 = vmatprep.subr.bf16.mxu1 %v7333_v10  ;;  %v5710_v3 = vcombine.low %v38_v0, %v38_v0  ;;  %v5711_v4 = vcombine.high %v38_v0, %v38_v0  ;;  %v7381_v10 = vld [vmem:[%s9202_s1 + $0xcc8] sm:$0xff]   ;;  %v7421_v0 = vld [vmem:[%s9202_s1 + $0xdd0] sm:$0xff]  }
 0x160   :  { %6695 = vmatpush3.bf16.msra.mxu0 %v7334_v11  ;;  %v7382_v11 = vld [vmem:[%s9202_s1 + $0xc08] sm:$0xff]  }
 0x161   :  { %6717 = vmatpush3.bf16.msra.mxu1 %v7335_v12  ;;  %6724 = vmatprep.subr.bf16.mxu0 %v7340_v19  ;;  %v7383_v12 = vld [vmem:[%s9202_s1 + $0xc88] sm:$0xff]   ;;  %v7390_v19 = vld [vmem:[%s9202_s1 + $0xc18] sm:$0xff]  }
 0x162   :  { %6746 = vmatprep.subr.bf16.mxu1 %v7341_v20  ;;  %v7391_v20 = vld [vmem:[%s9202_s1 + $0xc98] sm:$0xff]  }
 0x163   :  { %5207 = vmatmul.mubr.bf16.vlgmr.msra.gmra.mrb[40].mxu0 %v5704_v14  ;;  %v7385_v14 = vld [vmem:[%s9202_s1 + $0xcd0] sm:$0xff]  }
 0x164   :  { %5247 = vmatmul.mubr.bf16.vlgmr.msra.gmra.mrb[40].mxu1 %v5706_v17  ;;  %6725 = vmatpush3.bf16.msra.mxu0 %v7342_v21  ;;  %v7388_v17 = vld [vmem:[%s9202_s1 + $0xc58] sm:$0xff]   ;;  %v7392_v21 = vld [vmem:[%s9202_s1 + $0xc60] sm:$0xff]  }
 0x165   :  { %6747 = vmatpush3.bf16.msra.mxu1 %v7343_v22  ;;  %6726 = vmatprep.subr.bf16.mxu0 %v7344_v23  ;;  %v7393_v22 = vld [vmem:[%s9202_s1 + $0xce0] sm:$0xff]  }
 0x166   :  { %6748 = vmatprep.subr.bf16.mxu1 %v7345_v24  ;;  %5286 = vmatprep.mubr.bf16.mxu0 %v5709_v2  ;;  %v7394_v24 = vld [vmem:[%s9202_s1 + $0xc20] sm:$0xff]   ;;  %v7423_v2 = vld [vmem:[%s9202_s1 + $0xd90] sm:$0xff]  }
 0x167   :  { %5326 = vmatprep.mubr.bf16.mxu1 %v5711_v4  ;;  %v7425_v4 = vld [vmem:[%s9202_s1 + $0xdd8] sm:$0xff]  }
 0x168   :  { %6727 = vmatpush3.bf16.msra.mxu0 %v7346_v25 }
 0x169   :  { %6749 = vmatpush3.bf16.msra.mxu1 %v7347_v26  ;;  %6728 = vmatprep.subr.bf16.mxu0 %v7348_v27  ;;  %v7395_v26 = vld [vmem:[%s9202_s1 + $0xca0] sm:$0xff]  }
 0x16a   :  { %6750 = vmatprep.subr.bf16.mxu1 %v7349_v28 }
 0x16c   :  { %6729 = vmatpush3.bf16.msra.mxu0 %v7350_v29 }
 0x16d   :  { %6751 = vmatpush3.bf16.msra.mxu1 %v7351_v30  ;;  %6730 = vmatprep.subr.bf16.mxu0 %v7352_v31  ;;  %v7396_v30 = vld [vmem:[%s9202_s1 + $0xc68] sm:$0xff]  }
 0x16e   :  { %6752 = vmatprep.subr.bf16.mxu1 %v7353_v32  ;;  %v7397_v32 = vld [vmem:[%s9202_s1 + $0xce8] sm:$0xff]  }
 0x170   :  { %6731 = vmatpush3.bf16.msra.mxu0 %v7354_v33 }
 0x171   :  { %6753 = vmatpush3.bf16.msra.mxu1 %v7355_v34  ;;  %6732 = vmatprep.subr.bf16.mxu0 %v7356_v35 }
 0x172   :  { %6754 = vmatprep.subr.bf16.mxu1 %v7357_v36  ;;  %v7398_v36 = vld [vmem:[%s9202_s1 + $0xc28] sm:$0xff]  }
 0x174   :  { %6733 = vmatpush3.bf16.msra.mxu0 %v7358_v38 }
 0x175   :  { %6755 = vmatpush3.bf16.msra.mxu1 %v7359_v40  ;;  %6734 = vmatprep.subr.bf16.mxu0 %v7360_v43  ;;  %v7402_v43 = vld [vmem:[%s9202_s1 + $0xc30] sm:$0xff]  }
 0x176   :  { %v6432_v37 = vpop.f32.mrb[16].mxu0  ;;  %6756 = vmatprep.subr.bf16.mxu1 %v7361_v46  ;;  %v7405_v46 = vld [vmem:[%s9202_s1 + $0xcf8] sm:$0xff]  }
 0x177   :  { %v6454_v39 = vpop.f32.mrb[16].mxu1  ;;  %v6433_v41 = vpop.f32.mrb[17].mxu0 }
 0x178   :  { %v6455_v42 = vpop.f32.mrb[17].mxu1  ;;  %v6434_v44 = vadd.f32 %v6433_v41, %v6432_v37  ;;  %v6435_v47 = vpop.f32.mrb[18].mxu0  ;;  %6735 = vmatpush3.bf16.msra.mxu0 %v7362_v49  ;;  %v7399_v37 = vld [vmem:[%s9202_s1 + $0xca8] sm:$0xff]   ;;  %v7400_v41 = vld [vmem:[%s9202_s1 + $0xc70] sm:$0xff]   ;;  %v39_v49 = vld [vmem:[%s9203_s0 + $0xc0] sm:$0xff] }
 0x179   :  { %v6456_v45 = vadd.f32 %v6455_v42, %v6454_v39  ;;  %v6457_v48 = vpop.f32.mrb[18].mxu1  ;;  %v6436_v52 = vpop.f32.mrb[19].mxu0  ;;  %6757 = vmatpush3.bf16.msra.mxu1 %v7363_v51  ;;  %6736 = vmatprep.subr.bf16.mxu0 %v7364_v54  ;;  %v7401_v42 = vld [vmem:[%s9202_s1 + $0xcf0] sm:$0xff]   ;;  %v7406_v47 = vld [vmem:[%s9202_s1 + $0xc38] sm:$0xff]   ;;  %v5712_v51 = vcombine.low %v39_v49, %v39_v49  ;;  %v7412_v54 = vld [vmem:[%s9202_s1 + $0xd40] sm:$0xff]  }
 0x17a   :  { %v4729_v50 = vadd.f32 %v6434_v44, %v8647_v5  ;;  %v6458_v53 = vpop.f32.mrb[19].mxu1  ;;  %6758 = vmatprep.subr.bf16.mxu1 %v7365_v56  ;;  %v7376_v5 = vld [vmem:[%s9202_s1 + $0xc40] sm:$0xff]   ;;  %v7403_v44 = vld [vmem:[%s9202_s1 + $0xcb0] sm:$0xff]   ;;  %v7407_v48 = vld [vmem:[%s9202_s1 + $0xcb8] sm:$0xff]   ;;  %v5713_v52 = vcombine.high %v39_v49, %v39_v49 }
 0x17b   :  { %v7413_v56 = vld [vmem:[%s9202_s1 + $0xdc0] sm:$0xff]   ;;  %v7456_v49 = vld [vmem:[%s9202_s1 + $0xe50] sm:$0xff]  }
 0x17c   :  { %v8752_v55 = vadd.f32 %v6456_v45, %v4729_v50  ;;  %6737 = vmatpush3.bf16.msra.mxu0 %v7366_v57  ;;  %v7404_v45 = vld [vmem:[%s9202_s1 + $0xc78] sm:$0xff]   ;;  %v40_v50 = vld [vmem:[%s9203_s0 + $0xc8] sm:$0xff]  ;;  %v7414_v57 = vld [vmem:[%s9202_s1 + $0xd00] sm:$0xff]  }
 0x17d   :  { %6759 = vmatpush3.bf16.msra.mxu1 %v7367_v58  ;;  %6738 = vmatprep.subr.bf16.mxu0 %v7368_v59  ;;  %v5714_v53 = vcombine.low %v40_v50, %v40_v50  ;;  %v7415_v58 = vld [vmem:[%s9202_s1 + $0xd80] sm:$0xff]   ;;  %v7416_v59 = vld [vmem:[%s9202_s1 + $0xd48] sm:$0xff]  }
 0x17e   :  { %6760 = vmatprep.subr.bf16.mxu1 %v7369_v60  ;;  %v7417_v60 = vld [vmem:[%s9202_s1 + $0xdc8] sm:$0xff]  }
 0x180   :  { %6739 = vmatpush3.bf16.msra.mxu0 %v7370_v61  ;;  %v7418_v61 = vld [vmem:[%s9202_s1 + $0xd08] sm:$0xff]  }
 0x181   :  { %6761 = vmatpush3.bf16.msra.mxu1 %v7371_v62  ;;  %6768 = vmatprep.subr.bf16.mxu0 %v7376_v5  ;;  %v7419_v62 = vld [vmem:[%s9202_s1 + $0xd88] sm:$0xff]   ;;  %v7426_v5 = vld [vmem:[%s9202_s1 + $0xd18] sm:$0xff]  }
 0x182   :  { %6790 = vmatprep.subr.bf16.mxu1 %v7377_v6  ;;  %v7427_v6 = vld [vmem:[%s9202_s1 + $0xd98] sm:$0xff]  }
 0x183   :  { %5287 = vmatmul.mubr.bf16.vlgmr.msra.gmra.mrb[44].mxu0 %v5708_v1  ;;  %v7422_v1 = vld [vmem:[%s9202_s1 + $0xd10] sm:$0xff]  }
 0x184   :  { %5327 = vmatmul.mubr.bf16.vlgmr.msra.gmra.mrb[44].mxu1 %v5710_v3  ;;  %6769 = vmatpush3.bf16.msra.mxu0 %v7378_v7  ;;  %v7424_v3 = vld [vmem:[%s9202_s1 + $0xd58] sm:$0xff]   ;;  %v7428_v7 = vld [vmem:[%s9202_s1 + $0xd60] sm:$0xff]  }
 0x185   :  { %6791 = vmatpush3.bf16.msra.mxu1 %v7379_v8  ;;  %6770 = vmatprep.subr.bf16.mxu0 %v7380_v9  ;;  %v7429_v8 = vld [vmem:[%s9202_s1 + $0xde0] sm:$0xff]  }
 0x186   :  { %6792 = vmatprep.subr.bf16.mxu1 %v7381_v10  ;;  %5366 = vmatprep.mubr.bf16.mxu0 %v5713_v52  ;;  %v7430_v10 = vld [vmem:[%s9202_s1 + $0xd20] sm:$0xff]   ;;  %v7459_v52 = vld [vmem:[%s9202_s1 + $0xe90] sm:$0xff]  }
 0x188   :  { %6771 = vmatpush3.bf16.msra.mxu0 %v7382_v11 }
 0x189   :  { %6793 = vmatpush3.bf16.msra.mxu1 %v7383_v12  ;;  %6772 = vmatprep.subr.bf16.mxu0 %v7384_v13  ;;  %v7431_v12 = vld [vmem:[%s9202_s1 + $0xda0] sm:$0xff]  }
 0x18a   :  { %6794 = vmatprep.subr.bf16.mxu1 %v7385_v14 }
 0x18c   :  { %6773 = vmatpush3.bf16.msra.mxu0 %v7386_v15  ;;  %v7432_v15 = vld [vmem:[%s9202_s1 + $0xd68] sm:$0xff]  }
 0x18d   :  { %6795 = vmatpush3.bf16.msra.mxu1 %v7387_v16  ;;  %6774 = vmatprep.subr.bf16.mxu0 %v7388_v17 }
 0x18e   :  { %6796 = vmatprep.subr.bf16.mxu1 %v7389_v18  ;;  %v7433_v18 = vld [vmem:[%s9202_s1 + $0xde8] sm:$0xff]  }
 0x190   :  { %6775 = vmatpush3.bf16.msra.mxu0 %v7390_v19 }
 0x191   :  { %6797 = vmatpush3.bf16.msra.mxu1 %v7391_v20  ;;  %6776 = vmatprep.subr.bf16.mxu0 %v7392_v21  ;;  %v7434_v21 = vld [vmem:[%s9202_s1 + $0xd28] sm:$0xff]  }
 0x192   :  { %6798 = vmatprep.subr.bf16.mxu1 %v7393_v22 }
 0x194   :  { %6777 = vmatpush3.bf16.msra.mxu0 %v7394_v24 }
 0x195   :  { %6799 = vmatpush3.bf16.msra.mxu1 %v7395_v26  ;;  %6778 = vmatprep.subr.bf16.mxu0 %v7396_v30  ;;  %v7436_v26 = vld [vmem:[%s9202_s1 + $0xd70] sm:$0xff]  }
 0x196   :  { %v6476_v23 = vpop.f32.mrb[20].mxu0  ;;  %6800 = vmatprep.subr.bf16.mxu1 %v7397_v32  ;;  %v7439_v30 = vld [vmem:[%s9202_s1 + $0xdb0] sm:$0xff]   ;;  %v7441_v32 = vld [vmem:[%s9202_s1 + $0xdf8] sm:$0xff]  }
 0x197   :  { %v6498_v25 = vpop.f32.mrb[20].mxu1  ;;  %v6477_v27 = vpop.f32.mrb[21].mxu0 }
 0x198   :  { %v6478_v28 = vadd.f32 %v6477_v27, %v6476_v23  ;;  %v6499_v29 = vpop.f32.mrb[21].mxu1  ;;  %v6479_v33 = vpop.f32.mrb[22].mxu0  ;;  %6779 = vmatpush3.bf16.msra.mxu0 %v7398_v36  ;;  %v7435_v23 = vld [vmem:[%s9202_s1 + $0xda8] sm:$0xff]  }
 0x199   :  { %v6500_v31 = vadd.f32 %v6499_v29, %v6498_v25  ;;  %v6501_v35 = vpop.f32.mrb[22].mxu1  ;;  %v6480_v38 = vpop.f32.mrb[23].mxu0  ;;  %6801 = vmatpush3.bf16.msra.mxu1 %v7399_v37  ;;  %6780 = vmatprep.subr.bf16.mxu0 %v7400_v41  ;;  %v7438_v29 = vld [vmem:[%s9202_s1 + $0xd30] sm:$0xff]   ;;  %v7442_v33 = vld [vmem:[%s9202_s1 + $0xd38] sm:$0xff]   ;;  %v7448_v41 = vld [vmem:[%s9202_s1 + $0xe40] sm:$0xff]  }
 0x19a   :  { %v4809_v34 = vadd.f32 %v6478_v28, %v8752_v55  ;;  %v6502_v40 = vpop.f32.mrb[23].mxu1  ;;  %6802 = vmatprep.subr.bf16.mxu1 %v7401_v42  ;;  %v5715_v55 = vcombine.high %v40_v50, %v40_v50  ;;  %v7437_v28 = vld [vmem:[%s9202_s1 + $0xdf0] sm:$0xff]   ;;  %v42_v38 = vld [vmem:[%s9203_s0 + $0xd8] sm:$0xff]  ;;  %v7449_v42 = vld [vmem:[%s9202_s1 + $0xec0] sm:$0xff]  }
 0x19b   :  { %v41_v35 = vld [vmem:[%s9203_s0 + $0xd0] sm:$0xff]  ;;  %v5719_v40 = vcombine.high %v42_v38, %v42_v38 }
 0x19c   :  { %v8854_v39 = vadd.f32 %v6500_v31, %v4809_v34  ;;  %6781 = vmatpush3.bf16.msra.mxu0 %v7402_v43  ;;  %5406 = vmatprep.mubr.bf16.mxu1 %v5715_v55  ;;  %v7440_v31 = vld [vmem:[%s9202_s1 + $0xd78] sm:$0xff]   ;;  %v5716_v36 = vcombine.low %v41_v35, %v41_v35  ;;  %v5717_v37 = vcombine.high %v41_v35, %v41_v35  ;;  %v7450_v43 = vld [vmem:[%s9202_s1 + $0xe00] sm:$0xff]   ;;  %v7457_v50 = vld [vmem:[%s9202_s1 + $0xed0] sm:$0xff]  }
 0x19d   :  { %6803 = vmatpush3.bf16.msra.mxu1 %v7403_v44  ;;  %6782 = vmatprep.subr.bf16.mxu0 %v7404_v45  ;;  %v7443_v34 = vld [vmem:[%s9202_s1 + $0xdb8] sm:$0xff]   ;;  %v7451_v44 = vld [vmem:[%s9202_s1 + $0xe80] sm:$0xff]   ;;  %v7452_v45 = vld [vmem:[%s9202_s1 + $0xe48] sm:$0xff]  }
 0x19e   :  { %6804 = vmatprep.subr.bf16.mxu1 %v7405_v46  ;;  %v7453_v46 = vld [vmem:[%s9202_s1 + $0xec8] sm:$0xff]   ;;  %v7462_v55 = vld [vmem:[%s9202_s1 + $0xe18] sm:$0xff]   ;;  %v7492_v35 = vld [vmem:[%s9202_s1 + $0xf50] sm:$0xff]  }
 0x1a0   :  { %6783 = vmatpush3.bf16.msra.mxu0 %v7406_v47  ;;  %v7454_v47 = vld [vmem:[%s9202_s1 + $0xe08] sm:$0xff]  }
 0x1a1   :  { %6805 = vmatpush3.bf16.msra.mxu1 %v7407_v48  ;;  %6812 = vmatprep.subr.bf16.mxu0 %v7412_v54  ;;  %v7455_v48 = vld [vmem:[%s9202_s1 + $0xe88] sm:$0xff]   ;;  %v7461_v54 = vld [vmem:[%s9202_s1 + $0xed8] sm:$0xff]  }
 0x1a2   :  { %6834 = vmatprep.subr.bf16.mxu1 %v7413_v56  ;;  %v7463_v56 = vld [vmem:[%s9202_s1 + $0xe98] sm:$0xff]  }
 0x1a3   :  { %5367 = vmatmul.mubr.bf16.vlgmr.msra.gmra.mrb[48].mxu0 %v5712_v51  ;;  %v7458_v51 = vld [vmem:[%s9202_s1 + $0xe10] sm:$0xff]  }
 0x1a4   :  { %5407 = vmatmul.mubr.bf16.vlgmr.msra.gmra.mrb[48].mxu1 %v5714_v53  ;;  %6813 = vmatpush3.bf16.msra.mxu0 %v7414_v57  ;;  %v7460_v53 = vld [vmem:[%s9202_s1 + $0xe58] sm:$0xff]   ;;  %v7464_v57 = vld [vmem:[%s9202_s1 + $0xe60] sm:$0xff]  }
 0x1a5   :  { %6835 = vmatpush3.bf16.msra.mxu1 %v7415_v58  ;;  %6814 = vmatprep.subr.bf16.mxu0 %v7416_v59  ;;  %v7465_v58 = vld [vmem:[%s9202_s1 + $0xee0] sm:$0xff]  }
 0x1a6   :  { %6836 = vmatprep.subr.bf16.mxu1 %v7417_v60  ;;  %5446 = vmatprep.mubr.bf16.mxu0 %v5717_v37  ;;  %v7466_v60 = vld [vmem:[%s9202_s1 + $0xe20] sm:$0xff]   ;;  %v7494_v37 = vld [vmem:[%s9202_s1 + $0xf10] sm:$0xff]  }
 0x1a7   :  { %5486 = vmatprep.mubr.bf16.mxu1 %v5719_v40  ;;  %v7497_v40 = vld [vmem:[%s9202_s1 + $0xfd8] sm:$0xff]  }
 0x1a8   :  { %6815 = vmatpush3.bf16.msra.mxu0 %v7418_v61 }
 0x1a9   :  { %6837 = vmatpush3.bf16.msra.mxu1 %v7419_v62  ;;  %6816 = vmatprep.subr.bf16.mxu0 %v7420_v63  ;;  %v7467_v62 = vld [vmem:[%s9202_s1 + $0xea0] sm:$0xff]  }
 0x1aa   :  { %6838 = vmatprep.subr.bf16.mxu1 %v7421_v0 }
 0x1ac   :  { %6817 = vmatpush3.bf16.msra.mxu0 %v7422_v1  ;;  %v7468_v1 = vld [vmem:[%s9202_s1 + $0xe68] sm:$0xff]  }
 0x1ad   :  { %6839 = vmatpush3.bf16.msra.mxu1 %v7423_v2  ;;  %6818 = vmatprep.subr.bf16.mxu0 %v7424_v3 }
 0x1ae   :  { %6840 = vmatprep.subr.bf16.mxu1 %v7425_v4  ;;  %v7469_v4 = vld [vmem:[%s9202_s1 + $0xee8] sm:$0xff]  }
 0x1b0   :  { %6819 = vmatpush3.bf16.msra.mxu0 %v7426_v5 }
 0x1b1   :  { %6841 = vmatpush3.bf16.msra.mxu1 %v7427_v6  ;;  %6820 = vmatprep.subr.bf16.mxu0 %v7428_v7  ;;  %v7470_v7 = vld [vmem:[%s9202_s1 + $0xe28] sm:$0xff]  }
 0x1b2   :  { %6842 = vmatprep.subr.bf16.mxu1 %v7429_v8 }
 0x1b4   :  { %6821 = vmatpush3.bf16.msra.mxu0 %v7430_v10 }
 0x1b5   :  { %6843 = vmatpush3.bf16.msra.mxu1 %v7431_v12  ;;  %6822 = vmatprep.subr.bf16.mxu0 %v7432_v15  ;;  %v7472_v12 = vld [vmem:[%s9202_s1 + $0xe70] sm:$0xff]  }
 0x1b6   :  { %v6520_v9 = vpop.f32.mrb[24].mxu0  ;;  %6844 = vmatprep.subr.bf16.mxu1 %v7433_v18  ;;  %v7474_v15 = vld [vmem:[%s9202_s1 + $0xe30] sm:$0xff]   ;;  %v7477_v18 = vld [vmem:[%s9202_s1 + $0xef8] sm:$0xff]  }
 0x1b7   :  { %v6542_v11 = vpop.f32.mrb[24].mxu1  ;;  %v6521_v13 = vpop.f32.mrb[25].mxu0 }
 0x1b8   :  { %v6543_v14 = vpop.f32.mrb[25].mxu1  ;;  %v6522_v16 = vadd.f32 %v6521_v13, %v6520_v9  ;;  %v6523_v19 = vpop.f32.mrb[26].mxu0  ;;  %6823 = vmatpush3.bf16.msra.mxu0 %v7434_v21  ;;  %v7471_v9 = vld [vmem:[%s9202_s1 + $0xea8] sm:$0xff]   ;;  %v43_v21 = vld [vmem:[%s9203_s0 + $0xe0] sm:$0xff] }
 0x1b9   :  { %v6544_v17 = vadd.f32 %v6543_v14, %v6542_v11  ;;  %v6545_v20 = vpop.f32.mrb[26].mxu1  ;;  %v6524_v24 = vpop.f32.mrb[27].mxu0  ;;  %6845 = vmatpush3.bf16.msra.mxu1 %v7435_v23  ;;  %6824 = vmatprep.subr.bf16.mxu0 %v7436_v26  ;;  %v7473_v14 = vld [vmem:[%s9202_s1 + $0xef0] sm:$0xff]   ;;  %v7478_v19 = vld [vmem:[%s9202_s1 + $0xe38] sm:$0xff]   ;;  %v5720_v23 = vcombine.low %v43_v21, %v43_v21 }
 0x1ba   :  { %v4889_v22 = vadd.f32 %v6522_v16, %v8854_v39  ;;  %v6546_v25 = vpop.f32.mrb[27].mxu1  ;;  %6846 = vmatprep.subr.bf16.mxu1 %v7437_v28  ;;  %v5718_v39 = vcombine.low %v42_v38, %v42_v38  ;;  %v7475_v16 = vld [vmem:[%s9202_s1 + $0xeb0] sm:$0xff]   ;;  %v7479_v20 = vld [vmem:[%s9202_s1 + $0xeb8] sm:$0xff]   ;;  %v5721_v24 = vcombine.high %v43_v21, %v43_v21  ;;  %v7485_v28 = vld [vmem:[%s9202_s1 + $0xfc0] sm:$0xff]  }
 0x1bb   :  { %v7495_v38 = vld [vmem:[%s9202_s1 + $0xf90] sm:$0xff]  }
 0x1bc   :  { %v8962_v27 = vadd.f32 %v6544_v17, %v4889_v22  ;;  %6825 = vmatpush3.bf16.msra.mxu0 %v7438_v29  ;;  %v7476_v17 = vld [vmem:[%s9202_s1 + $0xe78] sm:$0xff]   ;;  %v44_v22 = vld [vmem:[%s9203_s0 + $0xe8] sm:$0xff]  ;;  %v7486_v29 = vld [vmem:[%s9202_s1 + $0xf00] sm:$0xff]  }
 0x1bd   :  { %6847 = vmatpush3.bf16.msra.mxu1 %v7439_v30  ;;  %6826 = vmatprep.subr.bf16.mxu0 %v7440_v31  ;;  %v5722_v25 = vcombine.low %v44_v22, %v44_v22  ;;  %v5723_v26 = vcombine.high %v44_v22, %v44_v22  ;;  %v7487_v30 = vld [vmem:[%s9202_s1 + $0xf80] sm:$0xff]   ;;  %v7488_v31 = vld [vmem:[%s9202_s1 + $0xf48] sm:$0xff]  }
 0x1be   :  { %6848 = vmatprep.subr.bf16.mxu1 %v7441_v32  ;;  %v7489_v32 = vld [vmem:[%s9202_s1 + $0xfc8] sm:$0xff]  }
 0x1c0   :  { %6827 = vmatpush3.bf16.msra.mxu0 %v7442_v33  ;;  %v7490_v33 = vld [vmem:[%s9202_s1 + $0xf08] sm:$0xff]  }
 0x1c1   :  { %6849 = vmatpush3.bf16.msra.mxu1 %v7443_v34  ;;  %6856 = vmatprep.subr.bf16.mxu0 %v7448_v41  ;;  %v7491_v34 = vld [vmem:[%s9202_s1 + $0xf88] sm:$0xff]   ;;  %v7498_v41 = vld [vmem:[%s9202_s1 + $0xf18] sm:$0xff]  }
 0x1c2   :  { %6878 = vmatprep.subr.bf16.mxu1 %v7449_v42  ;;  %v7499_v42 = vld [vmem:[%s9202_s1 + $0xf98] sm:$0xff]  }
 0x1c3   :  { %5447 = vmatmul.mubr.bf16.vlgmr.msra.gmra.mrb[52].mxu0 %v5716_v36  ;;  %v7493_v36 = vld [vmem:[%s9202_s1 + $0xfd0] sm:$0xff]  }
 0x1c4   :  { %5487 = vmatmul.mubr.bf16.vlgmr.msra.gmra.mrb[52].mxu1 %v5718_v39  ;;  %6857 = vmatpush3.bf16.msra.mxu0 %v7450_v43  ;;  %v7496_v39 = vld [vmem:[%s9202_s1 + $0xf58] sm:$0xff]   ;;  %v7500_v43 = vld [vmem:[%s9202_s1 + $0xf60] sm:$0xff]  }
 0x1c5   :  { %6879 = vmatpush3.bf16.msra.mxu1 %v7451_v44  ;;  %6858 = vmatprep.subr.bf16.mxu0 %v7452_v45  ;;  %v7501_v44 = vld [vmem:[%s9202_s1 + $0xfe0] sm:$0xff]  }
 0x1c6   :  { %6880 = vmatprep.subr.bf16.mxu1 %v7453_v46  ;;  %5526 = vmatprep.mubr.bf16.mxu0 %v5721_v24  ;;  %v7502_v45 = vld [vmem:[%s9202_s1 + $0xf20] sm:$0xff]  }
 0x1c7   :  { %5566 = vmatprep.mubr.bf16.mxu1 %v5723_v26 }
 0x1c8   :  { %6859 = vmatpush3.bf16.msra.mxu0 %v7454_v47  ;;  %v7503_v47 = vld [vmem:[%s9202_s1 + $0xfa0] sm:$0xff]  }
 0x1c9   :  { %6881 = vmatpush3.bf16.msra.mxu1 %v7455_v48  ;;  %6860 = vmatprep.subr.bf16.mxu0 %v7456_v49 }
 0x1ca   :  { %6882 = vmatprep.subr.bf16.mxu1 %v7457_v50 }
 0x1cc   :  { %6861 = vmatpush3.bf16.msra.mxu0 %v7458_v51 }
 0x1cd   :  { %6883 = vmatpush3.bf16.msra.mxu1 %v7459_v52  ;;  %6862 = vmatprep.subr.bf16.mxu0 %v7460_v53  ;;  %v7504_v53 = vld [vmem:[%s9202_s1 + $0xf68] sm:$0xff]  }
 0x1ce   :  { %6884 = vmatprep.subr.bf16.mxu1 %v7461_v54 }
 0x1d0   :  { %6863 = vmatpush3.bf16.msra.mxu0 %v7462_v55  ;;  %v7505_v55 = vld [vmem:[%s9202_s1 + $0xfe8] sm:$0xff]  }
 0x1d1   :  { %6885 = vmatpush3.bf16.msra.mxu1 %v7463_v56  ;;  %6864 = vmatprep.subr.bf16.mxu0 %v7464_v57 }
 0x1d2   :  { %6886 = vmatprep.subr.bf16.mxu1 %v7465_v58  ;;  %v7506_v58 = vld [vmem:[%s9202_s1 + $0xf28] sm:$0xff]  }
 0x1d4   :  { %6865 = vmatpush3.bf16.msra.mxu0 %v7466_v60  ;;  %v7507_v60 = vld [vmem:[%s9202_s1 + $0xfa8] sm:$0xff]  }
 0x1d5   :  { %6887 = vmatpush3.bf16.msra.mxu1 %v7467_v62  ;;  %6866 = vmatprep.subr.bf16.mxu0 %v7468_v1  ;;  %v7510_v1 = vld [vmem:[%s9202_s1 + $0xf30] sm:$0xff]  }
 0x1d6   :  { %v6564_v59 = vpop.f32.mrb[28].mxu0  ;;  %6888 = vmatprep.subr.bf16.mxu1 %v7469_v4  ;;  %v7513_v4 = vld [vmem:[%s9202_s1 + $0xff8] sm:$0xff]  }
 0x1d7   :  { %v6586_v61 = vpop.f32.mrb[28].mxu1  ;;  %v6565_v63 = vpop.f32.mrb[29].mxu0 }
 0x1d8   :  { %v6587_v0 = vpop.f32.mrb[29].mxu1  ;;  %v6566_v2 = vadd.f32 %v6565_v63, %v6564_v59  ;;  %v6567_v5 = vpop.f32.mrb[30].mxu0  ;;  %6867 = vmatpush3.bf16.msra.mxu0 %v7470_v7  ;;  %v7508_v63 = vld [vmem:[%s9202_s1 + $0xf70] sm:$0xff]  }
 0x1d9   :  { %v6588_v3 = vadd.f32 %v6587_v0, %v6586_v61  ;;  %v6589_v6 = vpop.f32.mrb[30].mxu1  ;;  %v6568_v10 = vpop.f32.mrb[31].mxu0  ;;  %6889 = vmatpush3.bf16.msra.mxu1 %v7471_v9  ;;  %6868 = vmatprep.subr.bf16.mxu0 %v7472_v12  ;;  %v7509_v0 = vld [vmem:[%s9202_s1 + $0xff0] sm:$0xff]   ;;  %v7514_v5 = vld [vmem:[%s9202_s1 + $0xf38] sm:$0xff]  }
 0x1da   :  { %v4969_v8 = vadd.f32 %v6566_v2, %v8962_v27  ;;  %v6590_v11 = vpop.f32.mrb[31].mxu1  ;;  %6890 = vmatprep.subr.bf16.mxu1 %v7473_v14  ;;  %v7484_v27 = vld [vmem:[%s9202_s1 + $0xf40] sm:$0xff]   ;;  %v7511_v2 = vld [vmem:[%s9202_s1 + $0xfb0] sm:$0xff]   ;;  %v7515_v6 = vld [vmem:[%s9202_s1 + $0xfb8] sm:$0xff]  }
 0x1db   :  { %v45_v7 = vld [vmem:[%s9203_s0 + $0xf0] sm:$0xff] }
 0x1dc   :  { %v9067_v13 = vadd.f32 %v6588_v3, %v4969_v8  ;;  %6869 = vmatpush3.bf16.msra.mxu0 %v7474_v15  ;;  %v7512_v3 = vld [vmem:[%s9202_s1 + $0xf78] sm:$0xff]   ;;  %v5724_v9 = vcombine.low %v45_v7, %v45_v7  ;;  %v5725_v10 = vcombine.high %v45_v7, %v45_v7 }
 0x1dd   :  { %6891 = vmatpush3.bf16.msra.mxu1 %v7475_v16  ;;  %6870 = vmatprep.subr.bf16.mxu0 %v7476_v17  ;;  %v46_v8 = vld [vmem:[%s9203_s0 + $0xf8] sm:$0xff] }
 0x1de   :  { %6892 = vmatprep.subr.bf16.mxu1 %v7477_v18  ;;  %v5726_v11 = vcombine.low %v46_v8, %v46_v8  ;;  %v5727_v12 = vcombine.high %v46_v8, %v46_v8 }
 0x1e0   :  { %6871 = vmatpush3.bf16.msra.mxu0 %v7478_v19 }
 0x1e1   :  { %6893 = vmatpush3.bf16.msra.mxu1 %v7479_v20  ;;  %6900 = vmatprep.subr.bf16.mxu0 %v7484_v27 }
 0x1e2   :  { %6922 = vmatprep.subr.bf16.mxu1 %v7485_v28 }
 0x1e3   :  { %5527 = vmatmul.mubr.bf16.vlgmr.msra.gmra.mrb[56].mxu0 %v5720_v23 }
 0x1e4   :  { %5567 = vmatmul.mubr.bf16.vlgmr.msra.gmra.mrb[56].mxu1 %v5722_v25  ;;  %6901 = vmatpush3.bf16.msra.mxu0 %v7486_v29 }
 0x1e5   :  { %6923 = vmatpush3.bf16.msra.mxu1 %v7487_v30  ;;  %6902 = vmatprep.subr.bf16.mxu0 %v7488_v31 }
 0x1e6   :  { %6924 = vmatprep.subr.bf16.mxu1 %v7489_v32  ;;  %5606 = vmatprep.mubr.bf16.mxu0 %v5725_v10 }
 0x1e7   :  { %5646 = vmatprep.mubr.bf16.mxu1 %v5727_v12 }
 0x1e8   :  { %6903 = vmatpush3.bf16.msra.mxu0 %v7490_v33 }
 0x1e9   :  { %6925 = vmatpush3.bf16.msra.mxu1 %v7491_v34  ;;  %6904 = vmatprep.subr.bf16.mxu0 %v7492_v35 }
 0x1ea   :  { %6926 = vmatprep.subr.bf16.mxu1 %v7493_v36 }
 0x1ec   :  { %6905 = vmatpush3.bf16.msra.mxu0 %v7494_v37 }
 0x1ed   :  { %6927 = vmatpush3.bf16.msra.mxu1 %v7495_v38  ;;  %6906 = vmatprep.subr.bf16.mxu0 %v7496_v39 }
 0x1ee   :  { %6928 = vmatprep.subr.bf16.mxu1 %v7497_v40 }
 0x1f0   :  { %6907 = vmatpush3.bf16.msra.mxu0 %v7498_v41 }
 0x1f1   :  { %6929 = vmatpush3.bf16.msra.mxu1 %v7499_v42  ;;  %6908 = vmatprep.subr.bf16.mxu0 %v7500_v43 }
 0x1f2   :  { %6930 = vmatprep.subr.bf16.mxu1 %v7501_v44 }
 0x1f4   :  { %6909 = vmatpush3.bf16.msra.mxu0 %v7502_v45 }
 0x1f5   :  { %6931 = vmatpush3.bf16.msra.mxu1 %v7503_v47  ;;  %6910 = vmatprep.subr.bf16.mxu0 %v7504_v53 }
 0x1f6   :  { %v6608_v46 = vpop.f32.mrb[32].mxu0  ;;  %6932 = vmatprep.subr.bf16.mxu1 %v7505_v55 }
 0x1f7   :  { %v6630_v48 = vpop.f32.mrb[32].mxu1  ;;  %v6609_v49 = vpop.f32.mrb[33].mxu0 }
 0x1f8   :  { %v6631_v50 = vpop.f32.mrb[33].mxu1  ;;  %v6610_v51 = vadd.f32 %v6609_v49, %v6608_v46  ;;  %v6611_v54 = vpop.f32.mrb[34].mxu0  ;;  %6911 = vmatpush3.bf16.msra.mxu0 %v7506_v58 }
 0x1f9   :  { %v6632_v52 = vadd.f32 %v6631_v50, %v6630_v48  ;;  %v6633_v56 = vpop.f32.mrb[34].mxu1  ;;  %v6612_v59 = vpop.f32.mrb[35].mxu0  ;;  %6933 = vmatpush3.bf16.msra.mxu1 %v7507_v60  ;;  %6912 = vmatprep.subr.bf16.mxu0 %v7508_v63 }
 0x1fa   :  { %v5049_v57 = vadd.f32 %v6610_v51, %v9067_v13  ;;  %v6634_v61 = vpop.f32.mrb[35].mxu1  ;;  %6934 = vmatprep.subr.bf16.mxu1 %v7509_v0 }
 0x1fc   :  { %v5089_v62 = vadd.f32 %v6632_v52, %v5049_v57  ;;  %6913 = vmatpush3.bf16.msra.mxu0 %v7510_v1 }
 0x1fd   :  { %6935 = vmatpush3.bf16.msra.mxu1 %v7511_v2  ;;  %6914 = vmatprep.subr.bf16.mxu0 %v7512_v3 }
 0x1fe   :  { %6936 = vmatprep.subr.bf16.mxu1 %v7513_v4 }
 0x200   :  { %6915 = vmatpush3.bf16.msra.mxu0 %v7514_v5 }
 0x201   :  { %6937 = vmatpush3.bf16.msra.mxu1 %v7515_v6 }
 0x203   :  { %5607 = vmatmul.mubr.bf16.vlgmr.msra.gmra.mrb[60].mxu0 %v5724_v9 }
 0x204   :  { %5647 = vmatmul.mubr.bf16.vlgmr.msra.gmra.mrb[60].mxu1 %v5726_v11 }
 0x216   :  { %v6652_v13 = vpop.f32.mrb[36].mxu0 }
 0x217   :  { %v6674_v14 = vpop.f32.mrb[36].mxu1  ;;  %v6653_v15 = vpop.f32.mrb[37].mxu0 }
 0x218   :  { %v6654_v16 = vadd.f32 %v6653_v15, %v6652_v13  ;;  %v6675_v17 = vpop.f32.mrb[37].mxu1  ;;  %v6655_v18 = vpop.f32.mrb[38].mxu0 }
 0x219   :  { %v6676_v19 = vadd.f32 %v6675_v17, %v6674_v14  ;;  %v6677_v20 = vpop.f32.mrb[38].mxu1  ;;  %v6656_v21 = vpop.f32.mrb[39].mxu0 }
 0x21a   :  { %v5129_v22 = vadd.f32 %v6654_v16, %v5089_v62  ;;  %v6678_v23 = vpop.f32.mrb[39].mxu1 }
 0x21c   :  { %v5169_v24 = vadd.f32 %v6676_v19, %v5129_v22 }
 0x236   :  { %v6696_v25 = vpop.f32.mrb[40].mxu0 }
 0x237   :  { %v6718_v26 = vpop.f32.mrb[40].mxu1  ;;  %v6697_v27 = vpop.f32.mrb[41].mxu0 }
 0x238   :  { %v6719_v28 = vpop.f32.mrb[41].mxu1  ;;  %v6698_v29 = vadd.f32 %v6697_v27, %v6696_v25  ;;  %v6699_v31 = vpop.f32.mrb[42].mxu0 }
 0x239   :  { %v6720_v30 = vadd.f32 %v6719_v28, %v6718_v26  ;;  %v6721_v32 = vpop.f32.mrb[42].mxu1  ;;  %v6700_v33 = vpop.f32.mrb[43].mxu0 }
 0x23a   :  { %v6722_v34 = vpop.f32.mrb[43].mxu1  ;;  %v5209_v35 = vadd.f32 %v6698_v29, %v5169_v24 }
 0x23c   :  { %v5249_v36 = vadd.f32 %v6720_v30, %v5209_v35 }
 0x256   :  { %v6740_v37 = vpop.f32.mrb[44].mxu0 }
 0x257   :  { %v6762_v38 = vpop.f32.mrb[44].mxu1  ;;  %v6741_v39 = vpop.f32.mrb[45].mxu0 }
 0x258   :  { %v6742_v40 = vadd.f32 %v6741_v39, %v6740_v37  ;;  %v6763_v41 = vpop.f32.mrb[45].mxu1  ;;  %v6743_v42 = vpop.f32.mrb[46].mxu0 }
 0x259   :  { %v6764_v43 = vadd.f32 %v6763_v41, %v6762_v38  ;;  %v6765_v44 = vpop.f32.mrb[46].mxu1  ;;  %v6744_v45 = vpop.f32.mrb[47].mxu0 }
 0x25a   :  { %v5289_v46 = vadd.f32 %v6742_v40, %v5249_v36  ;;  %v6766_v47 = vpop.f32.mrb[47].mxu1 }
 0x25c   :  { %v5329_v48 = vadd.f32 %v6764_v43, %v5289_v46 }
 0x276   :  { %v6784_v49 = vpop.f32.mrb[48].mxu0 }
 0x277   :  { %v6806_v50 = vpop.f32.mrb[48].mxu1  ;;  %v6785_v51 = vpop.f32.mrb[49].mxu0 }
 0x278   :  { %v6786_v52 = vadd.f32 %v6785_v51, %v6784_v49  ;;  %v6807_v53 = vpop.f32.mrb[49].mxu1  ;;  %v6787_v54 = vpop.f32.mrb[50].mxu0 }
 0x279   :  { %v6808_v55 = vadd.f32 %v6807_v53, %v6806_v50  ;;  %v6809_v56 = vpop.f32.mrb[50].mxu1  ;;  %v6788_v57 = vpop.f32.mrb[51].mxu0 }
 0x27a   :  { %v5369_v58 = vadd.f32 %v6786_v52, %v5329_v48  ;;  %v6810_v59 = vpop.f32.mrb[51].mxu1 }
 0x27c   :  { %v5409_v60 = vadd.f32 %v6808_v55, %v5369_v58 }
 0x296   :  { %v6828_v61 = vpop.f32.mrb[52].mxu0 }
 0x297   :  { %v6850_v62 = vpop.f32.mrb[52].mxu1  ;;  %v6829_v63 = vpop.f32.mrb[53].mxu0 }
 0x298   :  { %v6851_v0 = vpop.f32.mrb[53].mxu1  ;;  %v6830_v1 = vadd.f32 %v6829_v63, %v6828_v61  ;;  %v6831_v3 = vpop.f32.mrb[54].mxu0 }
 0x299   :  { %v6852_v2 = vadd.f32 %v6851_v0, %v6850_v62  ;;  %v6853_v4 = vpop.f32.mrb[54].mxu1  ;;  %v6832_v5 = vpop.f32.mrb[55].mxu0 }
 0x29a   :  { %v6854_v6 = vpop.f32.mrb[55].mxu1  ;;  %v5449_v7 = vadd.f32 %v6830_v1, %v5409_v60 }
 0x29c   :  { %v5489_v8 = vadd.f32 %v6852_v2, %v5449_v7 }
 0x2b6   :  { %v6872_v9 = vpop.f32.mrb[56].mxu0 }
 0x2b7   :  { %v6894_v10 = vpop.f32.mrb[56].mxu1  ;;  %v6873_v11 = vpop.f32.mrb[57].mxu0 }
 0x2b8   :  { %v6874_v12 = vadd.f32 %v6873_v11, %v6872_v9  ;;  %v6895_v13 = vpop.f32.mrb[57].mxu1  ;;  %v6875_v14 = vpop.f32.mrb[58].mxu0 }
 0x2b9   :  { %v6896_v15 = vadd.f32 %v6895_v13, %v6894_v10  ;;  %v6897_v16 = vpop.f32.mrb[58].mxu1  ;;  %v6876_v17 = vpop.f32.mrb[59].mxu0 }
 0x2ba   :  { %v5529_v18 = vadd.f32 %v6874_v12, %v5489_v8  ;;  %v6898_v19 = vpop.f32.mrb[59].mxu1 }
 0x2bc   :  { %v5569_v20 = vadd.f32 %v6896_v15, %v5529_v18 }
 0x2d6   :  { %v6916_v21 = vpop.f32.mrb[60].mxu0 }
 0x2d7   :  { %v6938_v22 = vpop.f32.mrb[60].mxu1  ;;  %v6917_v23 = vpop.f32.mrb[61].mxu0 }
 0x2d8   :  { %v6918_v24 = vadd.f32 %v6917_v23, %v6916_v21  ;;  %v6939_v25 = vpop.f32.mrb[61].mxu1  ;;  %v6919_v26 = vpop.f32.mrb[62].mxu0 }
 0x2d9   :  { %v6940_v27 = vadd.f32 %v6939_v25, %v6938_v22  ;;  %v6941_v28 = vpop.f32.mrb[62].mxu1  ;;  %v6920_v29 = vpop.f32.mrb[63].mxu0 }
 0x2da   :  { %v5609_v30 = vadd.f32 %v6918_v24, %v5569_v20  ;;  %v6942_v31 = vpop.f32.mrb[63].mxu1 }
 0x2dc   :  { %v5649_v32 = vadd.f32 %v6940_v27, %v5609_v30 }
 0x2de   :  { %v5654_v33 = vmul.f32 0.01, %v5649_v32 }
 0x2e0   :  { %v5655_v34 = vmax.f32 %v5649_v32, %v5654_v33 }
 0x2e2   :  { %v5656_v35 = vpack.c.bf16 %v5655_v34, %v5655_v34 }
 0x2e4   :  { %5658 = vst.msk [vmem:[%s9205_s3] sm:$0xf] %vm5657_vm0, %v5656_v35 }

// kernel: appearance_autoencoder_forward.15
= control target key start
LH: loop header
LB: loop body
LE: loop exit
PB: predicated region body
PF: predicated region fallthrough
CT: control target
= control target key end

     0   :  { %v3081_v3 = vmov 0   ;;  %vm1120_vm0 = vcmask 261120   ;;  %s3787_s1 = inlined_call_operand.vmem [shape: bf16[32,8192], index: 1, kind: input, shape index: {}]   ;;  %s3788_s0 = inlined_call_operand.vmem [shape: bf16[8,32], index: 0, kind: input, shape index: {}]   ;;  %s3789_s2 = inlined_call_operand.vmem [shape: f32[1,8192], index: 2, kind: input, shape index: {}]   ;;  %s3790_s3 = inlined_call_operand.vmem [shape: bf16[8,8192], index: 3, kind: output, shape index: {}]  }
   0x1   :  { %v16_v0 = vld [vmem:[%s3787_s1] sm:$0xff]  ;;  %v17_v2 = vld [vmem:[%s3787_s1 + $0x8] sm:$0xff]  ;;  %1156 = vmatprep.mubr.bf16.mxu0 %v3081_v3  ;;  %1197 = vmatprep.mubr.bf16.mxu1 %v3081_v3  ;;  %v18_v15 = vld [vmem:[%s3787_s1 + $0x10] sm:$0xff] }
   0x2   :  { %v48_v1 = vld [vmem:[%s3787_s1 + $0x100] sm:$0xff]  ;;  %v49_v5 = vld [vmem:[%s3787_s1 + $0x108] sm:$0xff]  ;;  %v50_v16 = vld [vmem:[%s3787_s1 + $0x110] sm:$0xff] }
   0x3   :  { %v2857_v4 = vcombine.high %v16_v0, %v48_v1  ;;  %v2856_v6 = vcombine.low %v16_v0, %v48_v1  ;;  %v80_v7 = vld [vmem:[%s3787_s1 + $0x200] sm:$0xff]  ;;  %v2859_v9 = vcombine.high %v17_v2, %v49_v5  ;;  %v2858_v10 = vcombine.low %v17_v2, %v49_v5  ;;  %v81_v12 = vld [vmem:[%s3787_s1 + $0x208] sm:$0xff]  ;;  %v19_v17 = vld [vmem:[%s3787_s1 + $0x18] sm:$0xff] }
   0x4   :  { %v112_v8 = vld [vmem:[%s3787_s1 + $0x300] sm:$0xff]  ;;  %v113_v13 = vld [vmem:[%s3787_s1 + $0x308] sm:$0xff]  ;;  %v51_v19 = vld [vmem:[%s3787_s1 + $0x118] sm:$0xff]  ;;  %v2861_v21 = vcombine.high %v18_v15, %v50_v16  ;;  %v2860_v28 = vcombine.low %v18_v15, %v50_v16 }
   0x5   :  { %v2921_v11 = vcombine.high %v80_v7, %v112_v8  ;;  %1124 = vmatprep.subr.bf16.mxu0 %v2857_v4  ;;  %v2923_v14 = vcombine.high %v81_v12, %v113_v13  ;;  %1165 = vmatprep.subr.bf16.mxu1 %v2859_v9  ;;  %v2920_v18 = vcombine.low %v80_v7, %v112_v8  ;;  %v82_v23 = vld [vmem:[%s3787_s1 + $0x210] sm:$0xff]  ;;  %v83_v25 = vld [vmem:[%s3787_s1 + $0x218] sm:$0xff]  ;;  %v3155_v27 = vld [vmem:[%s3788_s0] sm:$0xf] }
   0x6   :  { %1125 = vmatpush1.bf16.msra.mxu0 %v2856_v6  ;;  %1166 = vmatpush1.bf16.msra.mxu1 %v2858_v10  ;;  %v2922_v20 = vcombine.low %v81_v12, %v113_v13  ;;  %v2863_v22 = vcombine.high %v19_v17, %v51_v19  ;;  %v114_v24 = vld [vmem:[%s3787_s1 + $0x310] sm:$0xff]  ;;  %v115_v26 = vld [vmem:[%s3787_s1 + $0x318] sm:$0xff]  ;;  %v2862_v29 = vcombine.low %v19_v17, %v51_v19  ;;  %v20_v32 = vld [vmem:[%s3787_s1 + $0x20] sm:$0xff] }
   0x7   :  { %1126 = vmatprep.subr.bf16.mxu0 %v2921_v11  ;;  %1167 = vmatprep.subr.bf16.mxu1 %v2923_v14  ;;  %v2925_v30 = vcombine.high %v82_v23, %v114_v24  ;;  %v2927_v31 = vcombine.high %v83_v25, %v115_v26  ;;  %v52_v33 = vld [vmem:[%s3787_s1 + $0x120] sm:$0xff]  ;;  %v21_v34 = vld [vmem:[%s3787_s1 + $0x28] sm:$0xff]  ;;  %v2924_v36 = vcombine.low %v82_v23, %v114_v24  ;;  %v22_v48 = vld [vmem:[%s3787_s1 + $0x30] sm:$0xff] }
   0x8   :  { %v53_v35 = vld [vmem:[%s3787_s1 + $0x128] sm:$0xff]  ;;  %v2926_v37 = vcombine.low %v83_v25, %v115_v26  ;;  %v2865_v38 = vcombine.high %v20_v32, %v52_v33  ;;  %v84_v40 = vld [vmem:[%s3787_s1 + $0x220] sm:$0xff]  ;;  %v2864_v44 = vcombine.low %v20_v32, %v52_v33  ;;  %v54_v49 = vld [vmem:[%s3787_s1 + $0x130] sm:$0xff] }
   0x9   :  { %v2867_v39 = vcombine.high %v21_v34, %v53_v35  ;;  %v116_v41 = vld [vmem:[%s3787_s1 + $0x320] sm:$0xff]  ;;  %v85_v42 = vld [vmem:[%s3787_s1 + $0x228] sm:$0xff]  ;;  %v2866_v45 = vcombine.low %v21_v34, %v53_v35  ;;  %v23_v50 = vld [vmem:[%s3787_s1 + $0x38] sm:$0xff]  ;;  %v2869_v54 = vcombine.high %v22_v48, %v54_v49  ;;  %v2868_v60 = vcombine.low %v22_v48, %v54_v49 }
   0xa   :  { %1127 = vmatpush1.bf16.msra.mxu0 %v2920_v18  ;;  %1168 = vmatpush1.bf16.msra.mxu1 %v2922_v20  ;;  %v117_v43 = vld [vmem:[%s3787_s1 + $0x328] sm:$0xff]  ;;  %v2929_v46 = vcombine.high %v84_v40, %v116_v41  ;;  %v55_v51 = vld [vmem:[%s3787_s1 + $0x138] sm:$0xff]  ;;  %v2928_v52 = vcombine.low %v84_v40, %v116_v41  ;;  %v86_v56 = vld [vmem:[%s3787_s1 + $0x230] sm:$0xff] }
   0xb   :  { %1206 = vmatprep.subr.bf16.mxu0 %v2861_v21  ;;  %1247 = vmatprep.subr.bf16.mxu1 %v2863_v22  ;;  %v2931_v47 = vcombine.high %v85_v42, %v117_v43  ;;  %v2930_v53 = vcombine.low %v85_v42, %v117_v43  ;;  %v2871_v55 = vcombine.high %v23_v50, %v55_v51  ;;  %v118_v57 = vld [vmem:[%s3787_s1 + $0x330] sm:$0xff]  ;;  %v87_v58 = vld [vmem:[%s3787_s1 + $0x238] sm:$0xff]  ;;  %v24_v0 = vld [vmem:[%s3787_s1 + $0x40] sm:$0xff] }
   0xc   :  { %v119_v59 = vld [vmem:[%s3787_s1 + $0x338] sm:$0xff]  ;;  %v2870_v61 = vcombine.low %v23_v50, %v55_v51  ;;  %v2933_v62 = vcombine.high %v86_v56, %v118_v57  ;;  %v56_v1 = vld [vmem:[%s3787_s1 + $0x140] sm:$0xff]  ;;  %v25_v2 = vld [vmem:[%s3787_s1 + $0x48] sm:$0xff]  ;;  %v2932_v5 = vcombine.low %v86_v56, %v118_v57 }
   0xd   :  { %2984 = vmatmul.mubr.msk.bf16.vlgmr.msra.gmra.mrb[0].mxu0 %vm1120_vm0, %v3155_v27  ;;  %2985 = vmatmul.mubr.msk.bf16.vlgmr.msra.gmra.mrb[0].mxu1 %vm1120_vm0, %v3155_v27  ;;  %v2935_v63 = vcombine.high %v87_v58, %v119_v59  ;;  %v57_v4 = vld [vmem:[%s3787_s1 + $0x148] sm:$0xff]  ;;  %v2934_v6 = vcombine.low %v87_v58, %v119_v59  ;;  %v2873_v7 = vcombine.high %v24_v0, %v56_v1  ;;  %v88_v9 = vld [vmem:[%s3787_s1 + $0x240] sm:$0xff]  ;;  %v26_v17 = vld [vmem:[%s3787_s1 + $0x50] sm:$0xff] }
   0xe   :  { %1207 = vmatpush1.bf16.msra.mxu0 %v2860_v28  ;;  %1248 = vmatpush1.bf16.msra.mxu1 %v2862_v29  ;;  %v2875_v8 = vcombine.high %v25_v2, %v57_v4  ;;  %v120_v10 = vld [vmem:[%s3787_s1 + $0x340] sm:$0xff]  ;;  %v89_v11 = vld [vmem:[%s3787_s1 + $0x248] sm:$0xff]  ;;  %v2872_v13 = vcombine.low %v24_v0, %v56_v1  ;;  %v2874_v14 = vcombine.low %v25_v2, %v57_v4  ;;  %v58_v18 = vld [vmem:[%s3787_s1 + $0x150] sm:$0xff] }
   0xf   :  { %1208 = vmatprep.subr.bf16.mxu0 %v2925_v30  ;;  %1249 = vmatprep.subr.bf16.mxu1 %v2927_v31  ;;  %v121_v12 = vld [vmem:[%s3787_s1 + $0x348] sm:$0xff]  ;;  %v2937_v15 = vcombine.high %v88_v9, %v120_v10  ;;  %v27_v19 = vld [vmem:[%s3787_s1 + $0x58] sm:$0xff]  ;;  %v2936_v21 = vcombine.low %v88_v9, %v120_v10  ;;  %v2877_v23 = vcombine.high %v26_v17, %v58_v18  ;;  %v90_v25 = vld [vmem:[%s3787_s1 + $0x250] sm:$0xff] }
  0x10   :  { %1238 = vmatprep.mubr.bf16.mxu0 %v3081_v3  ;;  %1279 = vmatprep.mubr.bf16.mxu1 %v3081_v3  ;;  %v2939_v16 = vcombine.high %v89_v11, %v121_v12  ;;  %v59_v20 = vld [vmem:[%s3787_s1 + $0x158] sm:$0xff]  ;;  %v2938_v22 = vcombine.low %v89_v11, %v121_v12  ;;  %v122_v26 = vld [vmem:[%s3787_s1 + $0x350] sm:$0xff]  ;;  %v2876_v30 = vcombine.low %v26_v17, %v58_v18  ;;  %v28_v34 = vld [vmem:[%s3787_s1 + $0x60] sm:$0xff] }
  0x11   :  { %v2879_v24 = vcombine.high %v27_v19, %v59_v20  ;;  %v91_v28 = vld [vmem:[%s3787_s1 + $0x258] sm:$0xff]  ;;  %v2878_v31 = vcombine.low %v27_v19, %v59_v20  ;;  %v2941_v32 = vcombine.high %v90_v25, %v122_v26  ;;  %v60_v35 = vld [vmem:[%s3787_s1 + $0x160] sm:$0xff]  ;;  %v30_v50 = vld [vmem:[%s3787_s1 + $0x70] sm:$0xff] }
  0x12   :  { %1209 = vmatpush1.bf16.msra.mxu0 %v2924_v36  ;;  %1250 = vmatpush1.bf16.msra.mxu1 %v2926_v37  ;;  %v123_v29 = vld [vmem:[%s3787_s1 + $0x358] sm:$0xff]  ;;  %v29_v36 = vld [vmem:[%s3787_s1 + $0x68] sm:$0xff]  ;;  %v2881_v40 = vcombine.high %v28_v34, %v60_v35  ;;  %v92_v42 = vld [vmem:[%s3787_s1 + $0x260] sm:$0xff] }
  0x13   :  { %1288 = vmatprep.subr.bf16.mxu0 %v2865_v38  ;;  %1329 = vmatprep.subr.bf16.mxu1 %v2867_v39  ;;  %v2943_v33 = vcombine.high %v91_v28, %v123_v29  ;;  %v61_v37 = vld [vmem:[%s3787_s1 + $0x168] sm:$0xff]  ;;  %v2940_v38 = vcombine.low %v90_v25, %v122_v26  ;;  %v2942_v39 = vcombine.low %v91_v28, %v123_v29  ;;  %v124_v43 = vld [vmem:[%s3787_s1 + $0x360] sm:$0xff]  ;;  %v62_v51 = vld [vmem:[%s3787_s1 + $0x170] sm:$0xff] }
  0x14   :  { %v2883_v41 = vcombine.high %v29_v36, %v61_v37  ;;  %v2945_v48 = vcombine.high %v92_v42, %v124_v43  ;;  %v2885_v56 = vcombine.high %v30_v50, %v62_v51  ;;  %v94_v58 = vld [vmem:[%s3787_s1 + $0x270] sm:$0xff]  ;;  %v32_v2 = vld [vmem:[%s3787_s1 + $0x80] sm:$0xff] }
  0x15   :  { %2986 = vmatmul.mubr.msk.bf16.vlgmr.msra.gmra.mrb[4].mxu0 %vm1120_vm0, %v3155_v27  ;;  %2987 = vmatmul.mubr.msk.bf16.vlgmr.msra.gmra.mrb[4].mxu1 %vm1120_vm0, %v3155_v27  ;;  %v126_v59 = vld [vmem:[%s3787_s1 + $0x370] sm:$0xff]  ;;  %v64_v4 = vld [vmem:[%s3787_s1 + $0x180] sm:$0xff] }
  0x16   :  { %1289 = vmatpush1.bf16.msra.mxu0 %v2864_v44  ;;  %1330 = vmatpush1.bf16.msra.mxu1 %v2866_v45  ;;  %v93_v44 = vld [vmem:[%s3787_s1 + $0x268] sm:$0xff]  ;;  %v2949_v0 = vcombine.high %v94_v58, %v126_v59  ;;  %v2889_v9 = vcombine.high %v32_v2, %v64_v4  ;;  %v96_v11 = vld [vmem:[%s3787_s1 + $0x280] sm:$0xff]  ;;  %v34_v19 = vld [vmem:[%s3787_s1 + $0x90] sm:$0xff] }
  0x17   :  { %1290 = vmatprep.subr.bf16.mxu0 %v2929_v46  ;;  %1331 = vmatprep.subr.bf16.mxu1 %v2931_v47  ;;  %v125_v45 = vld [vmem:[%s3787_s1 + $0x368] sm:$0xff]  ;;  %v2880_v46 = vcombine.low %v28_v34, %v60_v35  ;;  %v2882_v47 = vcombine.low %v29_v36, %v61_v37  ;;  %v128_v12 = vld [vmem:[%s3787_s1 + $0x380] sm:$0xff]  ;;  %v66_v20 = vld [vmem:[%s3787_s1 + $0x190] sm:$0xff] }
  0x18   :  { %1320 = vmatprep.mubr.bf16.mxu0 %v3081_v3  ;;  %1361 = vmatprep.mubr.bf16.mxu1 %v3081_v3  ;;  %v2947_v49 = vcombine.high %v93_v44, %v125_v45  ;;  %v2953_v17 = vcombine.high %v96_v11, %v128_v12  ;;  %v2893_v25 = vcombine.high %v34_v19, %v66_v20  ;;  %v98_v28 = vld [vmem:[%s3787_s1 + $0x290] sm:$0xff]  ;;  %v36_v36 = vld [vmem:[%s3787_s1 + $0xa0] sm:$0xff] }
  0x19   :  { %v130_v29 = vld [vmem:[%s3787_s1 + $0x390] sm:$0xff]  ;;  %v68_v37 = vld [vmem:[%s3787_s1 + $0x1a0] sm:$0xff] }
  0x1a   :  { %1291 = vmatpush1.bf16.msra.mxu0 %v2928_v52  ;;  %1332 = vmatpush1.bf16.msra.mxu1 %v2930_v53  ;;  %v31_v52 = vld [vmem:[%s3787_s1 + $0x78] sm:$0xff]  ;;  %v2957_v34 = vcombine.high %v98_v28, %v130_v29 }
  0x1b   :  { %1370 = vmatprep.subr.bf16.mxu0 %v2869_v54  ;;  %1411 = vmatprep.subr.bf16.mxu1 %v2871_v55  ;;  %v63_v53 = vld [vmem:[%s3787_s1 + $0x178] sm:$0xff]  ;;  %v2944_v54 = vcombine.low %v92_v42, %v124_v43  ;;  %v2946_v55 = vcombine.low %v93_v44, %v125_v45  ;;  %v2897_v42 = vcombine.high %v36_v36, %v68_v37  ;;  %v100_v44 = vld [vmem:[%s3787_s1 + $0x2a0] sm:$0xff] }
  0x1c   :  { %v2887_v57 = vcombine.high %v31_v52, %v63_v53  ;;  %v132_v45 = vld [vmem:[%s3787_s1 + $0x3a0] sm:$0xff] }
  0x1d   :  { %2988 = vmatmul.mubr.msk.bf16.vlgmr.msra.gmra.mrb[8].mxu0 %vm1120_vm0, %v3155_v27  ;;  %2989 = vmatmul.mubr.msk.bf16.vlgmr.msra.gmra.mrb[8].mxu1 %vm1120_vm0, %v3155_v27 }
  0x1e   :  { %1371 = vmatpush1.bf16.msra.mxu0 %v2868_v60  ;;  %1412 = vmatpush1.bf16.msra.mxu1 %v2870_v61  ;;  %v95_v60 = vld [vmem:[%s3787_s1 + $0x278] sm:$0xff] }
  0x1f   :  { %1372 = vmatprep.subr.bf16.mxu0 %v2933_v62  ;;  %1413 = vmatprep.subr.bf16.mxu1 %v2935_v63  ;;  %v127_v61 = vld [vmem:[%s3787_s1 + $0x378] sm:$0xff]  ;;  %v2884_v62 = vcombine.low %v30_v50, %v62_v51  ;;  %v2886_v63 = vcombine.low %v31_v52, %v63_v53  ;;  %v2961_v50 = vcombine.high %v100_v44, %v132_v45  ;;  %v38_v52 = vld [vmem:[%s3787_s1 + $0xb0] sm:$0xff] }
  0x20   :  { %1402 = vmatprep.mubr.bf16.mxu0 %v3081_v3  ;;  %1443 = vmatprep.mubr.bf16.mxu1 %v3081_v3  ;;  %v2951_v1 = vcombine.high %v95_v60, %v127_v61  ;;  %v70_v53 = vld [vmem:[%s3787_s1 + $0x1b0] sm:$0xff] }
  0x22   :  { %1373 = vmatpush1.bf16.msra.mxu0 %v2932_v5  ;;  %1414 = vmatpush1.bf16.msra.mxu1 %v2934_v6  ;;  %v33_v5 = vld [vmem:[%s3787_s1 + $0x88] sm:$0xff] }
  0x23   :  { %1452 = vmatprep.subr.bf16.mxu0 %v2873_v7  ;;  %1493 = vmatprep.subr.bf16.mxu1 %v2875_v8  ;;  %v65_v6 = vld [vmem:[%s3787_s1 + $0x188] sm:$0xff]  ;;  %v2948_v7 = vcombine.low %v94_v58, %v126_v59  ;;  %v2950_v8 = vcombine.low %v95_v60, %v127_v61  ;;  %v2901_v58 = vcombine.high %v38_v52, %v70_v53  ;;  %v102_v60 = vld [vmem:[%s3787_s1 + $0x2b0] sm:$0xff] }
  0x24   :  { %v2891_v10 = vcombine.high %v33_v5, %v65_v6  ;;  %v134_v61 = vld [vmem:[%s3787_s1 + $0x3b0] sm:$0xff] }
  0x25   :  { %2990 = vmatmul.mubr.msk.bf16.vlgmr.msra.gmra.mrb[12].mxu0 %vm1120_vm0, %v3155_v27  ;;  %2991 = vmatmul.mubr.msk.bf16.vlgmr.msra.gmra.mrb[12].mxu1 %vm1120_vm0, %v3155_v27 }
  0x26   :  { %1453 = vmatpush1.bf16.msra.mxu0 %v2872_v13  ;;  %1494 = vmatpush1.bf16.msra.mxu1 %v2874_v14  ;;  %v97_v13 = vld [vmem:[%s3787_s1 + $0x288] sm:$0xff] }
  0x27   :  { %1454 = vmatprep.subr.bf16.mxu0 %v2937_v15  ;;  %1495 = vmatprep.subr.bf16.mxu1 %v2939_v16  ;;  %v129_v14 = vld [vmem:[%s3787_s1 + $0x388] sm:$0xff]  ;;  %v2888_v15 = vcombine.low %v32_v2, %v64_v4  ;;  %v2890_v16 = vcombine.low %v33_v5, %v65_v6  ;;  %v2965_v2 = vcombine.high %v102_v60, %v134_v61  ;;  %v40_v5 = vld [vmem:[%s3787_s1 + $0xc0] sm:$0xff] }
  0x28   :  { %1484 = vmatprep.mubr.bf16.mxu0 %v3081_v3  ;;  %1525 = vmatprep.mubr.bf16.mxu1 %v3081_v3  ;;  %v2955_v18 = vcombine.high %v97_v13, %v129_v14  ;;  %v72_v6 = vld [vmem:[%s3787_s1 + $0x1c0] sm:$0xff] }
  0x2a   :  { %1455 = vmatpush1.bf16.msra.mxu0 %v2936_v21  ;;  %1496 = vmatpush1.bf16.msra.mxu1 %v2938_v22  ;;  %v35_v21 = vld [vmem:[%s3787_s1 + $0x98] sm:$0xff] }
  0x2b   :  { %1534 = vmatprep.subr.bf16.mxu0 %v2877_v23  ;;  %1575 = vmatprep.subr.bf16.mxu1 %v2879_v24  ;;  %v67_v22 = vld [vmem:[%s3787_s1 + $0x198] sm:$0xff]  ;;  %v2952_v23 = vcombine.low %v96_v11, %v128_v12  ;;  %v2954_v24 = vcombine.low %v97_v13, %v129_v14  ;;  %v2905_v11 = vcombine.high %v40_v5, %v72_v6  ;;  %v104_v13 = vld [vmem:[%s3787_s1 + $0x2c0] sm:$0xff] }
  0x2c   :  { %v2895_v26 = vcombine.high %v35_v21, %v67_v22  ;;  %v136_v14 = vld [vmem:[%s3787_s1 + $0x3c0] sm:$0xff] }
  0x2d   :  { %2992 = vmatmul.mubr.msk.bf16.vlgmr.msra.gmra.mrb[16].mxu0 %vm1120_vm0, %v3155_v27  ;;  %2993 = vmatmul.mubr.msk.bf16.vlgmr.msra.gmra.mrb[16].mxu1 %vm1120_vm0, %v3155_v27 }
  0x2e   :  { %1535 = vmatpush1.bf16.msra.mxu0 %v2876_v30  ;;  %1576 = vmatpush1.bf16.msra.mxu1 %v2878_v31  ;;  %v99_v30 = vld [vmem:[%s3787_s1 + $0x298] sm:$0xff] }
  0x2f   :  { %1536 = vmatprep.subr.bf16.mxu0 %v2941_v32  ;;  %1577 = vmatprep.subr.bf16.mxu1 %v2943_v33  ;;  %v131_v31 = vld [vmem:[%s3787_s1 + $0x398] sm:$0xff]  ;;  %v2892_v32 = vcombine.low %v34_v19, %v66_v20  ;;  %v2894_v33 = vcombine.low %v35_v21, %v67_v22  ;;  %v2969_v19 = vcombine.high %v104_v13, %v136_v14  ;;  %v42_v21 = vld [vmem:[%s3787_s1 + $0xd0] sm:$0xff] }
  0x30   :  { %1566 = vmatprep.mubr.bf16.mxu0 %v3081_v3  ;;  %1607 = vmatprep.mubr.bf16.mxu1 %v3081_v3  ;;  %v2959_v35 = vcombine.high %v99_v30, %v131_v31  ;;  %v74_v22 = vld [vmem:[%s3787_s1 + $0x1d0] sm:$0xff] }
  0x32   :  { %1537 = vmatpush1.bf16.msra.mxu0 %v2940_v38  ;;  %1578 = vmatpush1.bf16.msra.mxu1 %v2942_v39  ;;  %v37_v38 = vld [vmem:[%s3787_s1 + $0xa8] sm:$0xff] }
  0x33   :  { %1616 = vmatprep.subr.bf16.mxu0 %v2881_v40  ;;  %1657 = vmatprep.subr.bf16.mxu1 %v2883_v41  ;;  %v69_v39 = vld [vmem:[%s3787_s1 + $0x1a8] sm:$0xff]  ;;  %v2956_v40 = vcombine.low %v98_v28, %v130_v29  ;;  %v2958_v41 = vcombine.low %v99_v30, %v131_v31  ;;  %v2909_v28 = vcombine.high %v42_v21, %v74_v22  ;;  %v106_v30 = vld [vmem:[%s3787_s1 + $0x2d0] sm:$0xff] }
  0x34   :  { %v2899_v43 = vcombine.high %v37_v38, %v69_v39  ;;  %v138_v31 = vld [vmem:[%s3787_s1 + $0x3d0] sm:$0xff] }
  0x35   :  { %2994 = vmatmul.mubr.msk.bf16.vlgmr.msra.gmra.mrb[20].mxu0 %vm1120_vm0, %v3155_v27  ;;  %2995 = vmatmul.mubr.msk.bf16.vlgmr.msra.gmra.mrb[20].mxu1 %vm1120_vm0, %v3155_v27 }
  0x36   :  { %1617 = vmatpush1.bf16.msra.mxu0 %v2880_v46  ;;  %1658 = vmatpush1.bf16.msra.mxu1 %v2882_v47  ;;  %v101_v46 = vld [vmem:[%s3787_s1 + $0x2a8] sm:$0xff] }
  0x37   :  { %1618 = vmatprep.subr.bf16.mxu0 %v2945_v48  ;;  %1659 = vmatprep.subr.bf16.mxu1 %v2947_v49  ;;  %v133_v47 = vld [vmem:[%s3787_s1 + $0x3a8] sm:$0xff]  ;;  %v2896_v48 = vcombine.low %v36_v36, %v68_v37  ;;  %v2898_v49 = vcombine.low %v37_v38, %v69_v39  ;;  %v2973_v36 = vcombine.high %v106_v30, %v138_v31  ;;  %v44_v38 = vld [vmem:[%s3787_s1 + $0xe0] sm:$0xff] }
  0x38   :  { %1648 = vmatprep.mubr.bf16.mxu0 %v3081_v3  ;;  %1689 = vmatprep.mubr.bf16.mxu1 %v3081_v3  ;;  %v2963_v51 = vcombine.high %v101_v46, %v133_v47  ;;  %v76_v39 = vld [vmem:[%s3787_s1 + $0x1e0] sm:$0xff] }
  0x3a   :  { %1619 = vmatpush1.bf16.msra.mxu0 %v2944_v54  ;;  %1660 = vmatpush1.bf16.msra.mxu1 %v2946_v55  ;;  %v39_v54 = vld [vmem:[%s3787_s1 + $0xb8] sm:$0xff] }
  0x3b   :  { %1698 = vmatprep.subr.bf16.mxu0 %v2885_v56  ;;  %1739 = vmatprep.subr.bf16.mxu1 %v2887_v57  ;;  %v71_v55 = vld [vmem:[%s3787_s1 + $0x1b8] sm:$0xff]  ;;  %v2960_v56 = vcombine.low %v100_v44, %v132_v45  ;;  %v2962_v57 = vcombine.low %v101_v46, %v133_v47  ;;  %v2913_v44 = vcombine.high %v44_v38, %v76_v39  ;;  %v108_v46 = vld [vmem:[%s3787_s1 + $0x2e0] sm:$0xff] }
  0x3c   :  { %v2903_v59 = vcombine.high %v39_v54, %v71_v55  ;;  %v140_v47 = vld [vmem:[%s3787_s1 + $0x3e0] sm:$0xff] }
  0x3d   :  { %2996 = vmatmul.mubr.msk.bf16.vlgmr.msra.gmra.mrb[24].mxu0 %vm1120_vm0, %v3155_v27  ;;  %2997 = vmatmul.mubr.msk.bf16.vlgmr.msra.gmra.mrb[24].mxu1 %vm1120_vm0, %v3155_v27 }
  0x3e   :  { %1699 = vmatpush1.bf16.msra.mxu0 %v2884_v62  ;;  %1740 = vmatpush1.bf16.msra.mxu1 %v2886_v63  ;;  %v103_v62 = vld [vmem:[%s3787_s1 + $0x2b8] sm:$0xff] }
  0x3f   :  { %1700 = vmatprep.subr.bf16.mxu0 %v2949_v0  ;;  %1741 = vmatprep.subr.bf16.mxu1 %v2951_v1  ;;  %v135_v63 = vld [vmem:[%s3787_s1 + $0x3b8] sm:$0xff]  ;;  %v2900_v0 = vcombine.low %v38_v52, %v70_v53  ;;  %v2902_v1 = vcombine.low %v39_v54, %v71_v55  ;;  %v2977_v52 = vcombine.high %v108_v46, %v140_v47  ;;  %v46_v54 = vld [vmem:[%s3787_s1 + $0xf0] sm:$0xff] }
  0x40   :  { %1730 = vmatprep.mubr.bf16.mxu0 %v3081_v3  ;;  %1771 = vmatprep.mubr.bf16.mxu1 %v3081_v3  ;;  %v2967_v4 = vcombine.high %v103_v62, %v135_v63  ;;  %v78_v55 = vld [vmem:[%s3787_s1 + $0x1f0] sm:$0xff] }
  0x42   :  { %1701 = vmatpush1.bf16.msra.mxu0 %v2948_v7  ;;  %1742 = vmatpush1.bf16.msra.mxu1 %v2950_v8  ;;  %v41_v7 = vld [vmem:[%s3787_s1 + $0xc8] sm:$0xff] }
  0x43   :  { %1780 = vmatprep.subr.bf16.mxu0 %v2889_v9  ;;  %1821 = vmatprep.subr.bf16.mxu1 %v2891_v10  ;;  %v73_v8 = vld [vmem:[%s3787_s1 + $0x1c8] sm:$0xff]  ;;  %v2964_v9 = vcombine.low %v102_v60, %v134_v61  ;;  %v2966_v10 = vcombine.low %v103_v62, %v135_v63  ;;  %v2917_v60 = vcombine.high %v46_v54, %v78_v55  ;;  %v110_v62 = vld [vmem:[%s3787_s1 + $0x2f0] sm:$0xff] }
  0x44   :  { %v2907_v12 = vcombine.high %v41_v7, %v73_v8  ;;  %v142_v63 = vld [vmem:[%s3787_s1 + $0x3f0] sm:$0xff] }
  0x45   :  { %2998 = vmatmul.mubr.msk.bf16.vlgmr.msra.gmra.mrb[28].mxu0 %vm1120_vm0, %v3155_v27  ;;  %2999 = vmatmul.mubr.msk.bf16.vlgmr.msra.gmra.mrb[28].mxu1 %vm1120_vm0, %v3155_v27 }
  0x46   :  { %1781 = vmatpush1.bf16.msra.mxu0 %v2888_v15  ;;  %1822 = vmatpush1.bf16.msra.mxu1 %v2890_v16  ;;  %v105_v15 = vld [vmem:[%s3787_s1 + $0x2c8] sm:$0xff] }
  0x47   :  { %1782 = vmatprep.subr.bf16.mxu0 %v2953_v17  ;;  %1823 = vmatprep.subr.bf16.mxu1 %v2955_v18  ;;  %v137_v16 = vld [vmem:[%s3787_s1 + $0x3c8] sm:$0xff]  ;;  %v2904_v17 = vcombine.low %v40_v5, %v72_v6  ;;  %v2906_v18 = vcombine.low %v41_v7, %v73_v8  ;;  %v2981_v5 = vcombine.high %v110_v62, %v142_v63 }
  0x48   :  { %1812 = vmatprep.mubr.bf16.mxu0 %v3081_v3  ;;  %1853 = vmatprep.mubr.bf16.mxu1 %v3081_v3  ;;  %v2971_v20 = vcombine.high %v105_v15, %v137_v16  ;;  %v2980_v7 = vcombine.low %v110_v62, %v142_v63 }
  0x4a   :  { %1783 = vmatpush1.bf16.msra.mxu0 %v2952_v23  ;;  %1824 = vmatpush1.bf16.msra.mxu1 %v2954_v24  ;;  %v43_v23 = vld [vmem:[%s3787_s1 + $0xd8] sm:$0xff] }
  0x4b   :  { %1862 = vmatprep.subr.bf16.mxu0 %v2893_v25  ;;  %1903 = vmatprep.subr.bf16.mxu1 %v2895_v26  ;;  %v75_v24 = vld [vmem:[%s3787_s1 + $0x1d8] sm:$0xff]  ;;  %v2968_v25 = vcombine.low %v104_v13, %v136_v14  ;;  %v2970_v26 = vcombine.low %v105_v15, %v137_v16 }
  0x4c   :  { %v2911_v29 = vcombine.high %v43_v23, %v75_v24 }
  0x4d   :  { %3000 = vmatmul.mubr.msk.bf16.vlgmr.msra.gmra.mrb[32].mxu0 %vm1120_vm0, %v3155_v27  ;;  %3001 = vmatmul.mubr.msk.bf16.vlgmr.msra.gmra.mrb[32].mxu1 %vm1120_vm0, %v3155_v27 }
  0x4e   :  { %1863 = vmatpush1.bf16.msra.mxu0 %v2892_v32  ;;  %1904 = vmatpush1.bf16.msra.mxu1 %v2894_v33  ;;  %v107_v32 = vld [vmem:[%s3787_s1 + $0x2d8] sm:$0xff] }
  0x4f   :  { %1864 = vmatprep.subr.bf16.mxu0 %v2957_v34  ;;  %1905 = vmatprep.subr.bf16.mxu1 %v2959_v35  ;;  %v139_v33 = vld [vmem:[%s3787_s1 + $0x3d8] sm:$0xff]  ;;  %v2908_v34 = vcombine.low %v42_v21, %v74_v22  ;;  %v2910_v35 = vcombine.low %v43_v23, %v75_v24 }
  0x50   :  { %1894 = vmatprep.mubr.bf16.mxu0 %v3081_v3  ;;  %1935 = vmatprep.mubr.bf16.mxu1 %v3081_v3  ;;  %v2975_v37 = vcombine.high %v107_v32, %v139_v33 }
  0x52   :  { %1865 = vmatpush1.bf16.msra.mxu0 %v2956_v40  ;;  %1906 = vmatpush1.bf16.msra.mxu1 %v2958_v41  ;;  %v45_v40 = vld [vmem:[%s3787_s1 + $0xe8] sm:$0xff] }
  0x53   :  { %1944 = vmatprep.subr.bf16.mxu0 %v2897_v42  ;;  %1985 = vmatprep.subr.bf16.mxu1 %v2899_v43  ;;  %v77_v41 = vld [vmem:[%s3787_s1 + $0x1e8] sm:$0xff]  ;;  %v2972_v42 = vcombine.low %v106_v30, %v138_v31  ;;  %v2974_v43 = vcombine.low %v107_v32, %v139_v33 }
  0x54   :  { %v2915_v45 = vcombine.high %v45_v40, %v77_v41 }
  0x55   :  { %3002 = vmatmul.mubr.msk.bf16.vlgmr.msra.gmra.mrb[36].mxu0 %vm1120_vm0, %v3155_v27  ;;  %3003 = vmatmul.mubr.msk.bf16.vlgmr.msra.gmra.mrb[36].mxu1 %vm1120_vm0, %v3155_v27 }
  0x56   :  { %1945 = vmatpush1.bf16.msra.mxu0 %v2896_v48  ;;  %1986 = vmatpush1.bf16.msra.mxu1 %v2898_v49  ;;  %v109_v48 = vld [vmem:[%s3787_s1 + $0x2e8] sm:$0xff] }
  0x57   :  { %1946 = vmatprep.subr.bf16.mxu0 %v2961_v50  ;;  %1987 = vmatprep.subr.bf16.mxu1 %v2963_v51  ;;  %v141_v49 = vld [vmem:[%s3787_s1 + $0x3e8] sm:$0xff]  ;;  %v2912_v50 = vcombine.low %v44_v38, %v76_v39  ;;  %v2914_v51 = vcombine.low %v45_v40, %v77_v41 }
  0x58   :  { %1976 = vmatprep.mubr.bf16.mxu0 %v3081_v3  ;;  %2017 = vmatprep.mubr.bf16.mxu1 %v3081_v3  ;;  %v2979_v53 = vcombine.high %v109_v48, %v141_v49 }
  0x5a   :  { %1947 = vmatpush1.bf16.msra.mxu0 %v2960_v56  ;;  %1988 = vmatpush1.bf16.msra.mxu1 %v2962_v57  ;;  %v47_v56 = vld [vmem:[%s3787_s1 + $0xf8] sm:$0xff] }
  0x5b   :  { %2026 = vmatprep.subr.bf16.mxu0 %v2901_v58  ;;  %2067 = vmatprep.subr.bf16.mxu1 %v2903_v59  ;;  %v79_v57 = vld [vmem:[%s3787_s1 + $0x1f8] sm:$0xff]  ;;  %v2976_v58 = vcombine.low %v108_v46, %v140_v47  ;;  %v2978_v59 = vcombine.low %v109_v48, %v141_v49 }
  0x5c   :  { %v2919_v61 = vcombine.high %v47_v56, %v79_v57 }
  0x5d   :  { %3004 = vmatmul.mubr.msk.bf16.vlgmr.msra.gmra.mrb[40].mxu0 %vm1120_vm0, %v3155_v27  ;;  %3005 = vmatmul.mubr.msk.bf16.vlgmr.msra.gmra.mrb[40].mxu1 %vm1120_vm0, %v3155_v27 }
  0x5e   :  { %2027 = vmatpush1.bf16.msra.mxu0 %v2900_v0  ;;  %2068 = vmatpush1.bf16.msra.mxu1 %v2902_v1  ;;  %v111_v0 = vld [vmem:[%s3787_s1 + $0x2f8] sm:$0xff] }
  0x5f   :  { %2028 = vmatprep.subr.bf16.mxu0 %v2965_v2  ;;  %2069 = vmatprep.subr.bf16.mxu1 %v2967_v4  ;;  %v143_v1 = vld [vmem:[%s3787_s1 + $0x3f8] sm:$0xff]  ;;  %v2916_v2 = vcombine.low %v46_v54, %v78_v55  ;;  %v2918_v4 = vcombine.low %v47_v56, %v79_v57  ;;  %v145_v57 = vld [vmem:[%s3789_s2 + $0x8] sm:$0xff] }
  0x60   :  { %2058 = vmatprep.mubr.bf16.mxu0 %v3081_v3  ;;  %2099 = vmatprep.mubr.bf16.mxu1 %v3081_v3  ;;  %v2983_v6 = vcombine.high %v111_v0, %v143_v1  ;;  %v2982_v8 = vcombine.low %v111_v0, %v143_v1 }
  0x62   :  { %2029 = vmatpush1.bf16.msra.mxu0 %v2964_v9  ;;  %2070 = vmatpush1.bf16.msra.mxu1 %v2966_v10  ;;  %v160_v9 = vlaneseq }
  0x63   :  { %2108 = vmatprep.subr.bf16.mxu0 %v2905_v11  ;;  %2149 = vmatprep.subr.bf16.mxu1 %v2907_v12  ;;  %v144_v12 = vld [vmem:[%s3789_s2] sm:$0xff] }
  0x64   :  { %v161_v10 = vshrl.u32 %v160_v9, 7 }
  0x65   :  { %3006 = vmatmul.mubr.msk.bf16.vlgmr.msra.gmra.mrb[44].mxu0 %vm1120_vm0, %v3155_v27  ;;  %3007 = vmatmul.mubr.msk.bf16.vlgmr.msra.gmra.mrb[44].mxu1 %vm1120_vm0, %v3155_v27 }
  0x66   :  { %2109 = vmatpush1.bf16.msra.mxu0 %v2904_v17  ;;  %2150 = vmatpush1.bf16.msra.mxu1 %v2906_v18  ;;  %v3587_v11 = vsub.s32 0, %v161_v10  ;;  %v3592_v13 = vsub.s32 2, %v161_v10  ;;  %v3594_v14 = vsub.s32 1, %v161_v10  ;;  %v3602_v22 = vsub.s32 4, %v161_v10 }
  0x67   :  { %2110 = vmatprep.subr.bf16.mxu0 %v2969_v19  ;;  %2151 = vmatprep.subr.bf16.mxu1 %v2971_v20 }
  0x68   :  { %2140 = vmatprep.mubr.bf16.mxu0 %v3081_v3  ;;  %2181 = vmatprep.mubr.bf16.mxu1 %v3081_v3  ;;  %v163_v15 = vrot.slane %v144_v12, %v3587_v11  ;;  %v171_v16 = vrot.slane %v144_v12, %v3592_v13  ;;  %v179_v40 = vrot.slane %v144_v12, %v3602_v22 }
  0x6a   :  { %2111 = vmatpush1.bf16.msra.mxu0 %v2968_v25  ;;  %2152 = vmatpush1.bf16.msra.mxu1 %v2970_v26 }
  0x6b   :  { %2190 = vmatprep.subr.bf16.mxu0 %v2909_v28  ;;  %2231 = vmatprep.subr.bf16.mxu1 %v2911_v29  ;;  %v3604_v28 = vsub.s32 6, %v161_v10  ;;  %v3606_v29 = vsub.s32 5, %v161_v10 }
  0x6d   :  { %3008 = vmatmul.mubr.msk.bf16.vlgmr.msra.gmra.mrb[48].mxu0 %vm1120_vm0, %v3155_v27  ;;  %3009 = vmatmul.mubr.msk.bf16.vlgmr.msra.gmra.mrb[48].mxu1 %vm1120_vm0, %v3155_v27 }
  0x6e   :  { %2191 = vmatpush1.bf16.msra.mxu0 %v2908_v34  ;;  %2232 = vmatpush1.bf16.msra.mxu1 %v2910_v35  ;;  %v3608_v34 = vsub.s32 7, %v161_v10 }
  0x6f   :  { %2192 = vmatprep.subr.bf16.mxu0 %v2973_v36  ;;  %2233 = vmatprep.subr.bf16.mxu1 %v2975_v37 }
  0x70   :  { %2222 = vmatprep.mubr.bf16.mxu0 %v3081_v3  ;;  %2263 = vmatprep.mubr.bf16.mxu1 %v3081_v3  ;;  %v191_v46 = vrot.slane %v144_v12, %v3608_v34 }
  0x72   :  { %2193 = vmatpush1.bf16.msra.mxu0 %v2972_v42  ;;  %2234 = vmatpush1.bf16.msra.mxu1 %v2974_v43  ;;  %v187_v43 = vrot.slane %v144_v12, %v3604_v28 }
  0x73   :  { %2272 = vmatprep.subr.bf16.mxu0 %v2913_v44  ;;  %2313 = vmatprep.subr.bf16.mxu1 %v2915_v45  ;;  %v183_v44 = vrot.slane %v144_v12, %v3606_v29 }
  0x75   :  { %3010 = vmatmul.mubr.msk.bf16.vlgmr.msra.gmra.mrb[52].mxu0 %vm1120_vm0, %v3155_v27  ;;  %3011 = vmatmul.mubr.msk.bf16.vlgmr.msra.gmra.mrb[52].mxu1 %vm1120_vm0, %v3155_v27 }
  0x76   :  { %2273 = vmatpush1.bf16.msra.mxu0 %v2912_v50  ;;  %2314 = vmatpush1.bf16.msra.mxu1 %v2914_v51 }
  0x77   :  { %2274 = vmatprep.subr.bf16.mxu0 %v2977_v52  ;;  %2315 = vmatprep.subr.bf16.mxu1 %v2979_v53 }
  0x78   :  { %2304 = vmatprep.mubr.bf16.mxu0 %v3081_v3  ;;  %2345 = vmatprep.mubr.bf16.mxu1 %v3081_v3 }
  0x7a   :  { %2275 = vmatpush1.bf16.msra.mxu0 %v2976_v58  ;;  %2316 = vmatpush1.bf16.msra.mxu1 %v2978_v59 }
  0x7b   :  { %2354 = vmatprep.subr.bf16.mxu0 %v2917_v60  ;;  %2395 = vmatprep.subr.bf16.mxu1 %v2919_v61 }
  0x7d   :  { %3012 = vmatmul.mubr.msk.bf16.vlgmr.msra.gmra.mrb[56].mxu0 %vm1120_vm0, %v3155_v27  ;;  %3013 = vmatmul.mubr.msk.bf16.vlgmr.msra.gmra.mrb[56].mxu1 %vm1120_vm0, %v3155_v27 }
  0x7e   :  { %2355 = vmatpush1.bf16.msra.mxu0 %v2916_v2  ;;  %2396 = vmatpush1.bf16.msra.mxu1 %v2918_v4  ;;  %v195_v4 = vrot.slane %v145_v57, %v3587_v11 }
  0x7f   :  { %2356 = vmatprep.subr.bf16.mxu0 %v2981_v5  ;;  %2397 = vmatprep.subr.bf16.mxu1 %v2983_v6 }
  0x80   :  { %2386 = vmatprep.mubr.bf16.mxu0 %v3081_v3  ;;  %2427 = vmatprep.mubr.bf16.mxu1 %v3081_v3  ;;  %v3596_v3 = vsub.s32 3, %v161_v10 }
  0x82   :  { %2357 = vmatpush1.bf16.msra.mxu0 %v2980_v7  ;;  %2398 = vmatpush1.bf16.msra.mxu1 %v2982_v8  ;;  %v175_v17 = vrot.slane %v144_v12, %v3596_v3  ;;  %v203_v7 = vrot.slane %v145_v57, %v3592_v13  ;;  %v199_v8 = vrot.slane %v145_v57, %v3594_v14 }
  0x83   :  { %v207_v10 = vrot.slane %v145_v57, %v3596_v3 }
  0x85   :  { %3014 = vmatmul.mubr.msk.bf16.vlgmr.msra.gmra.mrb[60].mxu0 %vm1120_vm0, %v3155_v27  ;;  %3015 = vmatmul.mubr.msk.bf16.vlgmr.msra.gmra.mrb[60].mxu1 %vm1120_vm0, %v3155_v27  ;;  %v167_v27 = vrot.slane %v144_v12, %v3594_v14 }
  0xe0   :  { %v1158_v18 = vpop.f32.mrb[0].mxu0  ;;  %v1199_v20 = vpop.f32.mrb[0].mxu1 }
  0xe1   :  { %v1159_v19 = vadd.f32 %v1158_v18, %v163_v15  ;;  %v1160_v21 = vpop.f32.mrb[1].mxu0  ;;  %v1200_v23 = vadd.f32 %v1199_v20, %v171_v16  ;;  %v1201_v25 = vpop.f32.mrb[1].mxu1 }
  0xe2   :  { %v1161_v24 = vadd.f32 %v1160_v21, %v167_v27  ;;  %v1162_v26 = vpop.f32.mrb[2].mxu0  ;;  %v1202_v31 = vadd.f32 %v1201_v25, %v175_v17  ;;  %v1203_v32 = vpop.f32.mrb[2].mxu1 }
  0xe3   :  { %v2436_v30 = vmul.f32 0.01, %v1159_v19  ;;  %v1163_v33 = vpop.f32.mrb[3].mxu0  ;;  %v2438_v35 = vmul.f32 0.01, %v1200_v23  ;;  %v1204_v37 = vpop.f32.mrb[3].mxu1 }
  0xe4   :  { %v2437_v36 = vmul.f32 0.01, %v1161_v24  ;;  %v2439_v39 = vmul.f32 0.01, %v1202_v31  ;;  %v211_v37 = vrot.slane %v145_v57, %v3602_v22 }
  0xe5   :  { %v2500_v38 = vmax.f32 %v1159_v19, %v2436_v30  ;;  %v2502_v41 = vmax.f32 %v1200_v23, %v2438_v35 }
  0xe6   :  { %v2501_v42 = vmax.f32 %v1161_v24, %v2437_v36  ;;  %v2503_v45 = vmax.f32 %v1202_v31, %v2439_v39 }
  0xe8   :  { %v3048_v47 = vpack.c.bf16 %v2501_v42, %v2500_v38  ;;  %v1240_v48 = vpop.f32.mrb[4].mxu0  ;;  %v3049_v49 = vpack.c.bf16 %v2503_v45, %v2502_v41  ;;  %v1281_v51 = vpop.f32.mrb[4].mxu1  ;;  %v215_v41 = vrot.slane %v145_v57, %v3606_v29 }
  0xe9   :  { %v1241_v50 = vadd.f32 %v1240_v48, %v179_v40  ;;  %v1242_v52 = vpop.f32.mrb[5].mxu0  ;;  %v1282_v53 = vadd.f32 %v1281_v51, %v187_v43  ;;  %v1283_v55 = vpop.f32.mrb[5].mxu1  ;;  %v219_v40 = vrot.slane %v145_v57, %v3604_v28  ;;  %v223_v43 = vrot.slane %v145_v57, %v3608_v34 }
  0xea   :  { %2820 = vst [vmem:[%s3790_s3] sm:$0xff] %v3048_v47  ;;  %v1243_v54 = vadd.f32 %v1242_v52, %v183_v44  ;;  %v1244_v56 = vpop.f32.mrb[6].mxu0  ;;  %2821 = vst [vmem:[%s3790_s3 + $0x8] sm:$0xff] %v3049_v49  ;;  %v1284_v59 = vadd.f32 %v1283_v55, %v191_v46  ;;  %v1285_v60 = vpop.f32.mrb[6].mxu1 }
  0xeb   :  { %v2440_v58 = vmul.f32 0.01, %v1241_v50  ;;  %v1245_v61 = vpop.f32.mrb[7].mxu0  ;;  %v2442_v62 = vmul.f32 0.01, %v1282_v53  ;;  %v1286_v0 = vpop.f32.mrb[7].mxu1 }
  0xec   :  { %v2441_v63 = vmul.f32 0.01, %v1243_v54  ;;  %v2443_v2 = vmul.f32 0.01, %v1284_v59 }
  0xed   :  { %v2504_v1 = vmax.f32 %v1241_v50, %v2440_v58  ;;  %v2506_v5 = vmax.f32 %v1282_v53, %v2442_v62 }
  0xee   :  { %v2505_v6 = vmax.f32 %v1243_v54, %v2441_v63  ;;  %v2507_v9 = vmax.f32 %v1284_v59, %v2443_v2  ;;  %v146_v54 = vld [vmem:[%s3789_s2 + $0x10] sm:$0xff] }
  0xef   :  { %v227_v0 = vrot.slane %v146_v54, %v3587_v11 }
  0xf0   :  { %v3050_v12 = vpack.c.bf16 %v2505_v6, %v2504_v1  ;;  %v1322_v15 = vpop.f32.mrb[8].mxu0  ;;  %v3051_v16 = vpack.c.bf16 %v2507_v9, %v2506_v5  ;;  %v1363_v17 = vpop.f32.mrb[8].mxu1  ;;  %v231_v5 = vrot.slane %v146_v54, %v3594_v14 }
  0xf1   :  { %v1323_v27 = vadd.f32 %v1322_v15, %v195_v4  ;;  %v1324_v18 = vpop.f32.mrb[9].mxu0  ;;  %v1364_v19 = vadd.f32 %v1363_v17, %v203_v7  ;;  %v1365_v21 = vpop.f32.mrb[9].mxu1  ;;  %v235_v4 = vrot.slane %v146_v54, %v3592_v13  ;;  %v239_v7 = vrot.slane %v146_v54, %v3596_v3 }
  0xf2   :  { %2822 = vst [vmem:[%s3790_s3 + $0x10] sm:$0xff] %v3050_v12  ;;  %v1325_v20 = vadd.f32 %v1324_v18, %v199_v8  ;;  %v1326_v23 = vpop.f32.mrb[10].mxu0  ;;  %2823 = vst [vmem:[%s3790_s3 + $0x18] sm:$0xff] %v3051_v16  ;;  %v1366_v25 = vadd.f32 %v1365_v21, %v207_v10  ;;  %v1367_v26 = vpop.f32.mrb[10].mxu1 }
  0xf3   :  { %v2444_v24 = vmul.f32 0.01, %v1323_v27  ;;  %v1327_v30 = vpop.f32.mrb[11].mxu0  ;;  %v2446_v31 = vmul.f32 0.01, %v1364_v19  ;;  %v1368_v33 = vpop.f32.mrb[11].mxu1 }
  0xf4   :  { %v2445_v32 = vmul.f32 0.01, %v1325_v20  ;;  %v2447_v36 = vmul.f32 0.01, %v1366_v25  ;;  %v243_v33 = vrot.slane %v146_v54, %v3602_v22 }
  0xf5   :  { %v2508_v35 = vmax.f32 %v1323_v27, %v2444_v24  ;;  %v2510_v38 = vmax.f32 %v1364_v19, %v2446_v31 }
  0xf6   :  { %v2509_v39 = vmax.f32 %v1325_v20, %v2445_v32  ;;  %v2511_v42 = vmax.f32 %v1366_v25, %v2447_v36 }
  0xf8   :  { %v3052_v44 = vpack.c.bf16 %v2509_v39, %v2508_v35  ;;  %v1404_v45 = vpop.f32.mrb[12].mxu0  ;;  %v3053_v46 = vpack.c.bf16 %v2511_v42, %v2510_v38  ;;  %v1445_v48 = vpop.f32.mrb[12].mxu1  ;;  %v247_v38 = vrot.slane %v146_v54, %v3606_v29 }
  0xf9   :  { %v1405_v47 = vadd.f32 %v1404_v45, %v211_v37  ;;  %v1406_v49 = vpop.f32.mrb[13].mxu0  ;;  %v1446_v50 = vadd.f32 %v1445_v48, %v219_v40  ;;  %v1447_v52 = vpop.f32.mrb[13].mxu1  ;;  %v251_v37 = vrot.slane %v146_v54, %v3604_v28  ;;  %v255_v40 = vrot.slane %v146_v54, %v3608_v34 }
  0xfa   :  { %2824 = vst [vmem:[%s3790_s3 + $0x20] sm:$0xff] %v3052_v44  ;;  %v1407_v51 = vadd.f32 %v1406_v49, %v215_v41  ;;  %v1408_v53 = vpop.f32.mrb[14].mxu0  ;;  %2825 = vst [vmem:[%s3790_s3 + $0x28] sm:$0xff] %v3053_v46  ;;  %v1448_v56 = vadd.f32 %v1447_v52, %v223_v43  ;;  %v1449_v57 = vpop.f32.mrb[14].mxu1 }
  0xfb   :  { %v2448_v55 = vmul.f32 0.01, %v1405_v47  ;;  %v1409_v58 = vpop.f32.mrb[15].mxu0  ;;  %v2450_v59 = vmul.f32 0.01, %v1446_v50  ;;  %v1450_v61 = vpop.f32.mrb[15].mxu1 }
  0xfc   :  { %v2449_v60 = vmul.f32 0.01, %v1407_v51  ;;  %v2451_v63 = vmul.f32 0.01, %v1448_v56 }
  0xfd   :  { %v2512_v62 = vmax.f32 %v1405_v47, %v2448_v55  ;;  %v2514_v1 = vmax.f32 %v1446_v50, %v2450_v59 }
  0xfe   :  { %v2513_v2 = vmax.f32 %v1407_v51, %v2449_v60  ;;  %v2515_v6 = vmax.f32 %v1448_v56, %v2451_v63  ;;  %v147_v51 = vld [vmem:[%s3789_s2 + $0x18] sm:$0xff] }
  0xff   :  { %v259_v61 = vrot.slane %v147_v51, %v3587_v11 }
 0x100   :  { %v3054_v8 = vpack.c.bf16 %v2513_v2, %v2512_v62  ;;  %v1486_v9 = vpop.f32.mrb[16].mxu0  ;;  %v3055_v10 = vpack.c.bf16 %v2515_v6, %v2514_v1  ;;  %v1527_v15 = vpop.f32.mrb[16].mxu1  ;;  %v263_v1 = vrot.slane %v147_v51, %v3594_v14 }
 0x101   :  { %v1487_v12 = vadd.f32 %v1486_v9, %v227_v0  ;;  %v1488_v16 = vpop.f32.mrb[17].mxu0  ;;  %v1528_v27 = vadd.f32 %v1527_v15, %v235_v4  ;;  %v1529_v18 = vpop.f32.mrb[17].mxu1  ;;  %v267_v0 = vrot.slane %v147_v51, %v3592_v13  ;;  %v271_v4 = vrot.slane %v147_v51, %v3596_v3 }
 0x102   :  { %2826 = vst [vmem:[%s3790_s3 + $0x30] sm:$0xff] %v3054_v8  ;;  %v1489_v17 = vadd.f32 %v1488_v16, %v231_v5  ;;  %v1490_v19 = vpop.f32.mrb[18].mxu0  ;;  %2827 = vst [vmem:[%s3790_s3 + $0x38] sm:$0xff] %v3055_v10  ;;  %v1530_v21 = vadd.f32 %v1529_v18, %v239_v7  ;;  %v1531_v23 = vpop.f32.mrb[18].mxu1 }
 0x103   :  { %v2452_v20 = vmul.f32 0.01, %v1487_v12  ;;  %v1491_v24 = vpop.f32.mrb[19].mxu0  ;;  %v2454_v25 = vmul.f32 0.01, %v1528_v27  ;;  %v1532_v30 = vpop.f32.mrb[19].mxu1 }
 0x104   :  { %v2453_v26 = vmul.f32 0.01, %v1489_v17  ;;  %v2455_v32 = vmul.f32 0.01, %v1530_v21  ;;  %v275_v30 = vrot.slane %v147_v51, %v3602_v22 }
 0x105   :  { %v2516_v31 = vmax.f32 %v1487_v12, %v2452_v20  ;;  %v2518_v35 = vmax.f32 %v1528_v27, %v2454_v25 }
 0x106   :  { %v2517_v36 = vmax.f32 %v1489_v17, %v2453_v26  ;;  %v2519_v39 = vmax.f32 %v1530_v21, %v2455_v32 }
 0x108   :  { %v3056_v41 = vpack.c.bf16 %v2517_v36, %v2516_v31  ;;  %v1568_v42 = vpop.f32.mrb[20].mxu0  ;;  %v3057_v43 = vpack.c.bf16 %v2519_v39, %v2518_v35  ;;  %v1609_v45 = vpop.f32.mrb[20].mxu1  ;;  %v279_v35 = vrot.slane %v147_v51, %v3606_v29 }
 0x109   :  { %v1569_v44 = vadd.f32 %v1568_v42, %v243_v33  ;;  %v1570_v46 = vpop.f32.mrb[21].mxu0  ;;  %v1610_v47 = vadd.f32 %v1609_v45, %v251_v37  ;;  %v1611_v49 = vpop.f32.mrb[21].mxu1  ;;  %v283_v33 = vrot.slane %v147_v51, %v3604_v28  ;;  %v287_v37 = vrot.slane %v147_v51, %v3608_v34 }
 0x10a   :  { %2828 = vst [vmem:[%s3790_s3 + $0x40] sm:$0xff] %v3056_v41  ;;  %v1571_v48 = vadd.f32 %v1570_v46, %v247_v38  ;;  %v1572_v50 = vpop.f32.mrb[22].mxu0  ;;  %2829 = vst [vmem:[%s3790_s3 + $0x48] sm:$0xff] %v3057_v43  ;;  %v1612_v53 = vadd.f32 %v1611_v49, %v255_v40  ;;  %v1613_v54 = vpop.f32.mrb[22].mxu1 }
 0x10b   :  { %v2456_v52 = vmul.f32 0.01, %v1569_v44  ;;  %v1573_v55 = vpop.f32.mrb[23].mxu0  ;;  %v2458_v56 = vmul.f32 0.01, %v1610_v47  ;;  %v1614_v58 = vpop.f32.mrb[23].mxu1 }
 0x10c   :  { %v2457_v57 = vmul.f32 0.01, %v1571_v48  ;;  %v2459_v60 = vmul.f32 0.01, %v1612_v53 }
 0x10d   :  { %v2520_v59 = vmax.f32 %v1569_v44, %v2456_v52  ;;  %v2522_v62 = vmax.f32 %v1610_v47, %v2458_v56 }
 0x10e   :  { %v2521_v63 = vmax.f32 %v1571_v48, %v2457_v57  ;;  %v2523_v2 = vmax.f32 %v1612_v53, %v2459_v60  ;;  %v148_v48 = vld [vmem:[%s3789_s2 + $0x20] sm:$0xff] }
 0x10f   :  { %v291_v58 = vrot.slane %v148_v48, %v3587_v11 }
 0x110   :  { %v3058_v5 = vpack.c.bf16 %v2521_v63, %v2520_v59  ;;  %v1650_v6 = vpop.f32.mrb[24].mxu0  ;;  %v3059_v7 = vpack.c.bf16 %v2523_v2, %v2522_v62  ;;  %v1691_v9 = vpop.f32.mrb[24].mxu1  ;;  %v295_v62 = vrot.slane %v148_v48, %v3594_v14 }
 0x111   :  { %v1651_v8 = vadd.f32 %v1650_v6, %v259_v61  ;;  %v1652_v10 = vpop.f32.mrb[25].mxu0  ;;  %v1692_v12 = vadd.f32 %v1691_v9, %v267_v0  ;;  %v1693_v16 = vpop.f32.mrb[25].mxu1  ;;  %v299_v61 = vrot.slane %v148_v48, %v3592_v13  ;;  %v303_v0 = vrot.slane %v148_v48, %v3596_v3 }
 0x112   :  { %2830 = vst [vmem:[%s3790_s3 + $0x50] sm:$0xff] %v3058_v5  ;;  %v1653_v15 = vadd.f32 %v1652_v10, %v263_v1  ;;  %v1654_v27 = vpop.f32.mrb[26].mxu0  ;;  %2831 = vst [vmem:[%s3790_s3 + $0x58] sm:$0xff] %v3059_v7  ;;  %v1694_v18 = vadd.f32 %v1693_v16, %v271_v4  ;;  %v1695_v19 = vpop.f32.mrb[26].mxu1 }
 0x113   :  { %v2460_v17 = vmul.f32 0.01, %v1651_v8  ;;  %v1655_v20 = vpop.f32.mrb[27].mxu0  ;;  %v2462_v21 = vmul.f32 0.01, %v1692_v12  ;;  %v1696_v24 = vpop.f32.mrb[27].mxu1 }
 0x114   :  { %v2461_v23 = vmul.f32 0.01, %v1653_v15  ;;  %v2463_v26 = vmul.f32 0.01, %v1694_v18  ;;  %v307_v24 = vrot.slane %v148_v48, %v3602_v22 }
 0x115   :  { %v2524_v25 = vmax.f32 %v1651_v8, %v2460_v17  ;;  %v2526_v31 = vmax.f32 %v1692_v12, %v2462_v21 }
 0x116   :  { %v2525_v32 = vmax.f32 %v1653_v15, %v2461_v23  ;;  %v2527_v36 = vmax.f32 %v1694_v18, %v2463_v26 }
 0x118   :  { %v3060_v38 = vpack.c.bf16 %v2525_v32, %v2524_v25  ;;  %v1732_v39 = vpop.f32.mrb[28].mxu0  ;;  %v3061_v40 = vpack.c.bf16 %v2527_v36, %v2526_v31  ;;  %v1773_v42 = vpop.f32.mrb[28].mxu1  ;;  %v311_v31 = vrot.slane %v148_v48, %v3606_v29 }
 0x119   :  { %v1733_v41 = vadd.f32 %v1732_v39, %v275_v30  ;;  %v1734_v43 = vpop.f32.mrb[29].mxu0  ;;  %v1774_v44 = vadd.f32 %v1773_v42, %v283_v33  ;;  %v1775_v46 = vpop.f32.mrb[29].mxu1  ;;  %v315_v30 = vrot.slane %v148_v48, %v3604_v28  ;;  %v319_v33 = vrot.slane %v148_v48, %v3608_v34 }
 0x11a   :  { %2832 = vst [vmem:[%s3790_s3 + $0x60] sm:$0xff] %v3060_v38  ;;  %v1735_v45 = vadd.f32 %v1734_v43, %v279_v35  ;;  %v1736_v47 = vpop.f32.mrb[30].mxu0  ;;  %2833 = vst [vmem:[%s3790_s3 + $0x68] sm:$0xff] %v3061_v40  ;;  %v1776_v50 = vadd.f32 %v1775_v46, %v287_v37  ;;  %v1777_v51 = vpop.f32.mrb[30].mxu1 }
 0x11b   :  { %v2464_v49 = vmul.f32 0.01, %v1733_v41  ;;  %v1737_v52 = vpop.f32.mrb[31].mxu0  ;;  %v2466_v53 = vmul.f32 0.01, %v1774_v44  ;;  %v1778_v55 = vpop.f32.mrb[31].mxu1 }
 0x11c   :  { %v2465_v54 = vmul.f32 0.01, %v1735_v45  ;;  %v2467_v57 = vmul.f32 0.01, %v1776_v50 }
 0x11d   :  { %v2528_v56 = vmax.f32 %v1733_v41, %v2464_v49  ;;  %v2530_v59 = vmax.f32 %v1774_v44, %v2466_v53 }
 0x11e   :  { %v2529_v60 = vmax.f32 %v1735_v45, %v2465_v54  ;;  %v2531_v63 = vmax.f32 %v1776_v50, %v2467_v57  ;;  %v149_v45 = vld [vmem:[%s3789_s2 + $0x28] sm:$0xff] }
 0x11f   :  { %v323_v55 = vrot.slane %v149_v45, %v3587_v11 }
 0x120   :  { %v3062_v1 = vpack.c.bf16 %v2529_v60, %v2528_v56  ;;  %v1814_v2 = vpop.f32.mrb[32].mxu0  ;;  %v3063_v4 = vpack.c.bf16 %v2531_v63, %v2530_v59  ;;  %v1855_v6 = vpop.f32.mrb[32].mxu1  ;;  %v327_v59 = vrot.slane %v149_v45, %v3594_v14 }
 0x121   :  { %v1815_v5 = vadd.f32 %v1814_v2, %v291_v58  ;;  %v1816_v7 = vpop.f32.mrb[33].mxu0  ;;  %v1856_v8 = vadd.f32 %v1855_v6, %v299_v61  ;;  %v1857_v10 = vpop.f32.mrb[33].mxu1  ;;  %v331_v58 = vrot.slane %v149_v45, %v3592_v13  ;;  %v335_v61 = vrot.slane %v149_v45, %v3596_v3 }
 0x122   :  { %2834 = vst [vmem:[%s3790_s3 + $0x70] sm:$0xff] %v3062_v1  ;;  %v1817_v9 = vadd.f32 %v1816_v7, %v295_v62  ;;  %v1818_v12 = vpop.f32.mrb[34].mxu0  ;;  %2835 = vst [vmem:[%s3790_s3 + $0x78] sm:$0xff] %v3063_v4  ;;  %v1858_v16 = vadd.f32 %v1857_v10, %v303_v0  ;;  %v1859_v27 = vpop.f32.mrb[34].mxu1 }
 0x123   :  { %v2468_v15 = vmul.f32 0.01, %v1815_v5  ;;  %v1819_v17 = vpop.f32.mrb[35].mxu0  ;;  %v2470_v18 = vmul.f32 0.01, %v1856_v8  ;;  %v1860_v20 = vpop.f32.mrb[35].mxu1 }
 0x124   :  { %v2469_v19 = vmul.f32 0.01, %v1817_v9  ;;  %v2471_v23 = vmul.f32 0.01, %v1858_v16  ;;  %v339_v20 = vrot.slane %v149_v45, %v3602_v22 }
 0x125   :  { %v2532_v21 = vmax.f32 %v1815_v5, %v2468_v15  ;;  %v2534_v25 = vmax.f32 %v1856_v8, %v2470_v18 }
 0x126   :  { %v2533_v26 = vmax.f32 %v1817_v9, %v2469_v19  ;;  %v2535_v32 = vmax.f32 %v1858_v16, %v2471_v23 }
 0x128   :  { %v3064_v35 = vpack.c.bf16 %v2533_v26, %v2532_v21  ;;  %v1896_v36 = vpop.f32.mrb[36].mxu0  ;;  %v3065_v37 = vpack.c.bf16 %v2535_v32, %v2534_v25  ;;  %v1937_v39 = vpop.f32.mrb[36].mxu1  ;;  %v343_v25 = vrot.slane %v149_v45, %v3606_v29 }
 0x129   :  { %v1897_v38 = vadd.f32 %v1896_v36, %v307_v24  ;;  %v1898_v40 = vpop.f32.mrb[37].mxu0  ;;  %v1938_v41 = vadd.f32 %v1937_v39, %v315_v30  ;;  %v1939_v43 = vpop.f32.mrb[37].mxu1  ;;  %v347_v24 = vrot.slane %v149_v45, %v3604_v28  ;;  %v351_v30 = vrot.slane %v149_v45, %v3608_v34 }
 0x12a   :  { %2836 = vst [vmem:[%s3790_s3 + $0x80] sm:$0xff] %v3064_v35  ;;  %v1899_v42 = vadd.f32 %v1898_v40, %v311_v31  ;;  %v1900_v44 = vpop.f32.mrb[38].mxu0  ;;  %2837 = vst [vmem:[%s3790_s3 + $0x88] sm:$0xff] %v3065_v37  ;;  %v1940_v47 = vadd.f32 %v1939_v43, %v319_v33  ;;  %v1941_v48 = vpop.f32.mrb[38].mxu1 }
 0x12b   :  { %v2472_v46 = vmul.f32 0.01, %v1897_v38  ;;  %v1901_v49 = vpop.f32.mrb[39].mxu0  ;;  %v2474_v50 = vmul.f32 0.01, %v1938_v41  ;;  %v1942_v52 = vpop.f32.mrb[39].mxu1 }
 0x12c   :  { %v2473_v51 = vmul.f32 0.01, %v1899_v42  ;;  %v2475_v54 = vmul.f32 0.01, %v1940_v47 }
 0x12d   :  { %v2536_v53 = vmax.f32 %v1897_v38, %v2472_v46  ;;  %v2538_v56 = vmax.f32 %v1938_v41, %v2474_v50 }
 0x12e   :  { %v2537_v57 = vmax.f32 %v1899_v42, %v2473_v51  ;;  %v2539_v60 = vmax.f32 %v1940_v47, %v2475_v54  ;;  %v150_v42 = vld [vmem:[%s3789_s2 + $0x30] sm:$0xff] }
 0x12f   :  { %v355_v52 = vrot.slane %v150_v42, %v3587_v11 }
 0x130   :  { %v3066_v62 = vpack.c.bf16 %v2537_v57, %v2536_v53  ;;  %v1978_v63 = vpop.f32.mrb[40].mxu0  ;;  %v3067_v0 = vpack.c.bf16 %v2539_v60, %v2538_v56  ;;  %v2019_v2 = vpop.f32.mrb[40].mxu1  ;;  %v359_v56 = vrot.slane %v150_v42, %v3594_v14 }
 0x131   :  { %v1979_v1 = vadd.f32 %v1978_v63, %v323_v55  ;;  %v1980_v4 = vpop.f32.mrb[41].mxu0  ;;  %v2020_v5 = vadd.f32 %v2019_v2, %v331_v58  ;;  %v2021_v7 = vpop.f32.mrb[41].mxu1  ;;  %v363_v55 = vrot.slane %v150_v42, %v3592_v13  ;;  %v367_v58 = vrot.slane %v150_v42, %v3596_v3 }
 0x132   :  { %2838 = vst [vmem:[%s3790_s3 + $0x90] sm:$0xff] %v3066_v62  ;;  %v1981_v6 = vadd.f32 %v1980_v4, %v327_v59  ;;  %v1982_v8 = vpop.f32.mrb[42].mxu0  ;;  %2839 = vst [vmem:[%s3790_s3 + $0x98] sm:$0xff] %v3067_v0  ;;  %v2022_v10 = vadd.f32 %v2021_v7, %v335_v61  ;;  %v2023_v12 = vpop.f32.mrb[42].mxu1 }
 0x133   :  { %v2476_v9 = vmul.f32 0.01, %v1979_v1  ;;  %v1983_v15 = vpop.f32.mrb[43].mxu0  ;;  %v2478_v16 = vmul.f32 0.01, %v2020_v5  ;;  %v2024_v17 = vpop.f32.mrb[43].mxu1 }
 0x134   :  { %v2477_v27 = vmul.f32 0.01, %v1981_v6  ;;  %v2479_v19 = vmul.f32 0.01, %v2022_v10  ;;  %v371_v17 = vrot.slane %v150_v42, %v3602_v22 }
 0x135   :  { %v2540_v18 = vmax.f32 %v1979_v1, %v2476_v9  ;;  %v2542_v21 = vmax.f32 %v2020_v5, %v2478_v16 }
 0x136   :  { %v2541_v23 = vmax.f32 %v1981_v6, %v2477_v27  ;;  %v2543_v26 = vmax.f32 %v2022_v10, %v2479_v19 }
 0x138   :  { %v3068_v31 = vpack.c.bf16 %v2541_v23, %v2540_v18  ;;  %v2060_v32 = vpop.f32.mrb[44].mxu0  ;;  %v3069_v33 = vpack.c.bf16 %v2543_v26, %v2542_v21  ;;  %v2101_v36 = vpop.f32.mrb[44].mxu1  ;;  %v375_v21 = vrot.slane %v150_v42, %v3606_v29 }
 0x139   :  { %v2061_v35 = vadd.f32 %v2060_v32, %v339_v20  ;;  %v2062_v37 = vpop.f32.mrb[45].mxu0  ;;  %v2102_v38 = vadd.f32 %v2101_v36, %v347_v24  ;;  %v2103_v40 = vpop.f32.mrb[45].mxu1  ;;  %v379_v20 = vrot.slane %v150_v42, %v3604_v28  ;;  %v383_v24 = vrot.slane %v150_v42, %v3608_v34 }
 0x13a   :  { %2840 = vst [vmem:[%s3790_s3 + $0xa0] sm:$0xff] %v3068_v31  ;;  %v2063_v39 = vadd.f32 %v2062_v37, %v343_v25  ;;  %v2064_v41 = vpop.f32.mrb[46].mxu0  ;;  %2841 = vst [vmem:[%s3790_s3 + $0xa8] sm:$0xff] %v3069_v33  ;;  %v2104_v44 = vadd.f32 %v2103_v40, %v351_v30  ;;  %v2105_v45 = vpop.f32.mrb[46].mxu1 }
 0x13b   :  { %v2480_v43 = vmul.f32 0.01, %v2061_v35  ;;  %v2065_v46 = vpop.f32.mrb[47].mxu0  ;;  %v2482_v47 = vmul.f32 0.01, %v2102_v38  ;;  %v2106_v49 = vpop.f32.mrb[47].mxu1 }
 0x13c   :  { %v2481_v48 = vmul.f32 0.01, %v2063_v39  ;;  %v2483_v51 = vmul.f32 0.01, %v2104_v44 }
 0x13d   :  { %v2544_v50 = vmax.f32 %v2061_v35, %v2480_v43  ;;  %v2546_v53 = vmax.f32 %v2102_v38, %v2482_v47 }
 0x13e   :  { %v2545_v54 = vmax.f32 %v2063_v39, %v2481_v48  ;;  %v2547_v57 = vmax.f32 %v2104_v44, %v2483_v51  ;;  %v151_v39 = vld [vmem:[%s3789_s2 + $0x38] sm:$0xff] }
 0x13f   :  { %v387_v49 = vrot.slane %v151_v39, %v3587_v11 }
 0x140   :  { %v3070_v59 = vpack.c.bf16 %v2545_v54, %v2544_v50  ;;  %v2142_v60 = vpop.f32.mrb[48].mxu0  ;;  %v3071_v61 = vpack.c.bf16 %v2547_v57, %v2546_v53  ;;  %v2183_v63 = vpop.f32.mrb[48].mxu1  ;;  %v391_v53 = vrot.slane %v151_v39, %v3594_v14 }
 0x141   :  { %v2143_v62 = vadd.f32 %v2142_v60, %v355_v52  ;;  %v2144_v0 = vpop.f32.mrb[49].mxu0  ;;  %v2184_v1 = vadd.f32 %v2183_v63, %v363_v55  ;;  %v2185_v4 = vpop.f32.mrb[49].mxu1  ;;  %v395_v52 = vrot.slane %v151_v39, %v3592_v13  ;;  %v399_v55 = vrot.slane %v151_v39, %v3596_v3 }
 0x142   :  { %2842 = vst [vmem:[%s3790_s3 + $0xb0] sm:$0xff] %v3070_v59  ;;  %v2145_v2 = vadd.f32 %v2144_v0, %v359_v56  ;;  %v2146_v5 = vpop.f32.mrb[50].mxu0  ;;  %2843 = vst [vmem:[%s3790_s3 + $0xb8] sm:$0xff] %v3071_v61  ;;  %v2186_v7 = vadd.f32 %v2185_v4, %v367_v58  ;;  %v2187_v8 = vpop.f32.mrb[50].mxu1 }
 0x143   :  { %v2484_v6 = vmul.f32 0.01, %v2143_v62  ;;  %v2147_v9 = vpop.f32.mrb[51].mxu0  ;;  %v2486_v10 = vmul.f32 0.01, %v2184_v1  ;;  %v2188_v15 = vpop.f32.mrb[51].mxu1  ;;  %v403_v8 = vrot.slane %v151_v39, %v3602_v22 }
 0x144   :  { %v2485_v12 = vmul.f32 0.01, %v2145_v2  ;;  %v2487_v27 = vmul.f32 0.01, %v2186_v7  ;;  %v407_v15 = vrot.slane %v151_v39, %v3606_v29 }
 0x145   :  { %v2548_v16 = vmax.f32 %v2143_v62, %v2484_v6  ;;  %v2550_v18 = vmax.f32 %v2184_v1, %v2486_v10 }
 0x146   :  { %v2549_v19 = vmax.f32 %v2145_v2, %v2485_v12  ;;  %v2551_v23 = vmax.f32 %v2186_v7, %v2487_v27  ;;  %v411_v12 = vrot.slane %v151_v39, %v3604_v28  ;;  %v415_v27 = vrot.slane %v151_v39, %v3608_v34 }
 0x148   :  { %v3072_v25 = vpack.c.bf16 %v2549_v19, %v2548_v16  ;;  %v2224_v26 = vpop.f32.mrb[52].mxu0  ;;  %v3073_v30 = vpack.c.bf16 %v2551_v23, %v2550_v18  ;;  %v2265_v32 = vpop.f32.mrb[52].mxu1 }
 0x149   :  { %v2225_v31 = vadd.f32 %v2224_v26, %v371_v17  ;;  %v2226_v33 = vpop.f32.mrb[53].mxu0  ;;  %v2266_v35 = vadd.f32 %v2265_v32, %v379_v20  ;;  %v2267_v37 = vpop.f32.mrb[53].mxu1 }
 0x14a   :  { %2844 = vst [vmem:[%s3790_s3 + $0xc0] sm:$0xff] %v3072_v25  ;;  %v2227_v36 = vadd.f32 %v2226_v33, %v375_v21  ;;  %v2228_v38 = vpop.f32.mrb[54].mxu0  ;;  %2845 = vst [vmem:[%s3790_s3 + $0xc8] sm:$0xff] %v3073_v30  ;;  %v2268_v41 = vadd.f32 %v2267_v37, %v383_v24  ;;  %v2269_v42 = vpop.f32.mrb[54].mxu1 }
 0x14b   :  { %v2488_v40 = vmul.f32 0.01, %v2225_v31  ;;  %v2229_v43 = vpop.f32.mrb[55].mxu0  ;;  %v2490_v44 = vmul.f32 0.01, %v2266_v35  ;;  %v2270_v46 = vpop.f32.mrb[55].mxu1 }
 0x14c   :  { %v2489_v45 = vmul.f32 0.01, %v2227_v36  ;;  %v2491_v48 = vmul.f32 0.01, %v2268_v41 }
 0x14d   :  { %v2552_v47 = vmax.f32 %v2225_v31, %v2488_v40  ;;  %v2554_v50 = vmax.f32 %v2266_v35, %v2490_v44 }
 0x14e   :  { %v2553_v51 = vmax.f32 %v2227_v36, %v2489_v45  ;;  %v2555_v54 = vmax.f32 %v2268_v41, %v2491_v48 }
 0x150   :  { %v3074_v56 = vpack.c.bf16 %v2553_v51, %v2552_v47  ;;  %v2306_v57 = vpop.f32.mrb[56].mxu0  ;;  %v3075_v58 = vpack.c.bf16 %v2555_v54, %v2554_v50  ;;  %v2347_v60 = vpop.f32.mrb[56].mxu1 }
 0x151   :  { %v2307_v59 = vadd.f32 %v2306_v57, %v387_v49  ;;  %v2308_v61 = vpop.f32.mrb[57].mxu0  ;;  %v2348_v11 = vadd.f32 %v2347_v60, %v395_v52  ;;  %v2349_v63 = vpop.f32.mrb[57].mxu1 }
 0x152   :  { %2846 = vst [vmem:[%s3790_s3 + $0xd0] sm:$0xff] %v3074_v56  ;;  %v2309_v62 = vadd.f32 %v2308_v61, %v391_v53  ;;  %v2310_v0 = vpop.f32.mrb[58].mxu0  ;;  %2847 = vst [vmem:[%s3790_s3 + $0xd8] sm:$0xff] %v3075_v58  ;;  %v2350_v14 = vadd.f32 %v2349_v63, %v399_v55  ;;  %v2351_v3 = vpop.f32.mrb[58].mxu1 }
 0x153   :  { %v2492_v13 = vmul.f32 0.01, %v2307_v59  ;;  %v2311_v1 = vpop.f32.mrb[59].mxu0  ;;  %v2494_v2 = vmul.f32 0.01, %v2348_v11  ;;  %v2352_v5 = vpop.f32.mrb[59].mxu1 }
 0x154   :  { %v2493_v4 = vmul.f32 0.01, %v2309_v62  ;;  %v2495_v7 = vmul.f32 0.01, %v2350_v14 }
 0x155   :  { %v2556_v6 = vmax.f32 %v2307_v59, %v2492_v13  ;;  %v2558_v9 = vmax.f32 %v2348_v11, %v2494_v2 }
 0x156   :  { %v2557_v10 = vmax.f32 %v2309_v62, %v2493_v4  ;;  %v2559_v16 = vmax.f32 %v2350_v14, %v2495_v7 }
 0x158   :  { %v3076_v17 = vpack.c.bf16 %v2557_v10, %v2556_v6  ;;  %v2388_v18 = vpop.f32.mrb[60].mxu0  ;;  %v3077_v19 = vpack.c.bf16 %v2559_v16, %v2558_v9  ;;  %v2429_v21 = vpop.f32.mrb[60].mxu1 }
 0x159   :  { %v2389_v20 = vadd.f32 %v2388_v18, %v403_v8  ;;  %v2390_v23 = vpop.f32.mrb[61].mxu0  ;;  %v2430_v22 = vadd.f32 %v2429_v21, %v411_v12  ;;  %v2431_v25 = vpop.f32.mrb[61].mxu1 }
 0x15a   :  { %2848 = vst [vmem:[%s3790_s3 + $0xe0] sm:$0xff] %v3076_v17  ;;  %v2391_v24 = vadd.f32 %v2390_v23, %v407_v15  ;;  %v2392_v26 = vpop.f32.mrb[62].mxu0  ;;  %2849 = vst [vmem:[%s3790_s3 + $0xe8] sm:$0xff] %v3077_v19  ;;  %v2432_v29 = vadd.f32 %v2431_v25, %v415_v27  ;;  %v2433_v34 = vpop.f32.mrb[62].mxu1 }
 0x15b   :  { %v2496_v28 = vmul.f32 0.01, %v2389_v20  ;;  %v2393_v30 = vpop.f32.mrb[63].mxu0  ;;  %v2498_v31 = vmul.f32 0.01, %v2430_v22  ;;  %v2434_v33 = vpop.f32.mrb[63].mxu1 }
 0x15c   :  { %v2497_v32 = vmul.f32 0.01, %v2391_v24  ;;  %v2499_v36 = vmul.f32 0.01, %v2432_v29 }
 0x15d   :  { %v2560_v35 = vmax.f32 %v2389_v20, %v2496_v28  ;;  %v2562_v37 = vmax.f32 %v2430_v22, %v2498_v31 }
 0x15e   :  { %v2561_v38 = vmax.f32 %v2391_v24, %v2497_v32  ;;  %v2563_v39 = vmax.f32 %v2432_v29, %v2499_v36 }
 0x160   :  { %v3078_v40 = vpack.c.bf16 %v2561_v38, %v2560_v35  ;;  %v3079_v41 = vpack.c.bf16 %v2563_v39, %v2562_v37 }
 0x162   :  { %2850 = vst [vmem:[%s3790_s3 + $0xf0] sm:$0xff] %v3078_v40  ;;  %2851 = vst [vmem:[%s3790_s3 + $0xf8] sm:$0xff] %v3079_v41 }

// kernel: appearance_autoencoder_forward.16
= control target key start
LH: loop header
LB: loop body
LE: loop exit
PB: predicated region body
PF: predicated region fallthrough
CT: control target
= control target key end

     0   :  { %s2029_s1 = inlined_call_operand.vmem [shape: bf16[512,256], index: 1, kind: input, shape index: {}]   ;;  %s2030_s0 = inlined_call_operand.vmem [shape: bf16[168,512], index: 0, kind: input, shape index: {}]   ;;  %s2031_s2 = inlined_call_operand.vmem [shape: f32[1,256], index: 2, kind: input, shape index: {}]   ;;  %s2032_s3 = inlined_call_operand.vmem [shape: bf16[168,256], index: 3, kind: output, shape index: {}]  }
   0x1   :  { %v1419_v0 = vld [vmem:[%s2029_s1 + $0x4] ss:$8 sps:$4 sm:$0xff]   ;;  %v1423_v2 = vld [vmem:[%s2029_s1] ss:$8 sps:$4 sm:$0xff]   ;;  %v1425_v4 = vld [vmem:[%s2029_s1 + $0x14] ss:$8 sps:$4 sm:$0xff]  }
   0x2   :  { %v1421_v1 = vld [vmem:[%s2029_s1 + $0x104] ss:$8 sps:$4 sm:$0xff]   ;;  %666 = vmatprep.subr.bf16.mxu1 %v1419_v0  ;;  %v1424_v3 = vld [vmem:[%s2029_s1 + $0x100] ss:$8 sps:$4 sm:$0xff]   ;;  %v1427_v5 = vld [vmem:[%s2029_s1 + $0x114] ss:$8 sps:$4 sm:$0xff]  }
   0x3   :  { %807 = vmatprep.subr.bf16.mxu0 %v1421_v1  ;;  %667 = vmatpush1.bf16.msra.mxu1 %v1423_v2  ;;  %v1429_v6 = vld [vmem:[%s2029_s1 + $0x10] ss:$8 sps:$4 sm:$0xff]   ;;  %v1431_v8 = vld [vmem:[%s2029_s1 + $0x24] ss:$8 sps:$4 sm:$0xff]   ;;  %v1435_v10 = vld [vmem:[%s2029_s1 + $0x20] ss:$8 sps:$4 sm:$0xff]  }
   0x4   :  { %808 = vmatpush1.bf16.msra.mxu0 %v1424_v3  ;;  %668 = vmatprep.subr.bf16.mxu1 %v1425_v4  ;;  %v1430_v7 = vld [vmem:[%s2029_s1 + $0x110] ss:$8 sps:$4 sm:$0xff]   ;;  %v1433_v9 = vld [vmem:[%s2029_s1 + $0x124] ss:$8 sps:$4 sm:$0xff]   ;;  %v1436_v11 = vld [vmem:[%s2029_s1 + $0x120] ss:$8 sps:$4 sm:$0xff]  }
   0x5   :  { %809 = vmatprep.subr.bf16.mxu0 %v1427_v5  ;;  %v1437_v12 = vld [vmem:[%s2029_s1 + $0x34] ss:$8 sps:$4 sm:$0xff]   ;;  %v1441_v14 = vld [vmem:[%s2029_s1 + $0x30] ss:$8 sps:$4 sm:$0xff]   ;;  %v1443_v16 = vld [vmem:[%s2029_s1 + $0x44] ss:$8 sps:$4 sm:$0xff]  }
   0x6   :  { %v1439_v13 = vld [vmem:[%s2029_s1 + $0x134] ss:$8 sps:$4 sm:$0xff]   ;;  %v1442_v15 = vld [vmem:[%s2029_s1 + $0x130] ss:$8 sps:$4 sm:$0xff]   ;;  %v1445_v17 = vld [vmem:[%s2029_s1 + $0x144] ss:$8 sps:$4 sm:$0xff]  }
   0x7   :  { %669 = vmatpush1.bf16.msra.mxu1 %v1429_v6  ;;  %v1447_v18 = vld [vmem:[%s2029_s1 + $0x40] ss:$8 sps:$4 sm:$0xff]   ;;  %v1449_v20 = vld [vmem:[%s2029_s1 + $0x54] ss:$8 sps:$4 sm:$0xff]   ;;  %v1453_v22 = vld [vmem:[%s2029_s1 + $0x50] ss:$8 sps:$4 sm:$0xff]  }
   0x8   :  { %810 = vmatpush1.bf16.msra.mxu0 %v1430_v7  ;;  %670 = vmatprep.subr.bf16.mxu1 %v1431_v8  ;;  %v1448_v19 = vld [vmem:[%s2029_s1 + $0x140] ss:$8 sps:$4 sm:$0xff]   ;;  %v1451_v21 = vld [vmem:[%s2029_s1 + $0x154] ss:$8 sps:$4 sm:$0xff]   ;;  %v1454_v23 = vld [vmem:[%s2029_s1 + $0x150] ss:$8 sps:$4 sm:$0xff]  }
   0x9   :  { %811 = vmatprep.subr.bf16.mxu0 %v1433_v9  ;;  %v1455_v24 = vld [vmem:[%s2029_s1 + $0x64] ss:$8 sps:$4 sm:$0xff]   ;;  %v1459_v26 = vld [vmem:[%s2029_s1 + $0x60] ss:$8 sps:$4 sm:$0xff]   ;;  %v1461_v28 = vld [vmem:[%s2029_s1 + $0x74] ss:$8 sps:$4 sm:$0xff]  }
   0xa   :  { %v1457_v25 = vld [vmem:[%s2029_s1 + $0x164] ss:$8 sps:$4 sm:$0xff]   ;;  %v1460_v27 = vld [vmem:[%s2029_s1 + $0x160] ss:$8 sps:$4 sm:$0xff]   ;;  %v1463_v29 = vld [vmem:[%s2029_s1 + $0x174] ss:$8 sps:$4 sm:$0xff]  }
   0xb   :  { %671 = vmatpush1.bf16.msra.mxu1 %v1435_v10  ;;  %v1465_v30 = vld [vmem:[%s2029_s1 + $0x70] ss:$8 sps:$4 sm:$0xff]   ;;  %v1467_v32 = vld [vmem:[%s2029_s1 + $0x84] ss:$8 sps:$4 sm:$0xff]   ;;  %v1471_v34 = vld [vmem:[%s2029_s1 + $0x80] ss:$8 sps:$4 sm:$0xff]  }
   0xc   :  { %812 = vmatpush1.bf16.msra.mxu0 %v1436_v11  ;;  %672 = vmatprep.subr.bf16.mxu1 %v1437_v12  ;;  %v1466_v31 = vld [vmem:[%s2029_s1 + $0x170] ss:$8 sps:$4 sm:$0xff]   ;;  %v1469_v33 = vld [vmem:[%s2029_s1 + $0x184] ss:$8 sps:$4 sm:$0xff]   ;;  %v1472_v35 = vld [vmem:[%s2029_s1 + $0x180] ss:$8 sps:$4 sm:$0xff]  }
   0xd   :  { %813 = vmatprep.subr.bf16.mxu0 %v1439_v13  ;;  %v1473_v36 = vld [vmem:[%s2029_s1 + $0x94] ss:$8 sps:$4 sm:$0xff]   ;;  %v1477_v38 = vld [vmem:[%s2029_s1 + $0x90] ss:$8 sps:$4 sm:$0xff]   ;;  %v1479_v40 = vld [vmem:[%s2029_s1 + $0xa4] ss:$8 sps:$4 sm:$0xff]  }
   0xe   :  { %v1475_v37 = vld [vmem:[%s2029_s1 + $0x194] ss:$8 sps:$4 sm:$0xff]   ;;  %v1478_v39 = vld [vmem:[%s2029_s1 + $0x190] ss:$8 sps:$4 sm:$0xff]   ;;  %v1481_v41 = vld [vmem:[%s2029_s1 + $0x1a4] ss:$8 sps:$4 sm:$0xff]  }
   0xf   :  { %673 = vmatpush1.bf16.msra.mxu1 %v1441_v14  ;;  %v1483_v42 = vld [vmem:[%s2029_s1 + $0xa0] ss:$8 sps:$4 sm:$0xff]   ;;  %v1485_v44 = vld [vmem:[%s2029_s1 + $0xb4] ss:$8 sps:$4 sm:$0xff]   ;;  %v1489_v46 = vld [vmem:[%s2029_s1 + $0xb0] ss:$8 sps:$4 sm:$0xff]  }
  0x10   :  { %814 = vmatpush1.bf16.msra.mxu0 %v1442_v15  ;;  %674 = vmatprep.subr.bf16.mxu1 %v1443_v16  ;;  %v1484_v43 = vld [vmem:[%s2029_s1 + $0x1a0] ss:$8 sps:$4 sm:$0xff]   ;;  %v1487_v45 = vld [vmem:[%s2029_s1 + $0x1b4] ss:$8 sps:$4 sm:$0xff]   ;;  %v1490_v47 = vld [vmem:[%s2029_s1 + $0x1b0] ss:$8 sps:$4 sm:$0xff]  }
  0x11   :  { %815 = vmatprep.subr.bf16.mxu0 %v1445_v17  ;;  %v1491_v48 = vld [vmem:[%s2029_s1 + $0xc4] ss:$8 sps:$4 sm:$0xff]   ;;  %v1495_v52 = vld [vmem:[%s2029_s1 + $0xc0] ss:$8 sps:$4 sm:$0xff]   ;;  %v1497_v54 = vld [vmem:[%s2029_s1 + $0xd4] ss:$8 sps:$4 sm:$0xff]  }
  0x12   :  { %v1517_v49 = vld [vmem:[%s2030_s0 + $0x4] ss:$16 sps:$4 sm:$0xff]   ;;  %v1520_v51 = vld [vmem:[%s2030_s0 + $0xc] ss:$16 sps:$4 sm:$0xff]   ;;  %v1496_v53 = vld [vmem:[%s2029_s1 + $0x1c0] ss:$8 sps:$4 sm:$0xff]  }
  0x13   :  { %675 = vmatpush1.bf16.msra.mxu1 %v1447_v18  ;;  %v1493_v50 = vld [vmem:[%s2029_s1 + $0x1c4] ss:$8 sps:$4 sm:$0xff]   ;;  %698 = vmatprep.mubr.bf16.mxu1 %v1517_v49  ;;  %v1499_v55 = vld [vmem:[%s2029_s1 + $0x1d4] ss:$8 sps:$4 sm:$0xff]   ;;  %v1501_v56 = vld [vmem:[%s2029_s1 + $0xd0] ss:$8 sps:$4 sm:$0xff]  }
  0x14   :  { %816 = vmatpush1.bf16.msra.mxu0 %v1448_v19  ;;  %676 = vmatprep.subr.bf16.mxu1 %v1449_v20  ;;  %v1502_v57 = vld [vmem:[%s2029_s1 + $0x1d0] ss:$8 sps:$4 sm:$0xff]   ;;  %v1503_v58 = vld [vmem:[%s2029_s1 + $0xe4] ss:$8 sps:$4 sm:$0xff]   ;;  %v1507_v60 = vld [vmem:[%s2029_s1 + $0xe0] ss:$8 sps:$4 sm:$0xff]  }
  0x15   :  { %817 = vmatprep.subr.bf16.mxu0 %v1451_v21  ;;  %839 = vmatprep.mubr.bf16.mxu0 %v1520_v51  ;;  %v1505_v59 = vld [vmem:[%s2029_s1 + $0x1e4] ss:$8 sps:$4 sm:$0xff]   ;;  %v1508_v61 = vld [vmem:[%s2029_s1 + $0x1e0] ss:$8 sps:$4 sm:$0xff]   ;;  %v1509_v62 = vld [vmem:[%s2029_s1 + $0xf4] ss:$8 sps:$4 sm:$0xff]  }
  0x16   :  { %v1511_v63 = vld [vmem:[%s2029_s1 + $0x1f4] ss:$8 sps:$4 sm:$0xff]   ;;  %v1513_v0 = vld [vmem:[%s2029_s1 + $0xf0] ss:$8 sps:$4 sm:$0xff]   ;;  %v120_v49 = vld [vmem:[%s2031_s2] sm:$0x3] }
  0x17   :  { %677 = vmatpush1.bf16.msra.mxu1 %v1453_v22  ;;  %v1514_v1 = vld [vmem:[%s2029_s1 + $0x1f0] ss:$8 sps:$4 sm:$0xff]   ;;  %v1521_v4 = vld [vmem:[%s2030_s0 + $0x24] ss:$16 sps:$4 sm:$0xff]   ;;  %v1523_v5 = vld [vmem:[%s2030_s0 + $0x2c] ss:$16 sps:$4 sm:$0xff]  }
  0x18   :  { %818 = vmatpush1.bf16.msra.mxu0 %v1454_v23  ;;  %678 = vmatprep.subr.bf16.mxu1 %v1455_v24  ;;  %v1515_v2 = vld [vmem:[%s2030_s0] ss:$16 sps:$4 sm:$0xff]   ;;  %v1518_v3 = vld [vmem:[%s2030_s0 + $0x8] ss:$16 sps:$4 sm:$0xff]   ;;  %v1527_v8 = vld [vmem:[%s2030_s0 + $0x44] ss:$16 sps:$4 sm:$0xff]  }
  0x19   :  { %819 = vmatprep.subr.bf16.mxu0 %v1457_v25  ;;  %v1525_v6 = vld [vmem:[%s2030_s0 + $0x20] ss:$16 sps:$4 sm:$0xff]   ;;  %v1526_v7 = vld [vmem:[%s2030_s0 + $0x28] ss:$16 sps:$4 sm:$0xff]   ;;  %v1529_v9 = vld [vmem:[%s2030_s0 + $0x4c] ss:$16 sps:$4 sm:$0xff]  }
  0x1a   :  { %v1531_v10 = vld [vmem:[%s2030_s0 + $0x40] ss:$16 sps:$4 sm:$0xff]   ;;  %v1532_v11 = vld [vmem:[%s2030_s0 + $0x48] ss:$16 sps:$4 sm:$0xff]   ;;  %v1533_v12 = vld [vmem:[%s2030_s0 + $0x64] ss:$16 sps:$4 sm:$0xff]  }
  0x1b   :  { %679 = vmatpush1.bf16.msra.mxu1 %v1459_v26  ;;  %v1535_v13 = vld [vmem:[%s2030_s0 + $0x6c] ss:$16 sps:$4 sm:$0xff]   ;;  %v1537_v14 = vld [vmem:[%s2030_s0 + $0x60] ss:$16 sps:$4 sm:$0xff]   ;;  %v1538_v15 = vld [vmem:[%s2030_s0 + $0x68] ss:$16 sps:$4 sm:$0xff]  }
  0x1c   :  { %820 = vmatpush1.bf16.msra.mxu0 %v1460_v27  ;;  %680 = vmatprep.subr.bf16.mxu1 %v1461_v28  ;;  %v1539_v16 = vld [vmem:[%s2030_s0 + $0x84] ss:$16 sps:$4 sm:$0xff]   ;;  %v1541_v17 = vld [vmem:[%s2030_s0 + $0x8c] ss:$16 sps:$4 sm:$0xff]   ;;  %v1543_v18 = vld [vmem:[%s2030_s0 + $0x80] ss:$16 sps:$4 sm:$0xff]  }
  0x1d   :  { %821 = vmatprep.subr.bf16.mxu0 %v1463_v29  ;;  %v1544_v19 = vld [vmem:[%s2030_s0 + $0x88] ss:$16 sps:$4 sm:$0xff]   ;;  %v1545_v20 = vld [vmem:[%s2030_s0 + $0xa4] ss:$16 sps:$4 sm:$0xff]   ;;  %v1547_v21 = vld [vmem:[%s2030_s0 + $0xac] ss:$16 sps:$4 sm:$0xff]  }
  0x1e   :  { %v1549_v22 = vld [vmem:[%s2030_s0 + $0xa0] ss:$16 sps:$4 sm:$0xff]   ;;  %v1550_v23 = vld [vmem:[%s2030_s0 + $0xa8] ss:$16 sps:$4 sm:$0xff]   ;;  %v1551_v24 = vld [vmem:[%s2030_s0 + $0xc4] ss:$16 sps:$4 sm:$0xff]  }
  0x1f   :  { %681 = vmatpush1.bf16.msra.mxu1 %v1465_v30  ;;  %v1553_v25 = vld [vmem:[%s2030_s0 + $0xcc] ss:$16 sps:$4 sm:$0xff]   ;;  %v1555_v26 = vld [vmem:[%s2030_s0 + $0xc0] ss:$16 sps:$4 sm:$0xff]   ;;  %v1556_v27 = vld [vmem:[%s2030_s0 + $0xc8] ss:$16 sps:$4 sm:$0xff]  }
  0x20   :  { %822 = vmatpush1.bf16.msra.mxu0 %v1466_v31  ;;  %682 = vmatprep.subr.bf16.mxu1 %v1467_v32  ;;  %v1557_v28 = vld [vmem:[%s2030_s0 + $0xe4] ss:$16 sps:$4 sm:$0xff]   ;;  %v1559_v29 = vld [vmem:[%s2030_s0 + $0xec] ss:$16 sps:$4 sm:$0xff]   ;;  %v1561_v30 = vld [vmem:[%s2030_s0 + $0xe0] ss:$16 sps:$4 sm:$0xff]  }
  0x21   :  { %823 = vmatprep.subr.bf16.mxu0 %v1469_v33  ;;  %v1562_v31 = vld [vmem:[%s2030_s0 + $0xe8] ss:$16 sps:$4 sm:$0xff]   ;;  %v1563_v32 = vld [vmem:[%s2030_s0 + $0x104] ss:$16 sps:$4 sm:$0xff]   ;;  %v1565_v33 = vld [vmem:[%s2030_s0 + $0x10c] ss:$16 sps:$4 sm:$0xff]  }
  0x23   :  { %683 = vmatpush1.bf16.msra.mxu1 %v1471_v34  ;;  %v1567_v34 = vld [vmem:[%s2030_s0 + $0x100] ss:$16 sps:$4 sm:$0xff]  }
  0x24   :  { %824 = vmatpush1.bf16.msra.mxu0 %v1472_v35  ;;  %684 = vmatprep.subr.bf16.mxu1 %v1473_v36  ;;  %v1568_v35 = vld [vmem:[%s2030_s0 + $0x108] ss:$16 sps:$4 sm:$0xff]   ;;  %v1569_v36 = vld [vmem:[%s2030_s0 + $0x124] ss:$16 sps:$4 sm:$0xff]  }
  0x25   :  { %825 = vmatprep.subr.bf16.mxu0 %v1475_v37  ;;  %v1571_v37 = vld [vmem:[%s2030_s0 + $0x12c] ss:$16 sps:$4 sm:$0xff]  }
  0x27   :  { %685 = vmatpush1.bf16.msra.mxu1 %v1477_v38  ;;  %v54_v38 = vld [vmem:[%s2030_s0 + $0x140] sm:$0xff] }
  0x28   :  { %826 = vmatpush1.bf16.msra.mxu0 %v1478_v39  ;;  %686 = vmatprep.subr.bf16.mxu1 %v1479_v40  ;;  %v55_v39 = vld [vmem:[%s2030_s0 + $0x148] sm:$0xff]  ;;  %v1573_v40 = vld [vmem:[%s2030_s0 + $0x120] ss:$16 sps:$4 sm:$0xff]  }
  0x29   :  { %827 = vmatprep.subr.bf16.mxu0 %v1481_v41  ;;  %v1574_v41 = vld [vmem:[%s2030_s0 + $0x128] ss:$16 sps:$4 sm:$0xff]  }
  0x2b   :  { %687 = vmatpush1.bf16.msra.mxu1 %v1483_v42  ;;  %v1226_v42 = vcombine.high %v54_v38, %v54_v38 }
  0x2c   :  { %828 = vmatpush1.bf16.msra.mxu0 %v1484_v43  ;;  %688 = vmatprep.subr.bf16.mxu1 %v1485_v44  ;;  %v1228_v43 = vcombine.high %v55_v39, %v55_v39  ;;  %v1225_v44 = vcombine.low %v54_v38, %v54_v38 }
  0x2d   :  { %829 = vmatprep.subr.bf16.mxu0 %v1487_v45  ;;  %v1227_v45 = vcombine.low %v55_v39, %v55_v39 }
  0x2f   :  { %689 = vmatpush1.bf16.msra.mxu1 %v1489_v46  ;;  %v122_v46 = vlaneseq }
  0x30   :  { %830 = vmatpush1.bf16.msra.mxu0 %v1490_v47  ;;  %690 = vmatprep.subr.bf16.mxu1 %v1491_v48 }
  0x31   :  { %831 = vmatprep.subr.bf16.mxu0 %v1493_v50  ;;  %v123_v47 = vshrl.u32 %v122_v46, 7 }
  0x33   :  { %691 = vmatpush1.bf16.msra.mxu1 %v1495_v52  ;;  %v124_v48 = vsub.s32 0, %v123_v47  ;;  %v128_v50 = vsub.s32 1, %v123_v47 }
  0x34   :  { %832 = vmatpush1.bf16.msra.mxu0 %v1496_v53  ;;  %692 = vmatprep.subr.bf16.mxu1 %v1497_v54 }
  0x35   :  { %833 = vmatprep.subr.bf16.mxu0 %v1499_v55  ;;  %v1920_v51 = vrot.slane %v120_v49, %v124_v48  ;;  %v1922_v52 = vrot.slane %v120_v49, %v128_v50 }
  0x37   :  { %693 = vmatpush1.bf16.msra.mxu1 %v1501_v56 }
  0x38   :  { %834 = vmatpush1.bf16.msra.mxu0 %v1502_v57  ;;  %694 = vmatprep.subr.bf16.mxu1 %v1503_v58 }
  0x39   :  { %835 = vmatprep.subr.bf16.mxu0 %v1505_v59 }
  0x3b   :  { %695 = vmatpush1.bf16.msra.mxu1 %v1507_v60 }
  0x3c   :  { %836 = vmatpush1.bf16.msra.mxu0 %v1508_v61  ;;  %696 = vmatprep.subr.bf16.mxu1 %v1509_v62 }
  0x3d   :  { %837 = vmatprep.subr.bf16.mxu0 %v1511_v63 }
  0x3f   :  { %697 = vmatpush1.bf16.msra.mxu1 %v1513_v0 }
  0x40   :  { %838 = vmatpush1.bf16.msra.mxu0 %v1514_v1 }
  0x42   :  { %699 = vmatmul.mubr.bf16.vlgmr.msra.gmra.mrb[0].mxu1 %v1515_v2 }
  0x43   :  { %840 = vmatmul.mubr.bf16.vlgmr.msra.gmra.mrb[0].mxu0 %v1518_v3  ;;  %708 = vmatprep.mubr.bf16.mxu1 %v1521_v4 }
  0x44   :  { %849 = vmatprep.mubr.bf16.mxu0 %v1523_v5 }
  0x4a   :  { %709 = vmatmul.mubr.bf16.gmra.mrb[4].mxu1 %v1525_v6 }
  0x4b   :  { %850 = vmatmul.mubr.bf16.gmra.mrb[4].mxu0 %v1526_v7  ;;  %718 = vmatprep.mubr.bf16.mxu1 %v1527_v8 }
  0x4c   :  { %859 = vmatprep.mubr.bf16.mxu0 %v1529_v9 }
  0x52   :  { %719 = vmatmul.mubr.bf16.gmra.mrb[8].mxu1 %v1531_v10 }
  0x53   :  { %860 = vmatmul.mubr.bf16.gmra.mrb[8].mxu0 %v1532_v11  ;;  %728 = vmatprep.mubr.bf16.mxu1 %v1533_v12 }
  0x54   :  { %869 = vmatprep.mubr.bf16.mxu0 %v1535_v13 }
  0x5a   :  { %729 = vmatmul.mubr.bf16.gmra.mrb[12].mxu1 %v1537_v14 }
  0x5b   :  { %870 = vmatmul.mubr.bf16.gmra.mrb[12].mxu0 %v1538_v15  ;;  %738 = vmatprep.mubr.bf16.mxu1 %v1539_v16 }
  0x5c   :  { %879 = vmatprep.mubr.bf16.mxu0 %v1541_v17 }
  0x62   :  { %739 = vmatmul.mubr.bf16.gmra.mrb[16].mxu1 %v1543_v18 }
  0x63   :  { %880 = vmatmul.mubr.bf16.gmra.mrb[16].mxu0 %v1544_v19  ;;  %748 = vmatprep.mubr.bf16.mxu1 %v1545_v20 }
  0x64   :  { %889 = vmatprep.mubr.bf16.mxu0 %v1547_v21 }
  0x6a   :  { %749 = vmatmul.mubr.bf16.gmra.mrb[20].mxu1 %v1549_v22 }
  0x6b   :  { %890 = vmatmul.mubr.bf16.gmra.mrb[20].mxu0 %v1550_v23  ;;  %758 = vmatprep.mubr.bf16.mxu1 %v1551_v24 }
  0x6c   :  { %899 = vmatprep.mubr.bf16.mxu0 %v1553_v25 }
  0x72   :  { %759 = vmatmul.mubr.bf16.gmra.mrb[24].mxu1 %v1555_v26 }
  0x73   :  { %900 = vmatmul.mubr.bf16.gmra.mrb[24].mxu0 %v1556_v27  ;;  %768 = vmatprep.mubr.bf16.mxu1 %v1557_v28 }
  0x74   :  { %909 = vmatprep.mubr.bf16.mxu0 %v1559_v29 }
  0x7a   :  { %769 = vmatmul.mubr.bf16.gmra.mrb[28].mxu1 %v1561_v30 }
  0x7b   :  { %910 = vmatmul.mubr.bf16.gmra.mrb[28].mxu0 %v1562_v31  ;;  %778 = vmatprep.mubr.bf16.mxu1 %v1563_v32 }
  0x7c   :  { %919 = vmatprep.mubr.bf16.mxu0 %v1565_v33 }
  0x82   :  { %779 = vmatmul.mubr.bf16.gmra.mrb[32].mxu1 %v1567_v34 }
  0x83   :  { %920 = vmatmul.mubr.bf16.gmra.mrb[32].mxu0 %v1568_v35  ;;  %788 = vmatprep.mubr.bf16.mxu1 %v1569_v36 }
  0x84   :  { %929 = vmatprep.mubr.bf16.mxu0 %v1571_v37 }
  0x8a   :  { %789 = vmatmul.mubr.bf16.gmra.mrb[36].mxu1 %v1573_v40 }
  0x8b   :  { %930 = vmatmul.mubr.bf16.gmra.mrb[36].mxu0 %v1574_v41  ;;  %798 = vmatprep.mubr.bf16.mxu1 %v1226_v42 }
  0x8c   :  { %939 = vmatprep.mubr.bf16.mxu0 %v1228_v43 }
  0x92   :  { %799 = vmatmul.mubr.bf16.gmra.mrb[40].mxu1 %v1225_v44 }
  0x93   :  { %940 = vmatmul.mubr.bf16.gmra.mrb[40].mxu0 %v1227_v45 }
 0x115   :  { %v700_v53 = vpop.f32.mrb[0].mxu1 }
 0x116   :  { %v841_v54 = vpop.f32.mrb[0].mxu0  ;;  %v701_v55 = vadd.f32 %v700_v53, %v1920_v51  ;;  %v702_v56 = vpop.f32.mrb[1].mxu1 }
 0x117   :  { %v843_v57 = vpop.f32.mrb[1].mxu0  ;;  %v703_v58 = vadd.f32 %v702_v56, %v1922_v52  ;;  %v704_v59 = vpop.f32.mrb[2].mxu1 }
 0x118   :  { %v845_v60 = vpop.f32.mrb[2].mxu0  ;;  %v842_v61 = vadd.f32 %v841_v54, %v701_v55  ;;  %v705_v62 = vadd.f32 %v704_v59, %v1920_v51  ;;  %v706_v63 = vpop.f32.mrb[3].mxu1 }
 0x119   :  { %v847_v0 = vpop.f32.mrb[3].mxu0  ;;  %v844_v1 = vadd.f32 %v843_v57, %v703_v58  ;;  %v707_v2 = vadd.f32 %v706_v63, %v1922_v52 }
 0x11a   :  { %v948_v3 = vmul.f32 0.01, %v842_v61  ;;  %v846_v4 = vadd.f32 %v845_v60, %v705_v62 }
 0x11b   :  { %v949_v5 = vmul.f32 0.01, %v844_v1  ;;  %v848_v6 = vadd.f32 %v847_v0, %v707_v2 }
 0x11c   :  { %v990_v7 = vmax.f32 %v842_v61, %v948_v3  ;;  %v950_v8 = vmul.f32 0.01, %v846_v4 }
 0x11d   :  { %v991_v9 = vmax.f32 %v844_v1, %v949_v5  ;;  %v951_v10 = vmul.f32 0.01, %v848_v6  ;;  %v710_v11 = vpop.f32.mrb[4].mxu1 }
 0x11e   :  { %v851_v12 = vpop.f32.mrb[4].mxu0  ;;  %v992_v13 = vmax.f32 %v846_v4, %v950_v8  ;;  %v711_v14 = vadd.f32 %v710_v11, %v1920_v51  ;;  %v712_v15 = vpop.f32.mrb[5].mxu1 }
 0x11f   :  { %v853_v16 = vpop.f32.mrb[5].mxu0  ;;  %v1314_v17 = vpack.c.bf16 %v991_v9, %v990_v7  ;;  %v993_v18 = vmax.f32 %v848_v6, %v951_v10  ;;  %v713_v19 = vadd.f32 %v712_v15, %v1922_v52  ;;  %v714_v20 = vpop.f32.mrb[6].mxu1 }
 0x120   :  { %v855_v21 = vpop.f32.mrb[6].mxu0  ;;  %v852_v22 = vadd.f32 %v851_v12, %v711_v14  ;;  %v715_v23 = vadd.f32 %v714_v20, %v1920_v51  ;;  %v716_v24 = vpop.f32.mrb[7].mxu1 }
 0x121   :  { %v857_v25 = vpop.f32.mrb[7].mxu0  ;;  %1160 = vst [vmem:[%s2032_s3] sm:$0xff] %v1314_v17  ;;  %v1315_v26 = vpack.c.bf16 %v993_v18, %v992_v13  ;;  %v854_v27 = vadd.f32 %v853_v16, %v713_v19  ;;  %v717_v28 = vadd.f32 %v716_v24, %v1922_v52 }
 0x122   :  { %v952_v29 = vmul.f32 0.01, %v852_v22  ;;  %v856_v30 = vadd.f32 %v855_v21, %v715_v23 }
 0x123   :  { %1161 = vst [vmem:[%s2032_s3 + $0x8] sm:$0xff] %v1315_v26  ;;  %v953_v31 = vmul.f32 0.01, %v854_v27  ;;  %v858_v32 = vadd.f32 %v857_v25, %v717_v28 }
 0x124   :  { %v994_v33 = vmax.f32 %v852_v22, %v952_v29  ;;  %v954_v34 = vmul.f32 0.01, %v856_v30 }
 0x125   :  { %v995_v35 = vmax.f32 %v854_v27, %v953_v31  ;;  %v955_v36 = vmul.f32 0.01, %v858_v32  ;;  %v720_v37 = vpop.f32.mrb[8].mxu1 }
 0x126   :  { %v861_v38 = vpop.f32.mrb[8].mxu0  ;;  %v996_v39 = vmax.f32 %v856_v30, %v954_v34  ;;  %v721_v40 = vadd.f32 %v720_v37, %v1920_v51  ;;  %v722_v41 = vpop.f32.mrb[9].mxu1 }
 0x127   :  { %v863_v42 = vpop.f32.mrb[9].mxu0  ;;  %v1316_v43 = vpack.c.bf16 %v995_v35, %v994_v33  ;;  %v997_v44 = vmax.f32 %v858_v32, %v955_v36  ;;  %v723_v45 = vadd.f32 %v722_v41, %v1922_v52  ;;  %v724_v46 = vpop.f32.mrb[10].mxu1 }
 0x128   :  { %v865_v47 = vpop.f32.mrb[10].mxu0  ;;  %v862_v48 = vadd.f32 %v861_v38, %v721_v40  ;;  %v725_v49 = vadd.f32 %v724_v46, %v1920_v51  ;;  %v726_v50 = vpop.f32.mrb[11].mxu1 }
 0x129   :  { %v867_v53 = vpop.f32.mrb[11].mxu0  ;;  %1162 = vst [vmem:[%s2032_s3 + $0x10] sm:$0xff] %v1316_v43  ;;  %v1317_v54 = vpack.c.bf16 %v997_v44, %v996_v39  ;;  %v864_v55 = vadd.f32 %v863_v42, %v723_v45  ;;  %v727_v56 = vadd.f32 %v726_v50, %v1922_v52 }
 0x12a   :  { %v956_v57 = vmul.f32 0.01, %v862_v48  ;;  %v866_v58 = vadd.f32 %v865_v47, %v725_v49 }
 0x12b   :  { %1163 = vst [vmem:[%s2032_s3 + $0x18] sm:$0xff] %v1317_v54  ;;  %v957_v59 = vmul.f32 0.01, %v864_v55  ;;  %v868_v60 = vadd.f32 %v867_v53, %v727_v56 }
 0x12c   :  { %v998_v61 = vmax.f32 %v862_v48, %v956_v57  ;;  %v958_v62 = vmul.f32 0.01, %v866_v58 }
 0x12d   :  { %v999_v63 = vmax.f32 %v864_v55, %v957_v59  ;;  %v959_v0 = vmul.f32 0.01, %v868_v60  ;;  %v730_v1 = vpop.f32.mrb[12].mxu1 }
 0x12e   :  { %v871_v2 = vpop.f32.mrb[12].mxu0  ;;  %v1000_v3 = vmax.f32 %v866_v58, %v958_v62  ;;  %v731_v4 = vadd.f32 %v730_v1, %v1920_v51  ;;  %v732_v5 = vpop.f32.mrb[13].mxu1 }
 0x12f   :  { %v873_v6 = vpop.f32.mrb[13].mxu0  ;;  %v1318_v7 = vpack.c.bf16 %v999_v63, %v998_v61  ;;  %v1001_v8 = vmax.f32 %v868_v60, %v959_v0  ;;  %v733_v9 = vadd.f32 %v732_v5, %v1922_v52  ;;  %v734_v10 = vpop.f32.mrb[14].mxu1 }
 0x130   :  { %v875_v11 = vpop.f32.mrb[14].mxu0  ;;  %v872_v12 = vadd.f32 %v871_v2, %v731_v4  ;;  %v735_v13 = vadd.f32 %v734_v10, %v1920_v51  ;;  %v736_v14 = vpop.f32.mrb[15].mxu1 }
 0x131   :  { %v877_v15 = vpop.f32.mrb[15].mxu0  ;;  %1164 = vst [vmem:[%s2032_s3 + $0x20] sm:$0xff] %v1318_v7  ;;  %v1319_v16 = vpack.c.bf16 %v1001_v8, %v1000_v3  ;;  %v874_v17 = vadd.f32 %v873_v6, %v733_v9  ;;  %v737_v18 = vadd.f32 %v736_v14, %v1922_v52 }
 0x132   :  { %v960_v19 = vmul.f32 0.01, %v872_v12  ;;  %v876_v20 = vadd.f32 %v875_v11, %v735_v13 }
 0x133   :  { %1165 = vst [vmem:[%s2032_s3 + $0x28] sm:$0xff] %v1319_v16  ;;  %v961_v21 = vmul.f32 0.01, %v874_v17  ;;  %v878_v22 = vadd.f32 %v877_v15, %v737_v18 }
 0x134   :  { %v1002_v23 = vmax.f32 %v872_v12, %v960_v19  ;;  %v962_v24 = vmul.f32 0.01, %v876_v20 }
 0x135   :  { %v1003_v25 = vmax.f32 %v874_v17, %v961_v21  ;;  %v963_v26 = vmul.f32 0.01, %v878_v22  ;;  %v740_v27 = vpop.f32.mrb[16].mxu1 }
 0x136   :  { %v881_v28 = vpop.f32.mrb[16].mxu0  ;;  %v1004_v29 = vmax.f32 %v876_v20, %v962_v24  ;;  %v741_v30 = vadd.f32 %v740_v27, %v1920_v51  ;;  %v742_v31 = vpop.f32.mrb[17].mxu1 }
 0x137   :  { %v883_v32 = vpop.f32.mrb[17].mxu0  ;;  %v1320_v33 = vpack.c.bf16 %v1003_v25, %v1002_v23  ;;  %v1005_v34 = vmax.f32 %v878_v22, %v963_v26  ;;  %v743_v35 = vadd.f32 %v742_v31, %v1922_v52  ;;  %v744_v36 = vpop.f32.mrb[18].mxu1 }
 0x138   :  { %v885_v37 = vpop.f32.mrb[18].mxu0  ;;  %v882_v38 = vadd.f32 %v881_v28, %v741_v30  ;;  %v745_v39 = vadd.f32 %v744_v36, %v1920_v51  ;;  %v746_v40 = vpop.f32.mrb[19].mxu1 }
 0x139   :  { %v887_v41 = vpop.f32.mrb[19].mxu0  ;;  %1166 = vst [vmem:[%s2032_s3 + $0x30] sm:$0xff] %v1320_v33  ;;  %v1321_v42 = vpack.c.bf16 %v1005_v34, %v1004_v29  ;;  %v884_v43 = vadd.f32 %v883_v32, %v743_v35  ;;  %v747_v44 = vadd.f32 %v746_v40, %v1922_v52 }
 0x13a   :  { %v964_v45 = vmul.f32 0.01, %v882_v38  ;;  %v886_v46 = vadd.f32 %v885_v37, %v745_v39 }
 0x13b   :  { %1167 = vst [vmem:[%s2032_s3 + $0x38] sm:$0xff] %v1321_v42  ;;  %v965_v47 = vmul.f32 0.01, %v884_v43  ;;  %v888_v48 = vadd.f32 %v887_v41, %v747_v44 }
 0x13c   :  { %v1006_v49 = vmax.f32 %v882_v38, %v964_v45  ;;  %v966_v50 = vmul.f32 0.01, %v886_v46 }
 0x13d   :  { %v1007_v53 = vmax.f32 %v884_v43, %v965_v47  ;;  %v967_v54 = vmul.f32 0.01, %v888_v48  ;;  %v750_v55 = vpop.f32.mrb[20].mxu1 }
 0x13e   :  { %v891_v56 = vpop.f32.mrb[20].mxu0  ;;  %v1008_v57 = vmax.f32 %v886_v46, %v966_v50  ;;  %v751_v58 = vadd.f32 %v750_v55, %v1920_v51  ;;  %v752_v59 = vpop.f32.mrb[21].mxu1 }
 0x13f   :  { %v893_v60 = vpop.f32.mrb[21].mxu0  ;;  %v1322_v61 = vpack.c.bf16 %v1007_v53, %v1006_v49  ;;  %v1009_v62 = vmax.f32 %v888_v48, %v967_v54  ;;  %v753_v63 = vadd.f32 %v752_v59, %v1922_v52  ;;  %v754_v0 = vpop.f32.mrb[22].mxu1 }
 0x140   :  { %v895_v1 = vpop.f32.mrb[22].mxu0  ;;  %v892_v2 = vadd.f32 %v891_v56, %v751_v58  ;;  %v755_v3 = vadd.f32 %v754_v0, %v1920_v51  ;;  %v756_v4 = vpop.f32.mrb[23].mxu1 }
 0x141   :  { %v897_v5 = vpop.f32.mrb[23].mxu0  ;;  %1168 = vst [vmem:[%s2032_s3 + $0x40] sm:$0xff] %v1322_v61  ;;  %v1323_v6 = vpack.c.bf16 %v1009_v62, %v1008_v57  ;;  %v894_v7 = vadd.f32 %v893_v60, %v753_v63  ;;  %v757_v8 = vadd.f32 %v756_v4, %v1922_v52 }
 0x142   :  { %v968_v9 = vmul.f32 0.01, %v892_v2  ;;  %v896_v10 = vadd.f32 %v895_v1, %v755_v3 }
 0x143   :  { %1169 = vst [vmem:[%s2032_s3 + $0x48] sm:$0xff] %v1323_v6  ;;  %v969_v11 = vmul.f32 0.01, %v894_v7  ;;  %v898_v12 = vadd.f32 %v897_v5, %v757_v8 }
 0x144   :  { %v1010_v13 = vmax.f32 %v892_v2, %v968_v9  ;;  %v970_v14 = vmul.f32 0.01, %v896_v10 }
 0x145   :  { %v1011_v15 = vmax.f32 %v894_v7, %v969_v11  ;;  %v971_v16 = vmul.f32 0.01, %v898_v12  ;;  %v760_v17 = vpop.f32.mrb[24].mxu1 }
 0x146   :  { %v901_v18 = vpop.f32.mrb[24].mxu0  ;;  %v1012_v19 = vmax.f32 %v896_v10, %v970_v14  ;;  %v761_v20 = vadd.f32 %v760_v17, %v1920_v51  ;;  %v762_v21 = vpop.f32.mrb[25].mxu1 }
 0x147   :  { %v903_v22 = vpop.f32.mrb[25].mxu0  ;;  %v1324_v23 = vpack.c.bf16 %v1011_v15, %v1010_v13  ;;  %v1013_v24 = vmax.f32 %v898_v12, %v971_v16  ;;  %v763_v25 = vadd.f32 %v762_v21, %v1922_v52  ;;  %v764_v26 = vpop.f32.mrb[26].mxu1 }
 0x148   :  { %v905_v27 = vpop.f32.mrb[26].mxu0  ;;  %v902_v28 = vadd.f32 %v901_v18, %v761_v20  ;;  %v765_v29 = vadd.f32 %v764_v26, %v1920_v51  ;;  %v766_v30 = vpop.f32.mrb[27].mxu1 }
 0x149   :  { %v907_v31 = vpop.f32.mrb[27].mxu0  ;;  %1170 = vst [vmem:[%s2032_s3 + $0x50] sm:$0xff] %v1324_v23  ;;  %v1325_v32 = vpack.c.bf16 %v1013_v24, %v1012_v19  ;;  %v904_v33 = vadd.f32 %v903_v22, %v763_v25  ;;  %v767_v34 = vadd.f32 %v766_v30, %v1922_v52 }
 0x14a   :  { %v972_v35 = vmul.f32 0.01, %v902_v28  ;;  %v906_v36 = vadd.f32 %v905_v27, %v765_v29 }
 0x14b   :  { %1171 = vst [vmem:[%s2032_s3 + $0x58] sm:$0xff] %v1325_v32  ;;  %v973_v37 = vmul.f32 0.01, %v904_v33  ;;  %v908_v38 = vadd.f32 %v907_v31, %v767_v34 }
 0x14c   :  { %v1014_v39 = vmax.f32 %v902_v28, %v972_v35  ;;  %v974_v40 = vmul.f32 0.01, %v906_v36 }
 0x14d   :  { %v1015_v41 = vmax.f32 %v904_v33, %v973_v37  ;;  %v975_v42 = vmul.f32 0.01, %v908_v38  ;;  %v770_v43 = vpop.f32.mrb[28].mxu1 }
 0x14e   :  { %v911_v44 = vpop.f32.mrb[28].mxu0  ;;  %v1016_v45 = vmax.f32 %v906_v36, %v974_v40  ;;  %v771_v46 = vadd.f32 %v770_v43, %v1920_v51  ;;  %v772_v47 = vpop.f32.mrb[29].mxu1 }
 0x14f   :  { %v913_v48 = vpop.f32.mrb[29].mxu0  ;;  %v1326_v49 = vpack.c.bf16 %v1015_v41, %v1014_v39  ;;  %v1017_v50 = vmax.f32 %v908_v38, %v975_v42  ;;  %v773_v53 = vadd.f32 %v772_v47, %v1922_v52  ;;  %v774_v54 = vpop.f32.mrb[30].mxu1 }
 0x150   :  { %v915_v55 = vpop.f32.mrb[30].mxu0  ;;  %v912_v56 = vadd.f32 %v911_v44, %v771_v46  ;;  %v775_v57 = vadd.f32 %v774_v54, %v1920_v51  ;;  %v776_v58 = vpop.f32.mrb[31].mxu1 }
 0x151   :  { %v917_v59 = vpop.f32.mrb[31].mxu0  ;;  %1172 = vst [vmem:[%s2032_s3 + $0x60] sm:$0xff] %v1326_v49  ;;  %v1327_v60 = vpack.c.bf16 %v1017_v50, %v1016_v45  ;;  %v914_v61 = vadd.f32 %v913_v48, %v773_v53  ;;  %v777_v62 = vadd.f32 %v776_v58, %v1922_v52 }
 0x152   :  { %v976_v63 = vmul.f32 0.01, %v912_v56  ;;  %v916_v0 = vadd.f32 %v915_v55, %v775_v57 }
 0x153   :  { %1173 = vst [vmem:[%s2032_s3 + $0x68] sm:$0xff] %v1327_v60  ;;  %v977_v1 = vmul.f32 0.01, %v914_v61  ;;  %v918_v2 = vadd.f32 %v917_v59, %v777_v62 }
 0x154   :  { %v1018_v3 = vmax.f32 %v912_v56, %v976_v63  ;;  %v978_v4 = vmul.f32 0.01, %v916_v0 }
 0x155   :  { %v1019_v5 = vmax.f32 %v914_v61, %v977_v1  ;;  %v979_v6 = vmul.f32 0.01, %v918_v2  ;;  %v780_v7 = vpop.f32.mrb[32].mxu1 }
 0x156   :  { %v921_v8 = vpop.f32.mrb[32].mxu0  ;;  %v1020_v9 = vmax.f32 %v916_v0, %v978_v4  ;;  %v781_v10 = vadd.f32 %v780_v7, %v1920_v51  ;;  %v782_v11 = vpop.f32.mrb[33].mxu1 }
 0x157   :  { %v923_v12 = vpop.f32.mrb[33].mxu0  ;;  %v1328_v13 = vpack.c.bf16 %v1019_v5, %v1018_v3  ;;  %v1021_v14 = vmax.f32 %v918_v2, %v979_v6  ;;  %v783_v15 = vadd.f32 %v782_v11, %v1922_v52  ;;  %v784_v16 = vpop.f32.mrb[34].mxu1 }
 0x158   :  { %v925_v17 = vpop.f32.mrb[34].mxu0  ;;  %v922_v18 = vadd.f32 %v921_v8, %v781_v10  ;;  %v785_v19 = vadd.f32 %v784_v16, %v1920_v51  ;;  %v786_v20 = vpop.f32.mrb[35].mxu1 }
 0x159   :  { %v927_v21 = vpop.f32.mrb[35].mxu0  ;;  %1174 = vst [vmem:[%s2032_s3 + $0x70] sm:$0xff] %v1328_v13  ;;  %v1329_v22 = vpack.c.bf16 %v1021_v14, %v1020_v9  ;;  %v924_v23 = vadd.f32 %v923_v12, %v783_v15  ;;  %v787_v24 = vadd.f32 %v786_v20, %v1922_v52 }
 0x15a   :  { %v980_v25 = vmul.f32 0.01, %v922_v18  ;;  %v926_v26 = vadd.f32 %v925_v17, %v785_v19 }
 0x15b   :  { %1175 = vst [vmem:[%s2032_s3 + $0x78] sm:$0xff] %v1329_v22  ;;  %v981_v27 = vmul.f32 0.01, %v924_v23  ;;  %v928_v28 = vadd.f32 %v927_v21, %v787_v24 }
 0x15c   :  { %v1022_v29 = vmax.f32 %v922_v18, %v980_v25  ;;  %v982_v30 = vmul.f32 0.01, %v926_v26 }
 0x15d   :  { %v1023_v31 = vmax.f32 %v924_v23, %v981_v27  ;;  %v983_v32 = vmul.f32 0.01, %v928_v28  ;;  %v790_v33 = vpop.f32.mrb[36].mxu1 }
 0x15e   :  { %v931_v34 = vpop.f32.mrb[36].mxu0  ;;  %v1024_v35 = vmax.f32 %v926_v26, %v982_v30  ;;  %v791_v36 = vadd.f32 %v790_v33, %v1920_v51  ;;  %v792_v37 = vpop.f32.mrb[37].mxu1 }
 0x15f   :  { %v933_v38 = vpop.f32.mrb[37].mxu0  ;;  %v1330_v39 = vpack.c.bf16 %v1023_v31, %v1022_v29  ;;  %v1025_v40 = vmax.f32 %v928_v28, %v983_v32  ;;  %v793_v41 = vadd.f32 %v792_v37, %v1922_v52  ;;  %v794_v42 = vpop.f32.mrb[38].mxu1 }
 0x160   :  { %v935_v43 = vpop.f32.mrb[38].mxu0  ;;  %v932_v44 = vadd.f32 %v931_v34, %v791_v36  ;;  %v795_v45 = vadd.f32 %v794_v42, %v1920_v51  ;;  %v796_v46 = vpop.f32.mrb[39].mxu1 }
 0x161   :  { %v937_v47 = vpop.f32.mrb[39].mxu0  ;;  %1176 = vst [vmem:[%s2032_s3 + $0x80] sm:$0xff] %v1330_v39  ;;  %v1331_v48 = vpack.c.bf16 %v1025_v40, %v1024_v35  ;;  %v934_v49 = vadd.f32 %v933_v38, %v793_v41  ;;  %v797_v50 = vadd.f32 %v796_v46, %v1922_v52 }
 0x162   :  { %v984_v53 = vmul.f32 0.01, %v932_v44  ;;  %v936_v54 = vadd.f32 %v935_v43, %v795_v45 }
 0x163   :  { %1177 = vst [vmem:[%s2032_s3 + $0x88] sm:$0xff] %v1331_v48  ;;  %v985_v55 = vmul.f32 0.01, %v934_v49  ;;  %v938_v56 = vadd.f32 %v937_v47, %v797_v50 }
 0x164   :  { %v1026_v57 = vmax.f32 %v932_v44, %v984_v53  ;;  %v986_v58 = vmul.f32 0.01, %v936_v54 }
 0x165   :  { %v1027_v59 = vmax.f32 %v934_v49, %v985_v55  ;;  %v987_v60 = vmul.f32 0.01, %v938_v56  ;;  %v800_v61 = vpop.f32.mrb[40].mxu1 }
 0x166   :  { %v941_v62 = vpop.f32.mrb[40].mxu0  ;;  %v1028_v63 = vmax.f32 %v936_v54, %v986_v58  ;;  %v801_v0 = vadd.f32 %v800_v61, %v1920_v51  ;;  %v802_v1 = vpop.f32.mrb[41].mxu1 }
 0x167   :  { %v943_v2 = vpop.f32.mrb[41].mxu0  ;;  %v1332_v3 = vpack.c.bf16 %v1027_v59, %v1026_v57  ;;  %v1029_v4 = vmax.f32 %v938_v56, %v987_v60  ;;  %v803_v5 = vadd.f32 %v802_v1, %v1922_v52  ;;  %v804_v6 = vpop.f32.mrb[42].mxu1 }
 0x168   :  { %v945_v7 = vpop.f32.mrb[42].mxu0  ;;  %v942_v8 = vadd.f32 %v941_v62, %v801_v0  ;;  %v805_v9 = vpop.f32.mrb[43].mxu1 }
 0x169   :  { %v946_v10 = vpop.f32.mrb[43].mxu0  ;;  %1178 = vst [vmem:[%s2032_s3 + $0x90] sm:$0xff] %v1332_v3  ;;  %v1333_v11 = vpack.c.bf16 %v1029_v4, %v1028_v63  ;;  %v944_v12 = vadd.f32 %v943_v2, %v803_v5 }
 0x16a   :  { %v988_v13 = vmul.f32 0.01, %v942_v8 }
 0x16b   :  { %1179 = vst [vmem:[%s2032_s3 + $0x98] sm:$0xff] %v1333_v11  ;;  %v989_v51 = vmul.f32 0.01, %v944_v12 }
 0x16c   :  { %v1030_v14 = vmax.f32 %v942_v8, %v988_v13 }
 0x16d   :  { %v1031_v15 = vmax.f32 %v944_v12, %v989_v51 }
 0x16f   :  { %v1334_v52 = vpack.c.bf16 %v1031_v15, %v1030_v14 }
 0x171   :  { %1180 = vst [vmem:[%s2032_s3 + $0xa0] sm:$0xff] %v1334_v52 }

// kernel: appearance_autoencoder_forward.17
= control target key start
LH: loop header
LB: loop body
LE: loop exit
PB: predicated region body
PF: predicated region fallthrough
CT: control target
= control target key end

     0   :  { %s2085_s12 = smov 0   ;;  %s2355_s0 = inlined_call_operand.vmem [shape: bf16[1024,256], index: 0, kind: input, shape index: {}]   ;;  %s2356_s1 = inlined_call_operand.vmem [shape: bf16[256,128], index: 1, kind: input, shape index: {}]   ;;  %s2357_s2 = inlined_call_operand.vmem [shape: f32[1,128], index: 2, kind: input, shape index: {}]   ;;  %s2358_s3 = inlined_call_operand.vmem [shape: bf16[1024,128], index: 3, kind: output, shape index: {}]  }
   0x1 LB: > { %s1490_s13 = sadd.s32 4294967295, %s2062_s12   ;;  %p1494_p0 = scmp.ge.s32.totalorder %s2062_s12, 1  ;;  %s2062_s12 = sphi %s2085_s12, %s13_s12  }
   0x2   : > { %p139_p1 = scmp.lt.s32.totalorder %s2062_s12, 3 }
   0x4   : > { %p140_p2 = pnand %p1494_p0, %p139_p1 }
   0x5   : > { %v1944_v0 = vld [vmem:[%s2356_s1] sm:$0xff] (!%p140_p2)   ;;  %v2064_v1 = vmov (!%p140_p2), 0   ;;  %s1495_s16 = sshll.u32 (!%p140_p2), %s1490_s13, 6  ;;  %v1945_v2 = vld [vmem:[%s2356_s1 + $0x8] sm:$0xff] (!%p140_p2)   ;;  %v1946_v3 = vld [vmem:[%s2356_s1 + $0x10] sm:$0xff] (!%p140_p2)  }
   0x6   : > { %143 = sbr.rel (%p140_p2) target bundleno = 413 (0x19d), region = 32  ;;  %697 = vmatprep.subr.bf16.mxu0 (!%p140_p2), %v2064_v1  ;;  %1903 = vmatprep.subr.bf16.mxu1 (!%p140_p2), %v2064_v1  ;;  %p165_p3 = scmp.lt.s32.totalorder (!%p140_p2), %s1495_s16, 127  ;;  %v1947_v4 = vld [vmem:[%s2356_s1 + $0x18] sm:$0xff] (!%p140_p2)   ;;  %v1948_v5 = vld [vmem:[%s2356_s1 + $0x20] sm:$0xff] (!%p140_p2)   ;;  %v1949_v7 = vld [vmem:[%s2356_s1 + $0x28] sm:$0xff] (!%p140_p2)  }
   0x7   : > { %698 = vmatpush1.bf16.msra.mxu0 (!%p140_p2), %v1944_v0  ;;  %1919 = vmatpush1.bf16.msra.mxu1 (!%p140_p2), %v1944_v0  ;;  %v1950_v9 = vld [vmem:[%s2356_s1 + $0x30] sm:$0xff] (!%p140_p2)   ;;  %v1951_v10 = vld [vmem:[%s2356_s1 + $0x38] sm:$0xff] (!%p140_p2)   ;;  %v1952_v11 = vld [vmem:[%s2356_s1 + $0x40] sm:$0xff] (!%p140_p2)  }
   0x8   : > { %699 = vmatprep.subr.bf16.mxu0 (!%p140_p2), %v2064_v1  ;;  %1904 = vmatprep.subr.bf16.mxu1 (!%p140_p2), %v2064_v1  ;;  %v1953_v12 = vld [vmem:[%s2356_s1 + $0x48] sm:$0xff] (!%p140_p2)   ;;  %v1954_v13 = vld [vmem:[%s2356_s1 + $0x50] sm:$0xff] (!%p140_p2)   ;;  %v1955_v14 = vld [vmem:[%s2356_s1 + $0x58] sm:$0xff] (!%p140_p2)  }
   0x9   : > { %v1956_v15 = vld [vmem:[%s2356_s1 + $0x60] sm:$0xff] (!%p140_p2)   ;;  %v1957_v16 = vld [vmem:[%s2356_s1 + $0x68] sm:$0xff] (!%p140_p2)   ;;  %v1958_v17 = vld [vmem:[%s2356_s1 + $0x70] sm:$0xff] (!%p140_p2)  }
   0xa   : > { %v1959_v18 = vld [vmem:[%s2356_s1 + $0x78] sm:$0xff] (!%p140_p2)  }
   0xb   : > { %700 = vmatpush1.bf16.msra.mxu0 (!%p140_p2), %v1945_v2  ;;  %1920 = vmatpush1.bf16.msra.mxu1 (!%p140_p2), %v1945_v2 }
   0xc   : > { %701 = vmatprep.subr.bf16.mxu0 (!%p140_p2), %v2064_v1  ;;  %1905 = vmatprep.subr.bf16.mxu1 (!%p140_p2), %v2064_v1 }
   0xd   : > { %s2360_s16 = smov (!%p165_p3, %s1495_s16), 127 }
   0xe   : > { %s1647_s23 = sshll.u32 %s2360_s16, 3 }
   0xf   : > { %702 = vmatpush1.bf16.msra.mxu0 %v1946_v3  ;;  %1921 = vmatpush1.bf16.msra.mxu1 %v1946_v3  ;;  %s2122_s28 = scalar_lea.vmem %s2355_s0, %s1647_s23 }
  0x10   : > { %703 = vmatprep.subr.bf16.mxu0 %v2064_v1  ;;  %1906 = vmatprep.subr.bf16.mxu1 %v2064_v1  ;;  %v1962_v6 = vld [vmem:[%s2122_s28 + $0x4] ss:$8 sps:$4 sm:$0xff]   ;;  %v1960_v19 = vld [vmem:[%s2122_s28] ss:$8 sps:$4 sm:$0xff]   ;;  %v1966_v21 = vld [vmem:[%s2122_s28 + $0x14] ss:$8 sps:$4 sm:$0xff]  }
  0x11   : > { %v1965_v8 = vld [vmem:[%s2122_s28 + $0x104] ss:$8 sps:$4 sm:$0xff]   ;;  %729 = vmatprep.mubr.bf16.mxu0 %v1962_v6  ;;  %v1963_v20 = vld [vmem:[%s2122_s28 + $0x100] ss:$8 sps:$4 sm:$0xff]   ;;  %v1968_v22 = vld [vmem:[%s2122_s28 + $0x114] ss:$8 sps:$4 sm:$0xff]  }
  0x12   : > { %857 = vmatprep.mubr.bf16.mxu1 %v1965_v8  ;;  %v1970_v23 = vld [vmem:[%s2122_s28 + $0x10] ss:$8 sps:$4 sm:$0xff]   ;;  %v1972_v25 = vld [vmem:[%s2122_s28 + $0x24] ss:$8 sps:$4 sm:$0xff]   ;;  %v1976_v27 = vld [vmem:[%s2122_s28 + $0x20] ss:$8 sps:$4 sm:$0xff]  }
  0x13   : > { %704 = vmatpush1.bf16.msra.mxu0 %v1947_v4  ;;  %1922 = vmatpush1.bf16.msra.mxu1 %v1947_v4  ;;  %v1971_v24 = vld [vmem:[%s2122_s28 + $0x110] ss:$8 sps:$4 sm:$0xff]   ;;  %v1974_v26 = vld [vmem:[%s2122_s28 + $0x124] ss:$8 sps:$4 sm:$0xff]   ;;  %v1977_v28 = vld [vmem:[%s2122_s28 + $0x120] ss:$8 sps:$4 sm:$0xff]  }
  0x14   : > { %705 = vmatprep.subr.bf16.mxu0 %v2064_v1  ;;  %1907 = vmatprep.subr.bf16.mxu1 %v2064_v1  ;;  %v1978_v29 = vld [vmem:[%s2122_s28 + $0x34] ss:$8 sps:$4 sm:$0xff]   ;;  %v1982_v31 = vld [vmem:[%s2122_s28 + $0x30] ss:$8 sps:$4 sm:$0xff]   ;;  %v1984_v33 = vld [vmem:[%s2122_s28 + $0x44] ss:$8 sps:$4 sm:$0xff]  }
  0x15   : > { %v1980_v30 = vld [vmem:[%s2122_s28 + $0x134] ss:$8 sps:$4 sm:$0xff]   ;;  %v1983_v32 = vld [vmem:[%s2122_s28 + $0x130] ss:$8 sps:$4 sm:$0xff]   ;;  %v1986_v34 = vld [vmem:[%s2122_s28 + $0x144] ss:$8 sps:$4 sm:$0xff]  }
  0x16   : > { %v1988_v35 = vld [vmem:[%s2122_s28 + $0x40] ss:$8 sps:$4 sm:$0xff]   ;;  %v1990_v37 = vld [vmem:[%s2122_s28 + $0x54] ss:$8 sps:$4 sm:$0xff]   ;;  %v1994_v39 = vld [vmem:[%s2122_s28 + $0x50] ss:$8 sps:$4 sm:$0xff]  }
  0x17   : > { %706 = vmatpush1.bf16.msra.mxu0 %v1948_v5  ;;  %1923 = vmatpush1.bf16.msra.mxu1 %v1948_v5  ;;  %v1989_v36 = vld [vmem:[%s2122_s28 + $0x140] ss:$8 sps:$4 sm:$0xff]   ;;  %v1992_v38 = vld [vmem:[%s2122_s28 + $0x154] ss:$8 sps:$4 sm:$0xff]   ;;  %v1995_v40 = vld [vmem:[%s2122_s28 + $0x150] ss:$8 sps:$4 sm:$0xff]  }
  0x18   : > { %707 = vmatprep.subr.bf16.mxu0 %v2064_v1  ;;  %1908 = vmatprep.subr.bf16.mxu1 %v2064_v1  ;;  %v1996_v41 = vld [vmem:[%s2122_s28 + $0x64] ss:$8 sps:$4 sm:$0xff]   ;;  %v2000_v43 = vld [vmem:[%s2122_s28 + $0x60] ss:$8 sps:$4 sm:$0xff]   ;;  %v2002_v45 = vld [vmem:[%s2122_s28 + $0x74] ss:$8 sps:$4 sm:$0xff]  }
  0x19   : > { %v1998_v42 = vld [vmem:[%s2122_s28 + $0x164] ss:$8 sps:$4 sm:$0xff]   ;;  %v2001_v44 = vld [vmem:[%s2122_s28 + $0x160] ss:$8 sps:$4 sm:$0xff]   ;;  %v2004_v46 = vld [vmem:[%s2122_s28 + $0x174] ss:$8 sps:$4 sm:$0xff]  }
  0x1a   : > { %v2006_v47 = vld [vmem:[%s2122_s28 + $0x70] ss:$8 sps:$4 sm:$0xff]   ;;  %v2008_v49 = vld [vmem:[%s2122_s28 + $0x84] ss:$8 sps:$4 sm:$0xff]   ;;  %v2012_v51 = vld [vmem:[%s2122_s28 + $0x80] ss:$8 sps:$4 sm:$0xff]  }
  0x1b   : > { %708 = vmatpush1.bf16.msra.mxu0 %v1949_v7  ;;  %1924 = vmatpush1.bf16.msra.mxu1 %v1949_v7  ;;  %v2007_v48 = vld [vmem:[%s2122_s28 + $0x170] ss:$8 sps:$4 sm:$0xff]   ;;  %v2010_v50 = vld [vmem:[%s2122_s28 + $0x184] ss:$8 sps:$4 sm:$0xff]   ;;  %v2013_v52 = vld [vmem:[%s2122_s28 + $0x180] ss:$8 sps:$4 sm:$0xff]  }
  0x1c   : > { %709 = vmatprep.subr.bf16.mxu0 %v2064_v1  ;;  %1909 = vmatprep.subr.bf16.mxu1 %v2064_v1  ;;  %v2014_v53 = vld [vmem:[%s2122_s28 + $0x94] ss:$8 sps:$4 sm:$0xff]   ;;  %v2018_v55 = vld [vmem:[%s2122_s28 + $0x90] ss:$8 sps:$4 sm:$0xff]   ;;  %v2020_v57 = vld [vmem:[%s2122_s28 + $0xa4] ss:$8 sps:$4 sm:$0xff]  }
  0x1d   : > { %v2016_v54 = vld [vmem:[%s2122_s28 + $0x194] ss:$8 sps:$4 sm:$0xff]   ;;  %v2019_v56 = vld [vmem:[%s2122_s28 + $0x190] ss:$8 sps:$4 sm:$0xff]   ;;  %v2022_v58 = vld [vmem:[%s2122_s28 + $0x1a4] ss:$8 sps:$4 sm:$0xff]  }
  0x1e   : > { %v2024_v59 = vld [vmem:[%s2122_s28 + $0xa0] ss:$8 sps:$4 sm:$0xff]   ;;  %v2026_v61 = vld [vmem:[%s2122_s28 + $0xb4] ss:$8 sps:$4 sm:$0xff]   ;;  %v2030_v63 = vld [vmem:[%s2122_s28 + $0xb0] ss:$8 sps:$4 sm:$0xff]  }
  0x1f   : > { %710 = vmatpush1.bf16.msra.mxu0 %v1950_v9  ;;  %1925 = vmatpush1.bf16.msra.mxu1 %v1950_v9  ;;  %v2025_v60 = vld [vmem:[%s2122_s28 + $0x1a0] ss:$8 sps:$4 sm:$0xff]   ;;  %v2028_v62 = vld [vmem:[%s2122_s28 + $0x1b4] ss:$8 sps:$4 sm:$0xff]   ;;  %v2031_v0 = vld [vmem:[%s2122_s28 + $0x1b0] ss:$8 sps:$4 sm:$0xff]  }
  0x20   : > { %711 = vmatprep.subr.bf16.mxu0 %v2064_v1  ;;  %1910 = vmatprep.subr.bf16.mxu1 %v2064_v1  ;;  %v2034_v2 = vld [vmem:[%s2122_s28 + $0x1c4] ss:$8 sps:$4 sm:$0xff]   ;;  %v2036_v3 = vld [vmem:[%s2122_s28 + $0xc0] ss:$8 sps:$4 sm:$0xff]   ;;  %v2038_v5 = vld [vmem:[%s2122_s28 + $0xd4] ss:$8 sps:$4 sm:$0xff]  }
  0x21   : > { %v2037_v4 = vld [vmem:[%s2122_s28 + $0x1c0] ss:$8 sps:$4 sm:$0xff]   ;;  %v2040_v6 = vld [vmem:[%s2122_s28 + $0x1d4] ss:$8 sps:$4 sm:$0xff]   ;;  %v2042_v7 = vld [vmem:[%s2122_s28 + $0xd0] ss:$8 sps:$4 sm:$0xff]  }
  0x22   : > { %v2043_v8 = vld [vmem:[%s2122_s28 + $0x1d0] ss:$8 sps:$4 sm:$0xff]   ;;  %v2044_v9 = vld [vmem:[%s2122_s28 + $0xe4] ss:$8 sps:$4 sm:$0xff]  }
  0x23   : > { %712 = vmatpush1.bf16.msra.mxu0 %v1951_v10  ;;  %1926 = vmatpush1.bf16.msra.mxu1 %v1951_v10  ;;  %v2046_v10 = vld [vmem:[%s2122_s28 + $0x1e4] ss:$8 sps:$4 sm:$0xff]  }
  0x24   : > { %713 = vmatprep.subr.bf16.mxu0 %v2064_v1  ;;  %1911 = vmatprep.subr.bf16.mxu1 %v2064_v1 }
  0x27   : > { %714 = vmatpush1.bf16.msra.mxu0 %v1952_v11  ;;  %1927 = vmatpush1.bf16.msra.mxu1 %v1952_v11  ;;  %v2048_v11 = vld [vmem:[%s2122_s28 + $0xe0] ss:$8 sps:$4 sm:$0xff]  }
  0x28   : > { %715 = vmatprep.subr.bf16.mxu0 %v2064_v1  ;;  %1912 = vmatprep.subr.bf16.mxu1 %v2064_v1 }
  0x2b   : > { %716 = vmatpush1.bf16.msra.mxu0 %v1953_v12  ;;  %1928 = vmatpush1.bf16.msra.mxu1 %v1953_v12  ;;  %v2049_v12 = vld [vmem:[%s2122_s28 + $0x1e0] ss:$8 sps:$4 sm:$0xff]  }
  0x2c   : > { %717 = vmatprep.subr.bf16.mxu0 %v2064_v1  ;;  %1913 = vmatprep.subr.bf16.mxu1 %v2064_v1 }
  0x2f   : > { %718 = vmatpush1.bf16.msra.mxu0 %v1954_v13  ;;  %1929 = vmatpush1.bf16.msra.mxu1 %v1954_v13  ;;  %v2050_v13 = vld [vmem:[%s2122_s28 + $0xf4] ss:$8 sps:$4 sm:$0xff]  }
  0x30   : > { %719 = vmatprep.subr.bf16.mxu0 %v2064_v1  ;;  %1914 = vmatprep.subr.bf16.mxu1 %v2064_v1 }
  0x33   : > { %720 = vmatpush1.bf16.msra.mxu0 %v1955_v14  ;;  %1930 = vmatpush1.bf16.msra.mxu1 %v1955_v14  ;;  %v2052_v14 = vld [vmem:[%s2122_s28 + $0x1f4] ss:$8 sps:$4 sm:$0xff]  }
  0x34   : > { %721 = vmatprep.subr.bf16.mxu0 %v2064_v1  ;;  %1915 = vmatprep.subr.bf16.mxu1 %v2064_v1 }
  0x37   : > { %722 = vmatpush1.bf16.msra.mxu0 %v1956_v15  ;;  %1931 = vmatpush1.bf16.msra.mxu1 %v1956_v15  ;;  %v2054_v15 = vld [vmem:[%s2122_s28 + $0xf0] ss:$8 sps:$4 sm:$0xff]  }
  0x38   : > { %723 = vmatprep.subr.bf16.mxu0 %v2064_v1  ;;  %1916 = vmatprep.subr.bf16.mxu1 %v2064_v1 }
  0x3b   : > { %724 = vmatpush1.bf16.msra.mxu0 %v1957_v16  ;;  %1932 = vmatpush1.bf16.msra.mxu1 %v1957_v16  ;;  %v2055_v16 = vld [vmem:[%s2122_s28 + $0x1f0] ss:$8 sps:$4 sm:$0xff]  }
  0x3c   : > { %725 = vmatprep.subr.bf16.mxu0 %v2064_v1  ;;  %1917 = vmatprep.subr.bf16.mxu1 %v2064_v1 }
  0x3f   : > { %726 = vmatpush1.bf16.msra.mxu0 %v1958_v17  ;;  %1933 = vmatpush1.bf16.msra.mxu1 %v1958_v17  ;;  %v2248_v17 = vld [vmem:[%s2357_s2] ss:$0 sm:$0xff] }
  0x40   : > { %727 = vmatprep.subr.bf16.mxu0 %v2064_v1  ;;  %1918 = vmatprep.subr.bf16.mxu1 %v2064_v1  ;;  %v2032_v1 = vld [vmem:[%s2122_s28 + $0xc4] ss:$8 sps:$4 sm:$0xff]   ;;  %s1499_s28 = sshll.u32 %s2360_s16, 2 }
  0x41   : > { %s2258_s4 = scalar_lea.vmem %s2358_s3, %s1499_s28 }
  0x43   : > { %728 = vmatpush1.bf16.msra.mxu0 %v1959_v18  ;;  %1934 = vmatpush1.bf16.msra.mxu1 %v1959_v18 }
  0x46   : > { %730 = vmatmul.mubr.bf16.vlgmr.msra.gmra.mrb[0].mxu0 %v1960_v19  ;;  %858 = vmatmul.mubr.bf16.vlgmr.msra.gmra.mrb[0].mxu1 %v1963_v20 }
  0x47   : > { %737 = vmatprep.mubr.bf16.mxu0 %v1966_v21  ;;  %865 = vmatprep.mubr.bf16.mxu1 %v1968_v22 }
  0x4e   : > { %738 = vmatmul.mubr.bf16.gmra.mrb[4].mxu0 %v1970_v23  ;;  %866 = vmatmul.mubr.bf16.gmra.mrb[4].mxu1 %v1971_v24 }
  0x4f   : > { %745 = vmatprep.mubr.bf16.mxu0 %v1972_v25  ;;  %873 = vmatprep.mubr.bf16.mxu1 %v1974_v26 }
  0x56   : > { %746 = vmatmul.mubr.bf16.gmra.mrb[8].mxu0 %v1976_v27  ;;  %874 = vmatmul.mubr.bf16.gmra.mrb[8].mxu1 %v1977_v28 }
  0x57   : > { %753 = vmatprep.mubr.bf16.mxu0 %v1978_v29  ;;  %881 = vmatprep.mubr.bf16.mxu1 %v1980_v30 }
  0x5e   : > { %754 = vmatmul.mubr.bf16.gmra.mrb[12].mxu0 %v1982_v31  ;;  %882 = vmatmul.mubr.bf16.gmra.mrb[12].mxu1 %v1983_v32 }
  0x5f   : > { %761 = vmatprep.mubr.bf16.mxu0 %v1984_v33  ;;  %889 = vmatprep.mubr.bf16.mxu1 %v1986_v34 }
  0x66   : > { %762 = vmatmul.mubr.bf16.gmra.mrb[16].mxu0 %v1988_v35  ;;  %890 = vmatmul.mubr.bf16.gmra.mrb[16].mxu1 %v1989_v36 }
  0x67   : > { %769 = vmatprep.mubr.bf16.mxu0 %v1990_v37  ;;  %897 = vmatprep.mubr.bf16.mxu1 %v1992_v38 }
  0x6e   : > { %770 = vmatmul.mubr.bf16.gmra.mrb[20].mxu0 %v1994_v39  ;;  %898 = vmatmul.mubr.bf16.gmra.mrb[20].mxu1 %v1995_v40 }
  0x6f   : > { %777 = vmatprep.mubr.bf16.mxu0 %v1996_v41  ;;  %905 = vmatprep.mubr.bf16.mxu1 %v1998_v42 }
  0x76   : > { %778 = vmatmul.mubr.bf16.gmra.mrb[24].mxu0 %v2000_v43  ;;  %906 = vmatmul.mubr.bf16.gmra.mrb[24].mxu1 %v2001_v44 }
  0x77   : > { %785 = vmatprep.mubr.bf16.mxu0 %v2002_v45  ;;  %913 = vmatprep.mubr.bf16.mxu1 %v2004_v46 }
  0x7e   : > { %786 = vmatmul.mubr.bf16.gmra.mrb[28].mxu0 %v2006_v47  ;;  %914 = vmatmul.mubr.bf16.gmra.mrb[28].mxu1 %v2007_v48 }
  0x7f   : > { %793 = vmatprep.mubr.bf16.mxu0 %v2008_v49  ;;  %921 = vmatprep.mubr.bf16.mxu1 %v2010_v50 }
  0x86   : > { %794 = vmatmul.mubr.bf16.gmra.mrb[32].mxu0 %v2012_v51  ;;  %922 = vmatmul.mubr.bf16.gmra.mrb[32].mxu1 %v2013_v52 }
  0x87   : > { %801 = vmatprep.mubr.bf16.mxu0 %v2014_v53  ;;  %929 = vmatprep.mubr.bf16.mxu1 %v2016_v54 }
  0x8e   : > { %802 = vmatmul.mubr.bf16.gmra.mrb[36].mxu0 %v2018_v55  ;;  %930 = vmatmul.mubr.bf16.gmra.mrb[36].mxu1 %v2019_v56 }
  0x8f   : > { %809 = vmatprep.mubr.bf16.mxu0 %v2020_v57  ;;  %937 = vmatprep.mubr.bf16.mxu1 %v2022_v58 }
  0x96   : > { %810 = vmatmul.mubr.bf16.gmra.mrb[40].mxu0 %v2024_v59  ;;  %938 = vmatmul.mubr.bf16.gmra.mrb[40].mxu1 %v2025_v60 }
  0x97   : > { %817 = vmatprep.mubr.bf16.mxu0 %v2026_v61  ;;  %945 = vmatprep.mubr.bf16.mxu1 %v2028_v62 }
  0x9e   : > { %818 = vmatmul.mubr.bf16.gmra.mrb[44].mxu0 %v2030_v63  ;;  %946 = vmatmul.mubr.bf16.gmra.mrb[44].mxu1 %v2031_v0 }
  0x9f   : > { %825 = vmatprep.mubr.bf16.mxu0 %v2032_v1  ;;  %953 = vmatprep.mubr.bf16.mxu1 %v2034_v2 }
  0xa6   : > { %826 = vmatmul.mubr.bf16.gmra.mrb[48].mxu0 %v2036_v3  ;;  %954 = vmatmul.mubr.bf16.gmra.mrb[48].mxu1 %v2037_v4 }
  0xa7   : > { %833 = vmatprep.mubr.bf16.mxu0 %v2038_v5  ;;  %961 = vmatprep.mubr.bf16.mxu1 %v2040_v6 }
  0xae   : > { %834 = vmatmul.mubr.bf16.gmra.mrb[52].mxu0 %v2042_v7  ;;  %962 = vmatmul.mubr.bf16.gmra.mrb[52].mxu1 %v2043_v8 }
  0xaf   : > { %841 = vmatprep.mubr.bf16.mxu0 %v2044_v9  ;;  %969 = vmatprep.mubr.bf16.mxu1 %v2046_v10 }
  0xb6   : > { %842 = vmatmul.mubr.bf16.gmra.mrb[56].mxu0 %v2048_v11  ;;  %970 = vmatmul.mubr.bf16.gmra.mrb[56].mxu1 %v2049_v12 }
  0xb7   : > { %849 = vmatprep.mubr.bf16.mxu0 %v2050_v13  ;;  %977 = vmatprep.mubr.bf16.mxu1 %v2052_v14 }
  0xbe   : > { %850 = vmatmul.mubr.bf16.gmra.mrb[60].mxu0 %v2054_v15  ;;  %978 = vmatmul.mubr.bf16.gmra.mrb[60].mxu1 %v2055_v16 }
 0x119   : > { %v731_v18 = vpop.f32.mrb[0].mxu0  ;;  %v859_v19 = vpop.f32.mrb[0].mxu1 }
 0x11a   : > { %v732_v20 = vadd.f32 %v2248_v17, %v731_v18  ;;  %v860_v21 = vadd.f32 %v2248_v17, %v859_v19  ;;  %v733_v22 = vpop.f32.mrb[1].mxu0  ;;  %v861_v23 = vpop.f32.mrb[1].mxu1 }
 0x11b   : > { %v734_v24 = vpop.f32.mrb[2].mxu0  ;;  %v862_v25 = vpop.f32.mrb[2].mxu1 }
 0x11c   : > { %v986_v26 = vmul.f32 0.01, %v732_v20  ;;  %v1018_v27 = vmul.f32 0.01, %v860_v21  ;;  %v735_v28 = vadd.f32 %v2248_v17, %v734_v24  ;;  %v863_v29 = vadd.f32 %v2248_v17, %v862_v25  ;;  %v736_v30 = vpop.f32.mrb[3].mxu0  ;;  %v864_v31 = vpop.f32.mrb[3].mxu1 }
 0x11e   : > { %v987_v32 = vmul.f32 0.01, %v735_v28  ;;  %v1019_v33 = vmul.f32 0.01, %v863_v29  ;;  %v1050_v34 = vmax.f32 %v732_v20, %v986_v26  ;;  %v1082_v35 = vmax.f32 %v860_v21, %v1018_v27 }
 0x120   : > { %v1051_v36 = vmax.f32 %v735_v28, %v987_v32  ;;  %v1083_v37 = vmax.f32 %v863_v29, %v1019_v33 }
 0x121   : > { %v739_v38 = vpop.f32.mrb[4].mxu0  ;;  %v867_v39 = vpop.f32.mrb[4].mxu1 }
 0x122   : > { %v1715_v40 = vpack.c.bf16 %v1051_v36, %v1050_v34  ;;  %v1795_v41 = vpack.c.bf16 %v1083_v37, %v1082_v35  ;;  %v740_v42 = vadd.f32 %v2248_v17, %v739_v38  ;;  %v868_v43 = vadd.f32 %v2248_v17, %v867_v39  ;;  %v741_v44 = vpop.f32.mrb[5].mxu0  ;;  %v869_v45 = vpop.f32.mrb[5].mxu1 }
 0x123   : > { %v742_v46 = vpop.f32.mrb[6].mxu0  ;;  %v870_v47 = vpop.f32.mrb[6].mxu1 }
 0x124   : > { %1716 = vst [vmem:[%s2258_s4] sm:$0xff] %v1715_v40   ;;  %1887 = vst [vmem:[%s2258_s4 + $0x80] sm:$0xff] %v1795_v41   ;;  %v988_v48 = vmul.f32 0.01, %v740_v42  ;;  %v1020_v49 = vmul.f32 0.01, %v868_v43  ;;  %v743_v50 = vadd.f32 %v2248_v17, %v742_v46  ;;  %v871_v51 = vadd.f32 %v2248_v17, %v870_v47  ;;  %v744_v52 = vpop.f32.mrb[7].mxu0 }
 0x125   : > { %v872_v53 = vpop.f32.mrb[7].mxu1 }
 0x126   : > { %v989_v54 = vmul.f32 0.01, %v743_v50  ;;  %v1021_v55 = vmul.f32 0.01, %v871_v51  ;;  %v1052_v56 = vmax.f32 %v740_v42, %v988_v48  ;;  %v1084_v57 = vmax.f32 %v868_v43, %v1020_v49 }
 0x128   : > { %v1053_v58 = vmax.f32 %v743_v50, %v989_v54  ;;  %v1085_v59 = vmax.f32 %v871_v51, %v1021_v55 }
 0x129   : > { %v747_v60 = vpop.f32.mrb[8].mxu0  ;;  %v875_v61 = vpop.f32.mrb[8].mxu1 }
 0x12a   : > { %v1720_v62 = vpack.c.bf16 %v1053_v58, %v1052_v56  ;;  %v1800_v63 = vpack.c.bf16 %v1085_v59, %v1084_v57  ;;  %v748_v0 = vadd.f32 %v2248_v17, %v747_v60  ;;  %v876_v1 = vadd.f32 %v2248_v17, %v875_v61  ;;  %v749_v2 = vpop.f32.mrb[9].mxu0  ;;  %v877_v3 = vpop.f32.mrb[9].mxu1 }
 0x12b   : > { %v750_v4 = vpop.f32.mrb[10].mxu0  ;;  %v878_v5 = vpop.f32.mrb[10].mxu1 }
 0x12c   : > { %1872 = vst [vmem:[%s2258_s4 + $0x8] sm:$0xff] %v1720_v62   ;;  %1888 = vst [vmem:[%s2258_s4 + $0x88] sm:$0xff] %v1800_v63   ;;  %v990_v6 = vmul.f32 0.01, %v748_v0  ;;  %v1022_v7 = vmul.f32 0.01, %v876_v1  ;;  %v751_v8 = vadd.f32 %v2248_v17, %v750_v4  ;;  %v879_v9 = vadd.f32 %v2248_v17, %v878_v5 }
 0x12d   : > { %v752_v10 = vpop.f32.mrb[11].mxu0  ;;  %v880_v11 = vpop.f32.mrb[11].mxu1 }
 0x12e   : > { %v991_v12 = vmul.f32 0.01, %v751_v8  ;;  %v1023_v13 = vmul.f32 0.01, %v879_v9  ;;  %v1054_v14 = vmax.f32 %v748_v0, %v990_v6  ;;  %v1086_v15 = vmax.f32 %v876_v1, %v1022_v7 }
 0x130   : > { %v1055_v16 = vmax.f32 %v751_v8, %v991_v12  ;;  %v1087_v18 = vmax.f32 %v879_v9, %v1023_v13 }
 0x131   : > { %v755_v19 = vpop.f32.mrb[12].mxu0  ;;  %v883_v20 = vpop.f32.mrb[12].mxu1 }
 0x132   : > { %v1725_v21 = vpack.c.bf16 %v1055_v16, %v1054_v14  ;;  %v1805_v22 = vpack.c.bf16 %v1087_v18, %v1086_v15  ;;  %v756_v23 = vadd.f32 %v2248_v17, %v755_v19  ;;  %v884_v24 = vadd.f32 %v2248_v17, %v883_v20  ;;  %v757_v25 = vpop.f32.mrb[13].mxu0  ;;  %v885_v26 = vpop.f32.mrb[13].mxu1 }
 0x133   : > { %v758_v27 = vpop.f32.mrb[14].mxu0  ;;  %v886_v28 = vpop.f32.mrb[14].mxu1 }
 0x134   : > { %1873 = vst [vmem:[%s2258_s4 + $0x10] sm:$0xff] %v1725_v21   ;;  %1889 = vst [vmem:[%s2258_s4 + $0x90] sm:$0xff] %v1805_v22   ;;  %v992_v29 = vmul.f32 0.01, %v756_v23  ;;  %v1024_v30 = vmul.f32 0.01, %v884_v24  ;;  %v759_v31 = vadd.f32 %v2248_v17, %v758_v27  ;;  %v887_v32 = vadd.f32 %v2248_v17, %v886_v28 }
 0x135   : > { %v760_v33 = vpop.f32.mrb[15].mxu0  ;;  %v888_v34 = vpop.f32.mrb[15].mxu1 }
 0x136   : > { %v993_v35 = vmul.f32 0.01, %v759_v31  ;;  %v1025_v36 = vmul.f32 0.01, %v887_v32  ;;  %v1056_v37 = vmax.f32 %v756_v23, %v992_v29  ;;  %v1088_v38 = vmax.f32 %v884_v24, %v1024_v30 }
 0x138   : > { %v1057_v39 = vmax.f32 %v759_v31, %v993_v35  ;;  %v1089_v40 = vmax.f32 %v887_v32, %v1025_v36 }
 0x139   : > { %v763_v41 = vpop.f32.mrb[16].mxu0  ;;  %v891_v42 = vpop.f32.mrb[16].mxu1 }
 0x13a   : > { %v1730_v43 = vpack.c.bf16 %v1057_v39, %v1056_v37  ;;  %v1810_v44 = vpack.c.bf16 %v1089_v40, %v1088_v38  ;;  %v764_v45 = vadd.f32 %v2248_v17, %v763_v41  ;;  %v892_v46 = vadd.f32 %v2248_v17, %v891_v42  ;;  %v765_v47 = vpop.f32.mrb[17].mxu0  ;;  %v893_v48 = vpop.f32.mrb[17].mxu1 }
 0x13b   : > { %v766_v49 = vpop.f32.mrb[18].mxu0  ;;  %v894_v50 = vpop.f32.mrb[18].mxu1 }
 0x13c   : > { %1874 = vst [vmem:[%s2258_s4 + $0x18] sm:$0xff] %v1730_v43   ;;  %1890 = vst [vmem:[%s2258_s4 + $0x98] sm:$0xff] %v1810_v44   ;;  %v994_v51 = vmul.f32 0.01, %v764_v45  ;;  %v1026_v52 = vmul.f32 0.01, %v892_v46  ;;  %v767_v53 = vadd.f32 %v2248_v17, %v766_v49  ;;  %v895_v54 = vadd.f32 %v2248_v17, %v894_v50 }
 0x13d   : > { %v768_v55 = vpop.f32.mrb[19].mxu0  ;;  %v896_v56 = vpop.f32.mrb[19].mxu1 }
 0x13e   : > { %v995_v57 = vmul.f32 0.01, %v767_v53  ;;  %v1027_v58 = vmul.f32 0.01, %v895_v54  ;;  %v1058_v59 = vmax.f32 %v764_v45, %v994_v51  ;;  %v1090_v60 = vmax.f32 %v892_v46, %v1026_v52 }
 0x140   : > { %v1059_v61 = vmax.f32 %v767_v53, %v995_v57  ;;  %v1091_v62 = vmax.f32 %v895_v54, %v1027_v58 }
 0x141   : > { %v771_v63 = vpop.f32.mrb[20].mxu0  ;;  %v899_v0 = vpop.f32.mrb[20].mxu1 }
 0x142   : > { %v1735_v1 = vpack.c.bf16 %v1059_v61, %v1058_v59  ;;  %v1815_v2 = vpack.c.bf16 %v1091_v62, %v1090_v60  ;;  %v772_v3 = vadd.f32 %v2248_v17, %v771_v63  ;;  %v900_v4 = vadd.f32 %v2248_v17, %v899_v0  ;;  %v773_v5 = vpop.f32.mrb[21].mxu0  ;;  %v901_v6 = vpop.f32.mrb[21].mxu1 }
 0x143   : > { %v774_v7 = vpop.f32.mrb[22].mxu0  ;;  %v902_v8 = vpop.f32.mrb[22].mxu1 }
 0x144   : > { %1875 = vst [vmem:[%s2258_s4 + $0x20] sm:$0xff] %v1735_v1   ;;  %1891 = vst [vmem:[%s2258_s4 + $0xa0] sm:$0xff] %v1815_v2   ;;  %v996_v9 = vmul.f32 0.01, %v772_v3  ;;  %v1028_v10 = vmul.f32 0.01, %v900_v4  ;;  %v775_v11 = vadd.f32 %v2248_v17, %v774_v7  ;;  %v903_v12 = vadd.f32 %v2248_v17, %v902_v8 }
 0x145   : > { %v776_v13 = vpop.f32.mrb[23].mxu0  ;;  %v904_v14 = vpop.f32.mrb[23].mxu1 }
 0x146   : > { %v997_v15 = vmul.f32 0.01, %v775_v11  ;;  %v1029_v16 = vmul.f32 0.01, %v903_v12  ;;  %v1060_v18 = vmax.f32 %v772_v3, %v996_v9  ;;  %v1092_v19 = vmax.f32 %v900_v4, %v1028_v10 }
 0x148   : > { %v1061_v20 = vmax.f32 %v775_v11, %v997_v15  ;;  %v1093_v21 = vmax.f32 %v903_v12, %v1029_v16 }
 0x149   : > { %v779_v22 = vpop.f32.mrb[24].mxu0  ;;  %v907_v23 = vpop.f32.mrb[24].mxu1 }
 0x14a   : > { %v1740_v24 = vpack.c.bf16 %v1061_v20, %v1060_v18  ;;  %v1820_v25 = vpack.c.bf16 %v1093_v21, %v1092_v19  ;;  %v780_v26 = vadd.f32 %v2248_v17, %v779_v22  ;;  %v908_v27 = vadd.f32 %v2248_v17, %v907_v23  ;;  %v781_v28 = vpop.f32.mrb[25].mxu0  ;;  %v909_v29 = vpop.f32.mrb[25].mxu1 }
 0x14b   : > { %v782_v30 = vpop.f32.mrb[26].mxu0  ;;  %v910_v31 = vpop.f32.mrb[26].mxu1 }
 0x14c   : > { %1876 = vst [vmem:[%s2258_s4 + $0x28] sm:$0xff] %v1740_v24   ;;  %1892 = vst [vmem:[%s2258_s4 + $0xa8] sm:$0xff] %v1820_v25   ;;  %v998_v32 = vmul.f32 0.01, %v780_v26  ;;  %v1030_v33 = vmul.f32 0.01, %v908_v27  ;;  %v783_v34 = vadd.f32 %v2248_v17, %v782_v30  ;;  %v911_v35 = vadd.f32 %v2248_v17, %v910_v31 }
 0x14d   : > { %v784_v36 = vpop.f32.mrb[27].mxu0  ;;  %v912_v37 = vpop.f32.mrb[27].mxu1 }
 0x14e   : > { %v999_v38 = vmul.f32 0.01, %v783_v34  ;;  %v1031_v39 = vmul.f32 0.01, %v911_v35  ;;  %v1062_v40 = vmax.f32 %v780_v26, %v998_v32  ;;  %v1094_v41 = vmax.f32 %v908_v27, %v1030_v33 }
 0x150   : > { %v1063_v42 = vmax.f32 %v783_v34, %v999_v38  ;;  %v1095_v43 = vmax.f32 %v911_v35, %v1031_v39 }
 0x151   : > { %v787_v44 = vpop.f32.mrb[28].mxu0  ;;  %v915_v45 = vpop.f32.mrb[28].mxu1 }
 0x152   : > { %v1745_v46 = vpack.c.bf16 %v1063_v42, %v1062_v40  ;;  %v1825_v47 = vpack.c.bf16 %v1095_v43, %v1094_v41  ;;  %v788_v48 = vadd.f32 %v2248_v17, %v787_v44  ;;  %v916_v49 = vadd.f32 %v2248_v17, %v915_v45  ;;  %v789_v50 = vpop.f32.mrb[29].mxu0  ;;  %v917_v51 = vpop.f32.mrb[29].mxu1 }
 0x153   : > { %v790_v52 = vpop.f32.mrb[30].mxu0  ;;  %v918_v53 = vpop.f32.mrb[30].mxu1 }
 0x154   : > { %1877 = vst [vmem:[%s2258_s4 + $0x30] sm:$0xff] %v1745_v46   ;;  %1893 = vst [vmem:[%s2258_s4 + $0xb0] sm:$0xff] %v1825_v47   ;;  %v1000_v54 = vmul.f32 0.01, %v788_v48  ;;  %v1032_v55 = vmul.f32 0.01, %v916_v49  ;;  %v791_v56 = vadd.f32 %v2248_v17, %v790_v52  ;;  %v919_v57 = vadd.f32 %v2248_v17, %v918_v53 }
 0x155   : > { %v792_v58 = vpop.f32.mrb[31].mxu0  ;;  %v920_v59 = vpop.f32.mrb[31].mxu1 }
 0x156   : > { %v1001_v60 = vmul.f32 0.01, %v791_v56  ;;  %v1033_v61 = vmul.f32 0.01, %v919_v57  ;;  %v1064_v62 = vmax.f32 %v788_v48, %v1000_v54  ;;  %v1096_v63 = vmax.f32 %v916_v49, %v1032_v55 }
 0x158   : > { %v1065_v0 = vmax.f32 %v791_v56, %v1001_v60  ;;  %v1097_v1 = vmax.f32 %v919_v57, %v1033_v61 }
 0x159   : > { %v795_v2 = vpop.f32.mrb[32].mxu0  ;;  %v923_v3 = vpop.f32.mrb[32].mxu1 }
 0x15a   : > { %v1750_v4 = vpack.c.bf16 %v1065_v0, %v1064_v62  ;;  %v1830_v5 = vpack.c.bf16 %v1097_v1, %v1096_v63  ;;  %v796_v6 = vadd.f32 %v2248_v17, %v795_v2  ;;  %v924_v7 = vadd.f32 %v2248_v17, %v923_v3  ;;  %v797_v8 = vpop.f32.mrb[33].mxu0  ;;  %v925_v9 = vpop.f32.mrb[33].mxu1 }
 0x15b   : > { %v798_v10 = vpop.f32.mrb[34].mxu0  ;;  %v926_v11 = vpop.f32.mrb[34].mxu1 }
 0x15c   : > { %1878 = vst [vmem:[%s2258_s4 + $0x38] sm:$0xff] %v1750_v4   ;;  %1894 = vst [vmem:[%s2258_s4 + $0xb8] sm:$0xff] %v1830_v5   ;;  %v1002_v12 = vmul.f32 0.01, %v796_v6  ;;  %v1034_v13 = vmul.f32 0.01, %v924_v7  ;;  %v799_v14 = vadd.f32 %v2248_v17, %v798_v10  ;;  %v927_v15 = vadd.f32 %v2248_v17, %v926_v11 }
 0x15d   : > { %v800_v16 = vpop.f32.mrb[35].mxu0  ;;  %v928_v18 = vpop.f32.mrb[35].mxu1 }
 0x15e   : > { %v1003_v19 = vmul.f32 0.01, %v799_v14  ;;  %v1035_v20 = vmul.f32 0.01, %v927_v15  ;;  %v1066_v21 = vmax.f32 %v796_v6, %v1002_v12  ;;  %v1098_v22 = vmax.f32 %v924_v7, %v1034_v13 }
 0x160   : > { %v1067_v23 = vmax.f32 %v799_v14, %v1003_v19  ;;  %v1099_v24 = vmax.f32 %v927_v15, %v1035_v20 }
 0x161   : > { %v803_v25 = vpop.f32.mrb[36].mxu0  ;;  %v931_v26 = vpop.f32.mrb[36].mxu1 }
 0x162   : > { %v1755_v27 = vpack.c.bf16 %v1067_v23, %v1066_v21  ;;  %v1835_v28 = vpack.c.bf16 %v1099_v24, %v1098_v22  ;;  %v804_v29 = vadd.f32 %v2248_v17, %v803_v25  ;;  %v932_v30 = vadd.f32 %v2248_v17, %v931_v26  ;;  %v805_v31 = vpop.f32.mrb[37].mxu0  ;;  %v933_v32 = vpop.f32.mrb[37].mxu1 }
 0x163   : > { %v806_v33 = vpop.f32.mrb[38].mxu0  ;;  %v934_v34 = vpop.f32.mrb[38].mxu1 }
 0x164   : > { %1879 = vst [vmem:[%s2258_s4 + $0x40] sm:$0xff] %v1755_v27   ;;  %1895 = vst [vmem:[%s2258_s4 + $0xc0] sm:$0xff] %v1835_v28   ;;  %v1004_v35 = vmul.f32 0.01, %v804_v29  ;;  %v1036_v36 = vmul.f32 0.01, %v932_v30  ;;  %v807_v37 = vadd.f32 %v2248_v17, %v806_v33  ;;  %v935_v38 = vadd.f32 %v2248_v17, %v934_v34 }
 0x165   : > { %v808_v39 = vpop.f32.mrb[39].mxu0  ;;  %v936_v40 = vpop.f32.mrb[39].mxu1 }
 0x166   : > { %v1005_v41 = vmul.f32 0.01, %v807_v37  ;;  %v1037_v42 = vmul.f32 0.01, %v935_v38  ;;  %v1068_v43 = vmax.f32 %v804_v29, %v1004_v35  ;;  %v1100_v44 = vmax.f32 %v932_v30, %v1036_v36 }
 0x168   : > { %v1069_v45 = vmax.f32 %v807_v37, %v1005_v41  ;;  %v1101_v46 = vmax.f32 %v935_v38, %v1037_v42 }
 0x169   : > { %v811_v47 = vpop.f32.mrb[40].mxu0  ;;  %v939_v48 = vpop.f32.mrb[40].mxu1 }
 0x16a   : > { %v1760_v49 = vpack.c.bf16 %v1069_v45, %v1068_v43  ;;  %v1840_v50 = vpack.c.bf16 %v1101_v46, %v1100_v44  ;;  %v812_v51 = vadd.f32 %v2248_v17, %v811_v47  ;;  %v940_v52 = vadd.f32 %v2248_v17, %v939_v48  ;;  %v813_v53 = vpop.f32.mrb[41].mxu0  ;;  %v941_v54 = vpop.f32.mrb[41].mxu1 }
 0x16b   : > { %v814_v55 = vpop.f32.mrb[42].mxu0  ;;  %v942_v56 = vpop.f32.mrb[42].mxu1 }
 0x16c   : > { %1880 = vst [vmem:[%s2258_s4 + $0x48] sm:$0xff] %v1760_v49   ;;  %1896 = vst [vmem:[%s2258_s4 + $0xc8] sm:$0xff] %v1840_v50   ;;  %v1006_v57 = vmul.f32 0.01, %v812_v51  ;;  %v1038_v58 = vmul.f32 0.01, %v940_v52  ;;  %v815_v59 = vadd.f32 %v2248_v17, %v814_v55  ;;  %v943_v60 = vadd.f32 %v2248_v17, %v942_v56 }
 0x16d   : > { %v816_v61 = vpop.f32.mrb[43].mxu0  ;;  %v944_v62 = vpop.f32.mrb[43].mxu1 }
 0x16e   : > { %v1007_v63 = vmul.f32 0.01, %v815_v59  ;;  %v1039_v0 = vmul.f32 0.01, %v943_v60  ;;  %v1070_v1 = vmax.f32 %v812_v51, %v1006_v57  ;;  %v1102_v2 = vmax.f32 %v940_v52, %v1038_v58 }
 0x170   : > { %v1071_v3 = vmax.f32 %v815_v59, %v1007_v63  ;;  %v1103_v4 = vmax.f32 %v943_v60, %v1039_v0 }
 0x171   : > { %v819_v5 = vpop.f32.mrb[44].mxu0  ;;  %v947_v6 = vpop.f32.mrb[44].mxu1 }
 0x172   : > { %v1765_v7 = vpack.c.bf16 %v1071_v3, %v1070_v1  ;;  %v1845_v8 = vpack.c.bf16 %v1103_v4, %v1102_v2  ;;  %v820_v9 = vadd.f32 %v2248_v17, %v819_v5  ;;  %v948_v10 = vadd.f32 %v2248_v17, %v947_v6  ;;  %v821_v11 = vpop.f32.mrb[45].mxu0  ;;  %v949_v12 = vpop.f32.mrb[45].mxu1 }
 0x173   : > { %v822_v13 = vpop.f32.mrb[46].mxu0  ;;  %v950_v14 = vpop.f32.mrb[46].mxu1 }
 0x174   : > { %1881 = vst [vmem:[%s2258_s4 + $0x50] sm:$0xff] %v1765_v7   ;;  %1897 = vst [vmem:[%s2258_s4 + $0xd0] sm:$0xff] %v1845_v8   ;;  %v1008_v15 = vmul.f32 0.01, %v820_v9  ;;  %v1040_v16 = vmul.f32 0.01, %v948_v10  ;;  %v823_v18 = vadd.f32 %v2248_v17, %v822_v13  ;;  %v951_v19 = vadd.f32 %v2248_v17, %v950_v14 }
 0x175   : > { %v824_v20 = vpop.f32.mrb[47].mxu0  ;;  %v952_v21 = vpop.f32.mrb[47].mxu1 }
 0x176   : > { %v1009_v22 = vmul.f32 0.01, %v823_v18  ;;  %v1041_v23 = vmul.f32 0.01, %v951_v19  ;;  %v1072_v24 = vmax.f32 %v820_v9, %v1008_v15  ;;  %v1104_v25 = vmax.f32 %v948_v10, %v1040_v16 }
 0x178   : > { %v1073_v26 = vmax.f32 %v823_v18, %v1009_v22  ;;  %v1105_v27 = vmax.f32 %v951_v19, %v1041_v23 }
 0x179   : > { %v827_v28 = vpop.f32.mrb[48].mxu0  ;;  %v955_v29 = vpop.f32.mrb[48].mxu1 }
 0x17a   : > { %v1770_v30 = vpack.c.bf16 %v1073_v26, %v1072_v24  ;;  %v1850_v31 = vpack.c.bf16 %v1105_v27, %v1104_v25  ;;  %v828_v32 = vadd.f32 %v2248_v17, %v827_v28  ;;  %v956_v33 = vadd.f32 %v2248_v17, %v955_v29  ;;  %v829_v34 = vpop.f32.mrb[49].mxu0  ;;  %v957_v35 = vpop.f32.mrb[49].mxu1 }
 0x17b   : > { %v830_v36 = vpop.f32.mrb[50].mxu0  ;;  %v958_v37 = vpop.f32.mrb[50].mxu1 }
 0x17c   : > { %1882 = vst [vmem:[%s2258_s4 + $0x58] sm:$0xff] %v1770_v30   ;;  %1898 = vst [vmem:[%s2258_s4 + $0xd8] sm:$0xff] %v1850_v31   ;;  %v1010_v38 = vmul.f32 0.01, %v828_v32  ;;  %v1042_v39 = vmul.f32 0.01, %v956_v33  ;;  %v831_v40 = vadd.f32 %v2248_v17, %v830_v36  ;;  %v959_v41 = vadd.f32 %v2248_v17, %v958_v37 }
 0x17d   : > { %v832_v42 = vpop.f32.mrb[51].mxu0  ;;  %v960_v43 = vpop.f32.mrb[51].mxu1 }
 0x17e   : > { %v1011_v44 = vmul.f32 0.01, %v831_v40  ;;  %v1043_v45 = vmul.f32 0.01, %v959_v41  ;;  %v1074_v46 = vmax.f32 %v828_v32, %v1010_v38  ;;  %v1106_v47 = vmax.f32 %v956_v33, %v1042_v39 }
 0x180   : > { %v1075_v48 = vmax.f32 %v831_v40, %v1011_v44  ;;  %v1107_v49 = vmax.f32 %v959_v41, %v1043_v45 }
 0x181   : > { %v835_v50 = vpop.f32.mrb[52].mxu0  ;;  %v963_v51 = vpop.f32.mrb[52].mxu1 }
 0x182   : > { %v1775_v52 = vpack.c.bf16 %v1075_v48, %v1074_v46  ;;  %v1855_v53 = vpack.c.bf16 %v1107_v49, %v1106_v47  ;;  %v836_v54 = vadd.f32 %v2248_v17, %v835_v50  ;;  %v964_v55 = vadd.f32 %v2248_v17, %v963_v51  ;;  %v837_v56 = vpop.f32.mrb[53].mxu0  ;;  %v965_v57 = vpop.f32.mrb[53].mxu1 }
 0x183   : > { %v838_v58 = vpop.f32.mrb[54].mxu0  ;;  %v966_v59 = vpop.f32.mrb[54].mxu1 }
 0x184   : > { %1883 = vst [vmem:[%s2258_s4 + $0x60] sm:$0xff] %v1775_v52   ;;  %1899 = vst [vmem:[%s2258_s4 + $0xe0] sm:$0xff] %v1855_v53   ;;  %v1012_v60 = vmul.f32 0.01, %v836_v54  ;;  %v1044_v61 = vmul.f32 0.01, %v964_v55  ;;  %v839_v62 = vadd.f32 %v2248_v17, %v838_v58  ;;  %v967_v63 = vadd.f32 %v2248_v17, %v966_v59 }
 0x185   : > { %v840_v0 = vpop.f32.mrb[55].mxu0  ;;  %v968_v1 = vpop.f32.mrb[55].mxu1 }
 0x186   : > { %v1013_v2 = vmul.f32 0.01, %v839_v62  ;;  %v1045_v3 = vmul.f32 0.01, %v967_v63  ;;  %v1076_v4 = vmax.f32 %v836_v54, %v1012_v60  ;;  %v1108_v5 = vmax.f32 %v964_v55, %v1044_v61 }
 0x188   : > { %v1077_v6 = vmax.f32 %v839_v62, %v1013_v2  ;;  %v1109_v7 = vmax.f32 %v967_v63, %v1045_v3 }
 0x189   : > { %v843_v8 = vpop.f32.mrb[56].mxu0  ;;  %v971_v9 = vpop.f32.mrb[56].mxu1 }
 0x18a   : > { %v1780_v10 = vpack.c.bf16 %v1077_v6, %v1076_v4  ;;  %v1860_v11 = vpack.c.bf16 %v1109_v7, %v1108_v5  ;;  %v844_v12 = vadd.f32 %v2248_v17, %v843_v8  ;;  %v972_v13 = vadd.f32 %v2248_v17, %v971_v9  ;;  %v845_v14 = vpop.f32.mrb[57].mxu0  ;;  %v973_v15 = vpop.f32.mrb[57].mxu1 }
 0x18b   : > { %v846_v16 = vpop.f32.mrb[58].mxu0  ;;  %v974_v18 = vpop.f32.mrb[58].mxu1 }
 0x18c   : > { %1884 = vst [vmem:[%s2258_s4 + $0x68] sm:$0xff] %v1780_v10   ;;  %1900 = vst [vmem:[%s2258_s4 + $0xe8] sm:$0xff] %v1860_v11   ;;  %v1014_v19 = vmul.f32 0.01, %v844_v12  ;;  %v1046_v20 = vmul.f32 0.01, %v972_v13  ;;  %v847_v21 = vadd.f32 %v2248_v17, %v846_v16  ;;  %v975_v22 = vadd.f32 %v2248_v17, %v974_v18 }
 0x18d   : > { %v848_v23 = vpop.f32.mrb[59].mxu0  ;;  %v976_v24 = vpop.f32.mrb[59].mxu1 }
 0x18e   : > { %v1015_v25 = vmul.f32 0.01, %v847_v21  ;;  %v1047_v26 = vmul.f32 0.01, %v975_v22  ;;  %v1078_v27 = vmax.f32 %v844_v12, %v1014_v19  ;;  %v1110_v28 = vmax.f32 %v972_v13, %v1046_v20 }
 0x190   : > { %v1079_v29 = vmax.f32 %v847_v21, %v1015_v25  ;;  %v1111_v30 = vmax.f32 %v975_v22, %v1047_v26 }
 0x191   : > { %v851_v31 = vpop.f32.mrb[60].mxu0  ;;  %v979_v32 = vpop.f32.mrb[60].mxu1 }
 0x192   : > { %v1785_v33 = vpack.c.bf16 %v1079_v29, %v1078_v27  ;;  %v1865_v34 = vpack.c.bf16 %v1111_v30, %v1110_v28  ;;  %v852_v35 = vadd.f32 %v2248_v17, %v851_v31  ;;  %v980_v36 = vadd.f32 %v2248_v17, %v979_v32  ;;  %v853_v37 = vpop.f32.mrb[61].mxu0  ;;  %v981_v38 = vpop.f32.mrb[61].mxu1 }
 0x193   : > { %v854_v39 = vpop.f32.mrb[62].mxu0  ;;  %v982_v40 = vpop.f32.mrb[62].mxu1 }
 0x194   : > { %1885 = vst [vmem:[%s2258_s4 + $0x70] sm:$0xff] %v1785_v33   ;;  %1901 = vst [vmem:[%s2258_s4 + $0xf0] sm:$0xff] %v1865_v34   ;;  %v1016_v41 = vmul.f32 0.01, %v852_v35  ;;  %v1048_v42 = vmul.f32 0.01, %v980_v36  ;;  %v855_v43 = vadd.f32 %v2248_v17, %v854_v39  ;;  %v983_v44 = vadd.f32 %v2248_v17, %v982_v40 }
 0x195   : > { %v856_v45 = vpop.f32.mrb[63].mxu0  ;;  %v984_v46 = vpop.f32.mrb[63].mxu1 }
 0x196   : > { %v1017_v47 = vmul.f32 0.01, %v855_v43  ;;  %v1049_v48 = vmul.f32 0.01, %v983_v44  ;;  %v1080_v49 = vmax.f32 %v852_v35, %v1016_v41  ;;  %v1112_v50 = vmax.f32 %v980_v36, %v1048_v42 }
 0x198   : > { %v1081_v51 = vmax.f32 %v855_v43, %v1017_v47  ;;  %v1113_v52 = vmax.f32 %v983_v44, %v1049_v48 }
 0x19a   : > { %v1790_v53 = vpack.c.bf16 %v1081_v51, %v1080_v49  ;;  %v1870_v54 = vpack.c.bf16 %v1113_v52, %v1112_v50 }
 0x19c   : > { %1886 = vst [vmem:[%s2258_s4 + $0x78] sm:$0xff] %v1790_v53   ;;  %1902 = vst [vmem:[%s2258_s4 + $0xf8] sm:$0xff] %v1870_v54  }
 0x19d PF: > { %s13_s12 = sadd.s32 1, %s2062_s12  }
 0x19e   : > { %p10_p4 = scmp.ge.s32.totalorder %s13_s12, 4  }
 0x1a0   :  { %12 = sbr.rel (!%p10_p4) target bundleno = 1 (0x1), region = 62 }

// kernel: appearance_autoencoder_forward.18
= control target key start
LH: loop header
LB: loop body
LE: loop exit
PB: predicated region body
PF: predicated region fallthrough
CT: control target
= control target key end

     0   :  { %s1688_s12 = smov 0   ;;  %s1969_s0 = inlined_call_operand.vmem [shape: bf16[2560,128], index: 0, kind: input, shape index: {}]   ;;  %s1970_s1 = inlined_call_operand.vmem [shape: bf16[128,64], index: 1, kind: input, shape index: {}]   ;;  %s1971_s2 = inlined_call_operand.vmem [shape: f32[1,64], index: 2, kind: input, shape index: {}]   ;;  %s1972_s3 = inlined_call_operand.vmem [shape: bf16[2560,64], index: 3, kind: output, shape index: {}]  }
   0x1 LB: > { %s1296_s13 = sadd.s32 4294967295, %s1666_s12   ;;  %p1300_p0 = scmp.ge.s32.totalorder %s1666_s12, 1  ;;  %s1666_s12 = sphi %s1688_s12, %s13_s12  }
   0x2   : > { %p138_p1 = scmp.lt.s32.totalorder %s1666_s12, 6 }
   0x4   : > { %p139_p2 = pnand %p1300_p0, %p138_p1 }
   0x5   : > { %v1620_v0 = vld [vmem:[%s1970_s1] sm:$0xff] (!%p139_p2)   ;;  %s1301_s16 = sshll.u32 (!%p139_p2), %s1296_s13, 6  ;;  %v1621_v1 = vld [vmem:[%s1970_s1 + $0x8] sm:$0xff] (!%p139_p2)   ;;  %v1622_v2 = vld [vmem:[%s1970_s1 + $0x10] sm:$0xff] (!%p139_p2)   ;;  %vm1175_vm0 = vcmask (!%p139_p2), 519168  }
   0x6   : > { %142 = sbr.rel (%p139_p2) target bundleno = 323 (0x143), region = 32  ;;  %p163_p3 = scmp.lt.s32.totalorder (!%p139_p2), %s1301_s16, 319  ;;  %1516 = vmatprep.subr.bf16.mxu0 (!%p139_p2), %v1620_v0  ;;  %1596 = vmatprep.subr.bf16.mxu1 (!%p139_p2), %v1620_v0  ;;  %v1623_v3 = vld [vmem:[%s1970_s1 + $0x18] sm:$0xff] (!%p139_p2)   ;;  %v1624_v6 = vld [vmem:[%s1970_s1 + $0x20] sm:$0xff] (!%p139_p2)   ;;  %v1625_v7 = vld [vmem:[%s1970_s1 + $0x28] sm:$0xff] (!%p139_p2)  }
   0x7   : > { %1517 = vmatpush3.bf16.msra.mxu0 (!%p139_p2), %v1620_v0  ;;  %1604 = vmatpush3.bf16.msra.mxu1 (!%p139_p2), %v1620_v0  ;;  %v1626_v8 = vld [vmem:[%s1970_s1 + $0x30] sm:$0xff] (!%p139_p2)   ;;  %v1627_v9 = vld [vmem:[%s1970_s1 + $0x38] sm:$0xff] (!%p139_p2)   ;;  %v1765_v40 = vld [vmem:[%s1971_s2] ss:$0 sm:$0xff] (!%p139_p2) }
   0x8   : > { %1518 = vmatprep.subr.bf16.mxu0 (!%p139_p2), %v1621_v1  ;;  %1597 = vmatprep.subr.bf16.mxu1 (!%p139_p2), %v1621_v1 }
   0xb   : > { %1519 = vmatpush3.bf16.msra.mxu0 (!%p139_p2), %v1621_v1  ;;  %1605 = vmatpush3.bf16.msra.mxu1 (!%p139_p2), %v1621_v1 }
   0xc   : > { %1520 = vmatprep.subr.bf16.mxu0 (!%p139_p2), %v1622_v2  ;;  %1598 = vmatprep.subr.bf16.mxu1 (!%p139_p2), %v1622_v2 }
   0xd   : > { %s1974_s16 = smov (!%p163_p3, %s1301_s16), 319 }
   0xe   : > { %s1302_s21 = sshll.u32 %s1974_s16, 2 }
   0xf   : > { %s1713_s24 = scalar_lea.vmem %s1969_s0, %s1302_s21  ;;  %1521 = vmatpush3.bf16.msra.mxu0 %v1622_v2  ;;  %1606 = vmatpush3.bf16.msra.mxu1 %v1622_v2  ;;  %s1780_s13 = scalar_lea.vmem %s1972_s3, %s1302_s21 }
  0x10   : > { %v1628_v4 = vld [vmem:[%s1713_s24] sm:$0xff]   ;;  %1522 = vmatprep.subr.bf16.mxu0 %v1623_v3  ;;  %1599 = vmatprep.subr.bf16.mxu1 %v1623_v3  ;;  %v1630_v10 = vld [vmem:[%s1713_s24 + $0x8] sm:$0xff]   ;;  %v1632_v12 = vld [vmem:[%s1713_s24 + $0x10] sm:$0xff]  }
  0x11   : > { %v1629_v5 = vld [vmem:[%s1713_s24 + $0x80] sm:$0xff]   ;;  %1532 = vmatprep.mubr.bf16.mxu0 %v1628_v4  ;;  %v1631_v11 = vld [vmem:[%s1713_s24 + $0x88] sm:$0xff]   ;;  %v1633_v13 = vld [vmem:[%s1713_s24 + $0x90] sm:$0xff]  }
  0x12   : > { %1564 = vmatprep.mubr.bf16.mxu1 %v1629_v5  ;;  %v1634_v14 = vld [vmem:[%s1713_s24 + $0x18] sm:$0xff]   ;;  %v1636_v16 = vld [vmem:[%s1713_s24 + $0x20] sm:$0xff]   ;;  %v1638_v18 = vld [vmem:[%s1713_s24 + $0x28] sm:$0xff]  }
  0x13   : > { %1523 = vmatpush3.bf16.msra.mxu0 %v1623_v3  ;;  %1607 = vmatpush3.bf16.msra.mxu1 %v1623_v3  ;;  %v1635_v15 = vld [vmem:[%s1713_s24 + $0x98] sm:$0xff]   ;;  %v1637_v17 = vld [vmem:[%s1713_s24 + $0xa0] sm:$0xff]   ;;  %v1639_v19 = vld [vmem:[%s1713_s24 + $0xa8] sm:$0xff]  }
  0x14   : > { %1524 = vmatprep.subr.bf16.mxu0 %v1624_v6  ;;  %1600 = vmatprep.subr.bf16.mxu1 %v1624_v6  ;;  %v1640_v20 = vld [vmem:[%s1713_s24 + $0x30] sm:$0xff]   ;;  %v1642_v22 = vld [vmem:[%s1713_s24 + $0x38] sm:$0xff]   ;;  %v1644_v24 = vld [vmem:[%s1713_s24 + $0x40] sm:$0xff]  }
  0x15   : > { %v1641_v21 = vld [vmem:[%s1713_s24 + $0xb0] sm:$0xff]   ;;  %v1643_v23 = vld [vmem:[%s1713_s24 + $0xb8] sm:$0xff]   ;;  %v1645_v25 = vld [vmem:[%s1713_s24 + $0xc0] sm:$0xff]  }
  0x16   : > { %v1646_v26 = vld [vmem:[%s1713_s24 + $0x48] sm:$0xff]   ;;  %v1648_v28 = vld [vmem:[%s1713_s24 + $0x50] sm:$0xff]   ;;  %v1650_v30 = vld [vmem:[%s1713_s24 + $0x58] sm:$0xff]  }
  0x17   : > { %1525 = vmatpush3.bf16.msra.mxu0 %v1624_v6  ;;  %1608 = vmatpush3.bf16.msra.mxu1 %v1624_v6  ;;  %v1647_v27 = vld [vmem:[%s1713_s24 + $0xc8] sm:$0xff]   ;;  %v1649_v29 = vld [vmem:[%s1713_s24 + $0xd0] sm:$0xff]   ;;  %v1651_v31 = vld [vmem:[%s1713_s24 + $0xd8] sm:$0xff]  }
  0x18   : > { %1526 = vmatprep.subr.bf16.mxu0 %v1625_v7  ;;  %1601 = vmatprep.subr.bf16.mxu1 %v1625_v7  ;;  %v1652_v32 = vld [vmem:[%s1713_s24 + $0x60] sm:$0xff]   ;;  %v1654_v34 = vld [vmem:[%s1713_s24 + $0x68] sm:$0xff]   ;;  %v1656_v36 = vld [vmem:[%s1713_s24 + $0x70] sm:$0xff]  }
  0x19   : > { %v1653_v33 = vld [vmem:[%s1713_s24 + $0xe0] sm:$0xff]   ;;  %v1655_v35 = vld [vmem:[%s1713_s24 + $0xe8] sm:$0xff]   ;;  %v1657_v37 = vld [vmem:[%s1713_s24 + $0xf0] sm:$0xff]  }
  0x1a   : > { %v1658_v38 = vld [vmem:[%s1713_s24 + $0x78] sm:$0xff]  }
  0x1b   : > { %1527 = vmatpush3.bf16.msra.mxu0 %v1625_v7  ;;  %1609 = vmatpush3.bf16.msra.mxu1 %v1625_v7  ;;  %v1659_v39 = vld [vmem:[%s1713_s24 + $0xf8] sm:$0xff]  }
  0x1c   : > { %1528 = vmatprep.subr.bf16.mxu0 %v1626_v8  ;;  %1602 = vmatprep.subr.bf16.mxu1 %v1626_v8 }
  0x1f   : > { %1529 = vmatpush3.bf16.msra.mxu0 %v1626_v8  ;;  %1610 = vmatpush3.bf16.msra.mxu1 %v1626_v8 }
  0x20   : > { %1530 = vmatprep.subr.bf16.mxu0 %v1627_v9  ;;  %1603 = vmatprep.subr.bf16.mxu1 %v1627_v9 }
  0x23   : > { %1531 = vmatpush3.bf16.msra.mxu0 %v1627_v9  ;;  %1611 = vmatpush3.bf16.msra.mxu1 %v1627_v9 }
  0x26   : > { %1533 = vmatmul.mubr.bf16.vlgmr.msra.gmra.mrb[0].mxu0 %v1630_v10  ;;  %1565 = vmatmul.mubr.bf16.vlgmr.msra.gmra.mrb[0].mxu1 %v1631_v11 }
  0x27   : > { %1536 = vmatprep.mubr.bf16.mxu0 %v1632_v12  ;;  %1568 = vmatprep.mubr.bf16.mxu1 %v1633_v13 }
  0x2e   : > { %1537 = vmatmul.mubr.bf16.gmra.mrb[4].mxu0 %v1634_v14  ;;  %1569 = vmatmul.mubr.bf16.gmra.mrb[4].mxu1 %v1635_v15 }
  0x2f   : > { %1540 = vmatprep.mubr.bf16.mxu0 %v1636_v16  ;;  %1572 = vmatprep.mubr.bf16.mxu1 %v1637_v17 }
  0x36   : > { %1541 = vmatmul.mubr.bf16.gmra.mrb[8].mxu0 %v1638_v18  ;;  %1573 = vmatmul.mubr.bf16.gmra.mrb[8].mxu1 %v1639_v19 }
  0x37   : > { %1544 = vmatprep.mubr.bf16.mxu0 %v1640_v20  ;;  %1576 = vmatprep.mubr.bf16.mxu1 %v1641_v21 }
  0x3e   : > { %1545 = vmatmul.mubr.bf16.gmra.mrb[12].mxu0 %v1642_v22  ;;  %1577 = vmatmul.mubr.bf16.gmra.mrb[12].mxu1 %v1643_v23 }
  0x3f   : > { %1548 = vmatprep.mubr.bf16.mxu0 %v1644_v24  ;;  %1580 = vmatprep.mubr.bf16.mxu1 %v1645_v25 }
  0x46   : > { %1549 = vmatmul.mubr.bf16.gmra.mrb[16].mxu0 %v1646_v26  ;;  %1581 = vmatmul.mubr.bf16.gmra.mrb[16].mxu1 %v1647_v27 }
  0x47   : > { %1552 = vmatprep.mubr.bf16.mxu0 %v1648_v28  ;;  %1584 = vmatprep.mubr.bf16.mxu1 %v1649_v29 }
  0x4e   : > { %1553 = vmatmul.mubr.bf16.gmra.mrb[20].mxu0 %v1650_v30  ;;  %1585 = vmatmul.mubr.bf16.gmra.mrb[20].mxu1 %v1651_v31 }
  0x4f   : > { %1556 = vmatprep.mubr.bf16.mxu0 %v1652_v32  ;;  %1588 = vmatprep.mubr.bf16.mxu1 %v1653_v33 }
  0x56   : > { %1557 = vmatmul.mubr.bf16.gmra.mrb[24].mxu0 %v1654_v34  ;;  %1589 = vmatmul.mubr.bf16.gmra.mrb[24].mxu1 %v1655_v35 }
  0x57   : > { %1560 = vmatprep.mubr.bf16.mxu0 %v1656_v36  ;;  %1592 = vmatprep.mubr.bf16.mxu1 %v1657_v37 }
  0x5e   : > { %1561 = vmatmul.mubr.bf16.gmra.mrb[28].mxu0 %v1658_v38  ;;  %1593 = vmatmul.mubr.bf16.gmra.mrb[28].mxu1 %v1659_v39 }
  0xf9   : > { %v1534_v41 = vpop.f32.mrb[0].mxu0  ;;  %v1566_v42 = vpop.f32.mrb[0].mxu1 }
  0xfa   : > { %v545_v43 = vadd.f32 %v1534_v41, %v1765_v40  ;;  %v673_v44 = vadd.f32 %v1566_v42, %v1765_v40  ;;  %v536_v45 = vpop.f32.mrb[1].mxu0  ;;  %v664_v46 = vpop.f32.mrb[1].mxu1 }
  0xfb   : > { %v537_v47 = vadd.f32 %v1765_v40, %v536_v45  ;;  %v665_v48 = vadd.f32 %v1765_v40, %v664_v46  ;;  %v1535_v49 = vpop.f32.mrb[2].mxu0  ;;  %v1567_v50 = vpop.f32.mrb[2].mxu1 }
  0xfc   : > { %v793_v51 = vmul.f32 0.01, %v545_v43  ;;  %v825_v52 = vmul.f32 0.01, %v673_v44  ;;  %v548_v53 = vadd.f32 %v1535_v49, %v1765_v40  ;;  %v676_v54 = vadd.f32 %v1567_v50, %v1765_v40  ;;  %v539_v55 = vpop.f32.mrb[3].mxu0  ;;  %v667_v56 = vpop.f32.mrb[3].mxu1 }
  0xfd   : > { %v791_v57 = vmul.f32 0.01, %v537_v47  ;;  %v823_v58 = vmul.f32 0.01, %v665_v48  ;;  %v540_v59 = vadd.f32 %v1765_v40, %v539_v55  ;;  %v668_v60 = vadd.f32 %v1765_v40, %v667_v56 }
  0xfe   : > { %v857_v61 = vmax.f32 %v545_v43, %v793_v51  ;;  %v889_v62 = vmax.f32 %v673_v44, %v825_v52  ;;  %v794_v63 = vmul.f32 0.01, %v548_v53  ;;  %v826_v0 = vmul.f32 0.01, %v676_v54 }
  0xff   : > { %v855_v1 = vmax.f32 %v537_v47, %v791_v57  ;;  %v887_v2 = vmax.f32 %v665_v48, %v823_v58  ;;  %v792_v3 = vmul.f32 0.01, %v540_v59  ;;  %v824_v4 = vmul.f32 0.01, %v668_v60 }
 0x100   : > { %v1414_v5 = vpack.c.bf16 %v857_v61, %v857_v61  ;;  %v1446_v6 = vpack.c.bf16 %v889_v62, %v889_v62  ;;  %v858_v7 = vmax.f32 %v548_v53, %v794_v63  ;;  %v890_v8 = vmax.f32 %v676_v54, %v826_v0 }
 0x101   : > { %v1412_v9 = vpack.c.bf16 %v855_v1, %v855_v1  ;;  %v1444_v10 = vpack.c.bf16 %v887_v2, %v887_v2  ;;  %v856_v11 = vmax.f32 %v540_v59, %v792_v3  ;;  %v888_v12 = vmax.f32 %v668_v60, %v824_v4  ;;  %v1538_v13 = vpop.f32.mrb[4].mxu0  ;;  %v1570_v14 = vpop.f32.mrb[4].mxu1 }
 0x102   : > { %1178 = vst.msk [vmem:[%s1780_s13 + $0x8] sm:$0xf] %vm1175_vm0, %v1414_v5  ;;  %1210 = vst.msk [vmem:[%s1780_s13 + $0x88] sm:$0xf] %vm1175_vm0, %v1446_v6  ;;  %v1415_v15 = vpack.c.bf16 %v858_v7, %v858_v7  ;;  %v1447_v16 = vpack.c.bf16 %v890_v8, %v890_v8  ;;  %v561_v17 = vadd.f32 %v1538_v13, %v1765_v40  ;;  %v552_v19 = vpop.f32.mrb[5].mxu0  ;;  %v680_v20 = vpop.f32.mrb[5].mxu1 }
 0x103   : > { %v689_v18 = vadd.f32 %v1570_v14, %v1765_v40  ;;  %1176 = vst.msk [vmem:[%s1780_s13] sm:$0xf] %vm1175_vm0, %v1412_v9  ;;  %1208 = vst.msk [vmem:[%s1780_s13 + $0x80] sm:$0xf] %vm1175_vm0, %v1444_v10  ;;  %v1413_v21 = vpack.c.bf16 %v856_v11, %v856_v11  ;;  %v1445_v22 = vpack.c.bf16 %v888_v12, %v888_v12  ;;  %v1539_v25 = vpop.f32.mrb[6].mxu0  ;;  %v1571_v26 = vpop.f32.mrb[6].mxu1 }
 0x104   : > { %v553_v23 = vadd.f32 %v1765_v40, %v552_v19  ;;  %v681_v24 = vadd.f32 %v1765_v40, %v680_v20  ;;  %1179 = vst.msk [vmem:[%s1780_s13 + $0xc] sm:$0xf] %vm1175_vm0, %v1415_v15  ;;  %1211 = vst.msk [vmem:[%s1780_s13 + $0x8c] sm:$0xf] %vm1175_vm0, %v1447_v16  ;;  %v797_v27 = vmul.f32 0.01, %v561_v17  ;;  %v564_v29 = vadd.f32 %v1539_v25, %v1765_v40 }
 0x105   : > { %v829_v28 = vmul.f32 0.01, %v689_v18  ;;  %v692_v30 = vadd.f32 %v1571_v26, %v1765_v40  ;;  %v555_v31 = vpop.f32.mrb[7].mxu0  ;;  %v683_v32 = vpop.f32.mrb[7].mxu1  ;;  %1177 = vst.msk [vmem:[%s1780_s13 + $0x4] sm:$0xf] %vm1175_vm0, %v1413_v21 }
 0x106   : > { %1209 = vst.msk [vmem:[%s1780_s13 + $0x84] sm:$0xf] %vm1175_vm0, %v1445_v22  ;;  %v795_v33 = vmul.f32 0.01, %v553_v23  ;;  %v827_v34 = vmul.f32 0.01, %v681_v24  ;;  %v556_v35 = vadd.f32 %v1765_v40, %v555_v31  ;;  %v684_v36 = vadd.f32 %v1765_v40, %v683_v32 }
 0x107   : > { %v861_v37 = vmax.f32 %v561_v17, %v797_v27  ;;  %v893_v38 = vmax.f32 %v689_v18, %v829_v28  ;;  %v798_v39 = vmul.f32 0.01, %v564_v29  ;;  %v830_v41 = vmul.f32 0.01, %v692_v30 }
 0x108   : > { %v859_v42 = vmax.f32 %v553_v23, %v795_v33  ;;  %v891_v43 = vmax.f32 %v681_v24, %v827_v34  ;;  %v796_v44 = vmul.f32 0.01, %v556_v35  ;;  %v828_v45 = vmul.f32 0.01, %v684_v36 }
 0x109   : > { %v1418_v46 = vpack.c.bf16 %v861_v37, %v861_v37  ;;  %v1450_v47 = vpack.c.bf16 %v893_v38, %v893_v38  ;;  %v862_v48 = vmax.f32 %v564_v29, %v798_v39  ;;  %v894_v49 = vmax.f32 %v692_v30, %v830_v41  ;;  %v1542_v54 = vpop.f32.mrb[8].mxu0  ;;  %v1574_v55 = vpop.f32.mrb[8].mxu1 }
 0x10a   : > { %v1416_v50 = vpack.c.bf16 %v859_v42, %v859_v42  ;;  %v1448_v51 = vpack.c.bf16 %v891_v43, %v891_v43  ;;  %v860_v52 = vmax.f32 %v556_v35, %v796_v44  ;;  %v892_v53 = vmax.f32 %v684_v36, %v828_v45  ;;  %v568_v60 = vpop.f32.mrb[9].mxu0  ;;  %v696_v61 = vpop.f32.mrb[9].mxu1 }
 0x10b   : > { %1182 = vst.msk [vmem:[%s1780_s13 + $0x18] sm:$0xf] %vm1175_vm0, %v1418_v46  ;;  %1214 = vst.msk [vmem:[%s1780_s13 + $0x98] sm:$0xf] %vm1175_vm0, %v1450_v47  ;;  %v1419_v56 = vpack.c.bf16 %v862_v48, %v862_v48  ;;  %v1451_v57 = vpack.c.bf16 %v894_v49, %v894_v49  ;;  %v577_v58 = vadd.f32 %v1542_v54, %v1765_v40  ;;  %v1543_v2 = vpop.f32.mrb[10].mxu0  ;;  %v1575_v3 = vpop.f32.mrb[10].mxu1 }
 0x10c   : > { %v705_v59 = vadd.f32 %v1574_v55, %v1765_v40  ;;  %1180 = vst.msk [vmem:[%s1780_s13 + $0x10] sm:$0xf] %vm1175_vm0, %v1416_v50  ;;  %1212 = vst.msk [vmem:[%s1780_s13 + $0x90] sm:$0xf] %vm1175_vm0, %v1448_v51  ;;  %v1417_v62 = vpack.c.bf16 %v860_v52, %v860_v52  ;;  %v1449_v63 = vpack.c.bf16 %v892_v53, %v892_v53  ;;  %v571_v8 = vpop.f32.mrb[11].mxu0  ;;  %v699_v9 = vpop.f32.mrb[11].mxu1 }
 0x10d   : > { %v569_v0 = vadd.f32 %v1765_v40, %v568_v60  ;;  %v697_v1 = vadd.f32 %v1765_v40, %v696_v61  ;;  %1183 = vst.msk [vmem:[%s1780_s13 + $0x1c] sm:$0xf] %vm1175_vm0, %v1419_v56  ;;  %1215 = vst.msk [vmem:[%s1780_s13 + $0x9c] sm:$0xf] %vm1175_vm0, %v1451_v57  ;;  %v801_v4 = vmul.f32 0.01, %v577_v58  ;;  %v580_v6 = vadd.f32 %v1543_v2, %v1765_v40 }
 0x10e   : > { %v833_v5 = vmul.f32 0.01, %v705_v59  ;;  %v708_v7 = vadd.f32 %v1575_v3, %v1765_v40  ;;  %1181 = vst.msk [vmem:[%s1780_s13 + $0x14] sm:$0xf] %vm1175_vm0, %v1417_v62  ;;  %1213 = vst.msk [vmem:[%s1780_s13 + $0x94] sm:$0xf] %vm1175_vm0, %v1449_v63  ;;  %v572_v12 = vadd.f32 %v1765_v40, %v571_v8  ;;  %v700_v13 = vadd.f32 %v1765_v40, %v699_v9 }
 0x10f   : > { %v799_v10 = vmul.f32 0.01, %v569_v0  ;;  %v831_v11 = vmul.f32 0.01, %v697_v1  ;;  %v865_v14 = vmax.f32 %v577_v58, %v801_v4  ;;  %v802_v16 = vmul.f32 0.01, %v580_v6 }
 0x110   : > { %v897_v15 = vmax.f32 %v705_v59, %v833_v5  ;;  %v834_v17 = vmul.f32 0.01, %v708_v7  ;;  %v800_v20 = vmul.f32 0.01, %v572_v12  ;;  %v832_v21 = vmul.f32 0.01, %v700_v13 }
 0x111   : > { %v863_v18 = vmax.f32 %v569_v0, %v799_v10  ;;  %v895_v19 = vmax.f32 %v697_v1, %v831_v11  ;;  %v1422_v22 = vpack.c.bf16 %v865_v14, %v865_v14  ;;  %v866_v24 = vmax.f32 %v580_v6, %v802_v16  ;;  %v1546_v30 = vpop.f32.mrb[12].mxu0  ;;  %v1578_v31 = vpop.f32.mrb[12].mxu1 }
 0x112   : > { %v1454_v23 = vpack.c.bf16 %v897_v15, %v897_v15  ;;  %v898_v25 = vmax.f32 %v708_v7, %v834_v17  ;;  %v864_v28 = vmax.f32 %v572_v12, %v800_v20  ;;  %v896_v29 = vmax.f32 %v700_v13, %v832_v21  ;;  %v584_v36 = vpop.f32.mrb[13].mxu0  ;;  %v712_v37 = vpop.f32.mrb[13].mxu1 }
 0x113   : > { %v1420_v26 = vpack.c.bf16 %v863_v18, %v863_v18  ;;  %v1452_v27 = vpack.c.bf16 %v895_v19, %v895_v19  ;;  %1186 = vst.msk [vmem:[%s1780_s13 + $0x28] sm:$0xf] %vm1175_vm0, %v1422_v22  ;;  %v1423_v32 = vpack.c.bf16 %v866_v24, %v866_v24  ;;  %v593_v34 = vadd.f32 %v1546_v30, %v1765_v40  ;;  %v1547_v43 = vpop.f32.mrb[14].mxu0  ;;  %v1579_v44 = vpop.f32.mrb[14].mxu1 }
 0x114   : > { %1218 = vst.msk [vmem:[%s1780_s13 + $0xa8] sm:$0xf] %vm1175_vm0, %v1454_v23  ;;  %v1455_v33 = vpack.c.bf16 %v898_v25, %v898_v25  ;;  %v721_v35 = vadd.f32 %v1578_v31, %v1765_v40  ;;  %v1421_v38 = vpack.c.bf16 %v864_v28, %v864_v28  ;;  %v1453_v39 = vpack.c.bf16 %v896_v29, %v896_v29  ;;  %v587_v49 = vpop.f32.mrb[15].mxu0  ;;  %v715_v50 = vpop.f32.mrb[15].mxu1 }
 0x115   : > { %1184 = vst.msk [vmem:[%s1780_s13 + $0x20] sm:$0xf] %vm1175_vm0, %v1420_v26  ;;  %1216 = vst.msk [vmem:[%s1780_s13 + $0xa0] sm:$0xf] %vm1175_vm0, %v1452_v27  ;;  %v585_v41 = vadd.f32 %v1765_v40, %v584_v36  ;;  %v713_v42 = vadd.f32 %v1765_v40, %v712_v37  ;;  %v805_v45 = vmul.f32 0.01, %v593_v34  ;;  %v596_v47 = vadd.f32 %v1547_v43, %v1765_v40 }
 0x116   : > { %1187 = vst.msk [vmem:[%s1780_s13 + $0x2c] sm:$0xf] %vm1175_vm0, %v1423_v32  ;;  %1219 = vst.msk [vmem:[%s1780_s13 + $0xac] sm:$0xf] %vm1175_vm0, %v1455_v33  ;;  %v837_v46 = vmul.f32 0.01, %v721_v35  ;;  %v724_v48 = vadd.f32 %v1579_v44, %v1765_v40  ;;  %v588_v53 = vadd.f32 %v1765_v40, %v587_v49  ;;  %v716_v54 = vadd.f32 %v1765_v40, %v715_v50 }
 0x117   : > { %1185 = vst.msk [vmem:[%s1780_s13 + $0x24] sm:$0xf] %vm1175_vm0, %v1421_v38  ;;  %1217 = vst.msk [vmem:[%s1780_s13 + $0xa4] sm:$0xf] %vm1175_vm0, %v1453_v39  ;;  %v803_v51 = vmul.f32 0.01, %v585_v41  ;;  %v869_v55 = vmax.f32 %v593_v34, %v805_v45 }
 0x118   : > { %v835_v52 = vmul.f32 0.01, %v713_v42  ;;  %v901_v56 = vmax.f32 %v721_v35, %v837_v46  ;;  %v806_v57 = vmul.f32 0.01, %v596_v47  ;;  %v838_v58 = vmul.f32 0.01, %v724_v48 }
 0x119   : > { %v867_v59 = vmax.f32 %v585_v41, %v803_v51  ;;  %v804_v61 = vmul.f32 0.01, %v588_v53  ;;  %v836_v62 = vmul.f32 0.01, %v716_v54  ;;  %v1426_v63 = vpack.c.bf16 %v869_v55, %v869_v55  ;;  %v1550_v7 = vpop.f32.mrb[16].mxu0  ;;  %v1582_v8 = vpop.f32.mrb[16].mxu1 }
 0x11a   : > { %v899_v60 = vmax.f32 %v713_v42, %v835_v52  ;;  %v1458_v0 = vpack.c.bf16 %v901_v56, %v901_v56  ;;  %v870_v1 = vmax.f32 %v596_v47, %v806_v57  ;;  %v902_v2 = vmax.f32 %v724_v48, %v838_v58  ;;  %v600_v13 = vpop.f32.mrb[17].mxu0  ;;  %v728_v14 = vpop.f32.mrb[17].mxu1 }
 0x11b   : > { %v1424_v3 = vpack.c.bf16 %v867_v59, %v867_v59  ;;  %v868_v5 = vmax.f32 %v588_v53, %v804_v61  ;;  %v900_v6 = vmax.f32 %v716_v54, %v836_v62  ;;  %1190 = vst.msk [vmem:[%s1780_s13 + $0x38] sm:$0xf] %vm1175_vm0, %v1426_v63  ;;  %v609_v11 = vadd.f32 %v1550_v7, %v1765_v40  ;;  %v1551_v19 = vpop.f32.mrb[18].mxu0  ;;  %v1583_v20 = vpop.f32.mrb[18].mxu1 }
 0x11c   : > { %v1456_v4 = vpack.c.bf16 %v899_v60, %v899_v60  ;;  %1222 = vst.msk [vmem:[%s1780_s13 + $0xb8] sm:$0xf] %vm1175_vm0, %v1458_v0  ;;  %v1427_v9 = vpack.c.bf16 %v870_v1, %v870_v1  ;;  %v1459_v10 = vpack.c.bf16 %v902_v2, %v902_v2  ;;  %v737_v12 = vadd.f32 %v1582_v8, %v1765_v40  ;;  %v603_v25 = vpop.f32.mrb[19].mxu0  ;;  %v731_v26 = vpop.f32.mrb[19].mxu1 }
 0x11d   : > { %1188 = vst.msk [vmem:[%s1780_s13 + $0x30] sm:$0xf] %vm1175_vm0, %v1424_v3  ;;  %v1425_v15 = vpack.c.bf16 %v868_v5, %v868_v5  ;;  %v1457_v16 = vpack.c.bf16 %v900_v6, %v900_v6  ;;  %v601_v17 = vadd.f32 %v1765_v40, %v600_v13  ;;  %v729_v18 = vadd.f32 %v1765_v40, %v728_v14 }
 0x11e   : > { %1220 = vst.msk [vmem:[%s1780_s13 + $0xb0] sm:$0xf] %vm1175_vm0, %v1456_v4  ;;  %1191 = vst.msk [vmem:[%s1780_s13 + $0x3c] sm:$0xf] %vm1175_vm0, %v1427_v9  ;;  %v809_v21 = vmul.f32 0.01, %v609_v11  ;;  %v612_v23 = vadd.f32 %v1551_v19, %v1765_v40  ;;  %v740_v24 = vadd.f32 %v1583_v20, %v1765_v40  ;;  %v604_v29 = vadd.f32 %v1765_v40, %v603_v25 }
 0x11f   : > { %1223 = vst.msk [vmem:[%s1780_s13 + $0xbc] sm:$0xf] %vm1175_vm0, %v1459_v10  ;;  %v841_v22 = vmul.f32 0.01, %v737_v12  ;;  %1189 = vst.msk [vmem:[%s1780_s13 + $0x34] sm:$0xf] %vm1175_vm0, %v1425_v15  ;;  %v732_v30 = vadd.f32 %v1765_v40, %v731_v26 }
 0x120   : > { %1221 = vst.msk [vmem:[%s1780_s13 + $0xb4] sm:$0xf] %vm1175_vm0, %v1457_v16  ;;  %v807_v27 = vmul.f32 0.01, %v601_v17  ;;  %v839_v28 = vmul.f32 0.01, %v729_v18  ;;  %v873_v31 = vmax.f32 %v609_v11, %v809_v21 }
 0x121   : > { %v905_v32 = vmax.f32 %v737_v12, %v841_v22  ;;  %v810_v33 = vmul.f32 0.01, %v612_v23  ;;  %v842_v34 = vmul.f32 0.01, %v740_v24  ;;  %v808_v37 = vmul.f32 0.01, %v604_v29 }
 0x122   : > { %v871_v35 = vmax.f32 %v601_v17, %v807_v27  ;;  %v903_v36 = vmax.f32 %v729_v18, %v839_v28  ;;  %v840_v38 = vmul.f32 0.01, %v732_v30  ;;  %v1430_v39 = vpack.c.bf16 %v873_v31, %v873_v31  ;;  %v1554_v48 = vpop.f32.mrb[20].mxu0  ;;  %v1586_v49 = vpop.f32.mrb[20].mxu1 }
 0x123   : > { %v1462_v41 = vpack.c.bf16 %v905_v32, %v905_v32  ;;  %v874_v42 = vmax.f32 %v612_v23, %v810_v33  ;;  %v906_v43 = vmax.f32 %v740_v24, %v842_v34  ;;  %v872_v46 = vmax.f32 %v604_v29, %v808_v37  ;;  %v616_v54 = vpop.f32.mrb[21].mxu0  ;;  %v744_v55 = vpop.f32.mrb[21].mxu1 }
 0x124   : > { %v1428_v44 = vpack.c.bf16 %v871_v35, %v871_v35  ;;  %v1460_v45 = vpack.c.bf16 %v903_v36, %v903_v36  ;;  %v904_v47 = vmax.f32 %v732_v30, %v840_v38  ;;  %1194 = vst.msk [vmem:[%s1780_s13 + $0x48] sm:$0xf] %vm1175_vm0, %v1430_v39  ;;  %v625_v52 = vadd.f32 %v1554_v48, %v1765_v40  ;;  %v1555_v60 = vpop.f32.mrb[22].mxu0  ;;  %v1587_v61 = vpop.f32.mrb[22].mxu1 }
 0x125   : > { %1226 = vst.msk [vmem:[%s1780_s13 + $0xc8] sm:$0xf] %vm1175_vm0, %v1462_v41  ;;  %v1431_v50 = vpack.c.bf16 %v874_v42, %v874_v42  ;;  %v1463_v51 = vpack.c.bf16 %v906_v43, %v906_v43  ;;  %v753_v53 = vadd.f32 %v1586_v49, %v1765_v40  ;;  %v1429_v56 = vpack.c.bf16 %v872_v46, %v872_v46  ;;  %v619_v2 = vpop.f32.mrb[23].mxu0  ;;  %v747_v3 = vpop.f32.mrb[23].mxu1 }
 0x126   : > { %1192 = vst.msk [vmem:[%s1780_s13 + $0x40] sm:$0xf] %vm1175_vm0, %v1428_v44  ;;  %1224 = vst.msk [vmem:[%s1780_s13 + $0xc0] sm:$0xf] %vm1175_vm0, %v1460_v45  ;;  %v1461_v57 = vpack.c.bf16 %v904_v47, %v904_v47  ;;  %v617_v58 = vadd.f32 %v1765_v40, %v616_v54  ;;  %v745_v59 = vadd.f32 %v1765_v40, %v744_v55  ;;  %v813_v62 = vmul.f32 0.01, %v625_v52 }
 0x127   : > { %1195 = vst.msk [vmem:[%s1780_s13 + $0x4c] sm:$0xf] %vm1175_vm0, %v1431_v50  ;;  %1227 = vst.msk [vmem:[%s1780_s13 + $0xcc] sm:$0xf] %vm1175_vm0, %v1463_v51  ;;  %v845_v63 = vmul.f32 0.01, %v753_v53  ;;  %v628_v0 = vadd.f32 %v1555_v60, %v1765_v40  ;;  %v756_v1 = vadd.f32 %v1587_v61, %v1765_v40  ;;  %v620_v6 = vadd.f32 %v1765_v40, %v619_v2 }
 0x128   : > { %1193 = vst.msk [vmem:[%s1780_s13 + $0x44] sm:$0xf] %vm1175_vm0, %v1429_v56  ;;  %1225 = vst.msk [vmem:[%s1780_s13 + $0xc4] sm:$0xf] %vm1175_vm0, %v1461_v57  ;;  %v811_v4 = vmul.f32 0.01, %v617_v58  ;;  %v748_v7 = vadd.f32 %v1765_v40, %v747_v3  ;;  %v877_v8 = vmax.f32 %v625_v52, %v813_v62 }
 0x129   : > { %v843_v5 = vmul.f32 0.01, %v745_v59  ;;  %v909_v9 = vmax.f32 %v753_v53, %v845_v63  ;;  %v814_v10 = vmul.f32 0.01, %v628_v0  ;;  %v846_v11 = vmul.f32 0.01, %v756_v1 }
 0x12a   : > { %v875_v12 = vmax.f32 %v617_v58, %v811_v4  ;;  %v812_v14 = vmul.f32 0.01, %v620_v6  ;;  %v844_v15 = vmul.f32 0.01, %v748_v7  ;;  %v1434_v16 = vpack.c.bf16 %v877_v8, %v877_v8  ;;  %v1558_v24 = vpop.f32.mrb[24].mxu0  ;;  %v1590_v25 = vpop.f32.mrb[24].mxu1 }
 0x12b   : > { %v907_v13 = vmax.f32 %v745_v59, %v843_v5  ;;  %v1466_v17 = vpack.c.bf16 %v909_v9, %v909_v9  ;;  %v878_v18 = vmax.f32 %v628_v0, %v814_v10  ;;  %v910_v19 = vmax.f32 %v756_v1, %v846_v11  ;;  %v632_v30 = vpop.f32.mrb[25].mxu0  ;;  %v760_v31 = vpop.f32.mrb[25].mxu1 }
 0x12c   : > { %v1432_v20 = vpack.c.bf16 %v875_v12, %v875_v12  ;;  %v876_v22 = vmax.f32 %v620_v6, %v812_v14  ;;  %v908_v23 = vmax.f32 %v748_v7, %v844_v15  ;;  %1198 = vst.msk [vmem:[%s1780_s13 + $0x58] sm:$0xf] %vm1175_vm0, %v1434_v16  ;;  %v641_v28 = vadd.f32 %v1558_v24, %v1765_v40  ;;  %v1559_v36 = vpop.f32.mrb[26].mxu0  ;;  %v1591_v37 = vpop.f32.mrb[26].mxu1 }
 0x12d   : > { %v1464_v21 = vpack.c.bf16 %v907_v13, %v907_v13  ;;  %1230 = vst.msk [vmem:[%s1780_s13 + $0xd8] sm:$0xf] %vm1175_vm0, %v1466_v17  ;;  %v1435_v26 = vpack.c.bf16 %v878_v18, %v878_v18  ;;  %v1467_v27 = vpack.c.bf16 %v910_v19, %v910_v19  ;;  %v769_v29 = vadd.f32 %v1590_v25, %v1765_v40  ;;  %v635_v43 = vpop.f32.mrb[27].mxu0  ;;  %v763_v44 = vpop.f32.mrb[27].mxu1 }
 0x12e   : > { %1196 = vst.msk [vmem:[%s1780_s13 + $0x50] sm:$0xf] %vm1175_vm0, %v1432_v20  ;;  %v1433_v32 = vpack.c.bf16 %v876_v22, %v876_v22  ;;  %v1465_v33 = vpack.c.bf16 %v908_v23, %v908_v23  ;;  %v633_v34 = vadd.f32 %v1765_v40, %v632_v30  ;;  %v761_v35 = vadd.f32 %v1765_v40, %v760_v31 }
 0x12f   : > { %1228 = vst.msk [vmem:[%s1780_s13 + $0xd0] sm:$0xf] %vm1175_vm0, %v1464_v21  ;;  %1199 = vst.msk [vmem:[%s1780_s13 + $0x5c] sm:$0xf] %vm1175_vm0, %v1435_v26  ;;  %v817_v38 = vmul.f32 0.01, %v641_v28  ;;  %v644_v41 = vadd.f32 %v1559_v36, %v1765_v40  ;;  %v772_v42 = vadd.f32 %v1591_v37, %v1765_v40  ;;  %v636_v47 = vadd.f32 %v1765_v40, %v635_v43 }
 0x130   : > { %1231 = vst.msk [vmem:[%s1780_s13 + $0xdc] sm:$0xf] %vm1175_vm0, %v1467_v27  ;;  %v849_v39 = vmul.f32 0.01, %v769_v29  ;;  %1197 = vst.msk [vmem:[%s1780_s13 + $0x54] sm:$0xf] %vm1175_vm0, %v1433_v32  ;;  %v764_v48 = vadd.f32 %v1765_v40, %v763_v44 }
 0x131   : > { %1229 = vst.msk [vmem:[%s1780_s13 + $0xd4] sm:$0xf] %vm1175_vm0, %v1465_v33  ;;  %v815_v45 = vmul.f32 0.01, %v633_v34  ;;  %v847_v46 = vmul.f32 0.01, %v761_v35  ;;  %v881_v49 = vmax.f32 %v641_v28, %v817_v38 }
 0x132   : > { %v913_v50 = vmax.f32 %v769_v29, %v849_v39  ;;  %v818_v51 = vmul.f32 0.01, %v644_v41  ;;  %v850_v52 = vmul.f32 0.01, %v772_v42  ;;  %v816_v55 = vmul.f32 0.01, %v636_v47 }
 0x133   : > { %v879_v53 = vmax.f32 %v633_v34, %v815_v45  ;;  %v911_v54 = vmax.f32 %v761_v35, %v847_v46  ;;  %v848_v56 = vmul.f32 0.01, %v764_v48  ;;  %v1438_v57 = vpack.c.bf16 %v881_v49, %v881_v49  ;;  %v1562_v1 = vpop.f32.mrb[28].mxu0  ;;  %v1594_v2 = vpop.f32.mrb[28].mxu1 }
 0x134   : > { %v1470_v58 = vpack.c.bf16 %v913_v50, %v913_v50  ;;  %v882_v59 = vmax.f32 %v644_v41, %v818_v51  ;;  %v914_v60 = vmax.f32 %v772_v42, %v850_v52  ;;  %v880_v63 = vmax.f32 %v636_v47, %v816_v55  ;;  %v648_v7 = vpop.f32.mrb[29].mxu0  ;;  %v776_v8 = vpop.f32.mrb[29].mxu1 }
 0x135   : > { %v1436_v61 = vpack.c.bf16 %v879_v53, %v879_v53  ;;  %v1468_v62 = vpack.c.bf16 %v911_v54, %v911_v54  ;;  %v912_v0 = vmax.f32 %v764_v48, %v848_v56  ;;  %1202 = vst.msk [vmem:[%s1780_s13 + $0x68] sm:$0xf] %vm1175_vm0, %v1438_v57  ;;  %v657_v5 = vadd.f32 %v1562_v1, %v1765_v40  ;;  %v1563_v13 = vpop.f32.mrb[30].mxu0  ;;  %v1595_v14 = vpop.f32.mrb[30].mxu1 }
 0x136   : > { %1234 = vst.msk [vmem:[%s1780_s13 + $0xe8] sm:$0xf] %vm1175_vm0, %v1470_v58  ;;  %v1439_v3 = vpack.c.bf16 %v882_v59, %v882_v59  ;;  %v1471_v4 = vpack.c.bf16 %v914_v60, %v914_v60  ;;  %v785_v6 = vadd.f32 %v1594_v2, %v1765_v40  ;;  %v1437_v9 = vpack.c.bf16 %v880_v63, %v880_v63  ;;  %v651_v19 = vpop.f32.mrb[31].mxu0  ;;  %v779_v20 = vpop.f32.mrb[31].mxu1 }
 0x137   : > { %1200 = vst.msk [vmem:[%s1780_s13 + $0x60] sm:$0xf] %vm1175_vm0, %v1436_v61  ;;  %1232 = vst.msk [vmem:[%s1780_s13 + $0xe0] sm:$0xf] %vm1175_vm0, %v1468_v62  ;;  %v1469_v10 = vpack.c.bf16 %v912_v0, %v912_v0  ;;  %v649_v11 = vadd.f32 %v1765_v40, %v648_v7  ;;  %v777_v12 = vadd.f32 %v1765_v40, %v776_v8  ;;  %v821_v15 = vmul.f32 0.01, %v657_v5 }
 0x138   : > { %1203 = vst.msk [vmem:[%s1780_s13 + $0x6c] sm:$0xf] %vm1175_vm0, %v1439_v3  ;;  %1235 = vst.msk [vmem:[%s1780_s13 + $0xec] sm:$0xf] %vm1175_vm0, %v1471_v4  ;;  %v853_v16 = vmul.f32 0.01, %v785_v6  ;;  %v660_v17 = vadd.f32 %v1563_v13, %v1765_v40  ;;  %v788_v18 = vadd.f32 %v1595_v14, %v1765_v40  ;;  %v652_v23 = vadd.f32 %v1765_v40, %v651_v19 }
 0x139   : > { %1201 = vst.msk [vmem:[%s1780_s13 + $0x64] sm:$0xf] %vm1175_vm0, %v1437_v9  ;;  %1233 = vst.msk [vmem:[%s1780_s13 + $0xe4] sm:$0xf] %vm1175_vm0, %v1469_v10  ;;  %v819_v21 = vmul.f32 0.01, %v649_v11  ;;  %v780_v24 = vadd.f32 %v1765_v40, %v779_v20  ;;  %v885_v25 = vmax.f32 %v657_v5, %v821_v15 }
 0x13a   : > { %v851_v22 = vmul.f32 0.01, %v777_v12  ;;  %v917_v26 = vmax.f32 %v785_v6, %v853_v16  ;;  %v822_v27 = vmul.f32 0.01, %v660_v17  ;;  %v854_v28 = vmul.f32 0.01, %v788_v18 }
 0x13b   : > { %v883_v29 = vmax.f32 %v649_v11, %v819_v21  ;;  %v820_v31 = vmul.f32 0.01, %v652_v23  ;;  %v852_v32 = vmul.f32 0.01, %v780_v24  ;;  %v1442_v33 = vpack.c.bf16 %v885_v25, %v885_v25 }
 0x13c   : > { %v915_v30 = vmax.f32 %v777_v12, %v851_v22  ;;  %v1474_v34 = vpack.c.bf16 %v917_v26, %v917_v26  ;;  %v886_v35 = vmax.f32 %v660_v17, %v822_v27  ;;  %v918_v36 = vmax.f32 %v788_v18, %v854_v28 }
 0x13d   : > { %v1440_v40 = vpack.c.bf16 %v883_v29, %v883_v29  ;;  %v884_v38 = vmax.f32 %v652_v23, %v820_v31  ;;  %v916_v39 = vmax.f32 %v780_v24, %v852_v32  ;;  %1206 = vst.msk [vmem:[%s1780_s13 + $0x78] sm:$0xf] %vm1175_vm0, %v1442_v33 }
 0x13e   : > { %v1472_v37 = vpack.c.bf16 %v915_v30, %v915_v30  ;;  %1238 = vst.msk [vmem:[%s1780_s13 + $0xf8] sm:$0xf] %vm1175_vm0, %v1474_v34  ;;  %v1443_v41 = vpack.c.bf16 %v886_v35, %v886_v35  ;;  %v1475_v42 = vpack.c.bf16 %v918_v36, %v918_v36 }
 0x13f   : > { %1204 = vst.msk [vmem:[%s1780_s13 + $0x70] sm:$0xf] %vm1175_vm0, %v1440_v40  ;;  %v1441_v43 = vpack.c.bf16 %v884_v38, %v884_v38  ;;  %v1473_v44 = vpack.c.bf16 %v916_v39, %v916_v39 }
 0x140   : > { %1236 = vst.msk [vmem:[%s1780_s13 + $0xf0] sm:$0xf] %vm1175_vm0, %v1472_v37  ;;  %1207 = vst.msk [vmem:[%s1780_s13 + $0x7c] sm:$0xf] %vm1175_vm0, %v1443_v41 }
 0x141   : > { %1239 = vst.msk [vmem:[%s1780_s13 + $0xfc] sm:$0xf] %vm1175_vm0, %v1475_v42  ;;  %1205 = vst.msk [vmem:[%s1780_s13 + $0x74] sm:$0xf] %vm1175_vm0, %v1441_v43 }
 0x142   : > { %1237 = vst.msk [vmem:[%s1780_s13 + $0xf4] sm:$0xf] %vm1175_vm0, %v1473_v44 }
 0x143 PF: > { %s13_s12 = sadd.s32 1, %s1666_s12  }
 0x144   : > { %p10_p4 = scmp.ge.s32.totalorder %s13_s12, 7  }
 0x146   :  { %12 = sbr.rel (!%p10_p4) target bundleno = 1 (0x1), region = 62 }

// kernel: appearance_autoencoder_forward.19
= control target key start
LH: loop header
LB: loop body
LE: loop exit
PB: predicated region body
PF: predicated region fallthrough
CT: control target
= control target key end

     0   :  { %s1854_s12 = smov 0   ;;  %s2267_s0 = inlined_call_operand.vmem [shape: bf16[8704,64], index: 0, kind: input, shape index: {}]   ;;  %s2268_s1 = inlined_call_operand.vmem [shape: bf16[64,12], index: 1, kind: input, shape index: {}]   ;;  %s2269_s2 = inlined_call_operand.vmem [shape: f32[1,12], index: 2, kind: input, shape index: {}]   ;;  %s2270_s3 = inlined_call_operand.vmem [shape: f32[8704,12], index: 3, kind: output, shape index: {}]  }
   0x1 LB: > { %s1329_s13 = sadd.s32 4294967295, %s1832_s12   ;;  %p1333_p0 = scmp.ge.s32.totalorder %s1832_s12, 1  ;;  %s1832_s12 = sphi %s1854_s12, %s13_s12  }
   0x2   : > { %p138_p1 = scmp.lt.s32.totalorder %s1832_s12, 18 }
   0x4   : > { %p139_p2 = pnand %p1333_p0, %p138_p1 }
   0x5   : > { %v1533_v0 = vld [vmem:[%s2268_s1] sm:$0xff] (!%p139_p2)   ;;  %s1334_s16 = sshll.u32 (!%p139_p2), %s1329_s13, 6  ;;  %v1534_v1 = vld [vmem:[%s2268_s1 + $0x8] sm:$0xff] (!%p139_p2)   ;;  %v1535_v2 = vld [vmem:[%s2268_s1 + $0x10] sm:$0xff] (!%p139_p2)   ;;  %vm438_vm0 = vcmask (!%p139_p2), 523264   ;;  %vm1208_vm1 = vcmask (!%p139_p2), 97280  }
   0x6   : > { %142 = sbr.rel (%p139_p2) target bundleno = 383 (0x17f), region = 32  ;;  %p163_p3 = scmp.lt.s32.totalorder (!%p139_p2), %s1334_s16, 1087  ;;  %1445 = vmatprep.subr.bf16.mxu0 (!%p139_p2), %v1533_v0  ;;  %1517 = vmatprep.subr.bf16.mxu1 (!%p139_p2), %v1533_v0  ;;  %v1536_v3 = vld [vmem:[%s2268_s1 + $0x18] sm:$0xff] (!%p139_p2)   ;;  %v1949_v36 = vld [vmem:[%s2269_s2] ss:$0 sm:$0xff] (!%p139_p2) }
   0x7   : > { %1446 = vmatpush3.bf16.msra.mxu0 (!%p139_p2), %v1533_v0  ;;  %1521 = vmatpush3.bf16.msra.mxu1 (!%p139_p2), %v1533_v0 }
   0x8   : > { %1447 = vmatprep.subr.bf16.mxu0 (!%p139_p2), %v1534_v1  ;;  %1518 = vmatprep.subr.bf16.mxu1 (!%p139_p2), %v1534_v1 }
   0xb   : > { %1448 = vmatpush3.bf16.msra.mxu0 (!%p139_p2), %v1534_v1  ;;  %1522 = vmatpush3.bf16.msra.mxu1 (!%p139_p2), %v1534_v1 }
   0xc   : > { %1449 = vmatprep.subr.bf16.mxu0 (!%p139_p2), %v1535_v2  ;;  %1519 = vmatprep.subr.bf16.mxu1 (!%p139_p2), %v1535_v2 }
   0xd   : > { %s2272_s16 = smov (!%p163_p3, %s1334_s16), 1087 }
   0xe   : > { %s1335_s21 = sshll.u32 %s2272_s16, 2  ;;  %s1337_s29 = sshll.u32 %s2272_s16, 3 }
   0xf   : > { %s1880_s26 = scalar_lea.vmem %s2267_s0, %s1335_s21  ;;  %1450 = vmatpush3.bf16.msra.mxu0 %v1535_v2  ;;  %1523 = vmatpush3.bf16.msra.mxu1 %v1535_v2  ;;  %s1989_s5 = scalar_lea.vmem %s2270_s3, %s1337_s29 }
  0x10   : > { %v1537_v4 = vld [vmem:[%s1880_s26] sm:$0xff]   ;;  %1451 = vmatprep.subr.bf16.mxu0 %v1536_v3  ;;  %1520 = vmatprep.subr.bf16.mxu1 %v1536_v3  ;;  %v1539_v6 = vld [vmem:[%s1880_s26 + $0x8] sm:$0xff]   ;;  %v1541_v8 = vld [vmem:[%s1880_s26 + $0x10] sm:$0xff]  }
  0x11   : > { %v1538_v5 = vld [vmem:[%s1880_s26 + $0x80] sm:$0xff]   ;;  %1453 = vmatprep.mubr.msk.bf16.mxu0 %vm438_vm0, %v1537_v4  ;;  %v1540_v7 = vld [vmem:[%s1880_s26 + $0x88] sm:$0xff]   ;;  %v1542_v9 = vld [vmem:[%s1880_s26 + $0x90] sm:$0xff]  }
  0x12   : > { %1485 = vmatprep.mubr.msk.bf16.mxu1 %vm438_vm0, %v1538_v5  ;;  %v1543_v10 = vld [vmem:[%s1880_s26 + $0x18] sm:$0xff]   ;;  %v1545_v12 = vld [vmem:[%s1880_s26 + $0x20] sm:$0xff]   ;;  %v1547_v14 = vld [vmem:[%s1880_s26 + $0x28] sm:$0xff]  }
  0x13   : > { %1452 = vmatpush3.bf16.msra.mxu0 %v1536_v3  ;;  %1524 = vmatpush3.bf16.msra.mxu1 %v1536_v3  ;;  %v1544_v11 = vld [vmem:[%s1880_s26 + $0x98] sm:$0xff]   ;;  %v1546_v13 = vld [vmem:[%s1880_s26 + $0xa0] sm:$0xff]   ;;  %v1548_v15 = vld [vmem:[%s1880_s26 + $0xa8] sm:$0xff]  }
  0x14   : > { %v1549_v16 = vld [vmem:[%s1880_s26 + $0x30] sm:$0xff]   ;;  %v1551_v18 = vld [vmem:[%s1880_s26 + $0x38] sm:$0xff]   ;;  %v1553_v20 = vld [vmem:[%s1880_s26 + $0x40] sm:$0xff]  }
  0x15   : > { %v1550_v17 = vld [vmem:[%s1880_s26 + $0xb0] sm:$0xff]   ;;  %v1552_v19 = vld [vmem:[%s1880_s26 + $0xb8] sm:$0xff]   ;;  %v1554_v21 = vld [vmem:[%s1880_s26 + $0xc0] sm:$0xff]  }
  0x16   : > { %1454 = vmatmul.mubr.msk.bf16.vlgmr.msra.gmra.mrb[0].mxu0 %vm438_vm0, %v1539_v6  ;;  %1486 = vmatmul.mubr.msk.bf16.vlgmr.msra.gmra.mrb[0].mxu1 %vm438_vm0, %v1540_v7  ;;  %v1555_v22 = vld [vmem:[%s1880_s26 + $0x48] sm:$0xff]   ;;  %v1557_v24 = vld [vmem:[%s1880_s26 + $0x50] sm:$0xff]   ;;  %v1559_v26 = vld [vmem:[%s1880_s26 + $0x58] sm:$0xff]  }
  0x17   : > { %1457 = vmatprep.mubr.msk.bf16.mxu0 %vm438_vm0, %v1541_v8  ;;  %1489 = vmatprep.mubr.msk.bf16.mxu1 %vm438_vm0, %v1542_v9  ;;  %v1556_v23 = vld [vmem:[%s1880_s26 + $0xc8] sm:$0xff]   ;;  %v1558_v25 = vld [vmem:[%s1880_s26 + $0xd0] sm:$0xff]   ;;  %v1560_v27 = vld [vmem:[%s1880_s26 + $0xd8] sm:$0xff]  }
  0x18   : > { %v1561_v28 = vld [vmem:[%s1880_s26 + $0x60] sm:$0xff]   ;;  %v1563_v30 = vld [vmem:[%s1880_s26 + $0x68] sm:$0xff]   ;;  %v1565_v32 = vld [vmem:[%s1880_s26 + $0x70] sm:$0xff]  }
  0x19   : > { %v1562_v29 = vld [vmem:[%s1880_s26 + $0xe0] sm:$0xff]   ;;  %v1564_v31 = vld [vmem:[%s1880_s26 + $0xe8] sm:$0xff]   ;;  %v1566_v33 = vld [vmem:[%s1880_s26 + $0xf0] sm:$0xff]  }
  0x1a   : > { %v1567_v34 = vld [vmem:[%s1880_s26 + $0x78] sm:$0xff]  }
  0x1b   : > { %v1568_v35 = vld [vmem:[%s1880_s26 + $0xf8] sm:$0xff]  }
  0x1e   : > { %1458 = vmatmul.mubr.msk.bf16.gmra.mrb[4].mxu0 %vm438_vm0, %v1543_v10  ;;  %1490 = vmatmul.mubr.msk.bf16.gmra.mrb[4].mxu1 %vm438_vm0, %v1544_v11 }
  0x1f   : > { %1461 = vmatprep.mubr.msk.bf16.mxu0 %vm438_vm0, %v1545_v12  ;;  %1493 = vmatprep.mubr.msk.bf16.mxu1 %vm438_vm0, %v1546_v13 }
  0x26   : > { %1462 = vmatmul.mubr.msk.bf16.gmra.mrb[8].mxu0 %vm438_vm0, %v1547_v14  ;;  %1494 = vmatmul.mubr.msk.bf16.gmra.mrb[8].mxu1 %vm438_vm0, %v1548_v15 }
  0x27   : > { %1465 = vmatprep.mubr.msk.bf16.mxu0 %vm438_vm0, %v1549_v16  ;;  %1497 = vmatprep.mubr.msk.bf16.mxu1 %vm438_vm0, %v1550_v17 }
  0x2e   : > { %1466 = vmatmul.mubr.msk.bf16.gmra.mrb[12].mxu0 %vm438_vm0, %v1551_v18  ;;  %1498 = vmatmul.mubr.msk.bf16.gmra.mrb[12].mxu1 %vm438_vm0, %v1552_v19 }
  0x2f   : > { %1469 = vmatprep.mubr.msk.bf16.mxu0 %vm438_vm0, %v1553_v20  ;;  %1501 = vmatprep.mubr.msk.bf16.mxu1 %vm438_vm0, %v1554_v21 }
  0x36   : > { %1470 = vmatmul.mubr.msk.bf16.gmra.mrb[16].mxu0 %vm438_vm0, %v1555_v22  ;;  %1502 = vmatmul.mubr.msk.bf16.gmra.mrb[16].mxu1 %vm438_vm0, %v1556_v23 }
  0x37   : > { %1473 = vmatprep.mubr.msk.bf16.mxu0 %vm438_vm0, %v1557_v24  ;;  %1505 = vmatprep.mubr.msk.bf16.mxu1 %vm438_vm0, %v1558_v25 }
  0x3e   : > { %1474 = vmatmul.mubr.msk.bf16.gmra.mrb[20].mxu0 %vm438_vm0, %v1559_v26  ;;  %1506 = vmatmul.mubr.msk.bf16.gmra.mrb[20].mxu1 %vm438_vm0, %v1560_v27 }
  0x3f   : > { %1477 = vmatprep.mubr.msk.bf16.mxu0 %vm438_vm0, %v1561_v28  ;;  %1509 = vmatprep.mubr.msk.bf16.mxu1 %vm438_vm0, %v1562_v29 }
  0x46   : > { %1478 = vmatmul.mubr.msk.bf16.gmra.mrb[24].mxu0 %vm438_vm0, %v1563_v30  ;;  %1510 = vmatmul.mubr.msk.bf16.gmra.mrb[24].mxu1 %vm438_vm0, %v1564_v31 }
  0x47   : > { %1481 = vmatprep.mubr.msk.bf16.mxu0 %vm438_vm0, %v1565_v32  ;;  %1513 = vmatprep.mubr.msk.bf16.mxu1 %vm438_vm0, %v1566_v33 }
  0x4e   : > { %1482 = vmatmul.mubr.msk.bf16.gmra.mrb[28].mxu0 %vm438_vm0, %v1567_v34  ;;  %1514 = vmatmul.mubr.msk.bf16.gmra.mrb[28].mxu1 %vm438_vm0, %v1568_v35 }
  0xe9   : > { %v1455_v37 = vpop.f32.mrb[0].mxu0  ;;  %v1487_v38 = vpop.f32.mrb[0].mxu1 }
  0xea   : > { %v578_v39 = vadd.f32 %v1455_v37, %v1949_v36  ;;  %v706_v40 = vadd.f32 %v1487_v38, %v1949_v36  ;;  %v569_v41 = vpop.f32.mrb[1].mxu0  ;;  %v697_v42 = vpop.f32.mrb[1].mxu1 }
  0xeb   : > { %v570_v43 = vadd.f32 %v1949_v36, %v569_v41  ;;  %v698_v44 = vadd.f32 %v1949_v36, %v697_v42  ;;  %v1456_v45 = vpop.f32.mrb[2].mxu0  ;;  %v1488_v46 = vpop.f32.mrb[2].mxu1 }
  0xec   : > { %v826_v47 = vsub.f32 0.0, %v578_v39  ;;  %v858_v48 = vsub.f32 0.0, %v706_v40  ;;  %v581_v49 = vadd.f32 %v1456_v45, %v1949_v36  ;;  %v709_v50 = vadd.f32 %v1488_v46, %v1949_v36  ;;  %v572_v51 = vpop.f32.mrb[3].mxu0  ;;  %v700_v52 = vpop.f32.mrb[3].mxu1 }
  0xed   : > { %v824_v53 = vsub.f32 0.0, %v570_v43  ;;  %v856_v54 = vsub.f32 0.0, %v698_v44  ;;  %v573_v55 = vadd.f32 %v1949_v36, %v572_v51  ;;  %v701_v56 = vadd.f32 %v1949_v36, %v700_v52 }
  0xee   : > { %v892_v57 = vmul.f32 1.442695, %v826_v47  ;;  %v956_v58 = vmul.f32 1.442695, %v858_v48  ;;  %v827_v59 = vsub.f32 0.0, %v581_v49  ;;  %v859_v60 = vsub.f32 0.0, %v709_v50 }
  0xef   : > { %v888_v61 = vmul.f32 1.442695, %v824_v53  ;;  %v952_v62 = vmul.f32 1.442695, %v856_v54  ;;  %v825_v63 = vsub.f32 0.0, %v573_v55  ;;  %v857_v0 = vsub.f32 0.0, %v701_v56 }
  0xf0   : > { %1569 = vpow2.f32 %v892_v57  ;;  %v894_v1 = vmul.f32 1.442695, %v827_v59  ;;  %v958_v2 = vmul.f32 1.442695, %v859_v60 }
  0xf1   : > { %1571 = vpow2.f32 %v956_v58  ;;  %v1459_v3 = vpop.f32.mrb[4].mxu0  ;;  %v1491_v4 = vpop.f32.mrb[4].mxu1  ;;  %v890_v5 = vmul.f32 1.442695, %v825_v63  ;;  %v954_v10 = vmul.f32 1.442695, %v857_v0 }
  0xf2   : > { %1573 = vpow2.f32 %v888_v61  ;;  %v594_v6 = vadd.f32 %v1459_v3, %v1949_v36  ;;  %v722_v7 = vadd.f32 %v1491_v4, %v1949_v36  ;;  %v585_v8 = vpop.f32.mrb[5].mxu0  ;;  %v713_v9 = vpop.f32.mrb[5].mxu1 }
  0xf3   : > { %1575 = vpow2.f32 %v952_v62  ;;  %v586_v11 = vadd.f32 %v1949_v36, %v585_v8  ;;  %v714_v12 = vadd.f32 %v1949_v36, %v713_v9  ;;  %v1460_v13 = vpop.f32.mrb[6].mxu0  ;;  %v1492_v14 = vpop.f32.mrb[6].mxu1 }
  0xf4   : > { %1577 = vpow2.f32 %v894_v1  ;;  %v830_v15 = vsub.f32 0.0, %v594_v6  ;;  %v862_v16 = vsub.f32 0.0, %v722_v7  ;;  %v597_v17 = vadd.f32 %v1460_v13, %v1949_v36  ;;  %v588_v18 = vpop.f32.mrb[7].mxu0  ;;  %v716_v19 = vpop.f32.mrb[7].mxu1 }
  0xf5   : > { %1579 = vpow2.f32 %v958_v2  ;;  %v828_v20 = vsub.f32 0.0, %v586_v11  ;;  %v860_v21 = vsub.f32 0.0, %v714_v12  ;;  %v725_v31 = vadd.f32 %v1492_v14, %v1949_v36 }
  0xf6   : > { %1581 = vpow2.f32 %v890_v5  ;;  %v900_v22 = vmul.f32 1.442695, %v830_v15  ;;  %v964_v23 = vmul.f32 1.442695, %v862_v16  ;;  %v831_v24 = vsub.f32 0.0, %v597_v17 }
  0xf7   : > { %1583 = vpow2.f32 %v954_v10  ;;  %v896_v25 = vmul.f32 1.442695, %v828_v20  ;;  %v960_v26 = vmul.f32 1.442695, %v860_v21  ;;  %v589_v41 = vadd.f32 %v1949_v36, %v588_v18 }
  0xf8   : > { %1585 = vpow2.f32 %v900_v22  ;;  %v902_v27 = vmul.f32 1.442695, %v831_v24  ;;  %v863_v48 = vsub.f32 0.0, %v725_v31  ;;  %v717_v51 = vadd.f32 %v1949_v36, %v716_v19 }
  0xf9   : > { %1587 = vpow2.f32 %v964_v23  ;;  %v1463_v28 = vpop.f32.mrb[8].mxu0  ;;  %v1495_v29 = vpop.f32.mrb[8].mxu1  ;;  %v829_v54 = vsub.f32 0.0, %v589_v41 }
  0xfa   : > { %v1570_v30 = vpop.eup %1569  ;;  %1589 = vpow2.f32 %v896_v25  ;;  %v601_v32 = vpop.f32.mrb[9].mxu0  ;;  %v610_v57 = vadd.f32 %v1463_v28, %v1949_v36  ;;  %v966_v62 = vmul.f32 1.442695, %v863_v48  ;;  %v738_v63 = vadd.f32 %v1495_v29, %v1949_v36 }
  0xfb   : > { %v729_v33 = vpop.f32.mrb[9].mxu1  ;;  %v1572_v34 = vpop.eup %1571  ;;  %v1018_v35 = vadd.f32 1.0, %v1570_v30  ;;  %1591 = vpow2.f32 %v960_v26  ;;  %v861_v4 = vsub.f32 0.0, %v717_v51  ;;  %v602_v5 = vadd.f32 %v1949_v36, %v601_v32 }
  0xfc   : > { %v1464_v37 = vpop.f32.mrb[10].mxu0  ;;  %v1496_v38 = vpop.f32.mrb[10].mxu1  ;;  %v1050_v40 = vadd.f32 1.0, %v1572_v34  ;;  %1593 = vpow2.f32 %v902_v27  ;;  %v898_v10 = vmul.f32 1.442695, %v829_v54  ;;  %v730_v11 = vadd.f32 %v1949_v36, %v729_v33 }
  0xfd   : > { %v1574_v39 = vpop.eup %1573  ;;  %v604_v42 = vpop.f32.mrb[11].mxu0  ;;  %1595 = vrcp.f32 %v1018_v35  ;;  %v834_v16 = vsub.f32 0.0, %v610_v57  ;;  %v613_v17 = vadd.f32 %v1464_v37, %v1949_v36  ;;  %v866_v20 = vsub.f32 0.0, %v738_v63 }
  0xfe   : > { %v1576_v43 = vpop.eup %1575  ;;  %v1016_v44 = vadd.f32 1.0, %v1574_v39  ;;  %v1966_v45 = vpop.f32.mrb[11].mxu1  ;;  %1597 = vrcp.f32 %v1050_v40  ;;  %v741_v21 = vadd.f32 %v1496_v38, %v1949_v36  ;;  %v832_v24 = vsub.f32 0.0, %v602_v5 }
  0xff   : > { %v1578_v46 = vpop.eup %1577  ;;  %v1048_v47 = vadd.f32 1.0, %v1576_v43  ;;  %v605_v25 = vadd.f32 %v1949_v36, %v604_v42  ;;  %v962_v27 = vmul.f32 1.442695, %v861_v4  ;;  %v864_v28 = vsub.f32 0.0, %v730_v11 }
 0x100   : > { %v1580_v49 = vpop.eup %1579  ;;  %1599 = vrcp.f32 %v1016_v44  ;;  %v1019_v50 = vadd.f32 1.0, %v1578_v46  ;;  %v733_v29 = vadd.f32 %v1949_v36, %v1966_v45  ;;  %v908_v31 = vmul.f32 1.442695, %v834_v16 }
 0x101   : > { %v1582_v52 = vpop.eup %1581  ;;  %1601 = vrcp.f32 %v1048_v47  ;;  %v1051_v53 = vadd.f32 1.0, %v1580_v49  ;;  %v1467_v58 = vpop.f32.mrb[12].mxu0  ;;  %v835_v32 = vsub.f32 0.0, %v613_v17  ;;  %v972_v38 = vmul.f32 1.442695, %v866_v20 }
 0x102   : > { %v1584_v55 = vpop.eup %1583  ;;  %1603 = vrcp.f32 %v1019_v50  ;;  %v1017_v56 = vadd.f32 1.0, %v1582_v52  ;;  %v1499_v59 = vpop.f32.mrb[12].mxu1  ;;  %v626_v33 = vadd.f32 %v1467_v58, %v1949_v36  ;;  %v867_v39 = vsub.f32 0.0, %v741_v21 }
 0x103   : > { %v1586_v60 = vpop.eup %1585  ;;  %1605 = vrcp.f32 %v1051_v53  ;;  %v1049_v61 = vadd.f32 1.0, %v1584_v55  ;;  %v1972_v0 = vpop.f32.mrb[13].mxu0  ;;  %v754_v40 = vadd.f32 %v1499_v59, %v1949_v36  ;;  %v904_v44 = vmul.f32 1.442695, %v832_v24 }
 0x104   : > { %v1974_v1 = vpop.f32.mrb[13].mxu1  ;;  %v1588_v2 = vpop.eup %1587  ;;  %1607 = vrcp.f32 %v1017_v56  ;;  %v1022_v3 = vadd.f32 1.0, %v1586_v60  ;;  %v833_v45 = vsub.f32 0.0, %v605_v25  ;;  %v968_v48 = vmul.f32 1.442695, %v864_v28 }
 0x105   : > { %v1977_v6 = vpop.f32.mrb[14].mxu0  ;;  %v1979_v7 = vpop.f32.mrb[14].mxu1  ;;  %1609 = vrcp.f32 %v1049_v61  ;;  %v1054_v9 = vadd.f32 1.0, %v1588_v2  ;;  %v865_v49 = vsub.f32 0.0, %v733_v29  ;;  %v910_v52 = vmul.f32 1.442695, %v835_v32 }
 0x106   : > { %v1590_v8 = vpop.eup %1589  ;;  %v1982_v12 = vpop.f32.mrb[15].mxu0  ;;  %1611 = vrcp.f32 %v1022_v3  ;;  %v838_v53 = vsub.f32 0.0, %v626_v33  ;;  %v974_v57 = vmul.f32 1.442695, %v867_v39  ;;  %v870_v58 = vsub.f32 0.0, %v754_v40 }
 0x107   : > { %v1984_v13 = vpop.f32.mrb[15].mxu1  ;;  %v1592_v14 = vpop.eup %1591  ;;  %v1020_v15 = vadd.f32 1.0, %v1590_v8  ;;  %1613 = vrcp.f32 %v1054_v9  ;;  %v906_v60 = vmul.f32 1.442695, %v833_v45  ;;  %v746_v24 = vadd.f32 %v1949_v36, %v1974_v1 }
 0x108   : > { %v1594_v18 = vpop.eup %1593  ;;  %v1052_v19 = vadd.f32 1.0, %v1592_v14  ;;  %v916_v2 = vmul.f32 1.442695, %v838_v53  ;;  %v980_v5 = vmul.f32 1.442695, %v870_v58  ;;  %v629_v29 = vadd.f32 %v1977_v6, %v1949_v36 }
 0x109   : > { %v1596_v22 = vpop.eup %1595  ;;  %1615 = vrcp.f32 %v1020_v15  ;;  %v1023_v23 = vadd.f32 1.0, %v1594_v18  ;;  %v2001_v34 = vpop.f32.mrb[16].mxu0  ;;  %v757_v6 = vadd.f32 %v1979_v7, %v1949_v36  ;;  %v749_v7 = vadd.f32 %v1949_v36, %v1984_v13 }
 0x10a   : > { %v1598_v26 = vpop.eup %1597  ;;  %1211 = vst.msk [vmem:[%s1989_s5 + $0x10] sm:$0xff] %vm1208_vm1, %v1596_v22  ;;  %1617 = vrcp.f32 %v1052_v19  ;;  %v2003_v35 = vpop.f32.mrb[16].mxu1  ;;  %v618_v19 = vadd.f32 %v1949_v36, %v1972_v0 }
 0x10b   : > { %v1600_v30 = vpop.eup %1599  ;;  %1243 = vst.msk [vmem:[%s1989_s5 + $0x110] sm:$0xff] %vm1208_vm1, %v1598_v26  ;;  %1619 = vrcp.f32 %v1023_v23  ;;  %v2008_v41 = vpop.f32.mrb[17].mxu0 }
 0x10c   : > { %v1602_v37 = vpop.eup %1601  ;;  %1209 = vst.msk [vmem:[%s1989_s5] sm:$0xff] %vm1208_vm1, %v1600_v30  ;;  %1621 = vpow2.f32 %v966_v62  ;;  %v2010_v42 = vpop.f32.mrb[17].mxu1  ;;  %v970_v62 = vmul.f32 1.442695, %v865_v49  ;;  %v634_v13 = vadd.f32 %v1949_v36, %v2008_v41 }
 0x10d   : > { %v1604_v43 = vpop.eup %1603  ;;  %1241 = vst.msk [vmem:[%s1989_s5 + $0x100] sm:$0xff] %vm1208_vm1, %v1602_v37  ;;  %1623 = vpow2.f32 %v898_v10  ;;  %v2014_v46 = vpop.f32.mrb[18].mxu0 }
 0x10e   : > { %v1606_v47 = vpop.eup %1605  ;;  %1212 = vst.msk [vmem:[%s1989_s5 + $0x18] sm:$0xff] %vm1208_vm1, %v1604_v43  ;;  %1625 = vpow2.f32 %v962_v27  ;;  %v2018_v50 = vpop.f32.mrb[18].mxu1  ;;  %v645_v41 = vadd.f32 %v2014_v46, %v1949_v36 }
 0x10f   : > { %v1608_v51 = vpop.eup %1607  ;;  %1244 = vst.msk [vmem:[%s1989_s5 + $0x118] sm:$0xff] %vm1208_vm1, %v1606_v47  ;;  %1627 = vpow2.f32 %v908_v31  ;;  %v2022_v54 = vpop.f32.mrb[19].mxu0  ;;  %v836_v31 = vsub.f32 0.0, %v618_v19 }
 0x110   : > { %v2024_v55 = vpop.f32.mrb[19].mxu1  ;;  %v1610_v56 = vpop.eup %1609  ;;  %1210 = vst.msk [vmem:[%s1989_s5 + $0x8] sm:$0xff] %vm1208_vm1, %v1608_v51  ;;  %1629 = vpow2.f32 %v972_v38  ;;  %v868_v38 = vsub.f32 0.0, %v746_v24  ;;  %v839_v51 = vsub.f32 0.0, %v629_v29 }
 0x111   : > { %v1612_v59 = vpop.eup %1611  ;;  %1242 = vst.msk [vmem:[%s1989_s5 + $0x108] sm:$0xff] %vm1208_vm1, %v1610_v56  ;;  %1631 = vpow2.f32 %v904_v44  ;;  %v2034_v3 = vpop.f32.mrb[20].mxu0 }
 0x112   : > { %v1614_v61 = vpop.eup %1613  ;;  %1215 = vst.msk [vmem:[%s1989_s5 + $0x30] sm:$0xff] %vm1208_vm1, %v1612_v59  ;;  %1633 = vpow2.f32 %v968_v48  ;;  %v2038_v8 = vpop.f32.mrb[20].mxu1  ;;  %v912_v59 = vmul.f32 1.442695, %v836_v31 }
 0x113   : > { %v1616_v63 = vpop.eup %1615  ;;  %1247 = vst.msk [vmem:[%s1989_s5 + $0x130] sm:$0xff] %vm1208_vm1, %v1614_v61  ;;  %1635 = vpow2.f32 %v910_v52  ;;  %v2042_v10 = vpop.f32.mrb[21].mxu0  ;;  %v621_v52 = vadd.f32 %v1949_v36, %v1982_v12 }
 0x114   : > { %v1618_v4 = vpop.eup %1617  ;;  %1213 = vst.msk [vmem:[%s1989_s5 + $0x20] sm:$0xff] %vm1208_vm1, %v1616_v63  ;;  %1637 = vpow2.f32 %v974_v57  ;;  %v2044_v11 = vpop.f32.mrb[21].mxu1  ;;  %v642_v63 = vadd.f32 %v2001_v34, %v1949_v36  ;;  %v869_v34 = vsub.f32 0.0, %v749_v7 }
 0x115   : > { %v1620_v9 = vpop.eup %1619  ;;  %1245 = vst.msk [vmem:[%s1989_s5 + $0x120] sm:$0xff] %vm1208_vm1, %v1618_v4  ;;  %1639 = vpow2.f32 %v906_v60  ;;  %v2048_v15 = vpop.f32.mrb[22].mxu0  ;;  %v871_v4 = vsub.f32 0.0, %v757_v6 }
 0x116   : > { %v1622_v14 = vpop.eup %1621  ;;  %1216 = vst.msk [vmem:[%s1989_s5 + $0x38] sm:$0xff] %vm1208_vm1, %v1620_v9  ;;  %1641 = vpow2.f32 %v970_v62  ;;  %v2050_v16 = vpop.f32.mrb[22].mxu1  ;;  %v976_v62 = vmul.f32 1.442695, %v868_v38  ;;  %v840_v38 = vsub.f32 0.0, %v634_v13 }
 0x117   : > { %v1624_v17 = vpop.eup %1623  ;;  %v1055_v18 = vadd.f32 1.0, %v1622_v14  ;;  %1643 = vpow2.f32 %v916_v2  ;;  %v2054_v20 = vpop.f32.mrb[23].mxu0 }
 0x118   : > { %v2056_v21 = vpop.f32.mrb[23].mxu1  ;;  %v1626_v22 = vpop.eup %1625  ;;  %v1021_v23 = vadd.f32 1.0, %v1624_v17  ;;  %1645 = vpow2.f32 %v980_v5  ;;  %v770_v5 = vadd.f32 %v2003_v35, %v1949_v36  ;;  %v837_v17 = vsub.f32 0.0, %v621_v52 }
 0x119   : > { %v1628_v25 = vpop.eup %1627  ;;  %1647 = vrcp.f32 %v1055_v18  ;;  %v1053_v26 = vadd.f32 1.0, %v1626_v22  ;;  %v2062_v32 = vpop.f32.mrb[24].mxu0  ;;  %v762_v22 = vadd.f32 %v1949_v36, %v2010_v42  ;;  %v982_v42 = vmul.f32 1.442695, %v871_v4 }
 0x11a   : > { %v1630_v27 = vpop.eup %1629  ;;  %1649 = vrcp.f32 %v1021_v23  ;;  %v1026_v28 = vadd.f32 1.0, %v1628_v25  ;;  %v2064_v33 = vpop.f32.mrb[24].mxu1  ;;  %v918_v25 = vmul.f32 1.442695, %v839_v51 }
 0x11b   : > { %v1632_v0 = vpop.eup %1631  ;;  %1651 = vrcp.f32 %v1053_v26  ;;  %v1058_v30 = vadd.f32 1.0, %v1630_v27  ;;  %v2066_v39 = vpop.f32.mrb[25].mxu0  ;;  %v842_v26 = vsub.f32 0.0, %v642_v63 }
 0x11c   : > { %v1634_v37 = vpop.eup %1633  ;;  %1653 = vrcp.f32 %v1026_v28  ;;  %v1024_v1 = vadd.f32 1.0, %v1632_v0  ;;  %v2068_v40 = vpop.f32.mrb[25].mxu1  ;;  %v874_v0 = vsub.f32 0.0, %v770_v5 }
 0x11d   : > { %v1636_v43 = vpop.eup %1635  ;;  %1655 = vrcp.f32 %v1058_v30  ;;  %v1056_v44 = vadd.f32 1.0, %v1634_v37  ;;  %v2072_v45 = vpop.f32.mrb[26].mxu0  ;;  %v773_v30 = vadd.f32 %v2018_v50, %v1949_v36  ;;  %v978_v50 = vmul.f32 1.442695, %v869_v34 }
 0x11e   : > { %v2074_v47 = vpop.f32.mrb[26].mxu1  ;;  %v1638_v48 = vpop.eup %1637  ;;  %1657 = vrcp.f32 %v1024_v1  ;;  %v1027_v49 = vadd.f32 1.0, %v1636_v43  ;;  %v914_v1 = vmul.f32 1.442695, %v837_v17  ;;  %v637_v43 = vadd.f32 %v1949_v36, %v2022_v54 }
 0x11f   : > { %v2078_v53 = vpop.f32.mrb[27].mxu0  ;;  %v2080_v56 = vpop.f32.mrb[27].mxu1  ;;  %1659 = vrcp.f32 %v1056_v44  ;;  %v1059_v58 = vadd.f32 1.0, %v1638_v48  ;;  %v872_v48 = vsub.f32 0.0, %v762_v22  ;;  %v924_v52 = vmul.f32 1.442695, %v842_v26 }
 0x120   : > { %v1640_v57 = vpop.eup %1639  ;;  %1661 = vrcp.f32 %v1027_v49 }
 0x121   : > { %v1642_v60 = vpop.eup %1641  ;;  %v1025_v61 = vadd.f32 1.0, %v1640_v57  ;;  %1663 = vrcp.f32 %v1059_v58  ;;  %v2092_v23 = vpop.f32.mrb[28].mxu0  ;;  %v843_v57 = vsub.f32 0.0, %v645_v41  ;;  %v988_v58 = vmul.f32 1.442695, %v874_v0 }
 0x122   : > { %v1644_v2 = vpop.eup %1643  ;;  %v1057_v12 = vadd.f32 1.0, %v1642_v60  ;;  %v2094_v24 = vpop.f32.mrb[28].mxu1  ;;  %v920_v60 = vmul.f32 1.442695, %v840_v38  ;;  %v984_v63 = vmul.f32 1.442695, %v872_v48  ;;  %v658_v0 = vadd.f32 %v2034_v3, %v1949_v36 }
 0x123   : > { %v1646_v9 = vpop.eup %1645  ;;  %1665 = vrcp.f32 %v1025_v61  ;;  %v1030_v14 = vadd.f32 1.0, %v1644_v2  ;;  %v2100_v27 = vpop.f32.mrb[29].mxu0  ;;  %v841_v61 = vsub.f32 0.0, %v637_v43  ;;  %v650_v43 = vadd.f32 %v1949_v36, %v2042_v10 }
 0x124   : > { %v1648_v18 = vpop.eup %1647  ;;  %1667 = vrcp.f32 %v1057_v12  ;;  %v1062_v19 = vadd.f32 1.0, %v1646_v9  ;;  %v2102_v28 = vpop.f32.mrb[29].mxu1  ;;  %v926_v12 = vmul.f32 1.442695, %v843_v57  ;;  %v778_v48 = vadd.f32 %v1949_v36, %v2044_v11 }
 0x125   : > { %v1650_v35 = vpop.eup %1649  ;;  %1248 = vst.msk [vmem:[%s1989_s5 + $0x138] sm:$0xff] %vm1208_vm1, %v1648_v18  ;;  %1669 = vrcp.f32 %v1030_v14  ;;  %v2108_v31 = vpop.f32.mrb[30].mxu0  ;;  %v922_v14 = vmul.f32 1.442695, %v841_v61  ;;  %v765_v18 = vadd.f32 %v1949_v36, %v2024_v55  ;;  %v786_v55 = vadd.f32 %v2038_v8, %v1949_v36 }
 0x126   : > { %v1652_v29 = vpop.eup %1651  ;;  %1214 = vst.msk [vmem:[%s1989_s5 + $0x28] sm:$0xff] %vm1208_vm1, %v1650_v35  ;;  %1671 = vrcp.f32 %v1062_v19  ;;  %v2110_v37 = vpop.f32.mrb[30].mxu1  ;;  %v846_v57 = vsub.f32 0.0, %v658_v0  ;;  %v789_v61 = vadd.f32 %v2050_v16, %v1949_v36 }
 0x127   : > { %v1654_v46 = vpop.eup %1653  ;;  %1246 = vst.msk [vmem:[%s1989_s5 + $0x128] sm:$0xff] %vm1208_vm1, %v1652_v29  ;;  %1673 = vpow2.f32 %v912_v59  ;;  %v2116_v44 = vpop.f32.mrb[31].mxu0  ;;  %v875_v59 = vsub.f32 0.0, %v773_v30 }
 0x128   : > { %v1656_v6 = vpop.eup %1655  ;;  %1219 = vst.msk [vmem:[%s1989_s5 + $0x50] sm:$0xff] %vm1208_vm1, %v1654_v46  ;;  %1675 = vpow2.f32 %v976_v62  ;;  %v2120_v49 = vpop.f32.mrb[31].mxu1 }
 0x129   : > { %v1658_v51 = vpop.eup %1657  ;;  %1251 = vst.msk [vmem:[%s1989_s5 + $0x150] sm:$0xff] %vm1208_vm1, %v1656_v6  ;;  %1677 = vpow2.f32 %v918_v25  ;;  %v990_v5 = vmul.f32 1.442695, %v875_v59  ;;  %v661_v59 = vadd.f32 %v2048_v15, %v1949_v36  ;;  %v932_v15 = vmul.f32 1.442695, %v846_v57 }
 0x12a   : > { %v1660_v54 = vpop.eup %1659  ;;  %1217 = vst.msk [vmem:[%s1989_s5 + $0x40] sm:$0xff] %vm1208_vm1, %v1658_v51  ;;  %1679 = vpow2.f32 %v982_v42  ;;  %v873_v42 = vsub.f32 0.0, %v765_v18  ;;  %v879_v18 = vsub.f32 0.0, %v789_v61 }
 0x12b   : > { %v1662_v7 = vpop.eup %1661  ;;  %1249 = vst.msk [vmem:[%s1989_s5 + $0x140] sm:$0xff] %vm1208_vm1, %v1660_v54  ;;  %1681 = vpow2.f32 %v914_v1  ;;  %v847_v16 = vsub.f32 0.0, %v661_v59  ;;  %v677_v59 = vadd.f32 %v2072_v45, %v1949_v36 }
 0x12c   : > { %v1664_v62 = vpop.eup %1663  ;;  %1220 = vst.msk [vmem:[%s1989_s5 + $0x58] sm:$0xff] %vm1208_vm1, %v1662_v7  ;;  %1683 = vpow2.f32 %v978_v50 }
 0x12d   : > { %v1666_v2 = vpop.eup %1665  ;;  %1252 = vst.msk [vmem:[%s1989_s5 + $0x158] sm:$0xff] %vm1208_vm1, %v1664_v62  ;;  %1685 = vpow2.f32 %v924_v52  ;;  %v986_v52 = vmul.f32 1.442695, %v873_v42 }
 0x12e   : > { %v1668_v4 = vpop.eup %1667  ;;  %1218 = vst.msk [vmem:[%s1989_s5 + $0x48] sm:$0xff] %vm1208_vm1, %v1666_v2  ;;  %1687 = vpow2.f32 %v988_v58  ;;  %v878_v58 = vsub.f32 0.0, %v786_v55  ;;  %v653_v2 = vadd.f32 %v1949_v36, %v2054_v20 }
 0x12f   : > { %v1670_v9 = vpop.eup %1669  ;;  %1250 = vst.msk [vmem:[%s1989_s5 + $0x148] sm:$0xff] %vm1208_vm1, %v1668_v4  ;;  %1689 = vpow2.f32 %v920_v60  ;;  %v844_v60 = vsub.f32 0.0, %v650_v43 }
 0x130   : > { %v1672_v17 = vpop.eup %1671  ;;  %1223 = vst.msk [vmem:[%s1989_s5 + $0x70] sm:$0xff] %vm1208_vm1, %v1670_v9  ;;  %1691 = vpow2.f32 %v984_v63  ;;  %v876_v63 = vsub.f32 0.0, %v778_v48  ;;  %v996_v20 = vmul.f32 1.442695, %v878_v58 }
 0x131   : > { %v1674_v13 = vpop.eup %1673  ;;  %1255 = vst.msk [vmem:[%s1989_s5 + $0x170] sm:$0xff] %vm1208_vm1, %v1672_v17  ;;  %1693 = vpow2.f32 %v926_v12  ;;  %v674_v17 = vadd.f32 %v2062_v32, %v1949_v36  ;;  %v666_v32 = vadd.f32 %v1949_v36, %v2066_v39  ;;  %v998_v39 = vmul.f32 1.442695, %v879_v18 }
 0x132   : > { %v1676_v19 = vpop.eup %1675  ;;  %v1028_v34 = vadd.f32 1.0, %v1674_v13  ;;  %1695 = vpow2.f32 %v990_v5  ;;  %v781_v5 = vadd.f32 %v1949_v36, %v2056_v21  ;;  %v928_v21 = vmul.f32 1.442695, %v844_v60 }
 0x133   : > { %v1678_v22 = vpop.eup %1677  ;;  %v1060_v35 = vadd.f32 1.0, %v1676_v19  ;;  %1697 = vpow2.f32 %v922_v14  ;;  %v802_v19 = vadd.f32 %v2064_v33, %v1949_v36  ;;  %v794_v33 = vadd.f32 %v1949_v36, %v2068_v40 }
 0x134   : > { %v1680_v25 = vpop.eup %1679  ;;  %1699 = vrcp.f32 %v1028_v34  ;;  %v1031_v26 = vadd.f32 1.0, %v1678_v22  ;;  %v845_v22 = vsub.f32 0.0, %v653_v2  ;;  %v850_v42 = vsub.f32 0.0, %v674_v17 }
 0x135   : > { %v1682_v41 = vpop.eup %1681  ;;  %1701 = vrcp.f32 %v1060_v35  ;;  %v1063_v29 = vadd.f32 1.0, %v1680_v25  ;;  %v992_v25 = vmul.f32 1.442695, %v876_v63  ;;  %v848_v55 = vsub.f32 0.0, %v666_v32 }
 0x136   : > { %v1684_v30 = vpop.eup %1683  ;;  %1703 = vrcp.f32 %v1031_v26  ;;  %v1029_v46 = vadd.f32 1.0, %v1682_v41  ;;  %v877_v26 = vsub.f32 0.0, %v781_v5  ;;  %v930_v40 = vmul.f32 1.442695, %v845_v22 }
 0x137   : > { %v1686_v1 = vpop.eup %1685  ;;  %1705 = vrcp.f32 %v1063_v29  ;;  %v1061_v38 = vadd.f32 1.0, %v1684_v30  ;;  %v934_v29 = vmul.f32 1.442695, %v847_v16  ;;  %v882_v30 = vsub.f32 0.0, %v802_v19 }
 0x138   : > { %v1688_v6 = vpop.eup %1687  ;;  %1707 = vrcp.f32 %v1029_v46  ;;  %v1034_v50 = vadd.f32 1.0, %v1686_v1  ;;  %v880_v43 = vsub.f32 0.0, %v794_v33  ;;  %v805_v60 = vadd.f32 %v2074_v47, %v1949_v36 }
 0x139   : > { %v1690_v51 = vpop.eup %1689  ;;  %1709 = vrcp.f32 %v1061_v38  ;;  %v1066_v3 = vadd.f32 1.0, %v1688_v6  ;;  %v994_v38 = vmul.f32 1.442695, %v877_v26  ;;  %v669_v47 = vadd.f32 %v1949_v36, %v2078_v53 }
 0x13a   : > { %v1692_v54 = vpop.eup %1691  ;;  %1711 = vrcp.f32 %v1034_v50  ;;  %v1032_v8 = vadd.f32 1.0, %v1690_v51  ;;  %v940_v50 = vmul.f32 1.442695, %v850_v42  ;;  %v1004_v51 = vmul.f32 1.442695, %v882_v30 }
 0x13b   : > { %v1694_v7 = vpop.eup %1693  ;;  %1713 = vrcp.f32 %v1066_v3  ;;  %v1064_v10 = vadd.f32 1.0, %v1692_v54  ;;  %v1000_v54 = vmul.f32 1.442695, %v880_v43  ;;  %v883_v45 = vsub.f32 0.0, %v805_v60 }
 0x13c   : > { %v1696_v11 = vpop.eup %1695  ;;  %1715 = vrcp.f32 %v1032_v8  ;;  %v1035_v62 = vadd.f32 1.0, %v1694_v7  ;;  %v818_v53 = vadd.f32 %v2094_v24, %v1949_v36  ;;  %v849_v26 = vsub.f32 0.0, %v669_v47 }
 0x13d   : > { %v1698_v12 = vpop.eup %1697  ;;  %1717 = vrcp.f32 %v1064_v10  ;;  %v1067_v4 = vadd.f32 1.0, %v1696_v11  ;;  %v1006_v32 = vmul.f32 1.442695, %v883_v45 }
 0x13e   : > { %v1700_v9 = vpop.eup %1699  ;;  %1719 = vrcp.f32 %v1035_v62  ;;  %v1033_v14 = vadd.f32 1.0, %v1698_v12 }
 0x13f   : > { %v1702_v13 = vpop.eup %1701  ;;  %1221 = vst.msk [vmem:[%s1989_s5 + $0x60] sm:$0xff] %vm1208_vm1, %v1700_v9  ;;  %1721 = vrcp.f32 %v1067_v4  ;;  %v851_v4 = vsub.f32 0.0, %v677_v59 }
 0x140   : > { %v1704_v34 = vpop.eup %1703  ;;  %1253 = vst.msk [vmem:[%s1989_s5 + $0x160] sm:$0xff] %vm1208_vm1, %v1702_v13  ;;  %1723 = vrcp.f32 %v1033_v14  ;;  %v797_v13 = vadd.f32 %v1949_v36, %v2080_v56  ;;  %v682_v56 = vadd.f32 %v1949_v36, %v2100_v27  ;;  %v886_v27 = vsub.f32 0.0, %v818_v53 }
 0x141   : > { %v1706_v35 = vpop.eup %1705  ;;  %1224 = vst.msk [vmem:[%s1989_s5 + $0x78] sm:$0xff] %vm1208_vm1, %v1704_v34  ;;  %1725 = vpow2.f32 %v986_v52  ;;  %v936_v52 = vmul.f32 1.442695, %v848_v55  ;;  %v942_v19 = vmul.f32 1.442695, %v851_v4  ;;  %v690_v34 = vadd.f32 %v2092_v23, %v1949_v36 }
 0x142   : > { %v1708_v41 = vpop.eup %1707  ;;  %1256 = vst.msk [vmem:[%s1989_s5 + $0x178] sm:$0xff] %vm1208_vm1, %v1706_v35  ;;  %1727 = vpow2.f32 %v932_v15  ;;  %v1825_v23 = vld [vmem:[%s2269_s2] ss:$0 sm:$0xff] }
 0x143   : > { %v1710_v0 = vpop.eup %1709  ;;  %1222 = vst.msk [vmem:[%s1989_s5 + $0x68] sm:$0xff] %vm1208_vm1, %v1708_v41  ;;  %1729 = vpow2.f32 %v996_v20  ;;  %v810_v42 = vadd.f32 %v1825_v23, %v2102_v28  ;;  %v693_v30 = vadd.f32 %v1825_v23, %v2108_v31  ;;  %v938_v28 = vmul.f32 1.442695, %v849_v26 }
 0x144   : > { %v1712_v46 = vpop.eup %1711  ;;  %1254 = vst.msk [vmem:[%s1989_s5 + $0x168] sm:$0xff] %vm1208_vm1, %v1710_v0  ;;  %1731 = vpow2.f32 %v928_v21 }
 0x145   : > { %v1714_v1 = vpop.eup %1713  ;;  %1227 = vst.msk [vmem:[%s1989_s5 + $0x90] sm:$0xff] %vm1208_vm1, %v1712_v46  ;;  %1733 = vpow2.f32 %v992_v25 }
 0x146   : > { %v1716_v6 = vpop.eup %1715  ;;  %1259 = vst.msk [vmem:[%s1989_s5 + $0x190] sm:$0xff] %vm1208_vm1, %v1714_v1  ;;  %1735 = vpow2.f32 %v934_v29  ;;  %v881_v29 = vsub.f32 0.0, %v797_v13  ;;  %v852_v1 = vsub.f32 0.0, %v682_v56 }
 0x147   : > { %v1718_v48 = vpop.eup %1717  ;;  %1225 = vst.msk [vmem:[%s1989_s5 + $0x80] sm:$0xff] %vm1208_vm1, %v1716_v6  ;;  %1737 = vpow2.f32 %v998_v39  ;;  %v854_v39 = vsub.f32 0.0, %v690_v34  ;;  %v884_v6 = vsub.f32 0.0, %v810_v42 }
 0x148   : > { %v1720_v3 = vpop.eup %1719  ;;  %1257 = vst.msk [vmem:[%s1989_s5 + $0x180] sm:$0xff] %vm1208_vm1, %v1718_v48  ;;  %1739 = vpow2.f32 %v930_v40  ;;  %v821_v40 = vadd.f32 %v1825_v23, %v2110_v37  ;;  %v1002_v31 = vmul.f32 1.442695, %v881_v29 }
 0x149   : > { %v1722_v57 = vpop.eup %1721  ;;  %1228 = vst.msk [vmem:[%s1989_s5 + $0x98] sm:$0xff] %vm1208_vm1, %v1720_v3  ;;  %1741 = vpow2.f32 %v994_v38  ;;  %v685_v38 = vadd.f32 %v1825_v23, %v2116_v44  ;;  %v948_v37 = vmul.f32 1.442695, %v854_v39  ;;  %v1012_v44 = vmul.f32 1.442695, %v886_v27 }
 0x14a   : > { %v1724_v8 = vpop.eup %1723  ;;  %1260 = vst.msk [vmem:[%s1989_s5 + $0x198] sm:$0xff] %vm1208_vm1, %v1722_v57  ;;  %1743 = vpow2.f32 %v940_v50  ;;  %v813_v50 = vadd.f32 %v1825_v23, %v2120_v49  ;;  %v944_v49 = vmul.f32 1.442695, %v852_v1 }
 0x14b   : > { %v1726_v58 = vpop.eup %1725  ;;  %1226 = vst.msk [vmem:[%s1989_s5 + $0x88] sm:$0xff] %vm1208_vm1, %v1724_v8  ;;  %1745 = vpow2.f32 %v1004_v51  ;;  %v855_v51 = vsub.f32 0.0, %v693_v30 }
 0x14c   : > { %v1728_v7 = vpop.eup %1727  ;;  %v1065_v10 = vadd.f32 1.0, %v1726_v58  ;;  %1747 = vpow2.f32 %v936_v52  ;;  %v887_v52 = vsub.f32 0.0, %v821_v40  ;;  %v1008_v58 = vmul.f32 1.442695, %v884_v6 }
 0x14d   : > { %v1730_v61 = vpop.eup %1729  ;;  %v1038_v11 = vadd.f32 1.0, %v1728_v7  ;;  %1749 = vpow2.f32 %v1000_v54  ;;  %v853_v54 = vsub.f32 0.0, %v685_v38  ;;  %v885_v59 = vsub.f32 0.0, %v813_v50 }
 0x14e   : > { %v1732_v62 = vpop.eup %1731  ;;  %1751 = vrcp.f32 %v1065_v10  ;;  %v1070_v63 = vadd.f32 1.0, %v1730_v61  ;;  %v950_v10 = vmul.f32 1.442695, %v855_v51  ;;  %v1014_v61 = vmul.f32 1.442695, %v887_v52 }
 0x14f   : > { %v1734_v2 = vpop.eup %1733  ;;  %1753 = vrcp.f32 %v1038_v11  ;;  %v1036_v12 = vadd.f32 1.0, %v1732_v62  ;;  %v946_v62 = vmul.f32 1.442695, %v853_v54 }
 0x150   : > { %v1736_v15 = vpop.eup %1735  ;;  %1755 = vrcp.f32 %v1070_v63  ;;  %v1068_v5 = vadd.f32 1.0, %v1734_v2  ;;  %v1010_v2 = vmul.f32 1.442695, %v885_v59 }
 0x151   : > { %v1738_v9 = vpop.eup %1737  ;;  %1757 = vrcp.f32 %v1036_v12  ;;  %v1039_v14 = vadd.f32 1.0, %v1736_v15 }
 0x152   : > { %v1740_v16 = vpop.eup %1739  ;;  %1759 = vrcp.f32 %v1068_v5  ;;  %v1071_v17 = vadd.f32 1.0, %v1738_v9 }
 0x153   : > { %v1742_v20 = vpop.eup %1741  ;;  %1761 = vrcp.f32 %v1039_v14  ;;  %v1037_v18 = vadd.f32 1.0, %v1740_v16 }
 0x154   : > { %v1744_v21 = vpop.eup %1743  ;;  %1763 = vrcp.f32 %v1071_v17  ;;  %v1069_v22 = vadd.f32 1.0, %v1742_v20 }
 0x155   : > { %v1746_v35 = vpop.eup %1745  ;;  %1765 = vrcp.f32 %v1037_v18  ;;  %v1042_v25 = vadd.f32 1.0, %v1744_v21 }
 0x156   : > { %v1748_v33 = vpop.eup %1747  ;;  %1767 = vrcp.f32 %v1069_v22  ;;  %v1074_v41 = vadd.f32 1.0, %v1746_v35 }
 0x157   : > { %v1750_v0 = vpop.eup %1749  ;;  %1769 = vrcp.f32 %v1042_v25  ;;  %v1040_v24 = vadd.f32 1.0, %v1748_v33 }
 0x158   : > { %v1752_v46 = vpop.eup %1751  ;;  %1771 = vrcp.f32 %v1074_v41  ;;  %v1072_v36 = vadd.f32 1.0, %v1750_v0 }
 0x159   : > { %v1754_v55 = vpop.eup %1753  ;;  %1258 = vst.msk [vmem:[%s1989_s5 + $0x188] sm:$0xff] %vm1208_vm1, %v1752_v46  ;;  %1773 = vrcp.f32 %v1040_v24 }
 0x15a   : > { %v1756_v43 = vpop.eup %1755  ;;  %1231 = vst.msk [vmem:[%s1989_s5 + $0xb0] sm:$0xff] %vm1208_vm1, %v1754_v55  ;;  %1775 = vrcp.f32 %v1072_v36 }
 0x15b   : > { %v1758_v48 = vpop.eup %1757  ;;  %1263 = vst.msk [vmem:[%s1989_s5 + $0x1b0] sm:$0xff] %vm1208_vm1, %v1756_v43  ;;  %1777 = vpow2.f32 %v942_v19 }
 0x15c   : > { %v1760_v3 = vpop.eup %1759  ;;  %1229 = vst.msk [vmem:[%s1989_s5 + $0xa0] sm:$0xff] %vm1208_vm1, %v1758_v48  ;;  %1779 = vpow2.f32 %v1006_v32 }
 0x15d   : > { %v1762_v57 = vpop.eup %1761  ;;  %1261 = vst.msk [vmem:[%s1989_s5 + $0x1a0] sm:$0xff] %vm1208_vm1, %v1760_v3  ;;  %1781 = vpow2.f32 %v938_v28 }
 0x15e   : > { %v1764_v8 = vpop.eup %1763  ;;  %1232 = vst.msk [vmem:[%s1989_s5 + $0xb8] sm:$0xff] %vm1208_vm1, %v1762_v57  ;;  %1783 = vpow2.f32 %v1002_v31 }
 0x15f   : > { %v1766_v7 = vpop.eup %1765  ;;  %1264 = vst.msk [vmem:[%s1989_s5 + $0x1b8] sm:$0xff] %vm1208_vm1, %v1764_v8  ;;  %1785 = vpow2.f32 %v948_v37 }
 0x160   : > { %v1768_v60 = vpop.eup %1767  ;;  %1230 = vst.msk [vmem:[%s1989_s5 + $0xa8] sm:$0xff] %vm1208_vm1, %v1766_v7  ;;  %1787 = vpow2.f32 %v1012_v44 }
 0x161   : > { %v1770_v11 = vpop.eup %1769  ;;  %1262 = vst.msk [vmem:[%s1989_s5 + $0x1a8] sm:$0xff] %vm1208_vm1, %v1768_v60  ;;  %1789 = vpow2.f32 %v944_v49 }
 0x162   : > { %v1772_v63 = vpop.eup %1771  ;;  %1235 = vst.msk [vmem:[%s1989_s5 + $0xd0] sm:$0xff] %vm1208_vm1, %v1770_v11  ;;  %1791 = vpow2.f32 %v1008_v58 }
 0x163   : > { %v1774_v12 = vpop.eup %1773  ;;  %1267 = vst.msk [vmem:[%s1989_s5 + $0x1d0] sm:$0xff] %vm1208_vm1, %v1772_v63  ;;  %1793 = vpow2.f32 %v950_v10 }
 0x164   : > { %v1776_v4 = vpop.eup %1775  ;;  %1233 = vst.msk [vmem:[%s1989_s5 + $0xc0] sm:$0xff] %vm1208_vm1, %v1774_v12  ;;  %1795 = vpow2.f32 %v1014_v61 }
 0x165   : > { %v1778_v15 = vpop.eup %1777  ;;  %1265 = vst.msk [vmem:[%s1989_s5 + $0x1c0] sm:$0xff] %vm1208_vm1, %v1776_v4  ;;  %1797 = vpow2.f32 %v946_v62 }
 0x166   : > { %v1780_v5 = vpop.eup %1779  ;;  %v1043_v45 = vadd.f32 1.0, %v1778_v15  ;;  %1799 = vpow2.f32 %v1010_v2 }
 0x167   : > { %v1782_v9 = vpop.eup %1781  ;;  %v1075_v14 = vadd.f32 1.0, %v1780_v5 }
 0x168   : > { %v1784_v47 = vpop.eup %1783  ;;  %1801 = vrcp.f32 %v1043_v45  ;;  %v1041_v16 = vadd.f32 1.0, %v1782_v9 }
 0x169   : > { %v1786_v17 = vpop.eup %1785  ;;  %1803 = vrcp.f32 %v1075_v14  ;;  %v1073_v13 = vadd.f32 1.0, %v1784_v47 }
 0x16a   : > { %v1788_v20 = vpop.eup %1787  ;;  %1805 = vrcp.f32 %v1041_v16  ;;  %v1046_v18 = vadd.f32 1.0, %v1786_v17 }
 0x16b   : > { %v1790_v19 = vpop.eup %1789  ;;  %1807 = vrcp.f32 %v1073_v13  ;;  %v1078_v34 = vadd.f32 1.0, %v1788_v20 }
 0x16c   : > { %v1792_v21 = vpop.eup %1791  ;;  %1809 = vrcp.f32 %v1046_v18  ;;  %v1044_v22 = vadd.f32 1.0, %v1790_v19 }
 0x16d   : > { %v1794_v32 = vpop.eup %1793  ;;  %1811 = vrcp.f32 %v1078_v34  ;;  %v1076_v53 = vadd.f32 1.0, %v1792_v21 }
 0x16e   : > { %v1796_v35 = vpop.eup %1795  ;;  %1813 = vrcp.f32 %v1044_v22  ;;  %v1047_v25 = vadd.f32 1.0, %v1794_v32 }
 0x16f   : > { %v1798_v26 = vpop.eup %1797  ;;  %1815 = vrcp.f32 %v1076_v53  ;;  %v1079_v56 = vadd.f32 1.0, %v1796_v35 }
 0x170   : > { %v1800_v33 = vpop.eup %1799  ;;  %1817 = vrcp.f32 %v1047_v25  ;;  %v1045_v41 = vadd.f32 1.0, %v1798_v26 }
 0x171   : > { %1819 = vrcp.f32 %v1079_v56  ;;  %v1077_v29 = vadd.f32 1.0, %v1800_v33 }
 0x172   : > { %v1802_v23 = vpop.eup %1801  ;;  %1821 = vrcp.f32 %v1045_v41 }
 0x173   : > { %v1804_v42 = vpop.eup %1803  ;;  %1236 = vst.msk [vmem:[%s1989_s5 + $0xd8] sm:$0xff] %vm1208_vm1, %v1802_v23  ;;  %1823 = vrcp.f32 %v1077_v29 }
 0x174   : > { %v1806_v0 = vpop.eup %1805  ;;  %1268 = vst.msk [vmem:[%s1989_s5 + $0x1d8] sm:$0xff] %vm1208_vm1, %v1804_v42 }
 0x175   : > { %v1808_v24 = vpop.eup %1807  ;;  %1234 = vst.msk [vmem:[%s1989_s5 + $0xc8] sm:$0xff] %vm1208_vm1, %v1806_v0 }
 0x176   : > { %v1810_v39 = vpop.eup %1809  ;;  %1266 = vst.msk [vmem:[%s1989_s5 + $0x1c8] sm:$0xff] %vm1208_vm1, %v1808_v24 }
 0x177   : > { %v1812_v30 = vpop.eup %1811  ;;  %1239 = vst.msk [vmem:[%s1989_s5 + $0xf0] sm:$0xff] %vm1208_vm1, %v1810_v39 }
 0x178   : > { %v1814_v46 = vpop.eup %1813  ;;  %1271 = vst.msk [vmem:[%s1989_s5 + $0x1f0] sm:$0xff] %vm1208_vm1, %v1812_v30 }
 0x179   : > { %v1816_v36 = vpop.eup %1815  ;;  %1237 = vst.msk [vmem:[%s1989_s5 + $0xe0] sm:$0xff] %vm1208_vm1, %v1814_v46 }
 0x17a   : > { %v1818_v27 = vpop.eup %1817  ;;  %1269 = vst.msk [vmem:[%s1989_s5 + $0x1e0] sm:$0xff] %vm1208_vm1, %v1816_v36 }
 0x17b   : > { %v1820_v40 = vpop.eup %1819  ;;  %1240 = vst.msk [vmem:[%s1989_s5 + $0xf8] sm:$0xff] %vm1208_vm1, %v1818_v27 }
 0x17c   : > { %v1822_v55 = vpop.eup %1821  ;;  %1272 = vst.msk [vmem:[%s1989_s5 + $0x1f8] sm:$0xff] %vm1208_vm1, %v1820_v40 }
 0x17d   : > { %v1824_v28 = vpop.eup %1823  ;;  %1238 = vst.msk [vmem:[%s1989_s5 + $0xe8] sm:$0xff] %vm1208_vm1, %v1822_v55 }
 0x17e   : > { %1270 = vst.msk [vmem:[%s1989_s5 + $0x1e8] sm:$0xff] %vm1208_vm1, %v1824_v28 }
 0x17f PF: > { %s13_s12 = sadd.s32 1, %s1832_s12  }
 0x180   : > { %p10_p4 = scmp.ge.s32.totalorder %s13_s12, 19  }
 0x182   :  { %12 = sbr.rel (!%p10_p4) target bundleno = 1 (0x1), region = 62 }

</bundles_post_ra>
